<compile_context>
chip_gen: v5e
topology: v5e:2x2
jax: 0.10.0
libtpu: 0.0.40
codegen_flags: <defaults>
</compile_context>

<pallas_src>
import jax
import jax.numpy as jnp
from jax.experimental import pallas as pl
from jax.experimental.pallas import tpu as pltpu


# ------------------------------- kernel ----------------------------------- #

def _make_kernel(H, W, stride, has_downsample, Wp):
    Ho, Wo = H // stride, W // stride
    s = stride

    def kernel(*refs):
        refs = list(refs)
        pad_ref = refs.pop()          # VMEM scratch: (H+2, Wp, P) bf16
        o_ref = refs.pop()            # output block: (1, Ho, Wo, C4) bf16
        it = iter(refs)
        x_ref = next(it)              # (1, H, W, Cin) bf16
        w1_ref, b1_ref = next(it), next(it)            # (Cin, P) bf16 / (1, P) f32
        w2_ref, b2_ref = next(it), next(it)            # (9, P, P) bf16 / (1, P) f32
        w3_ref, b3_ref = next(it), next(it)            # (P, C4) bf16 / (1, C4) f32
        if has_downsample:
            wd_ref, bd_ref = next(it), next(it)        # (Cin, C4) bf16 / (1, C4) f32

        P = pad_ref.shape[-1]
        Cin = x_ref.shape[-1]
        C4 = o_ref.shape[-1]
        f32, bf16 = jnp.float32, jnp.bfloat16

        def mxu(a, b):
            # bf16 operands, f32 accumulation on the MXU.
            return jnp.dot(a, b, preferred_element_type=f32)

        def avg_pool(v):
            # v: (H, W, C) value -> (Ho, Wo, C) f32.  Pure VPU adds:
            # split H on the leading axis, then split W into (Wo, s) groups.
            if s == 1:
                return v.astype(f32)
            C = v.shape[-1]
            v4 = v.reshape(Ho, s, W, C)
            vh = v4[:, 0].astype(f32)
            for i in range(1, s):
                vh = vh + v4[:, i].astype(f32)
            v5 = vh.reshape(Ho, Wo, s, C)
            vw = v5[:, :, 0, :]
            for j in range(1, s):
                vw = vw + v5[:, :, j, :]
            return vw * (1.0 / (s * s))

        # ---- zero only the 1-wide halo (interior is fully rewritten) ------
        zrow = jnp.zeros((1, Wp, P), bf16)
        pad_ref[0:1, :, :] = zrow
        pad_ref[H + 1:H + 2, :, :] = zrow
        zcol = jnp.zeros((H, 1, P), bf16)
        pad_ref[1:H + 1, 0:1, :] = zcol
        pad_ref[1:H + 1, W + 1:W + 2, :] = zcol

        x = x_ref[0]                                   # (H, W, Cin) bf16
        x2d = x.reshape(H * W, Cin)

        # ---- conv1 (1x1, BN folded) + ReLU --------------------------------
        h1 = jnp.maximum(mxu(x2d, w1_ref[...]) + b1_ref[...], 0.0)   # (H*W, P) f32

        # conv2 input goes into the zero-haloed bf16 scratch.
        pad_ref[1:H + 1, 1:W + 1, :] = h1.astype(bf16).reshape(H, W, P)

        # ---- conv2 (3x3, pad=1, BN folded) + ReLU --------------------------
        # 9 shifted-tap bf16 matmuls; accumulator seeded with tap(0,0)+bias.
        def tap(dy, dx):
            return pad_ref[dy:dy + H, dx:dx + W, :].reshape(H * W, P)

        acc = mxu(tap(0, 0), w2_ref[0]) + b2_ref[...]
        for k in range(1, 9):
            dy, dx = divmod(k, 3)
            acc = acc + mxu(tap(dy, dx), w2_ref[k])
        h2 = jnp.maximum(acc, 0.0)                                    # (H*W, P) f32

        # ---- AvgPool2d(stride): VPU adds on the value ----------------------
        if s > 1:
            h2m = avg_pool(h2.reshape(H, W, P)).reshape(Ho * Wo, P).astype(bf16)
        else:
            h2m = h2.astype(bf16)                                     # (H*W, P)

        # ---- conv3 (1x1, BN folded) ----------------------------------------
        out = mxu(h2m, w3_ref[...]) + b3_ref[...]                     # (Ho*Wo, C4) f32

        # ---- identity / downsample -----------------------------------------
        if has_downsample:
            if s > 1:
                idn2d = avg_pool(x).reshape(Ho * Wo, Cin).astype(bf16)
            else:
                idn2d = x2d
            identity = mxu(idn2d, wd_ref[...]) + bd_ref[...]          # (Ho*Wo, C4)
        else:
            identity = x2d                                            # Cin == C4

        y = jnp.maximum(out + identity, 0.0)
        o_ref[0] = y.reshape(Ho, Wo, C4).astype(o_ref.dtype)

    return kernel


# ------------------------------- wrapper ----------------------------------- #

def _fold_bn(w, bn, eps=1e-5):
    """Fold an eval-mode BatchNorm into the preceding bias-free conv."""
    scale = bn['gamma'] / jnp.sqrt(bn['var'] + eps)                  # (Cout,)
    return w * scale[:, None, None, None], bn['beta'] - bn['mean'] * scale


def _round_up(v, m):
    return (v + m - 1) // m * m


def bottleneck_forward_nhwc(x_nhwc, params, stride):
    """Primary NHWC API: x (N, H, W, Cin) -> (N, H//s, W//s, 4*planes) bf16."""
    N, H, W, Cin = x_nhwc.shape
    P = params['conv1_w'].shape[0]            # planes
    C4 = params['conv3_w'].shape[0]           # planes * expansion
    assert H % stride == 0 and W % stride == 0, "H, W must be divisible by stride"
    Ho, Wo = H // stride, W // stride
    has_downsample = (stride > 1) or (Cin != C4)
    if has_downsample:
        assert 'downsample_w' in params and 'bn_d' in params
    else:
        assert Cin == C4, "identity shortcut requires Cin == 4*planes"

    x = x_nhwc.astype(jnp.bfloat16)

    # Fold BN into the convs; pre-transpose weights to (Cin, Cout) in bf16.
    w1, b1 = _fold_bn(params['conv1_w'], params['bn1'])
    w2, b2 = _fold_bn(params['conv2_w'], params['bn2'])
    w3, b3 = _fold_bn(params['conv3_w'], params['bn3'])
    w1 = jnp.transpose(w1[:, :, 0, 0]).astype(jnp.bfloat16)                      # (Cin, P)
    w2 = jnp.transpose(w2, (2, 3, 1, 0)).reshape(9, P, P).astype(jnp.bfloat16)   # (ky*kx, Pin, Pout)
    w3 = jnp.transpose(w3[:, :, 0, 0]).astype(jnp.bfloat16)                      # (P, C4)

    inputs = [x]
    in_specs = [pl.BlockSpec((1, H, W, Cin), lambda n: (n, 0, 0, 0))]

    def add_full(arr):
        inputs.append(arr)
        in_specs.append(pl.BlockSpec(arr.shape, lambda n: (0,) * arr.ndim))

    add_full(w1); add_full(b1.reshape(1, P).astype(jnp.float32))
    add_full(w2); add_full(b2.reshape(1, P).astype(jnp.float32))
    add_full(w3); add_full(b3.reshape(1, C4).astype(jnp.float32))
    if has_downsample:
        wd, bd = _fold_bn(params['downsample_w'], params['bn_d'])
        add_full(jnp.transpose(wd[:, :, 0, 0]).astype(jnp.bfloat16))              # (Cin, C4)
        add_full(bd.reshape(1, C4).astype(jnp.float32))

    Wp = _round_up(W + 2, 8)   # 8-aligned scratch width for the 3x3 tap slices

    out = pl.pallas_call(
        _make_kernel(H, W, stride, has_downsample, Wp),
        out_shape=jax.ShapeDtypeStruct((N, Ho, Wo, C4), jnp.bfloat16),
        grid=(N,),
        in_specs=in_specs,
        out_specs=pl.BlockSpec((1, Ho, Wo, C4), lambda n: (n, 0, 0, 0)),
        scratch_shapes=[pltpu.VMEM((H + 2, Wp, P), jnp.bfloat16)],
        compiler_params=pltpu.CompilerParams(
            dimension_semantics=("parallel",),
            vmem_limit_bytes=48 * 1024 * 1024),
    )(*inputs)
    return out


def bottleneck_forward(x_nchw, params, stride):
    """PyTorch-layout convenience wrapper (NCHW in / NCHW out).

    The transposes below are outside the kernel; a full NHWC ResNet should
    call `bottleneck_forward_nhwc` directly and skip them entirely.
    """
    x_nhwc = jnp.transpose(x_nchw, (0, 2, 3, 1))
    out = bottleneck_forward_nhwc(x_nhwc, params, stride)
    return jnp.transpose(out, (0, 3, 1, 2)).astype(x_nchw.dtype)


# --------------------------- pure-JAX reference ----------------------------- #

def _reference(x, params, stride, eps=1e-5):
    hi = jax.lax.Precision.HIGHEST

    def bn(y, p):
        rs = p['gamma'] / jnp.sqrt(p['var'] + eps)
        return y * rs[None, :, None, None] + (p['beta'] - p['mean'] * rs)[None, :, None, None]

    def conv(y, w, pad):
        return jax.lax.conv_general_dilated(
            y, w, (1, 1), pad, dimension_numbers=('NCHW', 'OIHW', 'NCHW'),
            precision=hi)

    def avgpool(y, s):
        if s == 1:
            return y
        n, c, h, w = y.shape
        return y.reshape(n, c, h // s, s, w // s, s).mean(axis=(3, 5))

    out = jax.nn.relu(bn(conv(x, params['conv1_w'], 'VALID'), params['bn1']))
    out = jax.nn.relu(bn(conv(out, params['conv2_w'], ((1, 1), (1, 1))), params['bn2']))
    out = avgpool(out, stride)
    out = bn(conv(out, params['conv3_w'], 'VALID'), params['bn3'])
    C4 = params['conv3_w'].shape[0]
    if stride > 1 or x.shape[1] != C4:
        idn = bn(conv(avgpool(x, stride), params['downsample_w'], 'VALID'), params['bn_d'])
    else:
        idn = x
    return jax.nn.relu(out + idn)


# --------------------------------- main ------------------------------------- #

if __name__ == "__main__":
    def _bn_params(key, c):
        k1, k2, k3, k4 = jax.random.split(key, 4)
        return {'gamma': 1.0 + 0.2 * jax.random.normal(k1, (c,), jnp.float32),
                'beta': 0.2 * jax.random.normal(k2, (c,), jnp.float32),
                'mean': 0.2 * jax.random.normal(k3, (c,), jnp.float32),
                'var': 0.5 + jax.random.uniform(k4, (c,), jnp.float32)}

    def _make_params(key, inplanes, planes, stride):
        C4 = planes * 4
        ks = jax.random.split(key, 8)
        p = {'conv1_w': 0.05 * jax.random.normal(ks[0], (planes, inplanes, 1, 1), jnp.float32),
             'bn1': _bn_params(ks[1], planes),
             'conv2_w': 0.05 * jax.random.normal(ks[2], (planes, planes, 3, 3), jnp.float32),
             'bn2': _bn_params(ks[3], planes),
             'conv3_w': 0.05 * jax.random.normal(ks[4], (C4, planes, 1, 1), jnp.float32),
             'bn3': _bn_params(ks[5], C4)}
        if stride > 1 or inplanes != C4:
            p['downsample_w'] = 0.05 * jax.random.normal(ks[6], (C4, inplanes, 1, 1), jnp.float32)
            p['bn_d'] = _bn_params(ks[7], C4)
        return p

    key = jax.random.PRNGKey(0)
    k1, k2, k3, k4 = jax.random.split(key, 4)

    # Tolerances reflect bf16 activations / bf16 MXU inputs vs an f32 reference.
    TOL = dict(atol=5e-2, rtol=5e-2)

    # Case 1: stride=2 -> avgpool + downsample branch (avgpool + 1x1 conv + BN).
    params1 = _make_params(k1, 32, 16, 2)
    x1 = jax.random.normal(k2, (2, 32, 16, 16), jnp.float32)
    out1 = jax.block_until_ready(bottleneck_forward(x1, params1, 2))
    ref1 = _reference(x1, params1, 2)
    assert out1.shape == (2, 64, 8, 8)
    assert jnp.allclose(out1, ref1, **TOL), float(jnp.max(jnp.abs(out1 - ref1)))

    # Case 2: stride=1, inplanes == 4*planes -> pure identity shortcut.
    params2 = _make_params(k3, 64, 16, 1)
    x2 = jax.random.normal(k4, (2, 64, 16, 16), jnp.float32)
    out2 = jax.block_until_ready(bottleneck_forward(x2, params2, 1))
    ref2 = _reference(x2, params2, 1)
    assert out2.shape == (2, 64, 16, 16)
    assert jnp.allclose(out2, ref2, **TOL), float(jnp.max(jnp.abs(out2 - ref2)))

    print("KERNEL_OK")
</pallas_src>

<mosaic_0001>
module attributes {stable_mosaic.version = 11 : i64} {
  func.func @kernel(%arg0: i32, %arg1: memref<1x16x16x32xbf16, #tpu.memory_space<vmem>>, %arg2: memref<32x16xbf16, #tpu.memory_space<vmem>>, %arg3: memref<1x16xf32, #tpu.memory_space<vmem>>, %arg4: memref<9x16x16xbf16, #tpu.memory_space<vmem>>, %arg5: memref<1x16xf32, #tpu.memory_space<vmem>>, %arg6: memref<16x64xbf16, #tpu.memory_space<vmem>>, %arg7: memref<1x64xf32, #tpu.memory_space<vmem>>, %arg8: memref<32x64xbf16, #tpu.memory_space<vmem>>, %arg9: memref<1x64xf32, #tpu.memory_space<vmem>>, %arg10: memref<1x8x8x64xbf16, #tpu.memory_space<vmem>>, %arg11: memref<18x24x16xbf16, #tpu.memory_space<vmem>>) attributes {dimension_semantics = [#tpu.dimension_semantics<parallel>], iteration_bounds = array<i64: 2>, scalar_prefetch = 0 : i64, scratch_operands = 1 : i64, tpu.core_type = #tpu.core_type<tc>, window_params = [{transform_indices = @transform_0, window_bounds = array<i64: 1, 16, 16, 32>}, {pipeline_mode = #tpu.pipeline_mode<synchronous>, transform_indices = @transform_1, window_bounds = array<i64: 32, 16>}, {pipeline_mode = #tpu.pipeline_mode<synchronous>, transform_indices = @transform_2, window_bounds = array<i64: 1, 16>}, {pipeline_mode = #tpu.pipeline_mode<synchronous>, transform_indices = @transform_3, window_bounds = array<i64: 9, 16, 16>}, {pipeline_mode = #tpu.pipeline_mode<synchronous>, transform_indices = @transform_4, window_bounds = array<i64: 1, 16>}, {pipeline_mode = #tpu.pipeline_mode<synchronous>, transform_indices = @transform_5, window_bounds = array<i64: 16, 64>}, {pipeline_mode = #tpu.pipeline_mode<synchronous>, transform_indices = @transform_6, window_bounds = array<i64: 1, 64>}, {pipeline_mode = #tpu.pipeline_mode<synchronous>, transform_indices = @transform_7, window_bounds = array<i64: 32, 64>}, {pipeline_mode = #tpu.pipeline_mode<synchronous>, transform_indices = @transform_8, window_bounds = array<i64: 1, 64>}, {transform_indices = @transform_9, window_bounds = array<i64: 1, 8, 8, 64>}]} {
    %cst = arith.constant 0.000000e+00 : bf16
    %0 = vector.broadcast %cst : bf16 to vector<1x24x16xbf16>
    %c0 = arith.constant 0 : index
    %c0_0 = arith.constant 0 : index
    %c0_1 = arith.constant 0 : index
    %1 = vector.load %arg11[%c0, %c0_0, %c0_1] : memref<18x24x16xbf16, #tpu.memory_space<vmem>>, vector<1x24x16xbf16>
    tpu.vector_store %arg11[%c0, %c0_0, %c0_1], %0 {strides = array<i32>} : memref<18x24x16xbf16, #tpu.memory_space<vmem>>, vector<1x24x16xbf16>,
    %c17 = arith.constant 17 : index
    %c0_2 = arith.constant 0 : index
    %c0_3 = arith.constant 0 : index
    %2 = vector.load %arg11[%c17, %c0_2, %c0_3] : memref<18x24x16xbf16, #tpu.memory_space<vmem>>, vector<1x24x16xbf16>
    tpu.vector_store %arg11[%c17, %c0_2, %c0_3], %0 {strides = array<i32>} : memref<18x24x16xbf16, #tpu.memory_space<vmem>>, vector<1x24x16xbf16>,
    %cst_4 = arith.constant 0.000000e+00 : bf16
    %3 = vector.broadcast %cst_4 : bf16 to vector<16x1x16xbf16>
    %c1 = arith.constant 1 : index
    %c0_5 = arith.constant 0 : index
    %c0_6 = arith.constant 0 : index
    %4 = vector.load %arg11[%c1, %c0_5, %c0_6] : memref<18x24x16xbf16, #tpu.memory_space<vmem>>, vector<16x1x16xbf16>
    tpu.vector_store %arg11[%c1, %c0_5, %c0_6], %3 {strides = array<i32>} : memref<18x24x16xbf16, #tpu.memory_space<vmem>>, vector<16x1x16xbf16>,
    %c1_7 = arith.constant 1 : index
    %c17_8 = arith.constant 17 : index
    %c0_9 = arith.constant 0 : index
    %5 = vector.load %arg11[%c1_7, %c17_8, %c0_9] : memref<18x24x16xbf16, #tpu.memory_space<vmem>>, vector<16x1x16xbf16>
    tpu.vector_store %arg11[%c1_7, %c17_8, %c0_9], %3 {strides = array<i32>} : memref<18x24x16xbf16, #tpu.memory_space<vmem>>, vector<16x1x16xbf16>,
    %c0_10 = arith.constant 0 : index
    %c0_11 = arith.constant 0 : index
    %c0_12 = arith.constant 0 : index
    %c0_13 = arith.constant 0 : index
    %6 = vector.load %arg1[%c0_10, %c0_11, %c0_12, %c0_13] : memref<1x16x16x32xbf16, #tpu.memory_space<vmem>>, vector<1x16x16x32xbf16>
    %7 = vector.shape_cast %6 : vector<1x16x16x32xbf16> to vector<16x16x32xbf16>
    %8 = vector.shape_cast %7 : vector<16x16x32xbf16> to vector<256x32xbf16>
    %c0_14 = arith.constant 0 : index
    %c0_15 = arith.constant 0 : index
    %9 = vector.load %arg2[%c0_14, %c0_15] : memref<32x16xbf16, #tpu.memory_space<vmem>>, vector<32x16xbf16>
    %cst_16 = arith.constant dense<0.000000e+00> : vector<256x16xf32>
    %10 = tpu.matmul %8, %9, %cst_16 {dimension_numbers = #tpu.dot_dimension_numbers<[1], [0], [0], [1], [0, 0, 1, 1], [], []>} : vector<256x32xbf16>, vector<32x16xbf16>, vector<256x16xf32> -> vector<256x16xf32>
    %c0_17 = arith.constant 0 : index
    %c0_18 = arith.constant 0 : index
    %11 = vector.load %arg3[%c0_17, %c0_18] : memref<1x16xf32, #tpu.memory_space<vmem>>, vector<1x16xf32>
    %12 = vector.broadcast %11 : vector<1x16xf32> to vector<256x16xf32>
    %13 = arith.addf %10, %12 : vector<256x16xf32>
    %cst_19 = arith.constant 0.000000e+00 : f32
    %14 = vector.broadcast %cst_19 : f32 to vector<256x16xf32>
    %15 = arith.maximumf %13, %14 : vector<256x16xf32>
    %16 = arith.truncf %15 : vector<256x16xf32> to vector<256x16xbf16>
    %17 = vector.shape_cast %16 : vector<256x16xbf16> to vector<16x16x16xbf16>
    %c1_20 = arith.constant 1 : index
    %c1_21 = arith.constant 1 : index
    %c0_22 = arith.constant 0 : index
    %18 = vector.load %arg11[%c1_20, %c1_21, %c0_22] : memref<18x24x16xbf16, #tpu.memory_space<vmem>>, vector<16x16x16xbf16>
    tpu.vector_store %arg11[%c1_20, %c1_21, %c0_22], %17 {strides = array<i32>} : memref<18x24x16xbf16, #tpu.memory_space<vmem>>, vector<16x16x16xbf16>,
    %c0_23 = arith.constant 0 : index
    %c0_24 = arith.constant 0 : index
    %c0_25 = arith.constant 0 : index
    %19 = vector.load %arg11[%c0_23, %c0_24, %c0_25] : memref<18x24x16xbf16, #tpu.memory_space<vmem>>, vector<16x16x16xbf16>
    %20 = vector.shape_cast %19 : vector<16x16x16xbf16> to vector<256x16xbf16>
    %c0_26 = arith.constant 0 : index
    %c0_27 = arith.constant 0 : index
    %c0_28 = arith.constant 0 : index
    %21 = vector.load %arg4[%c0_26, %c0_27, %c0_28] : memref<9x16x16xbf16, #tpu.memory_space<vmem>>, vector<1x16x16xbf16>
    %22 = vector.shape_cast %21 : vector<1x16x16xbf16> to vector<16x16xbf16>
    %cst_29 = arith.constant dense<0.000000e+00> : vector<256x16xf32>
    %23 = tpu.matmul %20, %22, %cst_29 {dimension_numbers = #tpu.dot_dimension_numbers<[1], [0], [0], [1], [0, 0, 1, 1], [], []>} : vector<256x16xbf16>, vector<16x16xbf16>, vector<256x16xf32> -> vector<256x16xf32>
    %c0_30 = arith.constant 0 : index
    %c0_31 = arith.constant 0 : index
    %24 = vector.load %arg5[%c0_30, %c0_31] : memref<1x16xf32, #tpu.memory_space<vmem>>, vector<1x16xf32>
    %25 = vector.broadcast %24 : vector<1x16xf32> to vector<256x16xf32>
    %26 = arith.addf %23, %25 : vector<256x16xf32>
    %c0_32 = arith.constant 0 : index
    %c1_33 = arith.constant 1 : index
    %c0_34 = arith.constant 0 : index
    %27 = vector.load %arg11[%c0_32, %c1_33, %c0_34] : memref<18x24x16xbf16, #tpu.memory_space<vmem>>, vector<16x16x16xbf16>
    %28 = vector.shape_cast %27 : vector<16x16x16xbf16> to vector<256x16xbf16>
    %c1_35 = arith.constant 1 : index
    %c0_36 = arith.constant 0 : index
    %c0_37 = arith.constant 0 : index
    %29 = vector.load %arg4[%c1_35, %c0_36, %c0_37] : memref<9x16x16xbf16, #tpu.memory_space<vmem>>, vector<1x16x16xbf16>
    %30 = vector.shape_cast %29 : vector<1x16x16xbf16> to vector<16x16xbf16>
    %cst_38 = arith.constant dense<0.000000e+00> : vector<256x16xf32>
    %31 = tpu.matmul %28, %30, %cst_38 {dimension_numbers = #tpu.dot_dimension_numbers<[1], [0], [0], [1], [0, 0, 1, 1], [], []>} : vector<256x16xbf16>, vector<16x16xbf16>, vector<256x16xf32> -> vector<256x16xf32>
    %32 = arith.addf %26, %31 : vector<256x16xf32>
    %c0_39 = arith.constant 0 : index
    %c2 = arith.constant 2 : index
    %c0_40 = arith.constant 0 : index
    %33 = vector.load %arg11[%c0_39, %c2, %c0_40] : memref<18x24x16xbf16, #tpu.memory_space<vmem>>, vector<16x16x16xbf16>
    %34 = vector.shape_cast %33 : vector<16x16x16xbf16> to vector<256x16xbf16>
    %c2_41 = arith.constant 2 : index
    %c0_42 = arith.constant 0 : index
    %c0_43 = arith.constant 0 : index
    %35 = vector.load %arg4[%c2_41, %c0_42, %c0_43] : memref<9x16x16xbf16, #tpu.memory_space<vmem>>, vector<1x16x16xbf16>
    %36 = vector.shape_cast %35 : vector<1x16x16xbf16> to vector<16x16xbf16>
    %cst_44 = arith.constant dense<0.000000e+00> : vector<256x16xf32>
    %37 = tpu.matmul %34, %36, %cst_44 {dimension_numbers = #tpu.dot_dimension_numbers<[1], [0], [0], [1], [0, 0, 1, 1], [], []>} : vector<256x16xbf16>, vector<16x16xbf16>, vector<256x16xf32> -> vector<256x16xf32>
    %38 = arith.addf %32, %37 : vector<256x16xf32>
    %c1_45 = arith.constant 1 : index
    %c0_46 = arith.constant 0 : index
    %c0_47 = arith.constant 0 : index
    %39 = vector.load %arg11[%c1_45, %c0_46, %c0_47] : memref<18x24x16xbf16, #tpu.memory_space<vmem>>, vector<16x16x16xbf16>
    %40 = vector.shape_cast %39 : vector<16x16x16xbf16> to vector<256x16xbf16>
    %c3 = arith.constant 3 : index
    %c0_48 = arith.constant 0 : index
    %c0_49 = arith.constant 0 : index
    %41 = vector.load %arg4[%c3, %c0_48, %c0_49] : memref<9x16x16xbf16, #tpu.memory_space<vmem>>, vector<1x16x16xbf16>
    %42 = vector.shape_cast %41 : vector<1x16x16xbf16> to vector<16x16xbf16>
    %cst_50 = arith.constant dense<0.000000e+00> : vector<256x16xf32>
    %43 = tpu.matmul %40, %42, %cst_50 {dimension_numbers = #tpu.dot_dimension_numbers<[1], [0], [0], [1], [0, 0, 1, 1], [], []>} : vector<256x16xbf16>, vector<16x16xbf16>, vector<256x16xf32> -> vector<256x16xf32>
    %44 = arith.addf %38, %43 : vector<256x16xf32>
    %c1_51 = arith.constant 1 : index
    %c1_52 = arith.constant 1 : index
    %c0_53 = arith.constant 0 : index
    %45 = vector.load %arg11[%c1_51, %c1_52, %c0_53] : memref<18x24x16xbf16, #tpu.memory_space<vmem>>, vector<16x16x16xbf16>
    %46 = vector.shape_cast %45 : vector<16x16x16xbf16> to vector<256x16xbf16>
    %c4 = arith.constant 4 : index
    %c0_54 = arith.constant 0 : index
    %c0_55 = arith.constant 0 : index
    %47 = vector.load %arg4[%c4, %c0_54, %c0_55] : memref<9x16x16xbf16, #tpu.memory_space<vmem>>, vector<1x16x16xbf16>
    %48 = vector.shape_cast %47 : vector<1x16x16xbf16> to vector<16x16xbf16>
    %cst_56 = arith.constant dense<0.000000e+00> : vector<256x16xf32>
    %49 = tpu.matmul %46, %48, %cst_56 {dimension_numbers = #tpu.dot_dimension_numbers<[1], [0], [0], [1], [0, 0, 1, 1], [], []>} : vector<256x16xbf16>, vector<16x16xbf16>, vector<256x16xf32> -> vector<256x16xf32>
    %50 = arith.addf %44, %49 : vector<256x16xf32>
    %c1_57 = arith.constant 1 : index
    %c2_58 = arith.constant 2 : index
    %c0_59 = arith.constant 0 : index
    %51 = vector.load %arg11[%c1_57, %c2_58, %c0_59] : memref<18x24x16xbf16, #tpu.memory_space<vmem>>, vector<16x16x16xbf16>
    %52 = vector.shape_cast %51 : vector<16x16x16xbf16> to vector<256x16xbf16>
    %c5 = arith.constant 5 : index
    %c0_60 = arith.constant 0 : index
    %c0_61 = arith.constant 0 : index
    %53 = vector.load %arg4[%c5, %c0_60, %c0_61] : memref<9x16x16xbf16, #tpu.memory_space<vmem>>, vector<1x16x16xbf16>
    %54 = vector.shape_cast %53 : vector<1x16x16xbf16> to vector<16x16xbf16>
    %cst_62 = arith.constant dense<0.000000e+00> : vector<256x16xf32>
    %55 = tpu.matmul %52, %54, %cst_62 {dimension_numbers = #tpu.dot_dimension_numbers<[1], [0], [0], [1], [0, 0, 1, 1], [], []>} : vector<256x16xbf16>, vector<16x16xbf16>, vector<256x16xf32> -> vector<256x16xf32>
    %56 = arith.addf %50, %55 : vector<256x16xf32>
    %c2_63 = arith.constant 2 : index
    %c0_64 = arith.constant 0 : index
    %c0_65 = arith.constant 0 : index
    %57 = vector.load %arg11[%c2_63, %c0_64, %c0_65] : memref<18x24x16xbf16, #tpu.memory_space<vmem>>, vector<16x16x16xbf16>
    %58 = vector.shape_cast %57 : vector<16x16x16xbf16> to vector<256x16xbf16>
    %c6 = arith.constant 6 : index
    %c0_66 = arith.constant 0 : index
    %c0_67 = arith.constant 0 : index
    %59 = vector.load %arg4[%c6, %c0_66, %c0_67] : memref<9x16x16xbf16, #tpu.memory_space<vmem>>, vector<1x16x16xbf16>
    %60 = vector.shape_cast %59 : vector<1x16x16xbf16> to vector<16x16xbf16>
    %cst_68 = arith.constant dense<0.000000e+00> : vector<256x16xf32>
    %61 = tpu.matmul %58, %60, %cst_68 {dimension_numbers = #tpu.dot_dimension_numbers<[1], [0], [0], [1], [0, 0, 1, 1], [], []>} : vector<256x16xbf16>, vector<16x16xbf16>, vector<256x16xf32> -> vector<256x16xf32>
    %62 = arith.addf %56, %61 : vector<256x16xf32>
    %c2_69 = arith.constant 2 : index
    %c1_70 = arith.constant 1 : index
    %c0_71 = arith.constant 0 : index
    %63 = vector.load %arg11[%c2_69, %c1_70, %c0_71] : memref<18x24x16xbf16, #tpu.memory_space<vmem>>, vector<16x16x16xbf16>
    %64 = vector.shape_cast %63 : vector<16x16x16xbf16> to vector<256x16xbf16>
    %c7 = arith.constant 7 : index
    %c0_72 = arith.constant 0 : index
    %c0_73 = arith.constant 0 : index
    %65 = vector.load %arg4[%c7, %c0_72, %c0_73] : memref<9x16x16xbf16, #tpu.memory_space<vmem>>, vector<1x16x16xbf16>
    %66 = vector.shape_cast %65 : vector<1x16x16xbf16> to vector<16x16xbf16>
    %cst_74 = arith.constant dense<0.000000e+00> : vector<256x16xf32>
    %67 = tpu.matmul %64, %66, %cst_74 {dimension_numbers = #tpu.dot_dimension_numbers<[1], [0], [0], [1], [0, 0, 1, 1], [], []>} : vector<256x16xbf16>, vector<16x16xbf16>, vector<256x16xf32> -> vector<256x16xf32>
    %68 = arith.addf %62, %67 : vector<256x16xf32>
    %c2_75 = arith.constant 2 : index
    %c2_76 = arith.constant 2 : index
    %c0_77 = arith.constant 0 : index
    %69 = vector.load %arg11[%c2_75, %c2_76, %c0_77] : memref<18x24x16xbf16, #tpu.memory_space<vmem>>, vector<16x16x16xbf16>
    %70 = vector.shape_cast %69 : vector<16x16x16xbf16> to vector<256x16xbf16>
    %c8 = arith.constant 8 : index
    %c0_78 = arith.constant 0 : index
    %c0_79 = arith.constant 0 : index
    %71 = vector.load %arg4[%c8, %c0_78, %c0_79] : memref<9x16x16xbf16, #tpu.memory_space<vmem>>, vector<1x16x16xbf16>
    %72 = vector.shape_cast %71 : vector<1x16x16xbf16> to vector<16x16xbf16>
    %cst_80 = arith.constant dense<0.000000e+00> : vector<256x16xf32>
    %73 = tpu.matmul %70, %72, %cst_80 {dimension_numbers = #tpu.dot_dimension_numbers<[1], [0], [0], [1], [0, 0, 1, 1], [], []>} : vector<256x16xbf16>, vector<16x16xbf16>, vector<256x16xf32> -> vector<256x16xf32>
    %74 = arith.addf %68, %73 : vector<256x16xf32>
    %cst_81 = arith.constant 0.000000e+00 : f32
    %75 = vector.broadcast %cst_81 : f32 to vector<256x16xf32>
    %76 = arith.maximumf %74, %75 : vector<256x16xf32>
    %77 = vector.shape_cast %76 : vector<256x16xf32> to vector<16x16x16xf32>
    %78 = vector.shape_cast %77 : vector<16x16x16xf32> to vector<8x2x16x16xf32>
    %79 = vector.extract_strided_slice %78 {offsets = [0, 0, 0, 0], sizes = [8, 1, 16, 16], strides = [1, 1, 1, 1]} : vector<8x2x16x16xf32> to vector<8x1x16x16xf32>
    %80 = vector.shape_cast %79 : vector<8x1x16x16xf32> to vector<8x16x16xf32>
    %81 = vector.extract_strided_slice %78 {offsets = [0, 1, 0, 0], sizes = [8, 1, 16, 16], strides = [1, 1, 1, 1]} : vector<8x2x16x16xf32> to vector<8x1x16x16xf32>
    %82 = vector.shape_cast %81 : vector<8x1x16x16xf32> to vector<8x16x16xf32>
    %83 = arith.addf %80, %82 : vector<8x16x16xf32>
    %84 = vector.shape_cast %83 : vector<8x16x16xf32> to vector<8x8x2x16xf32>
    %85 = vector.extract_strided_slice %84 {offsets = [0, 0, 0, 0], sizes = [8, 8, 1, 16], strides = [1, 1, 1, 1]} : vector<8x8x2x16xf32> to vector<8x8x1x16xf32>
    %86 = vector.shape_cast %85 : vector<8x8x1x16xf32> to vector<8x8x16xf32>
    %87 = vector.extract_strided_slice %84 {offsets = [0, 0, 1, 0], sizes = [8, 8, 1, 16], strides = [1, 1, 1, 1]} : vector<8x8x2x16xf32> to vector<8x8x1x16xf32>
    %88 = vector.shape_cast %87 : vector<8x8x1x16xf32> to vector<8x8x16xf32>
    %89 = arith.addf %86, %88 : vector<8x8x16xf32>
    %cst_82 = arith.constant 2.500000e-01 : f32
    %90 = vector.broadcast %cst_82 : f32 to vector<8x8x16xf32>
    %91 = arith.mulf %89, %90 : vector<8x8x16xf32>
    %92 = vector.shape_cast %91 : vector<8x8x16xf32> to vector<64x16xf32>
    %93 = arith.truncf %92 : vector<64x16xf32> to vector<64x16xbf16>
    %c0_83 = arith.constant 0 : index
    %c0_84 = arith.constant 0 : index
    %94 = vector.load %arg6[%c0_83, %c0_84] : memref<16x64xbf16, #tpu.memory_space<vmem>>, vector<16x64xbf16>
    %cst_85 = arith.constant dense<0.000000e+00> : vector<64x64xf32>
    %95 = tpu.matmul %93, %94, %cst_85 {dimension_numbers = #tpu.dot_dimension_numbers<[1], [0], [0], [1], [0, 0, 1, 1], [], []>} : vector<64x16xbf16>, vector<16x64xbf16>, vector<64x64xf32> -> vector<64x64xf32>
    %c0_86 = arith.constant 0 : index
    %c0_87 = arith.constant 0 : index
    %96 = vector.load %arg7[%c0_86, %c0_87] : memref<1x64xf32, #tpu.memory_space<vmem>>, vector<1x64xf32>
    %97 = vector.broadcast %96 : vector<1x64xf32> to vector<64x64xf32>
    %98 = arith.addf %95, %97 : vector<64x64xf32>
    %99 = vector.shape_cast %7 : vector<16x16x32xbf16> to vector<8x2x16x32xbf16>
    %100 = vector.extract_strided_slice %99 {offsets = [0, 0, 0, 0], sizes = [8, 1, 16, 32], strides = [1, 1, 1, 1]} : vector<8x2x16x32xbf16> to vector<8x1x16x32xbf16>
    %101 = vector.shape_cast %100 : vector<8x1x16x32xbf16> to vector<8x16x32xbf16>
    %102 = arith.extf %101 : vector<8x16x32xbf16> to vector<8x16x32xf32>
    %103 = vector.extract_strided_slice %99 {offsets = [0, 1, 0, 0], sizes = [8, 1, 16, 32], strides = [1, 1, 1, 1]} : vector<8x2x16x32xbf16> to vector<8x1x16x32xbf16>
    %104 = vector.shape_cast %103 : vector<8x1x16x32xbf16> to vector<8x16x32xbf16>
    %105 = arith.extf %104 : vector<8x16x32xbf16> to vector<8x16x32xf32>
    %106 = arith.addf %102, %105 : vector<8x16x32xf32>
    %107 = vector.shape_cast %106 : vector<8x16x32xf32> to vector<8x8x2x32xf32>
    %108 = vector.extract_strided_slice %107 {offsets = [0, 0, 0, 0], sizes = [8, 8, 1, 32], strides = [1, 1, 1, 1]} : vector<8x8x2x32xf32> to vector<8x8x1x32xf32>
    %109 = vector.shape_cast %108 : vector<8x8x1x32xf32> to vector<8x8x32xf32>
    %110 = vector.extract_strided_slice %107 {offsets = [0, 0, 1, 0], sizes = [8, 8, 1, 32], strides = [1, 1, 1, 1]} : vector<8x8x2x32xf32> to vector<8x8x1x32xf32>
    %111 = vector.shape_cast %110 : vector<8x8x1x32xf32> to vector<8x8x32xf32>
    %112 = arith.addf %109, %111 : vector<8x8x32xf32>
    %cst_88 = arith.constant 2.500000e-01 : f32
    %113 = vector.broadcast %cst_88 : f32 to vector<8x8x32xf32>
    %114 = arith.mulf %112, %113 : vector<8x8x32xf32>
    %115 = vector.shape_cast %114 : vector<8x8x32xf32> to vector<64x32xf32>
    %116 = arith.truncf %115 : vector<64x32xf32> to vector<64x32xbf16>
    %c0_89 = arith.constant 0 : index
    %c0_90 = arith.constant 0 : index
    %117 = vector.load %arg8[%c0_89, %c0_90] : memref<32x64xbf16, #tpu.memory_space<vmem>>, vector<32x64xbf16>
    %cst_91 = arith.constant dense<0.000000e+00> : vector<64x64xf32>
    %118 = tpu.matmul %116, %117, %cst_91 {dimension_numbers = #tpu.dot_dimension_numbers<[1], [0], [0], [1], [0, 0, 1, 1], [], []>} : vector<64x32xbf16>, vector<32x64xbf16>, vector<64x64xf32> -> vector<64x64xf32>
    %c0_92 = arith.constant 0 : index
    %c0_93 = arith.constant 0 : index
    %119 = vector.load %arg9[%c0_92, %c0_93] : memref<1x64xf32, #tpu.memory_space<vmem>>, vector<1x64xf32>
    %120 = vector.broadcast %119 : vector<1x64xf32> to vector<64x64xf32>
    %121 = arith.addf %118, %120 : vector<64x64xf32>
    %122 = arith.addf %98, %121 : vector<64x64xf32>
    %cst_94 = arith.constant 0.000000e+00 : f32
    %123 = vector.broadcast %cst_94 : f32 to vector<64x64xf32>
    %124 = arith.maximumf %122, %123 : vector<64x64xf32>
    %125 = vector.shape_cast %124 : vector<64x64xf32> to vector<8x8x64xf32>
    %126 = arith.truncf %125 : vector<8x8x64xf32> to vector<8x8x64xbf16>
    %c0_95 = arith.constant 0 : index
    %c0_96 = arith.constant 0 : index
    %c0_97 = arith.constant 0 : index
    %c0_98 = arith.constant 0 : index
    %127 = vector.load %arg10[%c0_95, %c0_96, %c0_97, %c0_98] : memref<1x8x8x64xbf16, #tpu.memory_space<vmem>>, vector<1x8x8x64xbf16>
    %128 = vector.shape_cast %127 : vector<1x8x8x64xbf16> to vector<8x8x64xbf16>
    %129 = vector.shape_cast %126 : vector<8x8x64xbf16> to vector<1x8x8x64xbf16>
    tpu.vector_store %arg10[%c0_95, %c0_96, %c0_97, %c0_98], %129 {strides = array<i32>} : memref<1x8x8x64xbf16, #tpu.memory_space<vmem>>, vector<1x8x8x64xbf16>,
    return
  }
  func.func @transform_0(%arg0: i32) -> (i32, i32, i32, i32) {
    %c0_i32 = arith.constant 0 : i32
    %c0_i32_0 = arith.constant 0 : i32
    %c0_i32_1 = arith.constant 0 : i32
    %c0_i32_2 = arith.constant 0 : i32
    return %arg0, %c0_i32, %c0_i32_0, %c0_i32_1 : i32, i32, i32, i32
  }
  func.func @transform_1(%arg0: i32) -> (i32, i32) {
    %c0_i32 = arith.constant 0 : i32
    %c0_i32_0 = arith.constant 0 : i32
    %c0_i32_1 = arith.constant 0 : i32
    return %c0_i32, %c0_i32_0 : i32, i32
  }
  func.func @transform_2(%arg0: i32) -> (i32, i32) {
    %c0_i32 = arith.constant 0 : i32
    %c0_i32_0 = arith.constant 0 : i32
    %c0_i32_1 = arith.constant 0 : i32
    return %c0_i32, %c0_i32_0 : i32, i32
  }
  func.func @transform_3(%arg0: i32) -> (i32, i32, i32) {
    %c0_i32 = arith.constant 0 : i32
    %c0_i32_0 = arith.constant 0 : i32
    %c0_i32_1 = arith.constant 0 : i32
    %c0_i32_2 = arith.constant 0 : i32
    return %c0_i32, %c0_i32_0, %c0_i32_1 : i32, i32, i32
  }
  func.func @transform_4(%arg0: i32) -> (i32, i32) {
    %c0_i32 = arith.constant 0 : i32
    %c0_i32_0 = arith.constant 0 : i32
    %c0_i32_1 = arith.constant 0 : i32
    return %c0_i32, %c0_i32_0 : i32, i32
  }
  func.func @transform_5(%arg0: i32) -> (i32, i32) {
    %c0_i32 = arith.constant 0 : i32
    %c0_i32_0 = arith.constant 0 : i32
    %c0_i32_1 = arith.constant 0 : i32
    return %c0_i32, %c0_i32_0 : i32, i32
  }
  func.func @transform_6(%arg0: i32) -> (i32, i32) {
    %c0_i32 = arith.constant 0 : i32
    %c0_i32_0 = arith.constant 0 : i32
    %c0_i32_1 = arith.constant 0 : i32
    return %c0_i32, %c0_i32_0 : i32, i32
  }
  func.func @transform_7(%arg0: i32) -> (i32, i32) {
    %c0_i32 = arith.constant 0 : i32
    %c0_i32_0 = arith.constant 0 : i32
    %c0_i32_1 = arith.constant 0 : i32
    return %c0_i32, %c0_i32_0 : i32, i32
  }
  func.func @transform_8(%arg0: i32) -> (i32, i32) {
    %c0_i32 = arith.constant 0 : i32
    %c0_i32_0 = arith.constant 0 : i32
    %c0_i32_1 = arith.constant 0 : i32
    return %c0_i32, %c0_i32_0 : i32, i32
  }
  func.func @transform_9(%arg0: i32) -> (i32, i32, i32, i32) {
    %c0_i32 = arith.constant 0 : i32
    %c0_i32_0 = arith.constant 0 : i32
    %c0_i32_1 = arith.constant 0 : i32
    %c0_i32_2 = arith.constant 0 : i32
    return %arg0, %c0_i32, %c0_i32_0, %c0_i32_1 : i32, i32, i32, i32
  }
}

</mosaic_0001>

<bundles_post_ra>
// kernel: tpu_custom_call.1
= control target key start
LH: loop header
LB: loop body
LE: loop exit
PB: predicated region body
PF: predicated region fallthrough
CT: control target
= control target key end

     0   :  { %s10795_s0 = inlined_call_operand.hbm [shape: bf16[2,16,16,32], index: 0, kind: input, shape index: {}]   ;;  %s10796_s1 = inlined_call_operand.vmem [shape: bf16[32,16], index: 1, kind: input, shape index: {}]   ;;  %s10797_s2 = inlined_call_operand.vmem [shape: f32[1,16], index: 2, kind: input, shape index: {}]   ;;  %s10798_s3 = inlined_call_operand.hbm [shape: bf16[9,16,16], index: 3, kind: input, shape index: {}]   ;;  %s10799_s4 = inlined_call_operand.vmem [shape: f32[1,16], index: 4, kind: input, shape index: {}]   ;;  %s10800_s5 = inlined_call_operand.vmem [shape: bf16[16,64], index: 5, kind: input, shape index: {}]   ;;  %s10801_s6 = inlined_call_operand.vmem [shape: f32[1,64], index: 6, kind: input, shape index: {}]   ;;  %s10802_s7 = inlined_call_operand.vmem [shape: bf16[32,64], index: 7, kind: input, shape index: {}]   ;;  %s10803_s8 = inlined_call_operand.vmem [shape: f32[1,64], index: 8, kind: input, shape index: {}]   ;;  %s10804_s9 = inlined_call_operand.hbm [shape: bf16[2,8,8,64], index: 9, kind: output, shape index: {}]  }
   0x1   :  { %10823 = sst [smem:[#allocation60_spill]] %s10798_s3 }
   0x2   :  { %14 = vsyncpa [#allocation4], 0 }
   0x3   :  { %16 = vsyncpa [#allocation4 + $0x1], 0 }
   0x4   :  { %17 = vsyncpa [#allocation7], 0 }
   0x5   :  { %18 = vsyncpa [#allocation5], 0 }
   0x6   :  { %20 = vsyncpa [#allocation5 + $0x1], 0  ;;  %s8173_s30 = smov 0   ;;  %s8175_s10 = smov 0  }
   0x7   :  { %s8177_s11 = smov 0   ;;  %s8179_s12 = smov 0  }
   0x8 LB: > { %10824 = sst [smem:[#allocation12_spill]] %s8111_s11  ;;  %s8194_s13 = sadd.s32 4294967295, %s8115_s12   ;;  %s8115_s12 = sphi %s8179_s12, %s11020_s12   ;;  %s8111_s11 = sphi %s8177_s11, %s11019_s11   ;;  %s8107_s10 = sphi %s8175_s10, %s11018_s10   ;;  %s8103_s30 = sphi %s8173_s30, %s11017_s30  }
   0x9   : > { %s7109_s14 = sadd.s32 4294967294, %s8115_s12   ;;  %p46_p0 = scmp.ne.s32.totalorder %s8107_s10, %s8103_s30 }
   0xa   : > { %p47_p1 = scmp.eq.s32.totalorder %s8194_s13, 0  ;;  %p238_p2 = scmp.eq.s32.totalorder %s8194_s13, 1 }
   0xb   : > { %p244_p3 = scmp.eq.s32.totalorder %s7109_s14, 1  ;;  %p7110_p5 = scmp.ge.s32.totalorder %s8115_s12, 1 }
   0xc   : > { %p8203_p4 = por %p47_p1, %p46_p0  ;;  %p251_p7 = scmp.lt.s32.totalorder %s8115_s12, 3 }
   0xd   : > { %p8208_p6 = por %p244_p3, %p46_p0  ;;  %s10827_s3 = sld [smem:[#allocation60_spill]] }
   0xe   : > { %p8216_p8 = pnand %p7110_p5, %p251_p7  ;;  %s8117_s21 = smov [#allocation6]  }
   0xf   : > { %s270_s22 = sshll.u32 %s8117_s21, 4  ;;  %s8226_s23 = sadd.s32 1, %s8115_s12   ;;  %s271_s22 = int_to_ptr.vmem [resolvable:$true] %s270_s22 }
  0x10   : > { %p7871_p9 = pneg %p8216_p8  ;;  %s10805_s24 = smov 64  }
  0x11   : > { %s10806_s25 = smov 4   ;;  %s30_s26 = ssub.s32 %s8115_s12, %s8226_s23 }
  0x12   : > { %p7872_p10 = pnand %p7871_p9, %p47_p1  ;;  %s33_s27 = sadd.s32 1, %s8111_s11 }
  0x13   : > { %s268_s19 = sshll.u32 %s10827_s3, 4  ;;  %p31_p12 = scmp.eq.s32.totalorder %s30_s26, 0  ;;  %s269_s19 = int_to_ptr.hbm [resolvable:$true] %s268_s19 }
  0x14   : > { %7874 = dma.hbm_to_vmem [thread:$0]  (!%p7872_p10), %s269_s19, 1152, %s271_s22, [#allocation7], %s10805_s24, %s10805_s24, %s10806_s25  }
  0x15   : > { %p40_p13 = scmp.ne.s32.totalorder %s8111_s11, %s8107_s10  ;;  %p41_p0 = scmp.eq.s32.totalorder %s8115_s12, 0 }
  0x16   : > { %s8238_s28 = scalar_select %p31_p12, %s8111_s11, %s33_s27  }
  0x17   : > { %p8242_p3 = por %p238_p2, %p40_p13  ;;  %p7884_p5 = scmp.lt.s32.totalorder %s8115_s12, 2 }
  0x18   : > { %10829 = sst [smem:[#allocation13_spill]] %s8238_s28  ;;  %s299_s14 = sand.u32 1, %s8111_s11  }
  0x19   : > { %s7781_s17 = sshll.u32 %s8115_s12, 7  ;;  %p42_p7 = por %p41_p0, %p40_p13 }
  0x1a   : > { %s7113_s18 = sshll.u32 %s299_s14, 7  ;;  %s308_s19 = scalar_lea.hbm %s10795_s0, %s7781_s17 }
  0x1b   : > { %s309_s22 = sshll.u32 %s308_s19, 4  ;;  %s303_s26 = scalar_lea.vmem [#allocation3], %s7113_s18  ;;  %s310_s22 = int_to_ptr.hbm [resolvable:$true] %s309_s22 }
  0x1c   : > { %s311_s24 = sshll.u32 %s303_s26, 4  ;;  %p8252_p9 = pnand %p7884_p5, %p42_p7  ;;  %s312_s24 = int_to_ptr.vmem [resolvable:$true] %s311_s24 }
  0x1d   : > { %s300_s25 = scalar_lea.sflag [#allocation4], %s299_s14  ;;  %s8015_s28 = sshra.s32 %s310_s22, 4  ;;  %s8016_s28 = int_to_ptr.hbm [resolvable:$true] %s8015_s28 }
  0x1e   : > { %s8017_s11 = scalar_lea.hbm %s8016_s28, 128  ;;  %p8019_p10 = pneg %p8252_p9 }
  0x1f   : > { %p8018_p2 = scmp.ne.s32.totalorder %s8016_s28, %s8017_s11  ;;  %s8022_s18 = scalar_lea.hbm %s10795_s0, 256 }
  0x20   : > { %p8023_p0 = scmp.lt.s32.totalorder %s8016_s28, %s10795_s0  ;;  %p8024_p5 = scmp.lt.s32.totalorder %s8022_s18, %s8017_s11 }
  0x21   : > { %p8020_p12 = pnand %p8019_p10, %p8018_p2 }
  0x22   : > { %p8025_p7 = por %p8024_p5, %p8023_p0 }
  0x23   : > { %p8021_p13 = pneg %p8020_p12 }
  0x25   : > { %p8026_p11 = pnand %p8025_p7, %p8021_p13 }
  0x27   : > { %8029 = shalt.err (!%p8026_p11)
}
  0x28   : > { %s10832_s14 = smov 4   ;;  %s10833_s26 = smov 64  }
  0x29   : > { %7878 = dma.hbm_to_vmem [thread:$0]  (!%p8252_p9), %s310_s22, 2048, %s312_s24, %s300_s25, %s10833_s26, %s10833_s26, %s10832_s14  }
  0x2a   : > { %323 = sbr.rel (%p8216_p8) target bundleno = 1367 (0x557), region = 56 }
  0x2f   : > { %s8272_s3 = sand.u32 1, %s8107_s10  }
  0x30   : > { %s7117_s28 = sshll.u32 %s8272_s3, 7  ;;  %s326_s11 = scalar_lea.sflag [#allocation4], %s8272_s3 }
  0x31   : > { %s8276_s17 = scalar_lea.vmem [#allocation3], %s7117_s28 }
  0x32   : > { %8090 = dma.done.wait (%p8203_p4), %s326_s11, 2048  }
  0x33   : > { %8092 = vsyncadd (%p8203_p4), %s326_s11, 4294965248 }
  0x34   : > { %8094 = dma.done.wait (%p47_p1), [#allocation7], 1152  }
  0x35   : > { %8096 = vsyncadd (%p47_p1), [#allocation7], 4294966144  ;;  %v7799_v0 = vld [vmem:[%s10796_s1 + $0x8] sm:$0xff]  ;;  %v7798_v1 = vld [vmem:[%s10796_s1] sm:$0xff]  ;;  %vm613_vm0 = vcmask 261120   ;;  %vm380_vm1 = vcmask 122880  }
  0x36   : > { %668 = vmatpush.bf16.msra.mxu0 %v7799_v0  ;;  %v7782_v2 = vld [vmem:[%s8276_s17] sm:$0xff]  ;;  %v7783_v3 = vld [vmem:[%s8276_s17 + $0x8] sm:$0xff]  ;;  %v7784_v4 = vld [vmem:[%s8276_s17 + $0x10] sm:$0xff]  ;;  %vm381_vm2 = vsmask.f32 256  ;;  %vm371_vm4 = vcmask 125952  }
  0x37   : > { %v7785_v5 = vld [vmem:[%s8276_s17 + $0x18] sm:$0xff]  ;;  %v7786_v6 = vld [vmem:[%s8276_s17 + $0x20] sm:$0xff]  ;;  %v7787_v7 = vld [vmem:[%s8276_s17 + $0x28] sm:$0xff]  ;;  %vm431_vm5 = vsmask.f32 7938  ;;  %v8120_v12 = vmov 0  }
  0x38   : > { %v383_v8 = vld [vmem:[#allocation2 + $0xc] sm:$0x1]  ;;  %vm8305_vm3 = vmand %vm380_vm1, %vm381_vm2  ;;  %372 = vst.msk [vmem:[#allocation2] sm:$0xf] %vm371_vm4, %v8120_v12  ;;  %v433_v14 = vld [vmem:[#allocation2 + $0x14] sm:$0x1] }
  0x39   : > { %v384_v10 = vsel %vm8305_vm3, 0, %v383_v8  ;;  %v7788_v11 = vld [vmem:[%s8276_s17 + $0x30] sm:$0xff]  ;;  %373 = vst.msk [vmem:[#allocation2 + $0x4] sm:$0xf] %vm371_vm4, %v8120_v12  ;;  %vm8316_vm6 = vmand %vm380_vm1, %vm431_vm5  ;;  %v7816_v16 = vld [vmem:[#allocation6] sm:$0xff]  ;;  %vm1375_vm7 = vcmask 130048  }
  0x3a   : > { %669 = vmatpush.bf16.msra.mxu0 %v7798_v1  ;;  %385 = vst [vmem:[#allocation2 + $0xc] sm:$0x1] %v384_v10  ;;  %v434_v15 = vsel %vm8316_vm6, 0, %v433_v14  ;;  %1431 = vmatpush.bf16.msra.mxu1 %v7816_v16  ;;  %v7789_v17 = vld [vmem:[%s8276_s17 + $0x38] sm:$0xff]  ;;  %v386_v19 = vld [vmem:[#allocation2 + $0x18] sm:$0x1]  ;;  %vm8346_vm8 = vmand %vm371_vm4, %vm431_vm5 }
  0x3b   : > { %374 = vst.msk [vmem:[#allocation2 + $0x8] sm:$0xf] %vm371_vm4, %v8120_v12  ;;  %7861 = vmatpush.bf16.msra.mxu3 %v7816_v16  ;;  %v387_v20 = vsel %vm8305_vm3, 0, %v386_v19  ;;  %v436_v21 = vld [vmem:[#allocation2 + $0x20] sm:$0x1]  ;;  %v7790_v24 = vld [vmem:[%s8276_s17 + $0x40] sm:$0xff] }
  0x3c   : > { %376 = vst.msk [vmem:[#allocation2 + $0xcc] sm:$0xf] %vm371_vm4, %v8120_v12  ;;  %v8334_v22 = vld [vmem:[%s10797_s2] ss:$0 sm:$0xff]  ;;  %v437_v23 = vsel %vm8316_vm6, 0, %v436_v21  ;;  %vm2238_vm11 = vcmask 1042432  }
  0x3d   : > { %7192 = vmatmul.msk.bf16.vlgmr.msra.gmra.mxu0 %vm613_vm0, %v7782_v2  ;;  %377 = vst.msk [vmem:[#allocation2 + $0xd0] sm:$0xf] %vm371_vm4, %v8120_v12  ;;  %v389_v28 = vld [vmem:[#allocation2 + $0x24] sm:$0x1]  ;;  %v439_v40 = vld [vmem:[#allocation2 + $0x2c] sm:$0x1] }
  0x3e   : > { %378 = vst.msk [vmem:[#allocation2 + $0xd4] sm:$0xf] %vm371_vm4, %v8120_v12  ;;  %v390_v30 = vsel %vm8305_vm3, 0, %v389_v28  ;;  %v440_v43 = vsel %vm8316_vm6, 0, %v439_v40  ;;  %vm815_vm9 = vsmask.f32 4368 }
  0x3f   : > { %435 = vst [vmem:[#allocation2 + $0x14] sm:$0x1] %v434_v15  ;;  %v7791_v45 = vld [vmem:[%s8276_s17 + $0x48] sm:$0xff]  ;;  %vm8357_vm10 = vmor %vm381_vm2, %vm815_vm9  ;;  %v392_v56 = vld [vmem:[#allocation2 + $0x30] sm:$0x1]  ;;  %vm2239_vm12 = vcmask 1046532  }
  0x40   : > { %v7800_v18 = vld [vmem:[#allocation2] sm:$0xff]  ;;  %388 = vst [vmem:[#allocation2 + $0x18] sm:$0x1] %v387_v20  ;;  %v393_v60 = vsel %vm8305_vm3, 0, %v392_v56  ;;  %v7792_v12 = vld [vmem:[%s8276_s17 + $0x50] sm:$0xff]  ;;  %vm8391_vm13 = vmor %vm2238_vm11, %vm2239_vm12  ;;  %vm5959_vm2 = vcmask 1041409  }
  0x41   : > { %7276 = vmatmul.msk.bf16.vlgmr.msra.gmra.mxu1 %vm1375_vm7, %v7800_v18  ;;  %438 = vst [vmem:[#allocation2 + $0x20] sm:$0x1] %v437_v23  ;;  %v1139_v37 = vld [vmem:[#allocation2 + $0xc] sm:$0xf]  ;;  %vm1561_vm14 = vsmask.f32 3328 }
  0x42   : > { %391 = vst [vmem:[#allocation2 + $0x24] sm:$0x1] %v390_v30  ;;  %vm1562_vm15 = vsmask.f32 7440  ;;  %vm5968_vm5 = vcmask 1044484   ;;  %vm5977_vm9 = vcmask 1047559  }
  0x43   : > { %441 = vst [vmem:[#allocation2 + $0x2c] sm:$0x1] %v440_v43  ;;  %vm8501_vm1 = vmor %vm1561_vm14, %vm1562_vm15  ;;  %s7119_s14 = sshll.u32 %s8272_s3, 5  ;;  %s7860_s26 = sshll.u32 %s8194_s13, 5 }
  0x44   : > { %394 = vst [vmem:[#allocation2 + $0x30] sm:$0x1] %v393_v60  ;;  %s7022_s20 = scalar_lea.hbm %s10804_s9, %s7860_s26  ;;  %s7011_s13 = scalar_lea.sflag [#allocation5], %s8272_s3 }
  0x45   : > { %s7025_s25 = sshll.u32 %s7022_s20, 4  ;;  %s8065_s21 = scalar_lea.hbm %s10804_s9, 64  ;;  %s7026_s25 = int_to_ptr.hbm [resolvable:$true] %s7025_s25 }
  0x46   : > { %v1143_v51 = vld [vmem:[#allocation2 + $0x14] sm:$0x1]  ;;  %s8059_s22 = sshra.s32 %s7026_s25, 4  ;;  %s8060_s22 = int_to_ptr.hbm [resolvable:$true] %s8059_s22 }
  0x47   : > { %v1146_v2 = vld [vmem:[#allocation2 + $0x18] sm:$0xf]  ;;  %s8061_s15 = scalar_lea.hbm %s8060_s22, 32  ;;  %p8066_p11 = scmp.lt.s32.totalorder %s8060_s22, %s10804_s9 }
  0x48   : > { %v1150_v18 = vld [vmem:[#allocation2 + $0x20] sm:$0x1]  ;;  %p8062_p1 = scmp.ne.s32.totalorder %s8060_s22, %s8061_s15  ;;  %p8067_p9 = scmp.lt.s32.totalorder %s8065_s21, %s8061_s15 }
  0x49   : > { %v1153_v40 = vld [vmem:[#allocation2 + $0x24] sm:$0xf] }
  0x4a   : > { %p8063_p4 = pnand %p8062_p1, %p8242_p3  ;;  %p8068_p2 = por %p8067_p9, %p8066_p11 }
  0x4c   : > { %p8064_p8 = pneg %p8063_p4 }
  0x4d   : > { %7193 = vmatmul.msk.bf16.gmra.mxu0 %vm613_vm0, %v7783_v3 }
  0x4e   : > { %p8069_p10 = pnand %p8068_p2, %p8064_p8 }
  0x5d   : > { %7194 = vmatmul.msk.bf16.gmra.mxu0 %vm613_vm0, %v7784_v4 }
  0x6d   : > { %7195 = vmatmul.msk.bf16.gmra.mxu0 %vm613_vm0, %v7785_v5  ;;  %v442_v5 = vld [vmem:[#allocation2 + $0x38] sm:$0x1] }
  0x6e   : > { %v443_v10 = vsel %vm8316_vm6, 0, %v442_v5 }
  0x6f   : > { %444 = vst [vmem:[#allocation2 + $0x38] sm:$0x1] %v443_v10 }
  0x7d   : > { %7196 = vmatmul.msk.bf16.gmra.mxu0 %vm613_vm0, %v7786_v6 }
  0x8d   : > { %7197 = vmatmul.msk.bf16.gmra.mxu0 %vm613_vm0, %v7787_v7 }
  0x9d   : > { %7198 = vmatmul.msk.bf16.gmra.mxu0 %vm613_vm0, %v7788_v11 }
  0xad   : > { %7199 = vmatmul.msk.bf16.gmra.mxu0 %vm613_vm0, %v7789_v17 }
  0xba   : > { %v671_v25 = vpop.f32.mrf.mxu0 }
  0xbb   : > { %v672_v26 = vadd.f32 %v8334_v22, %v671_v25 }
  0xbd   : > { %v751_v27 = vmax.f32 %v672_v26, 0.0  ;;  %7200 = vmatmul.msk.bf16.gmra.mxu0 %vm613_vm0, %v7790_v24  ;;  %v395_v24 = vld [vmem:[#allocation2 + $0x3c] sm:$0x1] }
  0xbe   : > { %v396_v28 = vsel %vm8305_vm3, 0, %v395_v24 }
  0xbf   : > { %v783_v29 = vpack.c.bf16 %v751_v27, %v751_v27  ;;  %397 = vst [vmem:[#allocation2 + $0x3c] sm:$0x1] %v396_v28 }
  0xc1   : > { %v818_v31 = vshrl.u32 %v783_v29, 16  ;;  %v821_v34 = vshll.u32 %v783_v29, 16 }
  0xc2   : > { %v673_v32 = vpop.f32.mrf.mxu0 }
  0xc3   : > { %v820_v33 = vrot.slane %v818_v31, 7  ;;  %v674_v35 = vadd.f32 %v8334_v22, %v673_v32 }
  0xc5   : > { %v823_v38 = vor.u32 %v821_v34, %v820_v33  ;;  %v752_v39 = vmax.f32 %v674_v35, 0.0  ;;  %v824_v52 = vrot.slane %v820_v33, 4 }
  0xc7   : > { %v1140_v41 = vsel %vm8346_vm8, %v823_v38, %v1139_v37  ;;  %v784_v42 = vpack.c.bf16 %v752_v39, %v752_v39 }
  0xc8   : > { %1141 = vst [vmem:[#allocation2 + $0xc] sm:$0xf] %v1140_v41 }
  0xc9   : > { %v826_v44 = vshrl.u32 %v784_v42, 16  ;;  %v829_v48 = vshll.u32 %v784_v42, 16 }
  0xca   : > { %v676_v46 = vpop.f32.mrf.mxu0 }
  0xcb   : > { %v828_v47 = vrot.slane %v826_v44, 7  ;;  %v677_v49 = vadd.f32 %v8334_v22, %v676_v46  ;;  %v445_v44 = vld [vmem:[#allocation2 + $0x44] sm:$0x1] }
  0xcd   : > { %v831_v53 = vor.u32 %v829_v48, %v828_v47  ;;  %v833_v54 = vrot.slane %v828_v47, 4  ;;  %v753_v55 = vmax.f32 %v677_v49, 0.0  ;;  %7201 = vmatmul.msk.bf16.gmra.mxu0 %vm613_vm0, %v7791_v45 }
  0xcf   : > { %v832_v57 = vsel %vm8357_vm10, %v824_v52, %v831_v53  ;;  %v1144_v58 = vsel %vm8305_vm3, %v833_v54, %v1143_v51  ;;  %v785_v59 = vpack.c.bf16 %v753_v55, %v753_v55  ;;  %v2175_v31 = vld [vmem:[#allocation2 + $0xc] sm:$0xe]  ;;  %v446_v52 = vsel %vm8316_vm6, 0, %v445_v44  ;;  %v7793_v55 = vld [vmem:[%s8276_s17 + $0x58] sm:$0xff] }
  0xd0   : > { %1142 = vst.msk [vmem:[#allocation2 + $0x10] sm:$0xf] %vm371_vm4, %v832_v57  ;;  %v7313_v41 = vrot.slane %v2175_v31, 9 }
  0xd1   : > { %1145 = vst [vmem:[#allocation2 + $0x14] sm:$0x1] %v1144_v58  ;;  %v835_v61 = vshrl.u32 %v785_v59, 16  ;;  %v838_v0 = vshll.u32 %v785_v59, 16 }
  0xd2   : > { %v678_v62 = vpop.f32.mrf.mxu0  ;;  %447 = vst [vmem:[#allocation2 + $0x44] sm:$0x1] %v446_v52 }
  0xd3   : > { %v837_v63 = vrot.slane %v835_v61, 7  ;;  %v679_v1 = vadd.f32 %v8334_v22, %v678_v62 }
  0xd5   : > { %v840_v3 = vor.u32 %v838_v0, %v837_v63  ;;  %v754_v4 = vmax.f32 %v679_v1, 0.0  ;;  %v841_v19 = vrot.slane %v837_v63, 4  ;;  %v1157_v63 = vld [vmem:[#allocation2 + $0x2c] sm:$0x1] }
  0xd7   : > { %v1147_v6 = vsel %vm8346_vm8, %v840_v3, %v1146_v2  ;;  %v786_v7 = vpack.c.bf16 %v754_v4, %v754_v4  ;;  %v7801_v8 = vld [vmem:[#allocation2 + $0xc] sm:$0xff]  ;;  %v398_v4 = vld [vmem:[#allocation2 + $0x48] sm:$0x1] }
  0xd8   : > { %1148 = vst [vmem:[#allocation2 + $0x18] sm:$0xf] %v1147_v6  ;;  %7277 = vmatmul.msk.bf16.gmra.mxu1 %vm1375_vm7, %v7801_v8  ;;  %v8384_v29 = vld [vmem:[#allocation2 + $0x10] sm:$0xf]  ;;  %v8389_v38 = vld [vmem:[#allocation2 + $0x14] sm:$0x1] }
  0xd9   : > { %v843_v11 = vshrl.u32 %v786_v7, 16  ;;  %v846_v16 = vshll.u32 %v786_v7, 16  ;;  %v2250_v33 = vrot.slane %v8384_v29, 5  ;;  %v2253_v47 = vrot.slane %v8389_v38, 5 }
  0xda   : > { %v681_v14 = vpop.f32.mrf.mxu0  ;;  %v399_v8 = vsel %vm8305_vm3, 0, %v398_v4  ;;  %v451_v4 = vld [vmem:[#allocation2 + $0x5c] sm:$0x1] }
  0xdb   : > { %v845_v15 = vrot.slane %v843_v11, 7  ;;  %v682_v17 = vadd.f32 %v8334_v22, %v681_v14  ;;  %v2251_v45 = vsel %vm8391_vm13, %v7313_v41, %v2250_v33  ;;  %v2252_v46 = vrot.slane %v2250_v33, 4  ;;  %400 = vst [vmem:[#allocation2 + $0x48] sm:$0x1] %v399_v8 }
  0xdc   : > { %v2358_v56 = vunpack.c.l.b16 %v2251_v45  ;;  %v452_v8 = vsel %vm8316_vm6, 0, %v451_v4 }
  0xdd   : > { %v848_v20 = vor.u32 %v846_v16, %v845_v15  ;;  %v850_v21 = vrot.slane %v845_v15, 4  ;;  %v755_v23 = vmax.f32 %v682_v17, 0.0  ;;  %7202 = vmatmul.msk.bf16.gmra.mxu0 %vm613_vm0, %v7792_v12  ;;  %v2254_v53 = vsel %vm8391_vm13, %v2252_v46, %v2253_v47  ;;  %v1160_v16 = vld [vmem:[#allocation2 + $0x30] sm:$0xf]  ;;  %v401_v47 = vld [vmem:[#allocation2 + $0x54] sm:$0x1] }
  0xde   : > { %v2359_v57 = vunpack.c.l.b16 %v2254_v53  ;;  %453 = vst [vmem:[#allocation2 + $0x5c] sm:$0x1] %v452_v8 }
  0xdf   : > { %v849_v25 = vsel %vm8357_vm10, %v841_v19, %v848_v20  ;;  %v1151_v26 = vsel %vm8305_vm3, %v850_v21, %v1150_v18  ;;  %v787_v27 = vpack.c.bf16 %v755_v23, %v755_v23  ;;  %v448_v20 = vld [vmem:[#allocation2 + $0x50] sm:$0x1] }
  0xe0   : > { %1149 = vst.msk [vmem:[#allocation2 + $0x1c] sm:$0xf] %vm371_vm4, %v849_v25  ;;  %v8407_v62 = vpack.c.b16 %v2359_v57, %v2358_v56  ;;  %v449_v25 = vsel %vm8316_vm6, 0, %v448_v20  ;;  %v7817_v56 = vld [vmem:[#allocation6 + $0x8] sm:$0xff] }
  0xe1   : > { %1152 = vst [vmem:[#allocation2 + $0x20] sm:$0x1] %v1151_v26  ;;  %v852_v30 = vshrl.u32 %v787_v27, 16  ;;  %v855_v35 = vshll.u32 %v787_v27, 16  ;;  %v2176_v27 = vld [vmem:[#allocation2 + $0x18] sm:$0xe]  ;;  %7862 = vmatpush.bf16.msra.mxu2 %v7817_v56  ;;  %2060 = vmatpush.bf16.msrb.mxu0 %v7817_v56 }
  0xe2   : > { %v683_v32 = vpop.f32.mrf.mxu0  ;;  %450 = vst [vmem:[#allocation2 + $0x50] sm:$0x1] %v449_v25  ;;  %v7314_v41 = vrot.slane %v2176_v27, 9  ;;  %v404_v25 = vld [vmem:[#allocation2 + $0x60] sm:$0x1] }
  0xe3   : > { %v854_v34 = vrot.slane %v852_v30, 7  ;;  %v684_v37 = vadd.f32 %v8334_v22, %v683_v32  ;;  %v7794_v30 = vld [vmem:[%s8276_s17 + $0x60] sm:$0xff] }
  0xe5   : > { %v857_v42 = vor.u32 %v855_v35, %v854_v34  ;;  %v756_v43 = vmax.f32 %v684_v37, 0.0  ;;  %v858_v0 = vrot.slane %v854_v34, 4 }
  0xe7   : > { %v1154_v48 = vsel %vm8346_vm8, %v857_v42, %v1153_v40  ;;  %v788_v49 = vpack.c.bf16 %v756_v43, %v756_v43  ;;  %v7802_v51 = vld [vmem:[#allocation2 + $0x18] sm:$0xff] }
  0xe8   : > { %1155 = vst [vmem:[#allocation2 + $0x24] sm:$0xf] %v1154_v48  ;;  %7278 = vmatmul.msk.bf16.gmra.mxu1 %vm1375_vm7, %v7802_v51  ;;  %v8418_v17 = vld [vmem:[#allocation2 + $0x1c] sm:$0xf]  ;;  %v8427_v31 = vld [vmem:[#allocation2 + $0x20] sm:$0x1] }
  0xe9   : > { %v860_v54 = vshrl.u32 %v788_v49, 16  ;;  %v863_v60 = vshll.u32 %v788_v49, 16  ;;  %v2257_v26 = vrot.slane %v8418_v17, 5  ;;  %v1164_v40 = vld [vmem:[#allocation2 + $0x38] sm:$0x1]  ;;  %v2260_v42 = vrot.slane %v8427_v31, 5 }
  0xea   : > { %v686_v58 = vpop.f32.mrf.mxu0 }
  0xeb   : > { %v862_v59 = vrot.slane %v860_v54, 7  ;;  %v687_v61 = vadd.f32 %v8334_v22, %v686_v58  ;;  %v2259_v37 = vrot.slane %v2257_v26, 4  ;;  %v2258_v48 = vsel %vm8391_vm13, %v7314_v41, %v2257_v26  ;;  %v7836_v41 = vld [vmem:[#allocation6 + $0x20] sm:$0xff] }
  0xec   : > { %v402_v54 = vsel %vm8305_vm3, 0, %v401_v47  ;;  %v2360_v57 = vunpack.c.l.b16 %v2258_v48  ;;  %3413 = vmatpush.bf16.msrb.mxu2 %v7836_v41 }
  0xed   : > { %v865_v1 = vor.u32 %v863_v60, %v862_v59  ;;  %v867_v2 = vrot.slane %v862_v59, 4  ;;  %v757_v3 = vmax.f32 %v687_v61, 0.0  ;;  %7203 = vmatmul.msk.bf16.gmra.mxu0 %vm613_vm0, %v7793_v55  ;;  %v2261_v49 = vsel %vm8391_vm13, %v2259_v37, %v2260_v42  ;;  %403 = vst [vmem:[#allocation2 + $0x54] sm:$0x1] %v402_v54  ;;  %v7835_v42 = vld [vmem:[#allocation6 + $0x18] sm:$0xff] }
  0xee   : > { %v2361_v58 = vunpack.c.l.b16 %v2261_v49  ;;  %2755 = vmatpush.bf16.msrb.mxu1 %v7835_v42  ;;  %v1174_v49 = vld [vmem:[#allocation2 + $0x48] sm:$0xf] }
  0xef   : > { %v866_v5 = vsel %vm8357_vm10, %v858_v0, %v865_v1  ;;  %v1158_v6 = vsel %vm8305_vm3, %v867_v2, %v1157_v63  ;;  %v789_v7 = vpack.c.bf16 %v757_v3, %v757_v3  ;;  %v1167_v1 = vld [vmem:[#allocation2 + $0x3c] sm:$0xf]  ;;  %v2177_v48 = vld [vmem:[#allocation2 + $0x24] sm:$0xe] }
  0xf0   : > { %1156 = vst.msk [vmem:[#allocation2 + $0x28] sm:$0xf] %vm371_vm4, %v866_v5  ;;  %v8444_v0 = vpack.c.b16 %v2361_v58, %v2360_v57  ;;  %v454_v58 = vld [vmem:[#allocation2 + $0x68] sm:$0x1] }
  0xf1   : > { %1159 = vst [vmem:[#allocation2 + $0x2c] sm:$0x1] %v1158_v6  ;;  %v869_v10 = vshrl.u32 %v789_v7, 16  ;;  %v872_v14 = vshll.u32 %v789_v7, 16 }
  0xf2   : > { %v688_v11 = vpop.f32.mrf.mxu0 }
  0xf3   : > { %v871_v12 = vrot.slane %v869_v10, 7  ;;  %v689_v15 = vadd.f32 %v8334_v22, %v688_v11  ;;  %v7795_v11 = vld [vmem:[%s8276_s17 + $0x68] sm:$0xff] }
  0xf5   : > { %v874_v18 = vor.u32 %v872_v14, %v871_v12  ;;  %v758_v19 = vmax.f32 %v689_v15, 0.0  ;;  %v875_v43 = vrot.slane %v871_v12, 4 }
  0xf7   : > { %v1161_v21 = vsel %vm8346_vm8, %v874_v18, %v1160_v16  ;;  %v790_v23 = vpack.c.bf16 %v758_v19, %v758_v19  ;;  %v7803_v24 = vld [vmem:[#allocation2 + $0x24] sm:$0xff]  ;;  %v1516_v18 = vld [vmem:[#allocation2 + $0xc] sm:$0xf] }
  0xf8   : > { %1162 = vst [vmem:[#allocation2 + $0x30] sm:$0xf] %v1161_v21  ;;  %7279 = vmatmul.msk.bf16.gmra.mxu1 %vm1375_vm7, %v7803_v24  ;;  %v1171_v19 = vld [vmem:[#allocation2 + $0x44] sm:$0x1]  ;;  %v1589_v26 = vshrl.u32 %v1516_v18, 16 }
  0xf9   : > { %v877_v28 = vshrl.u32 %v790_v23, 16  ;;  %v880_v34 = vshll.u32 %v790_v23, 16  ;;  %v8461_v37 = vld [vmem:[#allocation2 + $0x28] sm:$0xf] }
  0xfa   : > { %v691_v32 = vpop.f32.mrf.mxu0  ;;  %v8468_v56 = vrot.slane %v1589_v26, 4 }
  0xfb   : > { %v879_v33 = vrot.slane %v877_v28, 7  ;;  %v692_v35 = vadd.f32 %v8334_v22, %v691_v32 }
  0xfd   : > { %v882_v44 = vor.u32 %v880_v34, %v879_v33  ;;  %v884_v45 = vrot.slane %v879_v33, 4  ;;  %v759_v46 = vmax.f32 %v692_v35, 0.0  ;;  %7204 = vmatmul.msk.bf16.gmra.mxu0 %vm613_vm0, %v7794_v30  ;;  %v405_v33 = vsel %vm8305_vm3, 0, %v404_v25  ;;  %v8494_v25 = vld [vmem:[#allocation2 + $0x2c] sm:$0x1] }
  0xfe   : > { %406 = vst [vmem:[#allocation2 + $0x60] sm:$0x1] %v405_v33 }
  0xff   : > { %v883_v51 = vsel %vm8357_vm10, %v875_v43, %v882_v44  ;;  %v1165_v52 = vsel %vm8305_vm3, %v884_v45, %v1164_v40  ;;  %v791_v53 = vpack.c.bf16 %v759_v46, %v759_v46  ;;  %v1592_v43 = vshll.u32 %v1516_v18, 16 }
 0x100   : > { %1163 = vst.msk [vmem:[#allocation2 + $0x34] sm:$0xf] %vm371_vm4, %v883_v51 }
 0x101   : > { %1166 = vst [vmem:[#allocation2 + $0x38] sm:$0x1] %v1165_v52  ;;  %v886_v55 = vshrl.u32 %v791_v53, 16  ;;  %v889_v61 = vshll.u32 %v791_v53, 16  ;;  %v2264_v53 = vrot.slane %v8461_v37, 5  ;;  %v8470_v57 = vrot.slane %v1592_v43, 5 }
 0x102   : > { %v693_v59 = vpop.f32.mrf.mxu0 }
 0x103   : > { %v888_v60 = vrot.slane %v886_v55, 7  ;;  %v694_v63 = vadd.f32 %v8334_v22, %v693_v59  ;;  %v7315_v59 = vrot.slane %v2177_v48, 9  ;;  %v2266_v42 = vrot.slane %v2264_v53, 4 }
 0x105   : > { %v891_v2 = vor.u32 %v889_v61, %v888_v60  ;;  %v760_v3 = vmax.f32 %v694_v63, 0.0  ;;  %v892_v20 = vrot.slane %v888_v60, 4 }
 0x107   : > { %v1168_v5 = vsel %vm8346_vm8, %v891_v2, %v1167_v1  ;;  %v792_v6 = vpack.c.bf16 %v760_v3, %v760_v3  ;;  %v7804_v7 = vld [vmem:[#allocation2 + $0x30] sm:$0xff]  ;;  %v455_v2 = vsel %vm8316_vm6, 0, %v454_v58 }
 0x108   : > { %1169 = vst [vmem:[#allocation2 + $0x3c] sm:$0xf] %v1168_v5  ;;  %7280 = vmatmul.msk.bf16.gmra.mxu1 %vm1375_vm7, %v7804_v7  ;;  %v8484_v7 = vsel %vm8391_vm13, %v7315_v59, %v2264_v53  ;;  %v1514_v53 = vld [vmem:[#allocation2 + $0x4] sm:$0xf] }
 0x109   : > { %v894_v10 = vshrl.u32 %v792_v6, 16  ;;  %v897_v15 = vshll.u32 %v792_v6, 16  ;;  %456 = vst [vmem:[#allocation2 + $0x68] sm:$0x1] %v455_v2  ;;  %v2362_v26 = vunpack.c.l.b16 %v8484_v7  ;;  %v1574_v7 = vshll.u32 %v1514_v53, 16 }
 0x10a   : > { %v696_v12 = vpop.f32.mrf.mxu0 }
 0x10b   : > { %v896_v14 = vrot.slane %v894_v10, 7  ;;  %v697_v16 = vadd.f32 %v8334_v22, %v696_v12  ;;  %v7796_v10 = vld [vmem:[%s8276_s17 + $0x70] sm:$0xff]  ;;  %v1595_v12 = vor.u32 %v8470_v57, %v8468_v56 }
 0x10d   : > { %v899_v21 = vor.u32 %v897_v15, %v896_v14  ;;  %v901_v23 = vrot.slane %v896_v14, 4  ;;  %v761_v24 = vmax.f32 %v697_v16, 0.0  ;;  %7205 = vmatmul.msk.bf16.gmra.mxu0 %vm613_vm0, %v7795_v11  ;;  %v1513_v11 = vld [vmem:[#allocation2] sm:$0xf]  ;;  %v1598_v14 = vshll.u32 %v8384_v29, 16 }
 0x10e   : > { %v1565_v33 = vshrl.u32 %v1513_v11, 16 }
 0x10f   : > { %v900_v27 = vsel %vm8357_vm10, %v892_v20, %v899_v21  ;;  %v1172_v28 = vsel %vm8305_vm3, %v901_v23, %v1171_v19  ;;  %v793_v30 = vpack.c.bf16 %v761_v24, %v761_v24  ;;  %v1528_v32 = vld [vmem:[#allocation2 + $0x3c] sm:$0xf]  ;;  %v1602_v20 = vshrl.u32 %v8384_v29, 16 }
 0x110   : > { %1170 = vst.msk [vmem:[#allocation2 + $0x40] sm:$0xf] %vm371_vm4, %v900_v27  ;;  %v1685_v34 = vshrl.u32 %v1528_v32, 16  ;;  %v1688_v35 = vshll.u32 %v1528_v32, 16 }
 0x111   : > { %1173 = vst [vmem:[#allocation2 + $0x44] sm:$0x1] %v1172_v28  ;;  %v903_v40 = vshrl.u32 %v793_v30, 16  ;;  %v906_v46 = vshll.u32 %v793_v30, 16  ;;  %v1178_v28 = vld [vmem:[#allocation2 + $0x50] sm:$0x1] }
 0x112   : > { %v698_v44 = vpop.f32.mrf.mxu0  ;;  %v1687_v51 = vrot.slane %v1685_v34, 4  ;;  %v1690_v52 = vrot.slane %v1688_v35, 5 }
 0x113   : > { %v8463_v45 = vrot.slane %v903_v40, 7  ;;  %v699_v47 = vadd.f32 %v8334_v22, %v698_v44 }
 0x114   : > { %v1691_v4 = vor.u32 %v1690_v52, %v1687_v51 }
 0x115   : > { %v908_v54 = vor.u32 %v906_v46, %v8463_v45  ;;  %v762_v55 = vmax.f32 %v699_v47, 0.0  ;;  %v909_v27 = vrot.slane %v8463_v45, 4  ;;  %v407_v46 = vld [vmem:[#allocation2 + $0x6c] sm:$0x1]  ;;  %v2267_v47 = vrot.slane %v8494_v25, 5 }
 0x116   : > { %v1692_v30 = vrot.slane %v1691_v4, 4 }
 0x117   : > { %v1175_v60 = vsel %vm8346_vm8, %v908_v54, %v1174_v49  ;;  %v794_v61 = vpack.c.bf16 %v762_v55, %v762_v55  ;;  %v7805_v63 = vld [vmem:[#allocation2 + $0x3c] sm:$0xff]  ;;  %v408_v54 = vsel %vm8305_vm3, 0, %v407_v46  ;;  %v2268_v4 = vsel %vm8391_vm13, %v2266_v42, %v2267_v47  ;;  %v457_v42 = vld [vmem:[#allocation2 + $0x74] sm:$0x1] }
 0x118   : > { %v8474_v1 = vld [vmem:[#allocation2 + $0x40] sm:$0xf]  ;;  %1176 = vst [vmem:[#allocation2 + $0x48] sm:$0xf] %v1175_v60  ;;  %v8478_v3 = vld [vmem:[#allocation2 + $0x44] sm:$0x1]  ;;  %7281 = vmatmul.msk.bf16.gmra.mxu1 %vm1375_vm7, %v7805_v63 }
 0x119   : > { %v1694_v5 = vshll.u32 %v8474_v1, 16  ;;  %v1698_v6 = vshrl.u32 %v8474_v1, 16  ;;  %v911_v8 = vshrl.u32 %v794_v61, 16  ;;  %v1704_v19 = vshll.u32 %v8478_v3, 16  ;;  %409 = vst [vmem:[#allocation2 + $0x6c] sm:$0x1] %v408_v54 }
 0x11a   : > { %v701_v15 = vpop.f32.mrf.mxu0  ;;  %v914_v23 = vshll.u32 %v794_v61, 16  ;;  %v1568_v60 = vshll.u32 %v1513_v11, 16  ;;  %v458_v46 = vsel %vm8316_vm6, 0, %v457_v42 }
 0x11b   : > { %v1696_v16 = vrot.slane %v1694_v5, 5  ;;  %v1700_v18 = vrot.slane %v1698_v6, 4  ;;  %v913_v21 = vrot.slane %v911_v8, 7  ;;  %v702_v24 = vadd.f32 %v8334_v22, %v701_v15  ;;  %459 = vst [vmem:[#allocation2 + $0x74] sm:$0x1] %v458_v46 }
 0x11c   : > { %v1706_v45 = vrot.slane %v1704_v19, 5  ;;  %v1567_v6 = vrot.slane %v1565_v33, 4  ;;  %v1578_v8 = vshrl.u32 %v1514_v53, 16  ;;  %v8528_v33 = vrot.slane %v1598_v14, 5 }
 0x11d   : > { %v1701_v32 = vor.u32 %v1700_v18, %v1696_v16  ;;  %v916_v34 = vor.u32 %v914_v23, %v913_v21  ;;  %v918_v35 = vrot.slane %v913_v21, 4  ;;  %v763_v40 = vmax.f32 %v702_v24, 0.0  ;;  %7206 = vmatmul.msk.bf16.gmra.mxu0 %vm613_vm0, %v7796_v10  ;;  %v1181_v18 = vld [vmem:[#allocation2 + $0x54] sm:$0xf]  ;;  %v1515_v24 = vld [vmem:[#allocation2 + $0x8] sm:$0x1] }
 0x11e   : > { %v1697_v43 = vsel %vm8501_vm1, %v1692_v30, %v1696_v16  ;;  %v2363_v10 = vunpack.c.l.b16 %v2268_v4  ;;  %v1185_v4 = vld [vmem:[#allocation2 + $0x5c] sm:$0x1] }
 0x11f   : > { %v1702_v44 = vrot.slane %v1701_v32, 4  ;;  %v917_v48 = vsel %vm8357_vm10, %v909_v27, %v916_v34  ;;  %v1179_v49 = vsel %vm8305_vm3, %v918_v35, %v1178_v28  ;;  %v795_v51 = vpack.c.bf16 %v763_v40, %v763_v40  ;;  %v1531_v52 = vld [vmem:[#allocation2 + $0x48] sm:$0xf] }
 0x120   : > { %1177 = vst.msk [vmem:[#allocation2 + $0x4c] sm:$0xf] %vm371_vm4, %v917_v48  ;;  %v1709_v58 = vshrl.u32 %v1531_v52, 16  ;;  %v1712_v59 = vshll.u32 %v1531_v52, 16  ;;  %v1961_v63 = vunpack.c.l.b16 %v1697_v43  ;;  %v1570_v27 = vrot.slane %v1568_v60, 5 }
 0x121   : > { %v1707_v55 = vsel %vm8501_vm1, %v1702_v44, %v1706_v45  ;;  %1180 = vst [vmem:[#allocation2 + $0x50] sm:$0x1] %v1179_v49  ;;  %v920_v61 = vshrl.u32 %v795_v51, 16  ;;  %v923_v16 = vshll.u32 %v795_v51, 16  ;;  %v8522_v28 = vpack.c.b16 %v2363_v10, %v2362_v26  ;;  %v7797_v49 = vld [vmem:[%s8276_s17 + $0x78] sm:$0xff] }
 0x122   : > { %v1962_v2 = vunpack.c.l.b16 %v1707_v55  ;;  %v703_v5 = vpop.f32.mrf.mxu0  ;;  %v1711_v21 = vrot.slane %v1709_v58, 4  ;;  %v1714_v23 = vrot.slane %v1712_v59, 5  ;;  %v8530_v34 = vrot.slane %v1602_v20, 4 }
 0x123   : > { %v8519_v15 = vrot.slane %v920_v61, 7  ;;  %v704_v19 = vadd.f32 %v8334_v22, %v703_v5  ;;  %v8532_v35 = vrot.slane %v1574_v7, 5  ;;  %v1580_v40 = vrot.slane %v1578_v8, 4 }
 0x124   : > { %v1988_v11 = vpack.c.b16 %v1962_v2, %v1961_v63  ;;  %v1596_v26 = vrot.slane %v1595_v12, 4  ;;  %v1608_v43 = vshll.u32 %v8389_v38, 16  ;;  %v1584_v20 = vshll.u32 %v1515_v24, 16 }
 0x125   : > { %v925_v30 = vor.u32 %v923_v16, %v8519_v15  ;;  %v764_v32 = vmax.f32 %v704_v19, 0.0  ;;  %v1715_v48 = vor.u32 %v1714_v23, %v1711_v21  ;;  %v1571_v38 = vor.u32 %v1570_v27, %v1567_v6  ;;  %v410_v27 = vld [vmem:[#allocation2 + $0x78] sm:$0x1] }
 0x126   : > { %7301 = vmatmul.msk.bf16.vlgmr.msra.gmra.mxu2 %vm1375_vm7, %v1988_v11  ;;  %v1601_v51 = vsel %vm8501_vm1, %v1596_v26, %v8528_v33  ;;  %v1605_v52 = vor.u32 %v8530_v34, %v8528_v33  ;;  %v1581_v59 = vor.u32 %v1580_v40, %v8532_v35  ;;  %v8558_v2 = vrot.slane %v1608_v43, 5 }
 0x127   : > { %v1182_v44 = vsel %vm8346_vm8, %v925_v30, %v1181_v18  ;;  %v796_v45 = vpack.c.bf16 %v764_v32, %v764_v32  ;;  %v7806_v29 = vld [vmem:[#allocation2 + $0x48] sm:$0xff]  ;;  %v1716_v5 = vrot.slane %v1715_v48, 4  ;;  %v1572_v7 = vrot.slane %v1571_v38, 4  ;;  %v2178_v48 = vld [vmem:[#allocation2 + $0x30] sm:$0xe] }
 0x128   : > { %v8540_v14 = vld [vmem:[#allocation2 + $0x4c] sm:$0xf]  ;;  %1183 = vst [vmem:[#allocation2 + $0x54] sm:$0xf] %v1182_v44  ;;  %v8544_v47 = vld [vmem:[#allocation2 + $0x50] sm:$0x1]  ;;  %7282 = vmatmul.msk.bf16.gmra.mxu1 %vm1375_vm7, %v7806_v29  ;;  %v8573_v43 = vunpack.c.l.b16 %v1601_v51 }
 0x129   : > { %v1718_v56 = vshll.u32 %v8540_v14, 16  ;;  %v1722_v57 = vshrl.u32 %v8540_v14, 16  ;;  %v928_v12 = vshrl.u32 %v796_v45, 16  ;;  %v1728_v58 = vshll.u32 %v8544_v47, 16  ;;  %v8575_v44 = vld [vmem:[#allocation2 + $0x34] sm:$0xf] }
 0x12a   : > { %v706_v54 = vpop.f32.mrf.mxu0  ;;  %v931_v61 = vshll.u32 %v796_v45, 16  ;;  %v1586_v8 = vrot.slane %v1584_v20, 5  ;;  %v926_v10 = vrot.slane %v8519_v15, 4  ;;  %v1582_v24 = vrot.slane %v1581_v59, 4 }
 0x12b   : > { %v1720_v53 = vrot.slane %v1718_v56, 5  ;;  %v1724_v55 = vrot.slane %v1722_v57, 4  ;;  %v930_v60 = vrot.slane %v928_v12, 7  ;;  %v707_v63 = vadd.f32 %v8334_v22, %v706_v54 }
 0x12c   : > { %v1730_v23 = vrot.slane %v1728_v58, 5  ;;  %v411_v34 = vsel %vm8305_vm3, 0, %v410_v27  ;;  %v8577_v46 = vrot.slane %v1605_v52, 4  ;;  %v1577_v57 = vsel %vm8501_vm1, %v1572_v7, %v8532_v35  ;;  %v1188_v58 = vld [vmem:[#allocation2 + $0x60] sm:$0xf] }
 0x12d   : > { %v1725_v6 = vor.u32 %v1724_v55, %v1720_v53  ;;  %v933_v16 = vor.u32 %v931_v61, %v930_v60  ;;  %v935_v18 = vrot.slane %v930_v60, 4  ;;  %v765_v19 = vmax.f32 %v707_v63, 0.0  ;;  %7207 = vmatmul.msk.bf16.gmra.mxu0 %vm613_vm0, %v7797_v49  ;;  %412 = vst [vmem:[#allocation2 + $0x78] sm:$0x1] %v411_v34  ;;  %v8589_v55 = vld [vmem:[#allocation2 + $0x38] sm:$0x1] }
 0x12e   : > { %v1721_v11 = vsel %vm8501_vm1, %v1716_v5, %v1720_v53  ;;  %v1587_v38 = vsel %vm8501_vm1, %v1582_v24, %v1586_v8  ;;  %v1622_v12 = vshll.u32 %v8418_v17, 16  ;;  %v1626_v49 = vshrl.u32 %v8418_v17, 16  ;;  %v460_v24 = vld [vmem:[#allocation2 + $0x80] sm:$0x1] }
 0x12f   : > { %v1726_v21 = vrot.slane %v1725_v6, 4  ;;  %v934_v30 = vsel %vm8357_vm10, %v926_v10, %v933_v16  ;;  %v1186_v32 = vsel %vm8305_vm3, %v935_v18, %v1185_v4  ;;  %v797_v33 = vpack.c.bf16 %v765_v19, %v765_v19  ;;  %v1534_v15 = vld [vmem:[#allocation2 + $0x54] sm:$0xf]  ;;  %v8594_v6 = vld [vmem:[#allocation2 + $0x18] sm:$0xf] }
 0x130   : > { %1184 = vst.msk [vmem:[#allocation2 + $0x58] sm:$0xf] %vm371_vm4, %v934_v30  ;;  %v1733_v42 = vshrl.u32 %v1534_v15, 16  ;;  %v1736_v26 = vshll.u32 %v1534_v15, 16  ;;  %v1963_v29 = vunpack.c.l.b16 %v1721_v11  ;;  %v7316_v35 = vrot.slane %v2178_v48, 9 }
 0x131   : > { %v1731_v40 = vsel %vm8501_vm1, %v1726_v21, %v1730_v23  ;;  %1187 = vst [vmem:[#allocation2 + $0x5c] sm:$0x1] %v1186_v32  ;;  %v937_v45 = vshrl.u32 %v797_v33, 16  ;;  %v940_v54 = vshll.u32 %v797_v33, 16  ;;  %v2271_v61 = vrot.slane %v8575_v44, 5 }
 0x132   : > { %v1964_v20 = vunpack.c.l.b16 %v1731_v40  ;;  %v708_v56 = vpop.f32.mrf.mxu0  ;;  %v1735_v59 = vrot.slane %v1733_v42, 4  ;;  %v1738_v60 = vrot.slane %v1736_v26, 5  ;;  %v1951_v17 = vunpack.c.l.b16 %v1577_v57 }
 0x133   : > { %v8586_v51 = vrot.slane %v937_v45, 7  ;;  %v709_v52 = vadd.f32 %v8334_v22, %v708_v56  ;;  %v1952_v5 = vunpack.c.l.b16 %v1587_v38  ;;  %v8596_v7 = vrot.slane %v1622_v12, 5 }
 0x134   : > { %v1989_v53 = vpack.c.b16 %v1964_v20, %v1963_v29  ;;  %v2272_v8 = vsel %vm8391_vm13, %v7316_v35, %v2271_v61  ;;  %v2273_v10 = vrot.slane %v2271_v61, 4  ;;  %v2274_v16 = vrot.slane %v8589_v55, 5 }
 0x135   : > { %v942_v63 = vor.u32 %v940_v54, %v8586_v51  ;;  %v766_v4 = vmax.f32 %v709_v52, 0.0  ;;  %v1611_v23 = vsel %vm8501_vm1, %v8577_v46, %v8558_v2  ;;  %v1628_v27 = vrot.slane %v1626_v49, 4  ;;  %v1192_v49 = vld [vmem:[#allocation2 + $0x68] sm:$0x1] }
 0x136   : > { %7302 = vmatmul.msk.bf16.gmra.mxu2 %vm1375_vm7, %v1989_v53  ;;  %v1739_v32 = vor.u32 %v1738_v60, %v1735_v59  ;;  %v2275_v34 = vsel %vm8391_vm13, %v2273_v10, %v2274_v16  ;;  %v1983_v42 = vpack.c.b16 %v1952_v5, %v1951_v17  ;;  %v2364_v2 = vunpack.c.l.b16 %v2272_v8 }
 0x137   : > { %v1189_v18 = vsel %vm8346_vm8, %v942_v63, %v1188_v58  ;;  %v798_v19 = vpack.c.bf16 %v766_v4, %v766_v4  ;;  %v7807_v11 = vld [vmem:[#allocation2 + $0x54] sm:$0xff]  ;;  %v461_v46 = vsel %vm8316_vm6, 0, %v460_v24  ;;  %v2365_v48 = vunpack.c.l.b16 %v2275_v34 }
 0x138   : > { %v8603_v21 = vld [vmem:[#allocation2 + $0x58] sm:$0xf]  ;;  %1190 = vst [vmem:[#allocation2 + $0x60] sm:$0xf] %v1189_v18  ;;  %v8609_v30 = vld [vmem:[#allocation2 + $0x5c] sm:$0x1]  ;;  %7283 = vmatmul.msk.bf16.gmra.mxu1 %vm1375_vm7, %v7807_v11  ;;  %v1629_v5 = vor.u32 %v1628_v27, %v8596_v7 }
 0x139   : > { %v1742_v33 = vshll.u32 %v8603_v21, 16  ;;  %v1746_v15 = vshrl.u32 %v8603_v21, 16  ;;  %v945_v40 = vshrl.u32 %v798_v19, 16  ;;  %v1752_v26 = vshll.u32 %v8609_v30, 16  ;;  %462 = vst [vmem:[#allocation2 + $0x80] sm:$0x1] %v461_v46 }
 0x13a   : > { %v711_v45 = vpop.f32.mrf.mxu0  ;;  %v948_v57 = vshll.u32 %v798_v19, 16  ;;  %v1613_v12 = vshrl.u32 %v8594_v6, 16  ;;  %v1740_v54 = vrot.slane %v1739_v32, 4  ;;  %v1616_v53 = vshll.u32 %v8594_v6, 16  ;;  %v413_v18 = vld [vmem:[#allocation2 + $0x84] sm:$0x1] }
 0x13b   : > { %v1744_v29 = vrot.slane %v1742_v33, 5  ;;  %v1748_v20 = vrot.slane %v1746_v15, 4  ;;  %v947_v56 = vrot.slane %v945_v40, 7  ;;  %v712_v38 = vadd.f32 %v8334_v22, %v711_v45  ;;  %v8635_v19 = vld [vmem:[#allocation2 + $0x24] sm:$0xf] }
 0x13c   : > { %v8622_v58 = vpack.c.b16 %v2365_v48, %v2364_v2  ;;  %v943_v59 = vrot.slane %v8586_v51, 4  ;;  %v1754_v17 = vrot.slane %v1752_v26, 5  ;;  %v8633_v51 = vunpack.c.l.b16 %v1611_v23 }
 0x13d   : > { %v1749_v52 = vor.u32 %v1748_v20, %v1744_v29  ;;  %v950_v60 = vor.u32 %v948_v57, %v947_v56  ;;  %v952_v35 = vrot.slane %v947_v56, 4  ;;  %v767_v61 = vmax.f32 %v712_v38, 0.0  ;;  %7296 = vmatmul.msk.bf16.vlgmr.msrb.gmra.mxu0 %vm1375_vm7, %v1983_v42  ;;  %v8644_v42 = vpop.f32.mrf.mxu1  ;;  %v1195_v57 = vld [vmem:[#allocation2 + $0x6c] sm:$0xf] }
 0x13e   : > { %v1745_v63 = vsel %vm8501_vm1, %v1740_v54, %v1744_v29  ;;  %v414_v32 = vsel %vm8305_vm3, 0, %v413_v18  ;;  %v8642_v23 = vrot.slane %v1613_v12, 4  ;;  %v8646_v26 = vrot.slane %v1616_v53, 5  ;;  %v2179_v54 = vld [vmem:[#allocation2 + $0x3c] sm:$0xe] }
 0x13f   : > { %v1750_v4 = vrot.slane %v1749_v52, 4  ;;  %v951_v8 = vsel %vm8357_vm10, %v943_v59, %v950_v60  ;;  %v1193_v6 = vsel %vm8305_vm3, %v952_v35, %v1192_v49  ;;  %v799_v10 = vpack.c.bf16 %v767_v61, %v767_v61  ;;  %v1537_v16 = vld [vmem:[#allocation2 + $0x60] sm:$0xf]  ;;  %415 = vst [vmem:[#allocation2 + $0x84] sm:$0x1] %v414_v32 }
 0x140   : > { %1191 = vst.msk [vmem:[#allocation2 + $0x64] sm:$0xf] %vm371_vm4, %v951_v8  ;;  %v1757_v24 = vshrl.u32 %v1537_v16, 16  ;;  %v1760_v27 = vshll.u32 %v1537_v16, 16  ;;  %v1965_v15 = vunpack.c.l.b16 %v1745_v63  ;;  %v8648_v2 = vrot.slane %v1629_v5, 4 }
 0x141   : > { %v1755_v11 = vsel %vm8501_vm1, %v1750_v4, %v1754_v17  ;;  %1194 = vst [vmem:[#allocation2 + $0x68] sm:$0x1] %v1193_v6  ;;  %v954_v33 = vshrl.u32 %v799_v10, 16  ;;  %v1632_v45 = vshll.u32 %v8427_v31, 16  ;;  %v1637_v29 = vshrl.u32 %v8635_v19, 16 }
 0x142   : > { %v1966_v34 = vunpack.c.l.b16 %v1755_v11  ;;  %v713_v40 = vpop.f32.mrf.mxu0  ;;  %v957_v46 = vshll.u32 %v799_v10, 16  ;;  %v1984_v38 = vpack.c.b16 %v8633_v51, %v8573_v43  ;;  %v1759_v12 = vrot.slane %v1757_v24, 4  ;;  %v463_v8 = vld [vmem:[#allocation2 + $0x8c] sm:$0x1] }
 0x143   : > { %v8652_v20 = vrot.slane %v954_v33, 7  ;;  %v714_v48 = vadd.f32 %v8334_v22, %v713_v40  ;;  %v1762_v49 = vrot.slane %v1760_v27, 5  ;;  %v1646_v31 = vshll.u32 %v8461_v37, 16 }
 0x144   : > { %v1990_v56 = vpack.c.b16 %v1966_v34, %v1965_v15  ;;  %v1650_v59 = vshrl.u32 %v8461_v37, 16  ;;  %v8661_v60 = vrot.slane %v1632_v45, 5  ;;  %v8663_v22 = vrot.slane %v1637_v29, 4 }
 0x145   : > { %v959_v52 = vor.u32 %v957_v46, %v8652_v20  ;;  %v768_v53 = vmax.f32 %v714_v48, 0.0  ;;  %v1640_v35 = vshll.u32 %v8635_v19, 16  ;;  %v2278_v43 = vrot.slane %v8474_v1, 5  ;;  %v1199_v46 = vld [vmem:[#allocation2 + $0x74] sm:$0x1]  ;;  %v8691_v48 = vpop.f32.mrf.mxu1 }
 0x146   : > { %7303 = vmatmul.msk.bf16.gmra.mxu2 %vm1375_vm7, %v1990_v56  ;;  %v1619_v5 = vor.u32 %v8646_v26, %v8642_v23  ;;  %v7317_v6 = vrot.slane %v2179_v54, 9  ;;  %v1763_v10 = vor.u32 %v1762_v49, %v1759_v12  ;;  %v1635_v1 = vsel %vm8501_vm1, %v8648_v2, %v8661_v60  ;;  %v8687_v26 = vld [vmem:[%s10797_s2] ss:$0 sm:$0xff] }
 0x147   : > { %v1196_v61 = vsel %vm8346_vm8, %v959_v52, %v1195_v57  ;;  %v800_v63 = vpack.c.bf16 %v768_v53, %v768_v53  ;;  %v7808_v4 = vld [vmem:[#allocation2 + $0x60] sm:$0xff]  ;;  %v8676_v11 = vrot.slane %v1646_v31, 5  ;;  %v8678_v24 = vrot.slane %v1650_v59, 4 }
 0x148   : > { %v1538_v17 = vld [vmem:[#allocation2 + $0x64] sm:$0xf]  ;;  %1197 = vst [vmem:[#allocation2 + $0x6c] sm:$0xf] %v1196_v61  ;;  %v1539_v37 = vld [vmem:[#allocation2 + $0x68] sm:$0x1]  ;;  %7284 = vmatmul.msk.bf16.gmra.mxu1 %vm1375_vm7, %v7808_v4  ;;  %v2279_v34 = vsel %vm8391_vm13, %v7317_v6, %v2278_v43 }
 0x149   : > { %v1766_v51 = vshll.u32 %v1538_v17, 16  ;;  %v1770_v16 = vshrl.u32 %v1538_v17, 16  ;;  %v962_v18 = vshrl.u32 %v800_v63, 16  ;;  %v1776_v19 = vshll.u32 %v1539_v37, 16  ;;  %v416_v4 = vld [vmem:[#allocation2 + $0x90] sm:$0x1] }
 0x14a   : > { %v716_v27 = vpop.f32.mrf.mxu0  ;;  %v464_v15 = vsel %vm8316_vm6, 0, %v463_v8  ;;  %v965_v40 = vshll.u32 %v800_v63, 16  ;;  %v2280_v45 = vrot.slane %v2278_v43, 4  ;;  %v960_v29 = vrot.slane %v8652_v20, 4 }
 0x14b   : > { %v1768_v32 = vrot.slane %v1766_v51, 5  ;;  %v1772_v33 = vrot.slane %v1770_v16, 4  ;;  %v964_v23 = vrot.slane %v962_v18, 7  ;;  %v717_v2 = vadd.f32 %v8687_v26, %v716_v27  ;;  %465 = vst [vmem:[#allocation2 + $0x8c] sm:$0x1] %v464_v15 }
 0x14c   : > { %v1764_v56 = vrot.slane %v1763_v10, 4  ;;  %v2281_v12 = vrot.slane %v8478_v3, 5  ;;  %v1778_v53 = vrot.slane %v1776_v19, 5  ;;  %v2366_v60 = vunpack.c.l.b16 %v2279_v34 }
 0x14d   : > { %v1773_v57 = vor.u32 %v1772_v33, %v1768_v32  ;;  %v967_v49 = vor.u32 %v965_v40, %v964_v23  ;;  %v969_v54 = vrot.slane %v964_v23, 4  ;;  %v769_v52 = vmax.f32 %v717_v2, 0.0  ;;  %7297 = vmatmul.msk.bf16.gmra.mxu0 %vm1375_vm7, %v1984_v38  ;;  %v1202_v2 = vld [vmem:[#allocation2 + $0x78] sm:$0xf] }
 0x14e   : > { %v1769_v31 = vsel %vm8501_vm1, %v1764_v56, %v1768_v32  ;;  %v2282_v20 = vsel %vm8391_vm13, %v2280_v45, %v2281_v12  ;;  %v417_v37 = vsel %vm8305_vm3, 0, %v416_v4  ;;  %v1642_v18 = vrot.slane %v1640_v35, 5 }
 0x14f   : > { %v1774_v59 = vrot.slane %v1773_v57, 4  ;;  %v968_v43 = vsel %vm8357_vm10, %v960_v29, %v967_v49  ;;  %v1200_v3 = vsel %vm8305_vm3, %v969_v54, %v1199_v46  ;;  %v801_v61 = vpack.c.bf16 %v769_v52, %v769_v52  ;;  %v1540_v63 = vld [vmem:[#allocation2 + $0x6c] sm:$0xf]  ;;  %418 = vst [vmem:[#allocation2 + $0x90] sm:$0x1] %v417_v37 }
 0x150   : > { %v2367_v17 = vunpack.c.l.b16 %v2282_v20  ;;  %1198 = vst.msk [vmem:[#allocation2 + $0x70] sm:$0xf] %vm371_vm4, %v968_v43  ;;  %v1781_v8 = vshrl.u32 %v1540_v63, 16  ;;  %v1784_v6 = vshll.u32 %v1540_v63, 16  ;;  %v1967_v51 = vunpack.c.l.b16 %v1769_v31  ;;  %v466_v31 = vld [vmem:[#allocation2 + $0x98] sm:$0x1] }
 0x151   : > { %v1779_v38 = vsel %vm8501_vm1, %v1774_v59, %v1778_v53  ;;  %1201 = vst [vmem:[#allocation2 + $0x74] sm:$0x1] %v1200_v3  ;;  %v971_v10 = vshrl.u32 %v801_v61, 16  ;;  %v1620_v27 = vrot.slane %v1619_v5, 4  ;;  %v1653_v32 = vor.u32 %v8678_v24, %v8676_v11  ;;  %v8726_v63 = vld [vmem:[#allocation2 + $0x30] sm:$0xf] }
 0x152   : > { %v1968_v16 = vunpack.c.l.b16 %v1779_v38  ;;  %v718_v19 = vpop.f32.mrf.mxu0  ;;  %v8710_v33 = vpack.c.b16 %v2367_v17, %v2366_v60  ;;  %v974_v34 = vshll.u32 %v801_v61, 16  ;;  %v1956_v29 = vunpack.c.l.b16 %v1635_v1 }
 0x153   : > { %v973_v15 = vrot.slane %v971_v10, 7  ;;  %v719_v23 = vadd.f32 %v8687_v26, %v718_v19  ;;  %v1625_v45 = vsel %vm8501_vm1, %v1620_v27, %v8596_v7  ;;  %v1783_v35 = vrot.slane %v1781_v8, 4 }
 0x154   : > { %v1991_v40 = vpack.c.b16 %v1968_v16, %v1967_v51  ;;  %v1786_v46 = vrot.slane %v1784_v6, 5  ;;  %v1643_v24 = vor.u32 %v1642_v18, %v8663_v22  ;;  %v1656_v57 = vshll.u32 %v8494_v25, 16  ;;  %v1206_v18 = vld [vmem:[#allocation2 + $0x80] sm:$0x1] }
 0x155   : > { %v976_v5 = vor.u32 %v974_v34, %v973_v15  ;;  %v770_v56 = vmax.f32 %v719_v23, 0.0  ;;  %v8719_v12 = vpop.f32.mrf.mxu1  ;;  %v1955_v53 = vunpack.c.l.b16 %v1625_v45  ;;  %v1654_v1 = vrot.slane %v1653_v32, 4 }
 0x156   : > { %7304 = vmatmul.msk.bf16.gmra.mxu2 %vm1375_vm7, %v1991_v40  ;;  %v1787_v20 = vor.u32 %v1786_v46, %v1783_v35  ;;  %v8724_v22 = vrot.slane %v1643_v24, 4  ;;  %v1658_v61 = vrot.slane %v1656_v57, 5  ;;  %v467_v6 = vsel %vm8316_vm6, 0, %v466_v31 }
 0x157   : > { %v1203_v49 = vsel %vm8346_vm8, %v976_v5, %v1202_v2  ;;  %v802_v54 = vpack.c.bf16 %v770_v56, %v770_v56  ;;  %v7809_v52 = vld [vmem:[#allocation2 + $0x6c] sm:$0xff]  ;;  %v1985_v25 = vpack.c.b16 %v1956_v29, %v1955_v53  ;;  %468 = vst [vmem:[#allocation2 + $0x98] sm:$0x1] %v467_v6  ;;  %v1661_v34 = vshrl.u32 %v8726_v63, 16  ;;  %v2180_v56 = vld [vmem:[#allocation2 + $0x48] sm:$0xe] }
 0x158   : > { %v1541_v7 = vld [vmem:[#allocation2 + $0x70] sm:$0xf]  ;;  %1204 = vst [vmem:[#allocation2 + $0x78] sm:$0xf] %v1203_v49  ;;  %v1542_v59 = vld [vmem:[#allocation2 + $0x74] sm:$0x1]  ;;  %7285 = vmatmul.msk.bf16.gmra.mxu1 %vm1375_vm7, %v7809_v52  ;;  %v1649_v16 = vsel %vm8501_vm1, %v8724_v22, %v8676_v11  ;;  %v1659_v32 = vsel %vm8501_vm1, %v1654_v1, %v1658_v61 }
 0x159   : > { %v1790_v60 = vshll.u32 %v1541_v7, 16  ;;  %v1794_v43 = vshrl.u32 %v1541_v7, 16  ;;  %v979_v3 = vshrl.u32 %v802_v54, 16  ;;  %v1800_v8 = vshll.u32 %v1542_v59, 16  ;;  %v1209_v6 = vld [vmem:[#allocation2 + $0x84] sm:$0xf] }
 0x15a   : > { %v721_v4 = vpop.f32.mrf.mxu0  ;;  %v982_v10 = vshll.u32 %v802_v54, 16  ;;  %v1788_v19 = vrot.slane %v1787_v20, 4  ;;  %v977_v23 = vrot.slane %v973_v15, 4  ;;  %v1670_v5 = vshll.u32 %v8575_v44, 16  ;;  %v419_v54 = vld [vmem:[#allocation2 + $0x9c] sm:$0x1] }
 0x15b   : > { %v1792_v17 = vrot.slane %v1790_v60, 5  ;;  %v1796_v38 = vrot.slane %v1794_v43, 4  ;;  %v981_v37 = vrot.slane %v979_v3, 7  ;;  %v722_v51 = vadd.f32 %v8687_v26, %v721_v4 }
 0x15c   : > { %v1802_v46 = vrot.slane %v1800_v8, 5  ;;  %v2285_v52 = vrot.slane %v8540_v14, 5  ;;  %v420_v31 = vsel %vm8305_vm3, 0, %v419_v54  ;;  %v1674_v43 = vshrl.u32 %v8575_v44, 16 }
 0x15d   : > { %v1797_v27 = vor.u32 %v1796_v38, %v1792_v17  ;;  %v984_v40 = vor.u32 %v982_v10, %v981_v37  ;;  %v986_v2 = vrot.slane %v981_v37, 4  ;;  %v771_v45 = vmax.f32 %v722_v51, 0.0  ;;  %7298 = vmatmul.msk.bf16.gmra.mxu0 %vm1375_vm7, %v1985_v25  ;;  %v8739_v29 = vpop.f32.mrf.mxu1  ;;  %421 = vst [vmem:[#allocation2 + $0x9c] sm:$0x1] %v420_v31 }
 0x15e   : > { %v1793_v11 = vsel %vm8501_vm1, %v1788_v19, %v1792_v17  ;;  %v8755_v25 = vunpack.c.l.b16 %v1659_v32  ;;  %v1664_v14 = vshll.u32 %v8726_v63, 16  ;;  %v8758_v22 = vrot.slane %v1670_v5, 5  ;;  %v469_v5 = vld [vmem:[#allocation2 + $0xa4] sm:$0x1] }
 0x15f   : > { %v1798_v35 = vrot.slane %v1797_v27, 4  ;;  %v985_v24 = vsel %vm8357_vm10, %v977_v23, %v984_v40  ;;  %v1207_v15 = vsel %vm8305_vm3, %v986_v2, %v1206_v18  ;;  %v803_v57 = vpack.c.bf16 %v771_v45, %v771_v45  ;;  %v1543_v49 = vld [vmem:[#allocation2 + $0x78] sm:$0xf] }
 0x160   : > { %1205 = vst.msk [vmem:[#allocation2 + $0x7c] sm:$0xf] %vm371_vm4, %v985_v24  ;;  %v1805_v7 = vshrl.u32 %v1543_v49, 16  ;;  %v1808_v1 = vshll.u32 %v1543_v49, 16  ;;  %v1969_v20 = vunpack.c.l.b16 %v1793_v11  ;;  %v7318_v61 = vrot.slane %v2180_v56, 9 }
 0x161   : > { %v1803_v53 = vsel %vm8501_vm1, %v1798_v35, %v1802_v46  ;;  %1208 = vst [vmem:[#allocation2 + $0x80] sm:$0x1] %v1207_v15  ;;  %v988_v59 = vshrl.u32 %v803_v57, 16  ;;  %v991_v17 = vshll.u32 %v803_v57, 16  ;;  %v2287_v51 = vrot.slane %v2285_v52, 4 }
 0x162   : > { %v1970_v60 = vunpack.c.l.b16 %v1803_v53  ;;  %v723_v3 = vpop.f32.mrf.mxu0  ;;  %v1807_v37 = vrot.slane %v1805_v7, 4  ;;  %v1810_v10 = vrot.slane %v1808_v1, 5  ;;  %v2288_v44 = vrot.slane %v8544_v47, 5 }
 0x163   : > { %v8760_v4 = vrot.slane %v988_v59, 7  ;;  %v724_v38 = vadd.f32 %v8687_v26, %v723_v3  ;;  %v1676_v63 = vrot.slane %v1674_v43, 4  ;;  %v2286_v27 = vsel %vm8391_vm13, %v7318_v61, %v2285_v52  ;;  %v7818_v59 = vld [vmem:[#allocation6 + $0x10] sm:$0xff] }
 0x164   : > { %v1992_v8 = vpack.c.b16 %v1970_v60, %v1969_v20  ;;  %v1957_v23 = vunpack.c.l.b16 %v1649_v16  ;;  %v8770_v40 = vrot.slane %v1661_v34, 4  ;;  %v2289_v2 = vsel %vm8391_vm13, %v2287_v51, %v2288_v44  ;;  %v7854_v60 = vld [vmem:[#allocation6 + $0x30] sm:$0xff]  ;;  %2465 = vmatpush.bf16.msrb.mxu3 %v7818_v59 }
 0x165   : > { %v993_v18 = vor.u32 %v991_v17, %v8760_v4  ;;  %v772_v19 = vmax.f32 %v724_v38, 0.0  ;;  %v8768_v32 = vpop.f32.mrf.mxu1  ;;  %v1666_v46 = vrot.slane %v1664_v14, 5  ;;  %v2369_v56 = vunpack.c.l.b16 %v2289_v2  ;;  %4106 = vmatpush.bf16.msra.mxu0 %v7854_v60 }
 0x166   : > { %7305 = vmatmul.msk.bf16.gmra.mxu2 %vm1375_vm7, %v1992_v8  ;;  %v1811_v15 = vor.u32 %v1810_v10, %v1807_v37  ;;  %v2368_v16 = vunpack.c.l.b16 %v2286_v27  ;;  %v1986_v54 = vpack.c.b16 %v8755_v25, %v1957_v23  ;;  %v1677_v53 = vor.u32 %v1676_v63, %v8758_v22  ;;  %v1213_v25 = vld [vmem:[#allocation2 + $0x8c] sm:$0x1] }
 0x167   : > { %v1210_v47 = vsel %vm8346_vm8, %v993_v18, %v1209_v6  ;;  %v804_v45 = vpack.c.bf16 %v772_v19, %v772_v19  ;;  %v7810_v11 = vld [vmem:[#allocation2 + $0x78] sm:$0xff]  ;;  %v470_v20 = vsel %vm8316_vm6, 0, %v469_v5  ;;  %v1680_v17 = vshll.u32 %v8589_v55, 16 }
 0x168   : > { %v1544_v35 = vld [vmem:[#allocation2 + $0x7c] sm:$0xf]  ;;  %1211 = vst [vmem:[#allocation2 + $0x84] sm:$0xf] %v1210_v47  ;;  %v1545_v24 = vld [vmem:[#allocation2 + $0x80] sm:$0x1]  ;;  %7286 = vmatmul.msk.bf16.gmra.mxu1 %vm1375_vm7, %v7810_v11  ;;  %v8781_v43 = vpack.c.b16 %v2369_v56, %v2368_v16  ;;  %v1667_v6 = vor.u32 %v1666_v46, %v8770_v40 }
 0x169   : > { %v1814_v57 = vshll.u32 %v1544_v35, 16  ;;  %v1818_v49 = vshrl.u32 %v1544_v35, 16  ;;  %v996_v34 = vshrl.u32 %v804_v45, 16  ;;  %v1824_v52 = vshll.u32 %v1545_v24, 16  ;;  %471 = vst [vmem:[#allocation2 + $0xa4] sm:$0x1] %v470_v20 }
 0x16a   : > { %v726_v7 = vpop.f32.mrf.mxu0  ;;  %v999_v14 = vshll.u32 %v804_v45, 16  ;;  %v1812_v38 = vrot.slane %v1811_v15, 4  ;;  %v994_v37 = vrot.slane %v8760_v4, 4  ;;  %v1678_v27 = vrot.slane %v1677_v53, 4  ;;  %v422_v45 = vld [vmem:[#allocation2 + $0xa8] sm:$0x1] }
 0x16b   : > { %v1816_v1 = vrot.slane %v1814_v57, 5  ;;  %v1820_v31 = vrot.slane %v1818_v49, 4  ;;  %v998_v3 = vrot.slane %v996_v34, 7  ;;  %v727_v61 = vadd.f32 %v8687_v26, %v726_v7  ;;  %v1216_v7 = vld [vmem:[#allocation2 + $0x90] sm:$0xf] }
 0x16c   : > { %v1826_v63 = vrot.slane %v1824_v52, 5  ;;  %v1682_v2 = vrot.slane %v1680_v17, 5  ;;  %v423_v5 = vsel %vm8305_vm3, 0, %v422_v45  ;;  %v1668_v49 = vrot.slane %v1667_v6, 4  ;;  %v7819_v6 = vld [vmem:[#allocation2 + $0xc] sm:$0xff] }
 0x16d   : > { %v1821_v8 = vor.u32 %v1820_v31, %v1816_v1  ;;  %v1001_v10 = vor.u32 %v999_v14, %v998_v3  ;;  %v1003_v51 = vrot.slane %v998_v3, 4  ;;  %v773_v44 = vmax.f32 %v727_v61, 0.0  ;;  %7299 = vmatmul.msk.bf16.gmra.mxu0 %vm1375_vm7, %v1986_v54  ;;  %v8788_v18 = vpop.f32.mrf.mxu1  ;;  %424 = vst [vmem:[#allocation2 + $0xa8] sm:$0x1] %v423_v5  ;;  %v2181_v61 = vld [vmem:[#allocation2 + $0x54] sm:$0xe] }
 0x16e   : > { %v1817_v55 = vsel %vm8501_vm1, %v1812_v38, %v1816_v1  ;;  %v1683_v16 = vsel %vm8501_vm1, %v1678_v27, %v1682_v2  ;;  %v1673_v1 = vsel %vm8501_vm1, %v1668_v49, %v8758_v22  ;;  %v2292_v17 = vrot.slane %v8603_v21, 5 }
 0x16f   : > { %v1822_v19 = vrot.slane %v1821_v8, 4  ;;  %v1002_v23 = vsel %vm8357_vm10, %v994_v37, %v1001_v10  ;;  %v1214_v40 = vsel %vm8305_vm3, %v1003_v51, %v1213_v25  ;;  %v805_v4 = vpack.c.bf16 %v773_v44, %v773_v44  ;;  %v1546_v47 = vld [vmem:[#allocation2 + $0x84] sm:$0xf] }
 0x170   : > { %1212 = vst.msk [vmem:[#allocation2 + $0x88] sm:$0xf] %vm371_vm4, %v1002_v23  ;;  %v1829_v35 = vshrl.u32 %v1546_v47, 16  ;;  %v1832_v46 = vshll.u32 %v1546_v47, 16  ;;  %v1971_v24 = vunpack.c.l.b16 %v1817_v55  ;;  %v1960_v3 = vunpack.c.l.b16 %v1683_v16  ;;  %v472_v47 = vld [vmem:[#allocation2 + $0xb0] sm:$0x1] }
 0x171   : > { %v1827_v11 = vsel %vm8501_vm1, %v1822_v19, %v1826_v63  ;;  %1215 = vst [vmem:[#allocation2 + $0x8c] sm:$0x1] %v1214_v40  ;;  %v1005_v56 = vshrl.u32 %v805_v4, 16  ;;  %v1008_v54 = vshll.u32 %v805_v4, 16  ;;  %v1959_v37 = vunpack.c.l.b16 %v1673_v1 }
 0x172   : > { %v1972_v15 = vunpack.c.l.b16 %v1827_v11  ;;  %v728_v57 = vpop.f32.mrf.mxu0  ;;  %v1831_v31 = vrot.slane %v1829_v35, 4  ;;  %v1834_v59 = vrot.slane %v1832_v46, 5  ;;  %v2295_v19 = vrot.slane %v8609_v30, 5 }
 0x173   : > { %v1007_v34 = vrot.slane %v1005_v56, 7  ;;  %v729_v52 = vadd.f32 %v8687_v26, %v728_v57  ;;  %v1987_v21 = vpack.c.b16 %v1960_v3, %v1959_v37  ;;  %v7319_v27 = vrot.slane %v2181_v61, 9  ;;  %v1220_v56 = vld [vmem:[#allocation2 + $0x98] sm:$0x1] }
 0x174   : > { %v1993_v53 = vpack.c.b16 %v1972_v15, %v1971_v24  ;;  %v1835_v51 = vor.u32 %v1834_v59, %v1831_v31  ;;  %v2294_v45 = vrot.slane %v2292_v17, 4  ;;  %v473_v30 = vsel %vm8316_vm6, 0, %v472_v47 }
 0x175   : > { %v1010_v20 = vor.u32 %v1008_v54, %v1007_v34  ;;  %v774_v60 = vmax.f32 %v729_v52, 0.0  ;;  %v8808_v14 = vpop.f32.mrf.mxu1  ;;  %v1011_v5 = vrot.slane %v1007_v34, 4  ;;  %474 = vst [vmem:[#allocation2 + $0xb0] sm:$0x1] %v473_v30  ;;  %v2293_v52 = vsel %vm8391_vm13, %v7319_v27, %v2292_v17  ;;  %v1223_v27 = vld [vmem:[#allocation2 + $0x9c] sm:$0xf] }
 0x176   : > { %7306 = vmatmul.msk.bf16.gmra.mxu2 %vm1375_vm7, %v1993_v53  ;;  %v1836_v24 = vrot.slane %v1835_v51, 4  ;;  %v2296_v57 = vsel %vm8391_vm13, %v2294_v45, %v2295_v19 }
 0x177   : > { %v1217_v25 = vsel %vm8346_vm8, %v1010_v20, %v1216_v7  ;;  %v806_v38 = vpack.c.bf16 %v774_v60, %v774_v60  ;;  %v7811_v8 = vld [vmem:[#allocation2 + $0x84] sm:$0xff]  ;;  %v2371_v31 = vunpack.c.l.b16 %v2296_v57 }
 0x178   : > { %v1547_v22 = vld [vmem:[#allocation2 + $0x88] sm:$0xf]  ;;  %1218 = vst [vmem:[#allocation2 + $0x90] sm:$0xf] %v1217_v25  ;;  %v1548_v10 = vld [vmem:[#allocation2 + $0x8c] sm:$0x1]  ;;  %7287 = vmatmul.msk.bf16.vlgmr.msra.gmra.mxu3 %vm1375_vm7, %v7811_v8  ;;  %7416 = vmatmul.msk.bf16.vlgmr.msrb.gmra.mxu1 %vm1375_vm7, %v7819_v6  ;;  %v2370_v8 = vunpack.c.l.b16 %v2293_v52 }
 0x179   : > { %v1838_v44 = vshll.u32 %v1547_v22, 16  ;;  %v1842_v55 = vshrl.u32 %v1547_v22, 16  ;;  %v1013_v63 = vshrl.u32 %v806_v38, 16  ;;  %v1848_v2 = vshll.u32 %v1548_v10, 16 }
 0x17a   : > { %v731_v23 = vpop.f32.mrf.mxu0  ;;  %v1016_v35 = vshll.u32 %v806_v38, 16  ;;  %v425_v38 = vld [vmem:[#allocation2 + $0xb4] sm:$0x1] }
 0x17b   : > { %v1840_v40 = vrot.slane %v1838_v44, 5  ;;  %v1844_v4 = vrot.slane %v1842_v55, 4  ;;  %v1015_v11 = vrot.slane %v1013_v63, 7  ;;  %v732_v46 = vadd.f32 %v8687_v26, %v731_v23 }
 0x17c   : > { %v1850_v1 = vrot.slane %v1848_v2, 5  ;;  %v426_v10 = vsel %vm8305_vm3, 0, %v425_v38  ;;  %v8837_v44 = vpack.c.b16 %v2371_v31, %v2370_v8 }
 0x17d   : > { %v1845_v15 = vor.u32 %v1844_v4, %v1840_v40  ;;  %v1018_v49 = vor.u32 %v1016_v35, %v1015_v11  ;;  %v1020_v16 = vrot.slane %v1015_v11, 4  ;;  %v775_v54 = vmax.f32 %v732_v46, 0.0  ;;  %7300 = vmatmul.msk.bf16.gmra.mxu0 %vm1375_vm7, %v1987_v21  ;;  %v8824_v53 = vpop.f32.mrf.mxu1  ;;  %427 = vst [vmem:[#allocation2 + $0xb4] sm:$0x1] %v426_v10  ;;  %v7820_v46 = vld [vmem:[#allocation2 + $0x18] sm:$0xff] }
 0x17e   : > { %v1841_v34 = vsel %vm8501_vm1, %v1836_v24, %v1840_v40 }
 0x17f   : > { %v1846_v7 = vrot.slane %v1845_v15, 4  ;;  %v1019_v59 = vsel %vm8357_vm10, %v1011_v5, %v1018_v49  ;;  %v1221_v20 = vsel %vm8305_vm3, %v1020_v16, %v1220_v56  ;;  %v807_v60 = vpack.c.bf16 %v775_v54, %v775_v54  ;;  %v1549_v3 = vld [vmem:[#allocation2 + $0x90] sm:$0xf] }
 0x180   : > { %1219 = vst.msk [vmem:[#allocation2 + $0x94] sm:$0xf] %vm371_vm4, %v1019_v59  ;;  %v1853_v17 = vshrl.u32 %v1549_v3, 16  ;;  %v1856_v25 = vshll.u32 %v1549_v3, 16  ;;  %v1973_v37 = vunpack.c.l.b16 %v1841_v34  ;;  %v475_v34 = vld [vmem:[#allocation2 + $0xbc] sm:$0x1] }
 0x181   : > { %v1851_v61 = vsel %vm8501_vm1, %v1846_v7, %v1850_v1  ;;  %1222 = vst [vmem:[#allocation2 + $0x98] sm:$0x1] %v1221_v20  ;;  %v1022_v6 = vshrl.u32 %v807_v60, 16  ;;  %v1025_v19 = vshll.u32 %v807_v60, 16  ;;  %v7838_v59 = vld [vmem:[#allocation2 + $0x18] sm:$0xff]  ;;  %v476_v20 = vsel %vm8316_vm6, 0, %v475_v34 }
 0x182   : > { %v1974_v22 = vunpack.c.l.b16 %v1851_v61  ;;  %v733_v51 = vpop.f32.mrf.mxu0  ;;  %v1855_v23 = vrot.slane %v1853_v17, 4  ;;  %v1858_v40 = vrot.slane %v1856_v25, 5  ;;  %v1227_v60 = vld [vmem:[#allocation2 + $0xa4] sm:$0x1]  ;;  %477 = vst [vmem:[#allocation2 + $0xbc] sm:$0x1] %v476_v20 }
 0x183   : > { %v1024_v55 = vrot.slane %v1022_v6, 7  ;;  %v734_v63 = vadd.f32 %v8687_v26, %v733_v51 }
 0x184   : > { %v1994_v21 = vpack.c.b16 %v1974_v22, %v1973_v37  ;;  %v1859_v56 = vor.u32 %v1858_v40, %v1855_v23 }
 0x185   : > { %v1027_v4 = vor.u32 %v1025_v19, %v1024_v55  ;;  %v776_v2 = vmax.f32 %v734_v63, 0.0  ;;  %v8841_v47 = vpop.f32.mrf.mxu1  ;;  %v1028_v17 = vrot.slane %v1024_v55, 4 }
 0x186   : > { %7307 = vmatmul.msk.bf16.gmra.mxu2 %vm1375_vm7, %v1994_v21  ;;  %v1860_v3 = vrot.slane %v1859_v56, 4 }
 0x187   : > { %v1224_v45 = vsel %vm8346_vm8, %v1027_v4, %v1223_v27  ;;  %v808_v11 = vpack.c.bf16 %v776_v2, %v776_v2  ;;  %v7812_v35 = vld [vmem:[#allocation2 + $0x90] sm:$0xff] }
 0x188   : > { %v1550_v30 = vld [vmem:[#allocation2 + $0x94] sm:$0xf]  ;;  %1225 = vst [vmem:[#allocation2 + $0x9c] sm:$0xf] %v1224_v45  ;;  %v1551_v5 = vld [vmem:[#allocation2 + $0x98] sm:$0x1]  ;;  %7288 = vmatmul.msk.bf16.gmra.mxu3 %vm1375_vm7, %v7812_v35  ;;  %7417 = vmatmul.msk.bf16.gmra.mxu1 %vm1375_vm7, %v7820_v46 }
 0x189   : > { %v1862_v24 = vshll.u32 %v1550_v30, 16  ;;  %v1866_v15 = vshrl.u32 %v1550_v30, 16  ;;  %v1030_v57 = vshrl.u32 %v808_v11, 16  ;;  %v1872_v52 = vshll.u32 %v1551_v5, 16  ;;  %v428_v45 = vld [vmem:[#allocation2 + $0xc0] sm:$0x1] }
 0x18a   : > { %v736_v49 = vpop.f32.mrf.mxu0  ;;  %v1033_v1 = vshll.u32 %v808_v11, 16  ;;  %v429_v35 = vsel %vm8305_vm3, 0, %v428_v45 }
 0x18b   : > { %v1864_v16 = vrot.slane %v1862_v24, 5  ;;  %v1868_v54 = vrot.slane %v1866_v15, 4  ;;  %v1032_v7 = vrot.slane %v1030_v57, 7  ;;  %v737_v31 = vadd.f32 %v8687_v26, %v736_v49  ;;  %430 = vst [vmem:[#allocation2 + $0xc0] sm:$0x1] %v429_v35 }
 0x18c   : > { %v1874_v10 = vrot.slane %v1872_v52, 5  ;;  %v1230_v24 = vld [vmem:[#allocation2 + $0xa8] sm:$0xf] }
 0x18d   : > { %v1869_v61 = vor.u32 %v1868_v54, %v1864_v16  ;;  %v1035_v25 = vor.u32 %v1033_v1, %v1032_v7  ;;  %v1037_v38 = vrot.slane %v1032_v7, 4  ;;  %v777_v8 = vmax.f32 %v737_v31, 0.0  ;;  %7556 = vmatmul.msk.bf16.vlgmr.msra.gmra.mxu0 %vm1375_vm7, %v7838_v59  ;;  %v8851_v6 = vpop.f32.mrf.mxu1  ;;  %v7821_v1 = vld [vmem:[#allocation2 + $0x24] sm:$0xff] }
 0x18e   : > { %v1865_v37 = vsel %vm8501_vm1, %v1860_v3, %v1864_v16 }
 0x18f   : > { %v1870_v22 = vrot.slane %v1869_v61, 4  ;;  %v1036_v51 = vsel %vm8357_vm10, %v1028_v17, %v1035_v25  ;;  %v1228_v19 = vsel %vm8305_vm3, %v1037_v38, %v1227_v60  ;;  %v809_v63 = vpack.c.bf16 %v777_v8, %v777_v8  ;;  %v1552_v55 = vld [vmem:[#allocation2 + $0x9c] sm:$0xf]  ;;  %v478_v17 = vld [vmem:[#allocation2 + $0xc8] sm:$0x1] }
 0x190   : > { %1226 = vst.msk [vmem:[#allocation2 + $0xa0] sm:$0xf] %vm371_vm4, %v1036_v51  ;;  %v1877_v27 = vshrl.u32 %v1552_v55, 16  ;;  %v1880_v23 = vshll.u32 %v1552_v55, 16  ;;  %v1975_v4 = vunpack.c.l.b16 %v1865_v37  ;;  %v1234_v55 = vld [vmem:[#allocation2 + $0xb0] sm:$0x1] }
 0x191   : > { %v1875_v21 = vsel %vm8501_vm1, %v1870_v22, %v1874_v10  ;;  %1229 = vst [vmem:[#allocation2 + $0xa4] sm:$0x1] %v1228_v19  ;;  %v1039_v40 = vshrl.u32 %v809_v63, 16  ;;  %v1042_v30 = vshll.u32 %v809_v63, 16  ;;  %v479_v22 = vsel %vm8316_vm6, 0, %v478_v17  ;;  %v7839_v63 = vld [vmem:[#allocation2 + $0x24] sm:$0xff] }
 0x192   : > { %v1976_v2 = vunpack.c.l.b16 %v1875_v21  ;;  %v738_v11 = vpop.f32.mrf.mxu0  ;;  %v1879_v15 = vrot.slane %v1877_v27, 4  ;;  %v1882_v57 = vrot.slane %v1880_v23, 5  ;;  %480 = vst [vmem:[#allocation2 + $0xc8] sm:$0x1] %v479_v22  ;;  %vm5971_vm6 = vcmask 1045509  }
 0x193   : > { %v1041_v46 = vrot.slane %v1039_v40, 7  ;;  %v739_v5 = vadd.f32 %v8687_v26, %v738_v11 }
 0x194   : > { %v1995_v56 = vpack.c.b16 %v1976_v2, %v1975_v4  ;;  %v1883_v20 = vor.u32 %v1882_v57, %v1879_v15 }
 0x195   : > { %v1044_v49 = vor.u32 %v1042_v30, %v1041_v46  ;;  %v778_v16 = vmax.f32 %v739_v5, 0.0  ;;  %v1458_v54 = vpop.f32.mrf.mxu1  ;;  %v1045_v23 = vrot.slane %v1041_v46, 4 }
 0x196   : > { %7308 = vmatmul.msk.bf16.gmra.mxu2 %vm1375_vm7, %v1995_v56  ;;  %v1884_v21 = vrot.slane %v1883_v20, 4 }
 0x197   : > { %v1231_v52 = vsel %vm8346_vm8, %v1044_v49, %v1230_v24  ;;  %v810_v34 = vpack.c.bf16 %v778_v16, %v778_v16  ;;  %v7813_v7 = vld [vmem:[#allocation2 + $0x9c] sm:$0xff] }
 0x198   : > { %v1553_v31 = vld [vmem:[#allocation2 + $0xa0] sm:$0xf]  ;;  %1232 = vst [vmem:[#allocation2 + $0xa8] sm:$0xf] %v1231_v52  ;;  %v1554_v59 = vld [vmem:[#allocation2 + $0xa4] sm:$0x1]  ;;  %7289 = vmatmul.msk.bf16.gmra.mxu3 %vm1375_vm7, %v7813_v7  ;;  %7418 = vmatmul.msk.bf16.gmra.mxu1 %vm1375_vm7, %v7821_v1 }
 0x199   : > { %v1886_v60 = vshll.u32 %v1553_v31, 16  ;;  %v1890_v3 = vshrl.u32 %v1553_v31, 16  ;;  %v1047_v61 = vshrl.u32 %v810_v34, 16  ;;  %v1896_v37 = vshll.u32 %v1554_v59, 16 }
 0x19a   : > { %v741_v25 = vpop.f32.mrf.mxu0  ;;  %v1050_v51 = vshll.u32 %v810_v34, 16 }
 0x19b   : > { %v1888_v38 = vrot.slane %v1886_v60, 5  ;;  %v1892_v8 = vrot.slane %v1890_v3, 4  ;;  %v1049_v10 = vrot.slane %v1047_v61, 7  ;;  %v742_v19 = vadd.f32 %v8687_v26, %v741_v25  ;;  %v1237_v3 = vld [vmem:[#allocation2 + $0xb4] sm:$0xf] }
 0x19c   : > { %v1898_v35 = vrot.slane %v1896_v37, 5  ;;  %v8889_v61 = vld [vmem:[%s10799_s4] ss:$0 sm:$0xff] }
 0x19d   : > { %v1893_v27 = vor.u32 %v1892_v8, %v1888_v38  ;;  %v1052_v40 = vor.u32 %v1050_v51, %v1049_v10  ;;  %v1054_v4 = vrot.slane %v1049_v10, 4  ;;  %v779_v2 = vmax.f32 %v742_v19, 0.0  ;;  %7557 = vmatmul.msk.bf16.gmra.mxu0 %vm1375_vm7, %v7839_v63  ;;  %v8874_v45 = vpop.f32.mrf.mxu1  ;;  %v7822_v51 = vld [vmem:[#allocation2 + $0x30] sm:$0xff] }
 0x19e   : > { %v1889_v13 = vsel %vm8501_vm1, %v1884_v21, %v1888_v38  ;;  %v1459_v8 = vadd.f32 %v8889_v61, %v1458_v54 }
 0x19f   : > { %v1894_v11 = vrot.slane %v1893_v27, 4  ;;  %v1053_v30 = vsel %vm8357_vm10, %v1045_v23, %v1052_v40  ;;  %v1235_v5 = vsel %vm8305_vm3, %v1054_v4, %v1234_v55  ;;  %v811_v56 = vpack.c.bf16 %v779_v2, %v779_v2  ;;  %v1555_v46 = vld [vmem:[#allocation2 + $0xa8] sm:$0xf] }
 0x1a0   : > { %1233 = vst.msk [vmem:[#allocation2 + $0xac] sm:$0xf] %vm371_vm4, %v1053_v30  ;;  %v1901_v15 = vshrl.u32 %v1555_v46, 16  ;;  %v1904_v57 = vshll.u32 %v1555_v46, 16  ;;  %v1977_v16 = vunpack.c.l.b16 %v1889_v13 }
 0x1a1   : > { %v1899_v24 = vsel %vm8501_vm1, %v1894_v11, %v1898_v35  ;;  %1236 = vst [vmem:[#allocation2 + $0xb0] sm:$0x1] %v1235_v5  ;;  %v1056_v49 = vshrl.u32 %v811_v56, 16  ;;  %v1059_v34 = vshll.u32 %v811_v56, 16  ;;  %v7840_v56 = vld [vmem:[#allocation2 + $0x30] sm:$0xff] }
 0x1a2   : > { %v1978_v52 = vunpack.c.l.b16 %v1899_v24  ;;  %v743_v7 = vpop.f32.mrf.mxu0  ;;  %v1903_v1 = vrot.slane %v1901_v15, 4  ;;  %v1906_v60 = vrot.slane %v1904_v57, 5  ;;  %v1241_v15 = vld [vmem:[#allocation2 + $0xbc] sm:$0x1] }
 0x1a3   : > { %v1058_v31 = vrot.slane %v1056_v49, 7  ;;  %v744_v59 = vadd.f32 %v8687_v26, %v743_v7 }
 0x1a4   : > { %v1996_v20 = vpack.c.b16 %v1978_v52, %v1977_v16  ;;  %v1907_v63 = vor.u32 %v1906_v60, %v1903_v1 }
 0x1a5   : > { %v1061_v17 = vor.u32 %v1059_v34, %v1058_v31  ;;  %v780_v25 = vmax.f32 %v744_v59, 0.0  ;;  %v8892_v38 = vpop.f32.mrf.mxu1  ;;  %v1062_v24 = vrot.slane %v1058_v31, 4 }
 0x1a6   : > { %7309 = vmatmul.msk.bf16.gmra.mxu2 %vm1375_vm7, %v1996_v20  ;;  %v1908_v46 = vrot.slane %v1907_v63, 4  ;;  %v1461_v20 = vadd.f32 %v8889_v61, %v8874_v45 }
 0x1a7   : > { %v1238_v37 = vsel %vm8346_vm8, %v1061_v17, %v1237_v3  ;;  %v812_v22 = vpack.c.bf16 %v780_v25, %v780_v25  ;;  %v7814_v10 = vld [vmem:[#allocation2 + $0xa8] sm:$0xff]  ;;  %v7837_v25 = vld [vmem:[#allocation6 + $0x28] sm:$0xff] }
 0x1a8   : > { %v1556_v19 = vld [vmem:[#allocation2 + $0xac] sm:$0xf]  ;;  %1239 = vst [vmem:[#allocation2 + $0xb4] sm:$0xf] %v1238_v37  ;;  %v1557_v21 = vld [vmem:[#allocation2 + $0xb0] sm:$0x1]  ;;  %7290 = vmatmul.msk.bf16.gmra.mxu3 %vm1375_vm7, %v7814_v10  ;;  %7419 = vmatmul.msk.bf16.gmra.mxu1 %vm1375_vm7, %v7822_v51 }
 0x1a9   : > { %v2087_v55 = vpop.f32.mrf.mxu2  ;;  %v1910_v27 = vshll.u32 %v1556_v19, 16  ;;  %v1914_v23 = vshrl.u32 %v1556_v19, 16  ;;  %v1064_v40 = vshrl.u32 %v812_v22, 16  ;;  %v1920_v11 = vshll.u32 %v1557_v21, 16  ;;  %3815 = vmatpush.bf16.msra.mxu3 %v7837_v25 }
 0x1aa   : > { %v8897_v4 = vadd.f32 %v2087_v55, %v1459_v8  ;;  %v746_v54 = vpop.f32.mrf.mxu0  ;;  %v1067_v30 = vshll.u32 %v812_v22, 16 }
 0x1ab   : > { %v1912_v2 = vrot.slane %v1910_v27, 5  ;;  %v1916_v13 = vrot.slane %v1914_v23, 4  ;;  %v1066_v35 = vrot.slane %v1064_v40, 7  ;;  %v747_v5 = vadd.f32 %v8687_v26, %v746_v54  ;;  %v1244_v54 = vld [vmem:[#allocation2 + $0xc0] sm:$0xf] }
 0x1ac   : > { %v1922_v59 = vrot.slane %v1920_v11, 5  ;;  %v2174_v11 = vld [vmem:[#allocation2] sm:$0xe] }
 0x1ad   : > { %v1917_v57 = vor.u32 %v1916_v13, %v1912_v2  ;;  %v1069_v49 = vor.u32 %v1067_v30, %v1066_v35  ;;  %v1071_v16 = vrot.slane %v1066_v35, 4  ;;  %v781_v52 = vmax.f32 %v747_v5, 0.0  ;;  %7558 = vmatmul.msk.bf16.gmra.mxu0 %vm1375_vm7, %v7840_v56  ;;  %v8905_v7 = vpop.f32.mrf.mxu1  ;;  %v7930_v5 = vld [vmem:[#allocation2 + $0x4] sm:$0xf] }
 0x1ae   : > { %v1913_v34 = vsel %vm8501_vm1, %v1908_v46, %v1912_v2  ;;  %v2243_v56 = vrot.slane %v7930_v5, 5  ;;  %v7856_v46 = vld [vmem:[#allocation6 + $0x40] sm:$0xff] }
 0x1af   : > { %v1918_v1 = vrot.slane %v1917_v57, 4  ;;  %v1070_v31 = vsel %vm8357_vm10, %v1062_v24, %v1069_v49  ;;  %v1242_v60 = vsel %vm8305_vm3, %v1071_v16, %v1241_v15  ;;  %v813_v3 = vpack.c.bf16 %v781_v52, %v781_v52  ;;  %v1558_v17 = vld [vmem:[#allocation2 + $0xb4] sm:$0xf]  ;;  %v7823_v16 = vld [vmem:[#allocation2 + $0x3c] sm:$0xff]  ;;  %5166 = vmatpush.bf16.msra.mxu2 %v7856_v46 }
 0x1b0   : > { %1240 = vst.msk [vmem:[#allocation2 + $0xb8] sm:$0xf] %vm371_vm4, %v1070_v31  ;;  %v1979_v22 = vunpack.c.l.b16 %v1913_v34  ;;  %v1925_v10 = vshrl.u32 %v1558_v17, 16  ;;  %v1928_v51 = vshll.u32 %v1558_v17, 16  ;;  %v1464_v15 = vadd.f32 %v8889_v61, %v8892_v38 }
 0x1b1   : > { %v2089_v8 = vpop.f32.mrf.mxu2  ;;  %v1923_v37 = vsel %vm8501_vm1, %v1918_v1, %v1922_v59  ;;  %1243 = vst [vmem:[#allocation2 + $0xbc] sm:$0x1] %v1242_v60  ;;  %v1073_v45 = vshrl.u32 %v813_v3, 16  ;;  %v1076_v19 = vshll.u32 %v813_v3, 16  ;;  %v7312_v34 = vrot.slane %v2174_v11, 9 }
 0x1b2   : > { %v8916_v63 = vadd.f32 %v2089_v8, %v1461_v20  ;;  %v1980_v55 = vunpack.c.l.b16 %v1923_v37  ;;  %v748_v21 = vpop.f32.mrf.mxu0  ;;  %v1927_v2 = vrot.slane %v1925_v10, 4  ;;  %v1930_v13 = vrot.slane %v1928_v51, 5  ;;  %v8935_v8 = vld [vmem:[#allocation2 + $0x10] sm:$0xf] }
 0x1b3   : > { %v8918_v27 = vrot.slane %v1073_v45, 7  ;;  %v749_v23 = vadd.f32 %v8687_v26, %v748_v21  ;;  %v1434_v1 = vadd.f32 %v8889_v61, %v8644_v42  ;;  %v2245_v36 = vrot.slane %v2243_v56, 4  ;;  %v7855_v37 = vld [vmem:[#allocation6 + $0x38] sm:$0xff]  ;;  %v7931_v45 = vld [vmem:[#allocation2 + $0x8] sm:$0x1] }
 0x1b4   : > { %10846 = vst [vmem:[#allocation14_spill] sm:$0xff] %v8916_v63  ;;  %v1997_v40 = vpack.c.b16 %v1980_v55, %v1979_v22  ;;  %v1931_v31 = vor.u32 %v1930_v13, %v1927_v2  ;;  %v2869_v55 = vld [vmem:[#allocation2 + $0xc] sm:$0xf]  ;;  %4764 = vmatpush.bf16.msra.mxu1 %v7855_v37  ;;  %v1248_v2 = vld [vmem:[#allocation2 + $0xc8] sm:$0x1] }
 0x1b5   : > { %v1078_v35 = vor.u32 %v1076_v19, %v8918_v27  ;;  %v782_v30 = vmax.f32 %v749_v23, 0.0  ;;  %v8923_v24 = vpop.f32.mrf.mxu1  ;;  %v2246_v19 = vrot.slane %v7931_v45, 5  ;;  %v1079_v21 = vrot.slane %v8918_v27, 4 }
 0x1b6   : > { %7310 = vmatmul.msk.bf16.gmra.mxu2 %vm1375_vm7, %v1997_v40  ;;  %v1932_v13 = vrot.slane %v1931_v31, 4  ;;  %v2918_v27 = vshrl.u32 %v2869_v55, 16 }
 0x1b7   : > { %v1245_v26 = vsel %vm8346_vm8, %v1078_v35, %v1244_v54  ;;  %v814_v57 = vpack.c.bf16 %v782_v30, %v782_v30  ;;  %v7815_v49 = vld [vmem:[#allocation2 + $0xb4] sm:$0xff]  ;;  %v7841_v54 = vld [vmem:[#allocation2 + $0x3c] sm:$0xff]  ;;  %v2927_v35 = vshll.u32 %v8935_v8, 16  ;;  %v2931_v30 = vshrl.u32 %v8935_v8, 16 }
 0x1b8   : > { %v1559_v52 = vld [vmem:[#allocation2 + $0xb8] sm:$0xf]  ;;  %1246 = vst [vmem:[#allocation2 + $0xc0] sm:$0xf] %v1245_v26  ;;  %v1560_v20 = vld [vmem:[#allocation2 + $0xbc] sm:$0x1]  ;;  %7291 = vmatmul.msk.bf16.gmra.mxu3 %vm1375_vm7, %v7815_v49  ;;  %7420 = vmatmul.msk.bf16.gmra.mxu1 %vm1375_vm7, %v7823_v16 }
 0x1b9   : > { %v2092_v59 = vpop.f32.mrf.mxu2  ;;  %v1934_v60 = vshll.u32 %v1559_v52, 16  ;;  %v1938_v3 = vshrl.u32 %v1559_v52, 16  ;;  %v1081_v17 = vshrl.u32 %v814_v57, 16  ;;  %v1084_v38 = vshll.u32 %v814_v57, 16 }
 0x1ba   : > { %v8931_v25 = vadd.f32 %v2092_v59, %v1464_v15  ;;  %v2062_v22 = vpop.f32.mrf.mxu0  ;;  %v1944_v51 = vshll.u32 %v1560_v20, 16  ;;  %v2244_v15 = vsel %vm8391_vm13, %v7312_v34, %v2243_v56  ;;  %v2247_v52 = vsel %vm8391_vm13, %v2245_v36, %v2246_v19 }
 0x1bb   : > { %v1936_v42 = vrot.slane %v1934_v60, 5  ;;  %v1940_v10 = vrot.slane %v1938_v3, 4  ;;  %v1083_v23 = vrot.slane %v1081_v17, 7  ;;  %v8938_v40 = vadd.f32 %v2062_v22, %v1434_v1  ;;  %v8962_v22 = vld [vmem:[#allocation2 + $0x14] sm:$0x1] }
 0x1bc   : > { %10847 = vst [vmem:[#allocation15_spill] sm:$0xff] %v8931_v25  ;;  %v1946_v16 = vrot.slane %v1944_v51, 5  ;;  %v1466_v1 = vadd.f32 %v8889_v61, %v8905_v7  ;;  %v2921_v56 = vshll.u32 %v2869_v55, 16  ;;  %v2356_v60 = vunpack.c.l.b16 %v2244_v15  ;;  %v2872_v15 = vld [vmem:[#allocation2 + $0x18] sm:$0xf] }
 0x1bd   : > { %v1941_v11 = vor.u32 %v1940_v10, %v1936_v42  ;;  %v1086_v5 = vor.u32 %v1084_v38, %v1083_v23  ;;  %v1088_v46 = vrot.slane %v1083_v23, 4  ;;  %7559 = vmatmul.msk.bf16.gmra.mxu0 %vm1375_vm7, %v7841_v54  ;;  %v1470_v26 = vpop.f32.mrf.mxu1  ;;  %v1937_v57 = vsel %vm8501_vm1, %v1932_v13, %v1936_v42  ;;  %v7824_v23 = vld [vmem:[#allocation2 + $0x48] sm:$0xff] }
 0x1be   : > { %v2929_v3 = vrot.slane %v2927_v35, 5  ;;  %v2933_v17 = vrot.slane %v2931_v30, 4  ;;  %v1981_v7 = vunpack.c.l.b16 %v1937_v57  ;;  %v2357_v50 = vunpack.c.l.b16 %v2247_v52 }
 0x1bf   : > { %v1942_v49 = vrot.slane %v1941_v11, 4  ;;  %v1087_v59 = vsel %vm8357_vm10, %v1079_v21, %v1086_v5  ;;  %v1249_v20 = vsel %vm8305_vm3, %v1088_v46, %v1248_v2  ;;  %v2920_v42 = vrot.slane %v2918_v27, 4  ;;  %v2873_v2 = vld [vmem:[#allocation2 + $0x1c] sm:$0xf] }
 0x1c0   : > { %1247 = vst.msk [vmem:[#allocation2 + $0xc4] sm:$0xf] %vm371_vm4, %v1087_v59  ;;  %v2923_v10 = vrot.slane %v2921_v56, 5  ;;  %v2934_v51 = vor.u32 %v2933_v17, %v2929_v3  ;;  %v2388_v45 = vpack.c.b16 %v2357_v50, %v2356_v60  ;;  %v2937_v55 = vshll.u32 %v8962_v22, 16 }
 0x1c1   : > { %v2094_v34 = vpop.f32.mrf.mxu2  ;;  %v1947_v31 = vsel %vm8501_vm1, %v1942_v49, %v1946_v16  ;;  %1250 = vst [vmem:[#allocation2 + $0xc8] sm:$0x1] %v1249_v20  ;;  %v1469_v21 = vadd.f32 %v8889_v61, %v8923_v24  ;;  %v1439_v35 = vadd.f32 %v8889_v61, %v8719_v12  ;;  %v2951_v27 = vshll.u32 %v2873_v2, 16  ;;  %v7842_v49 = vld [vmem:[#allocation2 + $0x48] sm:$0xff] }
 0x1c2   : > { %v8958_v38 = vadd.f32 %v2094_v34, %v1466_v1  ;;  %v1982_v36 = vunpack.c.l.b16 %v1947_v31  ;;  %v8960_v37 = vpop.f32.mrf.mxu0  ;;  %v2924_v54 = vor.u32 %v2923_v10, %v2920_v42  ;;  %v2935_v11 = vrot.slane %v2934_v51, 4  ;;  %v2874_v42 = vld [vmem:[#allocation2 + $0x20] sm:$0x1] }
 0x1c3   : > { %v2939_v46 = vrot.slane %v2937_v55, 5  ;;  %v2955_v57 = vshrl.u32 %v2873_v2, 16  ;;  %v2942_v1 = vshrl.u32 %v2872_v15, 16  ;;  %v2945_v59 = vshll.u32 %v2872_v15, 16 }
 0x1c4   : > { %10848 = vst [vmem:[#allocation16_spill] sm:$0xff] %v8958_v38  ;;  %v1998_v9 = vpack.c.b16 %v1982_v36, %v1981_v7  ;;  %v2925_v16 = vrot.slane %v2924_v54, 4  ;;  %v8981_v56 = vrot.slane %v2951_v27, 5  ;;  %v1471_v31 = vadd.f32 %v8889_v61, %v1470_v26  ;;  %v3527_v26 = vld [vmem:[#allocation2 + $0xc] sm:$0xe] }
 0x1c5   : > { %v1473_v19 = vpop.f32.mrf.mxu1  ;;  %v2940_v52 = vsel %vm8501_vm1, %v2935_v11, %v2939_v46  ;;  %v2957_v34 = vrot.slane %v2955_v57, 4  ;;  %v3593_v36 = vrot.slane %v8935_v8, 5  ;;  %v1441_v50 = vadd.f32 %v8889_v61, %v8739_v29  ;;  %v2876_v46 = vld [vmem:[#allocation2 + $0x28] sm:$0xf]  ;;  %v8997_v57 = vld [vmem:[#allocation2 + $0x1c] sm:$0xf] }
 0x1c6   : > { %7311 = vmatmul.msk.bf16.gmra.mxu2 %vm1375_vm7, %v1998_v9  ;;  %v2930_v12 = vsel %vm8501_vm1, %v2925_v16, %v2929_v3  ;;  %v3305_v60 = vunpack.c.l.b16 %v2940_v52  ;;  %v2944_v3 = vrot.slane %v2942_v1, 4  ;;  %v2947_v10 = vrot.slane %v2945_v59, 5  ;;  %v4878_v52 = vld [vmem:[#allocation2 + $0x18] sm:$0xe] }
 0x1c7   : > { %v3304_v7 = vunpack.c.l.b16 %v2930_v12  ;;  %v2961_v54 = vshll.u32 %v2874_v42, 16  ;;  %v3596_v2 = vrot.slane %v8962_v22, 5  ;;  %v7452_v11 = vrot.slane %v3527_v26, 9 }
 0x1c8   : > { %7332 = vmatmul.msk.bf16.vlgmr.msrb.gmra.mxu3 %vm1375_vm7, %v2388_v45  ;;  %7421 = vmatmul.msk.bf16.gmra.mxu1 %vm1375_vm7, %v7824_v23  ;;  %v2958_v45 = vor.u32 %v2957_v34, %v8981_v56  ;;  %v3595_v23 = vrot.slane %v3593_v36, 4  ;;  %v2948_v8 = vor.u32 %v2947_v10, %v2944_v3  ;;  %v1444_v22 = vadd.f32 %v8889_v61, %v8768_v32  ;;  %v2875_v3 = vld [vmem:[#allocation2 + $0x24] sm:$0xf] }
 0x1c9   : > { %v2097_v13 = vpop.f32.mrf.mxu2  ;;  %v2963_v27 = vrot.slane %v2961_v54, 5  ;;  %v2975_v34 = vshll.u32 %v2876_v46, 16  ;;  %v4944_v42 = vrot.slane %v8997_v57, 5  ;;  %vm5962_vm3 = vcmask 1042434  }
 0x1ca   : > { %v8970_v30 = vadd.f32 %v2097_v13, %v1469_v21  ;;  %v2067_v5 = vpop.f32.mrf.mxu0  ;;  %v3336_v21 = vpack.c.b16 %v3305_v60, %v3304_v7  ;;  %v2959_v13 = vrot.slane %v2958_v45, 4  ;;  %v3597_v16 = vsel %vm8391_vm13, %v3595_v23, %v3596_v2  ;;  %v4222_v60 = vld [vmem:[#allocation2 + $0x20] sm:$0x1] }
 0x1cb   : > { %v8974_v24 = vadd.f32 %v2067_v5, %v1439_v35  ;;  %v1474_v35 = vadd.f32 %v8889_v61, %v1473_v19  ;;  %v7825_v5 = vld [vmem:[#allocation2 + $0x54] sm:$0xff]  ;;  %v2949_v19 = vrot.slane %v2948_v8, 4  ;;  %v3707_v32 = vunpack.c.l.b16 %v3597_v16 }
 0x1cc   : > { %10849 = vst [vmem:[#allocation17_spill] sm:$0xff] %v8970_v30  ;;  %v2964_v59 = vsel %vm8501_vm1, %v2959_v13, %v2963_v27  ;;  %v4946_v45 = vrot.slane %v4944_v42, 4  ;;  %v9025_v54 = vrot.slane %v2975_v34, 5  ;;  %v2966_v13 = vshrl.u32 %v2875_v3, 16 }
 0x1cd   : > { %7560 = vmatmul.msk.bf16.gmra.mxu0 %vm1375_vm7, %v7842_v49  ;;  %v1475_v20 = vpop.f32.mrf.mxu1  ;;  %v3594_v49 = vsel %vm8391_vm13, %v7452_v11, %v3593_v36  ;;  %v7843_v36 = vld [vmem:[#allocation2 + $0x54] sm:$0xff]  ;;  %v3307_v23 = vunpack.c.l.b16 %v2964_v59  ;;  %v9028_v11 = vld [vmem:[#allocation2 + $0x28] sm:$0xf]  ;;  %v1446_v16 = vadd.f32 %v8889_v61, %v8788_v18  ;;  %v4225_v59 = vld [vmem:[#allocation2 + $0x2c] sm:$0x1]  ;;  %vm5965_vm4 = vcmask 1043459  }
 0x1ce   : > { %v1476_v2 = vadd.f32 %v8889_v61, %v1475_v20  ;;  %vm5974_vm8 = vcmask 1046534   ;;  %vm7001_vm10 = vcmask 519168  }
 0x1d1   : > { %v2099_v17 = vpop.f32.mrf.mxu2 }
 0x1d2   : > { %v8987_v9 = vadd.f32 %v2099_v17, %v1471_v31  ;;  %v2069_v51 = vpop.f32.mrf.mxu0  ;;  %v2979_v31 = vshrl.u32 %v2876_v46, 16  ;;  %v3706_v17 = vunpack.c.l.b16 %v3594_v49  ;;  %v4879_v49 = vld [vmem:[#allocation2 + $0x24] sm:$0xe] }
 0x1d3   : > { %v8990_v55 = vadd.f32 %v2069_v51, %v1441_v50  ;;  %v7592_v50 = vrot.slane %v4878_v52, 9 }
 0x1d4   : > { %10850 = vst [vmem:[#allocation18_spill] sm:$0xff] %v8987_v9  ;;  %v9019_v10 = vpack.c.b16 %v3707_v32, %v3706_v17  ;;  %v2981_v8 = vrot.slane %v2979_v31, 4  ;;  %v4951_v31 = vrot.slane %v9028_v11, 5  ;;  %v2968_v17 = vrot.slane %v2966_v13, 4 }
 0x1d5   : > { %v8994_v29 = vpop.f32.mrf.mxu1  ;;  %v4945_v51 = vsel %vm8391_vm13, %v7592_v50, %v4944_v42  ;;  %v7593_v32 = vrot.slane %v4879_v49, 9 }
 0x1d6   : > { %7436 = vmatmul.msk.bf16.vlgmr.msrb.gmra.mxu2 %vm1375_vm7, %v3336_v21  ;;  %10852 = vst [vmem:[#allocation20_spill] sm:$0xff] %v9019_v10  ;;  %v4947_v21 = vrot.slane %v4222_v60, 5  ;;  %v4953_v42 = vrot.slane %v4951_v31, 4 }
 0x1d7   : > { %v4952_v18 = vsel %vm8391_vm13, %v7593_v32, %v4951_v31  ;;  %v2878_v31 = vld [vmem:[#allocation2 + $0x30] sm:$0xf] }
 0x1d8   : > { %7333 = vmatmul.msk.bf16.gmra.mxu3 %vm1375_vm7, %v8407_v62  ;;  %7422 = vmatmul.msk.bf16.gmra.mxu1 %vm1375_vm7, %v7825_v5  ;;  %v2954_v62 = vsel %vm8501_vm1, %v2949_v19, %v8981_v56  ;;  %v2969_v56 = vshll.u32 %v2875_v3, 16 }
 0x1d9   : > { %v2102_v15 = vpop.f32.mrf.mxu2  ;;  %v3306_v46 = vunpack.c.l.b16 %v2954_v62  ;;  %v4954_v62 = vrot.slane %v4225_v59, 5 }
 0x1da   : > { %v9005_v12 = vadd.f32 %v2102_v15, %v1474_v35  ;;  %v2072_v1 = vpop.f32.mrf.mxu0  ;;  %v4948_v35 = vsel %vm8391_vm13, %v4946_v45, %v4947_v21  ;;  %v5057_v15 = vunpack.c.l.b16 %v4945_v51  ;;  %v1479_v45 = vadd.f32 %v8889_v61, %v8994_v29  ;;  %v7826_v21 = vld [vmem:[#allocation2 + $0x60] sm:$0xff] }
 0x1db   : > { %v9012_v7 = vadd.f32 %v2072_v1, %v1444_v22  ;;  %v5058_v27 = vunpack.c.l.b16 %v4948_v35  ;;  %v2877_v22 = vld [vmem:[#allocation2 + $0x2c] sm:$0x1]  ;;  %v3337_v20 = vpack.c.b16 %v3307_v23, %v3306_v46  ;;  %v2982_v1 = vor.u32 %v2981_v8, %v9025_v54  ;;  %v2879_v8 = vld [vmem:[#allocation2 + $0x34] sm:$0xf] }
 0x1dc   : > { %10851 = vst [vmem:[#allocation19_spill] sm:$0xff] %v9005_v12  ;;  %v2985_v50 = vshll.u32 %v2877_v22, 16  ;;  %v5059_v35 = vunpack.c.l.b16 %v4952_v18  ;;  %v1449_v46 = vadd.f32 %v8889_v61, %v8808_v14  ;;  %v2999_v49 = vshll.u32 %v2879_v8, 16  ;;  %v9058_v22 = vld [vmem:[#allocation2 + $0x34] sm:$0xf]  ;;  %v7844_v14 = vld [vmem:[#allocation2 + $0x60] sm:$0xff] }
 0x1dd   : > { %7561 = vmatmul.msk.bf16.gmra.mxu0 %vm1375_vm7, %v7843_v36  ;;  %v9023_v26 = vpop.f32.mrf.mxu1  ;;  %v9037_v34 = vpack.c.b16 %v5058_v27, %v5057_v15  ;;  %v2971_v36 = vrot.slane %v2969_v56, 5  ;;  %v2983_v51 = vrot.slane %v2982_v1, 4  ;;  %v2990_v18 = vshrl.u32 %v2878_v31, 16 }
 0x1de   : > { %v2987_v56 = vrot.slane %v2985_v50, 5  ;;  %v4958_v50 = vrot.slane %v9058_v22, 5 }
 0x1df   : > { %10854 = vst [vmem:[#allocation22_spill] sm:$0xff] %v9037_v34  ;;  %v2972_v23 = vor.u32 %v2971_v36, %v2968_v17  ;;  %v4228_v17 = vld [vmem:[#allocation2 + $0x38] sm:$0x1]  ;;  %v2889_v34 = vld [vmem:[#allocation2 + $0x5c] sm:$0x1] }
 0x1e0   : > { %v2988_v27 = vsel %vm8501_vm1, %v2983_v51, %v2987_v56  ;;  %v3001_v51 = vrot.slane %v2999_v49, 5 }
 0x1e1   : > { %v2104_v5 = vpop.f32.mrf.mxu2  ;;  %v2973_v59 = vrot.slane %v2972_v23, 4  ;;  %v3309_v36 = vunpack.c.l.b16 %v2988_v27 }
 0x1e2   : > { %v9034_v52 = vadd.f32 %v2104_v5, %v1476_v2  ;;  %v2074_v19 = vpop.f32.mrf.mxu0  ;;  %v4955_v2 = vsel %vm8391_vm13, %v4953_v42, %v4954_v62  ;;  %v2993_v62 = vshll.u32 %v2878_v31, 16 }
 0x1e3   : > { %v9040_v60 = vadd.f32 %v2074_v19, %v1446_v16  ;;  %v5060_v5 = vunpack.c.l.b16 %v4955_v2  ;;  %v3003_v16 = vshrl.u32 %v2879_v8, 16  ;;  %v4960_v8 = vrot.slane %v4958_v50, 4 }
 0x1e4   : > { %10853 = vst [vmem:[#allocation21_spill] sm:$0xff] %v9034_v52  ;;  %v4961_v2 = vrot.slane %v4228_v17, 5  ;;  %v2892_v52 = vld [vmem:[#allocation2 + $0x68] sm:$0x1] }
 0x1e5   : > { %v1483_v3 = vpop.f32.mrf.mxu1  ;;  %v9060_v19 = vpack.c.b16 %v5060_v5, %v5059_v35  ;;  %v2880_v5 = vld [vmem:[#allocation2 + $0x38] sm:$0x1] }
 0x1e6   : > { %7437 = vmatmul.msk.bf16.gmra.mxu2 %vm1375_vm7, %v3337_v20  ;;  %v4880_v20 = vld [vmem:[#allocation2 + $0x30] sm:$0xe]  ;;  %v3009_v31 = vshll.u32 %v2880_v5, 16 }
 0x1e7   : > { %10856 = vst [vmem:[#allocation24_spill] sm:$0xff] %v9060_v19  ;;  %v7594_v32 = vrot.slane %v4880_v20, 9 }
 0x1e8   : > { %7334 = vmatmul.msk.bf16.gmra.mxu3 %vm1375_vm7, %v8444_v0  ;;  %7423 = vmatmul.msk.bf16.gmra.mxu1 %vm1375_vm7, %v7826_v21  ;;  %v2978_v0 = vsel %vm8501_vm1, %v2973_v59, %v9025_v54  ;;  %v1481_v21 = vadd.f32 %v8889_v61, %v9023_v26  ;;  %v1451_v54 = vadd.f32 %v8889_v61, %v8824_v53  ;;  %v2995_v59 = vrot.slane %v2993_v62, 5 }
 0x1e9   : > { %v2107_v13 = vpop.f32.mrf.mxu2  ;;  %v4959_v23 = vsel %vm8391_vm13, %v7594_v32, %v4958_v50  ;;  %v3308_v35 = vunpack.c.l.b16 %v2978_v0  ;;  %v1484_v32 = vadd.f32 %v8889_v61, %v1483_v3  ;;  %v7827_v50 = vld [vmem:[#allocation2 + $0x6c] sm:$0xff] }
 0x1ea   : > { %v9051_v15 = vadd.f32 %v2107_v13, %v1479_v45  ;;  %v2077_v29 = vpop.f32.mrf.mxu0  ;;  %v3005_v45 = vrot.slane %v3003_v16, 4  ;;  %v5061_v49 = vunpack.c.l.b16 %v4959_v23 }
 0x1eb   : > { %v9062_v1 = vadd.f32 %v2077_v29, %v1449_v46  ;;  %v4962_v46 = vsel %vm8391_vm13, %v4960_v8, %v4961_v2  ;;  %v3338_v20 = vpack.c.b16 %v3309_v36, %v3308_v35  ;;  %v3011_v8 = vrot.slane %v3009_v31, 5  ;;  %v4881_v35 = vld [vmem:[#allocation2 + $0x3c] sm:$0xe] }
 0x1ec   : > { %10855 = vst [vmem:[#allocation23_spill] sm:$0xff] %v9051_v15  ;;  %v3006_v27 = vor.u32 %v3005_v45, %v3001_v51  ;;  %v5062_v26 = vunpack.c.l.b16 %v4962_v46  ;;  %v2882_v45 = vld [vmem:[#allocation2 + $0x40] sm:$0xf]  ;;  %v1454_v36 = vadd.f32 %v8889_v61, %v8841_v47  ;;  %v7845_v46 = vld [vmem:[#allocation2 + $0x6c] sm:$0xff] }
 0x1ed   : > { %7562 = vmatmul.msk.bf16.gmra.mxu0 %vm1375_vm7, %v7844_v14  ;;  %v1485_v42 = vpop.f32.mrf.mxu1  ;;  %v2992_v14 = vrot.slane %v2990_v18, 4  ;;  %v3023_v3 = vshll.u32 %v2882_v45, 16 }
 0x1ee   : > { %v9081_v17 = vpack.c.b16 %v5062_v26, %v5061_v49  ;;  %v3007_v0 = vrot.slane %v3006_v27, 4  ;;  %v9100_v49 = vld [vmem:[#allocation2 + $0x44] sm:$0x1] }
 0x1f0   : > { %10858 = vst [vmem:[#allocation26_spill] sm:$0xff] %v9081_v17  ;;  %v3012_v2 = vsel %vm8501_vm1, %v3007_v0, %v3011_v8  ;;  %v4968_v8 = vrot.slane %v9100_v49, 5 }
 0x1f1   : > { %v2109_v13 = vpop.f32.mrf.mxu2  ;;  %v3311_v26 = vunpack.c.l.b16 %v3012_v2 }
 0x1f2   : > { %v9075_v56 = vadd.f32 %v2109_v13, %v1481_v21  ;;  %v2079_v29 = vpop.f32.mrf.mxu0  ;;  %v2996_v21 = vor.u32 %v2995_v59, %v2992_v14  ;;  %v3027_v13 = vshrl.u32 %v2882_v45, 16 }
 0x1f3   : > { %v9079_v16 = vadd.f32 %v2079_v29, %v1451_v54  ;;  %v9096_v54 = vld [vmem:[#allocation2 + $0x40] sm:$0xf]  ;;  %v2881_v29 = vld [vmem:[#allocation2 + $0x3c] sm:$0xf] }
 0x1f4   : > { %10857 = vst [vmem:[#allocation25_spill] sm:$0xff] %v9075_v56  ;;  %v2997_v47 = vrot.slane %v2996_v21, 4  ;;  %v4965_v14 = vrot.slane %v9096_v54, 5  ;;  %v3014_v31 = vshrl.u32 %v2881_v29, 16  ;;  %v3017_v0 = vshll.u32 %v2881_v29, 16 }
 0x1f5   : > { %v9084_v53 = vpop.f32.mrf.mxu1  ;;  %v1486_v21 = vadd.f32 %v8889_v61, %v1485_v42 }
 0x1f6   : > { %7438 = vmatmul.msk.bf16.gmra.mxu2 %vm1375_vm7, %v3338_v20  ;;  %v7595_v20 = vrot.slane %v4881_v35, 9 }
 0x1f8   : > { %7335 = vmatmul.msk.bf16.gmra.mxu3 %vm1375_vm7, %v8522_v28  ;;  %7424 = vmatmul.msk.bf16.gmra.mxu1 %vm1375_vm7, %v7827_v50  ;;  %v3002_v28 = vsel %vm8501_vm1, %v2997_v47, %v3001_v51  ;;  %v3029_v50 = vrot.slane %v3027_v13, 4  ;;  %v4966_v45 = vsel %vm8391_vm13, %v7595_v20, %v4965_v14  ;;  %v3016_v20 = vrot.slane %v3014_v31, 4 }
 0x1f9   : > { %v2112_v23 = vpop.f32.mrf.mxu2  ;;  %v3310_v51 = vunpack.c.l.b16 %v3002_v28  ;;  %v5063_v42 = vunpack.c.l.b16 %v4966_v45  ;;  %v2885_v45 = vld [vmem:[#allocation2 + $0x4c] sm:$0xf] }
 0x1fa   : > { %v9089_v18 = vadd.f32 %v2112_v23, %v1484_v32  ;;  %v2082_v62 = vpop.f32.mrf.mxu0  ;;  %v3025_v32 = vrot.slane %v3023_v3, 5  ;;  %v4967_v23 = vrot.slane %v4965_v14, 4  ;;  %v3019_v14 = vrot.slane %v3017_v0, 5  ;;  %v2884_v0 = vld [vmem:[#allocation2 + $0x48] sm:$0xf] }
 0x1fb   : > { %v9098_v5 = vadd.f32 %v2082_v62, %v1454_v36  ;;  %v1488_v27 = vpop.f32.mrf.mxu3  ;;  %v1456_v62 = vadd.f32 %v8889_v61, %v8851_v6  ;;  %v3339_v13 = vpack.c.b16 %v3311_v26, %v3310_v51 }
 0x1fc   : > { %10859 = vst [vmem:[#allocation27_spill] sm:$0xff] %v9089_v18  ;;  %v4969_v35 = vsel %vm8391_vm13, %v4967_v23, %v4968_v8  ;;  %v3030_v17 = vor.u32 %v3029_v50, %v3025_v32  ;;  %v1489_v23 = vadd.f32 %v8889_v61, %v1488_v27  ;;  %v7828_v8 = vld [vmem:[#allocation2 + $0x78] sm:$0xff]  ;;  %v3020_v26 = vor.u32 %v3019_v14, %v3016_v20 }
 0x1fd   : > { %7563 = vmatmul.msk.bf16.gmra.mxu0 %vm1375_vm7, %v7845_v46  ;;  %v9106_v59 = vpop.f32.mrf.mxu1  ;;  %v2883_v46 = vld [vmem:[#allocation2 + $0x44] sm:$0x1]  ;;  %v5064_v47 = vunpack.c.l.b16 %v4969_v35  ;;  %v3047_v50 = vshll.u32 %v2885_v45, 16  ;;  %v3051_v35 = vshrl.u32 %v2885_v45, 16  ;;  %v7846_v27 = vld [vmem:[#allocation2 + $0x78] sm:$0xff]  ;;  %v3038_v20 = vshrl.u32 %v2884_v0, 16 }
 0x1fe   : > { %v3033_v6 = vshll.u32 %v2883_v46, 16  ;;  %v3021_v46 = vrot.slane %v3020_v26, 4  ;;  %v3041_v45 = vshll.u32 %v2884_v0, 16 }
 0x1ff   : > { %v9120_v28 = vpack.c.b16 %v5064_v47, %v5063_v42  ;;  %v9135_v47 = vld [vmem:[#allocation2 + $0x50] sm:$0x1]  ;;  %v3049_v26 = vrot.slane %v3047_v50, 5 }
 0x200   : > { %v3035_v31 = vrot.slane %v3033_v6, 5  ;;  %v3043_v19 = vrot.slane %v3041_v45, 5 }
 0x201   : > { %v2114_v36 = vpop.f32.mrf.mxu2  ;;  %10861 = vst [vmem:[#allocation29_spill] sm:$0xff] %v9120_v28 }
 0x202   : > { %v9114_v2 = vadd.f32 %v2114_v36, %v1486_v21  ;;  %v2084_v3 = vpop.f32.mrf.mxu0  ;;  %v3031_v36 = vrot.slane %v3030_v17, 4 }
 0x203   : > { %v9118_v29 = vadd.f32 %v2084_v3, %v1456_v62  ;;  %v1490_v18 = vpop.f32.mrf.mxu3  ;;  %v9131_v3 = vld [vmem:[#allocation2 + $0x4c] sm:$0xf] }
 0x204   : > { %10860 = vst [vmem:[#allocation28_spill] sm:$0xff] %v9114_v2  ;;  %v3036_v17 = vsel %vm8501_vm1, %v3031_v36, %v3035_v31  ;;  %v4972_v6 = vrot.slane %v9131_v3, 5  ;;  %v1491_v36 = vadd.f32 %v8889_v61, %v1490_v18  ;;  %v2886_v2 = vld [vmem:[#allocation2 + $0x50] sm:$0x1] }
 0x205   : > { %v9123_v21 = vpop.f32.mrf.mxu1 }
 0x206   : > { %7439 = vmatmul.msk.bf16.gmra.mxu2 %vm1375_vm7, %v3339_v13  ;;  %v4882_v13 = vld [vmem:[#allocation2 + $0x48] sm:$0xe]  ;;  %v4974_v28 = vrot.slane %v4972_v6, 4 }
 0x207   : > { %v7596_v14 = vrot.slane %v4882_v13, 9 }
 0x208   : > { %7336 = vmatmul.msk.bf16.gmra.mxu3 %vm1375_vm7, %v8622_v58  ;;  %7425 = vmatmul.msk.bf16.gmra.mxu1 %vm1375_vm7, %v7828_v8  ;;  %v3026_v58 = vsel %vm8501_vm1, %v3021_v46, %v3025_v32  ;;  %v3313_v8 = vunpack.c.l.b16 %v3036_v17 }
 0x209   : > { %v2117_v51 = vpop.f32.mrf.mxu2  ;;  %v4973_v31 = vsel %vm8391_vm13, %v7596_v14, %v4972_v6  ;;  %v3312_v13 = vunpack.c.l.b16 %v3026_v58  ;;  %v3057_v14 = vshll.u32 %v2886_v2, 16  ;;  %v7829_v58 = vld [vmem:[#allocation2 + $0x84] sm:$0xff] }
 0x20a   : > { %v9126_v62 = vadd.f32 %v2117_v51, %v1489_v23  ;;  %v3053_v51 = vrot.slane %v3051_v35, 4  ;;  %v5065_v17 = vunpack.c.l.b16 %v4973_v31  ;;  %v3040_v35 = vrot.slane %v3038_v20, 4  ;;  %v2888_v31 = vld [vmem:[#allocation2 + $0x58] sm:$0xf] }
 0x20b   : > { %v1493_v42 = vpop.f32.mrf.mxu3  ;;  %v3340_v50 = vpack.c.b16 %v3313_v8, %v3312_v13  ;;  %v3059_v20 = vrot.slane %v3057_v14, 5  ;;  %v7847_v8 = vld [vmem:[#allocation2 + $0x84] sm:$0xff]  ;;  %v3075_v13 = vshrl.u32 %v2888_v31, 16 }
 0x20c   : > { %10862 = vst [vmem:[#allocation30_spill] sm:$0xff] %v9126_v62  ;;  %v3054_v18 = vor.u32 %v3053_v51, %v3049_v26  ;;  %v2887_v51 = vld [vmem:[#allocation2 + $0x54] sm:$0xf] }
 0x20d   : > { %7564 = vmatmul.msk.bf16.gmra.mxu0 %vm1375_vm7, %v7846_v27  ;;  %v9141_v23 = vpop.f32.mrf.mxu1  ;;  %v4975_v27 = vrot.slane %v9135_v47, 5  ;;  %v3062_v14 = vshrl.u32 %v2887_v51, 16 }
 0x20f   : > { %v4976_v46 = vsel %vm8391_vm13, %v4974_v28, %v4975_v27  ;;  %v3055_v28 = vrot.slane %v3054_v18, 4 }
 0x210   : > { %v5066_v0 = vunpack.c.l.b16 %v4976_v46 }
 0x211   : > { %v2119_v62 = vpop.f32.mrf.mxu2  ;;  %v3060_v2 = vsel %vm8501_vm1, %v3055_v28, %v3059_v20 }
 0x212   : > { %v9147_v32 = vadd.f32 %v2119_v62, %v1491_v36  ;;  %v9151_v15 = vpack.c.b16 %v5066_v0, %v5065_v17  ;;  %v1494_v62 = vadd.f32 %v8889_v61, %v1493_v42  ;;  %v3044_v36 = vor.u32 %v3043_v19, %v3040_v35  ;;  %v4236_v17 = vld [vmem:[#allocation2 + $0x58] sm:$0xf]  ;;  %v4883_v0 = vld [vmem:[#allocation2 + $0x54] sm:$0xe] }
 0x213   : > { %v1495_v56 = vpop.f32.mrf.mxu3  ;;  %v3071_v42 = vshll.u32 %v2888_v31, 16  ;;  %v3315_v18 = vunpack.c.l.b16 %v3060_v2  ;;  %v7597_v31 = vrot.slane %v4883_v0, 9 }
 0x214   : > { %10863 = vst [vmem:[#allocation31_spill] sm:$0xff] %v9147_v32  ;;  %v3045_v45 = vrot.slane %v3044_v36, 4  ;;  %v1496_v36 = vadd.f32 %v8889_v61, %v1495_v56 }
 0x215   : > { %10864 = vst [vmem:[#allocation32_spill] sm:$0xff] %v9151_v15  ;;  %v9154_v6 = vpop.f32.mrf.mxu1  ;;  %v3073_v28 = vrot.slane %v3071_v42, 5 }
 0x216   : > { %7440 = vmatmul.msk.bf16.gmra.mxu2 %vm1375_vm7, %v3340_v50  ;;  %v3050_v50 = vsel %vm8501_vm1, %v3045_v45, %v3049_v26 }
 0x217   : > { %v3314_v15 = vunpack.c.l.b16 %v3050_v50  ;;  %v3081_v50 = vshll.u32 %v2889_v34, 16  ;;  %v2890_v34 = vld [vmem:[#allocation2 + $0x60] sm:$0xf] }
 0x218   : > { %7337 = vmatmul.msk.bf16.gmra.mxu3 %vm1375_vm7, %v8710_v33  ;;  %7426 = vmatmul.msk.bf16.gmra.mxu1 %vm1375_vm7, %v7829_v58  ;;  %v4237_v33 = vld [vmem:[#allocation2 + $0x5c] sm:$0x1]  ;;  %v4979_v58 = vrot.slane %v4236_v17, 5 }
 0x219   : > { %v2122_v27 = vpop.f32.mrf.mxu2  ;;  %v4982_v32 = vrot.slane %v4237_v33, 5  ;;  %v3341_v45 = vpack.c.b16 %v3315_v18, %v3314_v15  ;;  %v7830_v15 = vld [vmem:[#allocation2 + $0x90] sm:$0xff] }
 0x21a   : > { %v9157_v46 = vadd.f32 %v2122_v27, %v1494_v62  ;;  %v3065_v62 = vshll.u32 %v2887_v51, 16  ;;  %v3077_v27 = vrot.slane %v3075_v13, 4  ;;  %v4980_v26 = vsel %vm8391_vm13, %v7597_v31, %v4979_v58 }
 0x21b   : > { %v1498_v19 = vpop.f32.mrf.mxu3  ;;  %v3064_v51 = vrot.slane %v3062_v14, 4  ;;  %v5067_v0 = vunpack.c.l.b16 %v4980_v26  ;;  %v3083_v14 = vrot.slane %v3081_v50, 5 }
 0x21c   : > { %10865 = vst [vmem:[#allocation33_spill] sm:$0xff] %v9157_v46  ;;  %v4981_v46 = vrot.slane %v4979_v58, 4  ;;  %v3067_v17 = vrot.slane %v3065_v62, 5  ;;  %v3078_v56 = vor.u32 %v3077_v27, %v3073_v28  ;;  %v1499_v58 = vadd.f32 %v8889_v61, %v1498_v19  ;;  %v7848_v62 = vld [vmem:[#allocation2 + $0x90] sm:$0xff] }
 0x21d   : > { %7565 = vmatmul.msk.bf16.gmra.mxu0 %vm1375_vm7, %v7847_v8  ;;  %v9167_v35 = vpop.f32.mrf.mxu1 }
 0x21e   : > { %v4983_v2 = vsel %vm8391_vm13, %v4981_v46, %v4982_v32  ;;  %v3068_v18 = vor.u32 %v3067_v17, %v3064_v51  ;;  %v3079_v31 = vrot.slane %v3078_v56, 4  ;;  %v2891_v32 = vld [vmem:[#allocation2 + $0x64] sm:$0xf]  ;;  %v4884_v17 = vld [vmem:[#allocation2 + $0x60] sm:$0xe] }
 0x21f   : > { %v5068_v42 = vunpack.c.l.b16 %v4983_v2  ;;  %v3095_v19 = vshll.u32 %v2891_v32, 16  ;;  %v4239_v51 = vld [vmem:[#allocation2 + $0x64] sm:$0xf] }
 0x220   : > { %v3069_v27 = vrot.slane %v3068_v18, 4  ;;  %v3084_v26 = vsel %vm8501_vm1, %v3079_v31, %v3083_v14 }
 0x221   : > { %v2124_v20 = vpop.f32.mrf.mxu2  ;;  %v3097_v31 = vrot.slane %v3095_v19, 5 }
 0x222   : > { %v9170_v8 = vadd.f32 %v2124_v20, %v1496_v36  ;;  %v9179_v36 = vpack.c.b16 %v5068_v42, %v5067_v0  ;;  %v3074_v56 = vsel %vm8501_vm1, %v3069_v27, %v3073_v28  ;;  %v3089_v42 = vshll.u32 %v2890_v34, 16  ;;  %v4240_v0 = vld [vmem:[#allocation2 + $0x68] sm:$0x1] }
 0x223   : > { %v1500_v13 = vpop.f32.mrf.mxu3 }
 0x224   : > { %10866 = vst [vmem:[#allocation34_spill] sm:$0xff] %v9170_v8  ;;  %v1501_v18 = vadd.f32 %v8889_v61, %v1500_v13  ;;  %v4989_v8 = vrot.slane %v4240_v0, 5  ;;  %v3091_v27 = vrot.slane %v3089_v42, 5  ;;  %v2894_v0 = vld [vmem:[#allocation2 + $0x70] sm:$0xf] }
 0x225   : > { %v9177_v33 = vpop.f32.mrf.mxu1  ;;  %10867 = vst [vmem:[#allocation35_spill] sm:$0xff] %v9179_v36  ;;  %v3316_v36 = vunpack.c.l.b16 %v3074_v56 }
 0x226   : > { %7441 = vmatmul.msk.bf16.gmra.mxu2 %vm1375_vm7, %v3341_v45  ;;  %v3099_v45 = vshrl.u32 %v2891_v32, 16  ;;  %v7598_v32 = vrot.slane %v4884_v17, 9 }
 0x228   : > { %7338 = vmatmul.msk.bf16.gmra.mxu3 %vm1375_vm7, %v8781_v43  ;;  %7427 = vmatmul.msk.bf16.gmra.mxu1 %vm1375_vm7, %v7830_v15  ;;  %v3086_v43 = vshrl.u32 %v2890_v34, 16  ;;  %v4986_v15 = vrot.slane %v4239_v51, 5 }
 0x229   : > { %v2127_v20 = vpop.f32.mrf.mxu2 }
 0x22a   : > { %v9182_v46 = vadd.f32 %v2127_v20, %v1499_v58  ;;  %v3317_v58 = vunpack.c.l.b16 %v3084_v26  ;;  %v3101_v20 = vrot.slane %v3099_v45, 4  ;;  %v3088_v28 = vrot.slane %v3086_v43, 4  ;;  %v9207_v43 = vld [vmem:[%s10799_s4] ss:$0 sm:$0xff] }
 0x22b   : > { %v1503_v2 = vpop.f32.mrf.mxu3  ;;  %v4987_v34 = vsel %vm8391_vm13, %v7598_v32, %v4986_v15  ;;  %v3105_v45 = vshll.u32 %v2892_v52, 16 }
 0x22c   : > { %10868 = vst [vmem:[#allocation36_spill] sm:$0xff] %v9182_v46  ;;  %v4988_v46 = vrot.slane %v4986_v15, 4  ;;  %v3342_v51 = vpack.c.b16 %v3317_v58, %v3316_v36  ;;  %v3102_v61 = vor.u32 %v3101_v20, %v3097_v31  ;;  %v5069_v17 = vunpack.c.l.b16 %v4987_v34  ;;  %v7831_v36 = vld [vmem:[#allocation2 + $0x9c] sm:$0xff]  ;;  %v7933_v20 = vld [vmem:[#allocation2 + $0x64] sm:$0xf] }
 0x22d   : > { %7566 = vmatmul.msk.bf16.gmra.mxu0 %vm1375_vm7, %v7848_v62  ;;  %v9192_v50 = vpop.f32.mrf.mxu1  ;;  %v3092_v56 = vor.u32 %v3091_v27, %v3088_v28  ;;  %v1504_v42 = vadd.f32 %v9207_v43, %v1503_v2  ;;  %v3107_v52 = vrot.slane %v3105_v45, 5  ;;  %v2182_v15 = vld [vmem:[#allocation2 + $0x60] sm:$0xe]  ;;  %v2299_v32 = vrot.slane %v7933_v20, 5  ;;  %v2893_v27 = vld [vmem:[#allocation2 + $0x6c] sm:$0xf] }
 0x22e   : > { %v4990_v26 = vsel %vm8391_vm13, %v4988_v46, %v4989_v8  ;;  %v3103_v46 = vrot.slane %v3102_v61, 4  ;;  %v3119_v34 = vshll.u32 %v2894_v0, 16  ;;  %v3123_v2 = vshrl.u32 %v2894_v0, 16  ;;  %v4242_v20 = vld [vmem:[#allocation2 + $0x70] sm:$0xf] }
 0x22f   : > { %v5070_v13 = vunpack.c.l.b16 %v4990_v26  ;;  %v3093_v28 = vrot.slane %v3092_v56, 4  ;;  %v7849_v26 = vld [vmem:[#allocation2 + $0x9c] sm:$0xff]  ;;  %v7320_v45 = vrot.slane %v2182_v15, 9  ;;  %v4885_v0 = vld [vmem:[#allocation2 + $0x6c] sm:$0xe] }
 0x230   : > { %v3108_v61 = vsel %vm8501_vm1, %v3103_v46, %v3107_v52  ;;  %v3125_v56 = vrot.slane %v3123_v2, 4  ;;  %v7599_v2 = vrot.slane %v4885_v0, 9 }
 0x231   : > { %v2129_v14 = vpop.f32.mrf.mxu2  ;;  %v3319_v15 = vunpack.c.l.b16 %v3108_v61  ;;  %v2896_v61 = vld [vmem:[#allocation2 + $0x78] sm:$0xf] }
 0x232   : > { %v9195_v62 = vadd.f32 %v2129_v14, %v1501_v18  ;;  %v9202_v18 = vpack.c.b16 %v5070_v13, %v5069_v17  ;;  %v2301_v17 = vrot.slane %v2299_v32, 4 }
 0x233   : > { %v1505_v19 = vpop.f32.mrf.mxu3 }
 0x234   : > { %10869 = vst [vmem:[#allocation37_spill] sm:$0xff] %v9195_v62  ;;  %v4993_v62 = vrot.slane %v4242_v20, 5  ;;  %v1506_v46 = vadd.f32 %v9207_v43, %v1505_v19  ;;  %v2895_v20 = vld [vmem:[#allocation2 + $0x74] sm:$0x1] }
 0x235   : > { %10870 = vst [vmem:[#allocation38_spill] sm:$0xff] %v9202_v18  ;;  %v9210_v8 = vpop.f32.mrf.mxu1  ;;  %v7934_v18 = vld [vmem:[#allocation2 + $0x68] sm:$0x1] }
 0x236   : > { %7442 = vmatmul.msk.bf16.gmra.mxu2 %vm1375_vm7, %v3342_v51  ;;  %v3098_v51 = vsel %vm8501_vm1, %v3093_v28, %v3097_v31  ;;  %v9224_v31 = vpop.f32.mrf.mxu0  ;;  %v2300_v28 = vsel %vm8391_vm13, %v7320_v45, %v2299_v32  ;;  %v4994_v45 = vsel %vm8391_vm13, %v7599_v2, %v4993_v62 }
 0x237   : > { %10872 = vst [vmem:[#allocation40_spill] sm:$0xff] %v9224_v31  ;;  %v3318_v52 = vunpack.c.l.b16 %v3098_v51  ;;  %v5071_v25 = vunpack.c.l.b16 %v4994_v45 }
 0x238   : > { %7339 = vmatmul.msk.bf16.gmra.mxu3 %vm1375_vm7, %v8837_v44  ;;  %7428 = vmatmul.msk.bf16.gmra.mxu1 %vm1375_vm7, %v7831_v36  ;;  %v9222_v44 = vrot.slane %v3119_v34, 5  ;;  %v4243_v36 = vld [vmem:[#allocation2 + $0x74] sm:$0x1] }
 0x239   : > { %v2132_v58 = vpop.f32.mrf.mxu2  ;;  %v4996_v10 = vrot.slane %v4243_v36, 5 }
 0x23a   : > { %v9212_v14 = vadd.f32 %v2132_v58, %v1504_v42  ;;  %v3110_v42 = vshrl.u32 %v2893_v27, 16  ;;  %v3113_v58 = vshll.u32 %v2893_v27, 16  ;;  %v2897_v27 = vld [vmem:[#allocation2 + $0x7c] sm:$0xf]  ;;  %v3126_v51 = vor.u32 %v3125_v56, %v9222_v44 }
 0x23b   : > { %v1508_v13 = vpop.f32.mrf.mxu3  ;;  %v3143_v30 = vshll.u32 %v2897_v27, 16  ;;  %v3147_v32 = vshrl.u32 %v2897_v27, 16 }
 0x23c   : > { %10871 = vst [vmem:[#allocation39_spill] sm:$0xff] %v9212_v14  ;;  %v2302_v14 = vrot.slane %v7934_v18, 5  ;;  %v3112_v31 = vrot.slane %v3110_v42, 4  ;;  %v3115_v19 = vrot.slane %v3113_v58, 5  ;;  %v2372_v42 = vunpack.c.l.b16 %v2300_v28  ;;  %v7935_v58 = vld [vmem:[#allocation2 + $0x70] sm:$0xf] }
 0x23d   : > { %7567 = vmatmul.msk.bf16.gmra.mxu0 %vm1375_vm7, %v7849_v26  ;;  %v4995_v26 = vrot.slane %v4993_v62, 4  ;;  %v9231_v9 = vpop.f32.mrf.mxu1  ;;  %v2306_v56 = vrot.slane %v7935_v58, 5  ;;  %v3127_v63 = vrot.slane %v3126_v51, 4  ;;  %v3149_v62 = vrot.slane %v3147_v32, 4  ;;  %v7936_v32 = vld [vmem:[#allocation2 + $0x74] sm:$0x1] }
 0x23e   : > { %v2303_v34 = vsel %vm8391_vm13, %v2301_v17, %v2302_v14  ;;  %10873 = vst [vmem:[#allocation41_spill] sm:$0xff] %v9231_v9  ;;  %v3343_v17 = vpack.c.b16 %v3319_v15, %v3318_v52  ;;  %v3116_v27 = vor.u32 %v3115_v19, %v3112_v31  ;;  %v9241_v9 = vrot.slane %v3143_v30, 5  ;;  %v7832_v15 = vld [vmem:[#allocation2 + $0xa8] sm:$0xff]  ;;  %v2898_v19 = vld [vmem:[#allocation2 + $0x80] sm:$0x1] }
 0x23f   : > { %v4997_v14 = vsel %vm8391_vm13, %v4995_v26, %v4996_v10  ;;  %v2373_v36 = vunpack.c.l.b16 %v2303_v34  ;;  %v1509_v10 = vadd.f32 %v9207_v43, %v1508_v13  ;;  %v2183_v30 = vld [vmem:[#allocation2 + $0x6c] sm:$0xe]  ;;  %v2308_v31 = vrot.slane %v2306_v56, 4  ;;  %v2900_v58 = vld [vmem:[#allocation2 + $0x88] sm:$0xf] }
 0x240   : > { %v5072_v0 = vunpack.c.l.b16 %v4997_v14  ;;  %v9246_v14 = vpop.f32.mrf.mxu0  ;;  %v3117_v13 = vrot.slane %v3116_v27, 4  ;;  %v3150_v51 = vor.u32 %v3149_v62, %v9241_v9  ;;  %v2309_v45 = vrot.slane %v7936_v32, 5 }
 0x241   : > { %v2134_v12 = vpop.f32.mrf.mxu2  ;;  %v2396_v52 = vpack.c.b16 %v2373_v36, %v2372_v42  ;;  %10876 = vst [vmem:[#allocation44_spill] sm:$0xff] %v9246_v14  ;;  %v3153_v42 = vshll.u32 %v2898_v19, 16 }
 0x242   : > { %v9233_v18 = vadd.f32 %v2134_v12, %v1506_v46  ;;  %v3129_v12 = vshll.u32 %v2895_v20, 16  ;;  %v3134_v46 = vshrl.u32 %v2896_v61, 16  ;;  %v9244_v34 = vpack.c.b16 %v5072_v0, %v5071_v25 }
 0x243   : > { %v1510_v38 = vpop.f32.mrf.mxu3  ;;  %v3122_v0 = vsel %vm8501_vm1, %v3117_v13, %v9222_v44  ;;  %v2310_v62 = vsel %vm8391_vm13, %v2308_v31, %v2309_v45  ;;  %v2899_v44 = vld [vmem:[#allocation2 + $0x84] sm:$0xf]  ;;  %v3155_v13 = vrot.slane %v3153_v42, 5  ;;  %v4220_v45 = vld [vmem:[#allocation2 + $0x18] sm:$0xf] }
 0x244   : > { %10874 = vst [vmem:[#allocation42_spill] sm:$0xff] %v9233_v18  ;;  %v3137_v18 = vshll.u32 %v2896_v61, 16  ;;  %v3131_v26 = vrot.slane %v3129_v12, 5  ;;  %v3136_v20 = vrot.slane %v3134_v46, 4  ;;  %v7321_v12 = vrot.slane %v2183_v30, 9 }
 0x245   : > { %10875 = vst [vmem:[#allocation43_spill] sm:$0xff] %v9244_v34  ;;  %v2375_v30 = vunpack.c.l.b16 %v2310_v62  ;;  %v7938_v42 = vld [vmem:[#allocation2 + $0x7c] sm:$0xf] }
 0x246   : > { %7443 = vmatmul.msk.bf16.gmra.mxu2 %vm1375_vm7, %v3343_v17  ;;  %v3139_v61 = vrot.slane %v3137_v18, 5  ;;  %v3132_v25 = vsel %vm8501_vm1, %v3127_v63, %v3131_v26  ;;  %v9255_v18 = vpop.f32.mrf.mxu1  ;;  %v7850_v17 = vld [vmem:[#allocation2 + $0xa8] sm:$0xff]  ;;  %v3167_v26 = vshll.u32 %v2900_v58, 16 }
 0x247   : > { %v3321_v63 = vunpack.c.l.b16 %v3132_v25  ;;  %v9269_v25 = vld [vmem:[#allocation2 + $0x80] sm:$0x1] }
 0x248   : > { %7340 = vmatmul.msk.bf16.gmra.mxu3 %vm1375_vm7, %v2396_v52  ;;  %7429 = vmatmul.msk.bf16.gmra.mxu1 %vm1375_vm7, %v7832_v15  ;;  %v3140_v46 = vor.u32 %v3139_v61, %v3136_v20  ;;  %v3151_v52 = vrot.slane %v3150_v51, 4  ;;  %v1511_v15 = vadd.f32 %v9207_v43, %v1510_v38  ;;  %v3171_v20 = vshrl.u32 %v2900_v58, 16  ;;  %v2184_v38 = vld [vmem:[#allocation2 + $0x78] sm:$0xe] }
 0x249   : > { %v2137_v2 = vpop.f32.mrf.mxu2  ;;  %v1436_v61 = vadd.f32 %v9207_v43, %v8691_v48  ;;  %v3158_v43 = vshrl.u32 %v2899_v44, 16  ;;  %v2313_v58 = vrot.slane %v7938_v42, 5 }
 0x24a   : > { %v9248_v28 = vadd.f32 %v2137_v2, %v1509_v10  ;;  %v2307_v10 = vsel %vm8391_vm13, %v7321_v12, %v2306_v56  ;;  %v3320_v2 = vunpack.c.l.b16 %v3122_v0  ;;  %v3141_v19 = vrot.slane %v3140_v46, 4  ;;  %v9279_v0 = vld [vmem:[#allocation2 + $0x7c] sm:$0xf]  ;;  %v9282_v46 = vpop.f32.mrf.mxu0 }
 0x24b   : > { %v2467_v36 = vpop.f32.mrf.mxu3  ;;  %v2374_v51 = vunpack.c.l.b16 %v2307_v10  ;;  %v3156_v48 = vsel %vm8501_vm1, %v3151_v52, %v3155_v13  ;;  %v2143_v12 = vadd.f32 %v8960_v37, %v1436_v61  ;;  %10879 = vst [vmem:[#allocation47_spill] sm:$0xff] %v9282_v46  ;;  %v3173_v62 = vrot.slane %v3171_v20, 4  ;;  %v9286_v10 = vld [vmem:[#allocation2 + $0x8c] sm:$0x1] }
 0x24c   : > { %10877 = vst [vmem:[#allocation45_spill] sm:$0xff] %v9248_v28  ;;  %v2547_v27 = vadd.f32 %v2467_v36, %v8938_v40  ;;  %v3344_v56 = vpack.c.b16 %v3321_v63, %v3320_v2  ;;  %v3161_v36 = vshll.u32 %v2899_v44, 16  ;;  %v9284_v63 = vrot.slane %v3167_v26, 5  ;;  %v2901_v61 = vld [vmem:[#allocation2 + $0x8c] sm:$0x1] }
 0x24d   : > { %7568 = vmatmul.msk.bf16.gmra.mxu0 %vm1375_vm7, %v7850_v17  ;;  %v3146_v17 = vsel %vm8501_vm1, %v3141_v19, %v9241_v9  ;;  %v2323_v9 = vrot.slane %v9286_v10, 5  ;;  %v2397_v2 = vpack.c.b16 %v2375_v30, %v2374_v51  ;;  %v7322_v52 = vrot.slane %v2184_v38, 9  ;;  %v7940_v10 = vld [vmem:[#allocation2 + $0x88] sm:$0xf]  ;;  %v4246_v30 = vld [vmem:[#allocation2 + $0x80] sm:$0x1] }
 0x24e   : > { %v9289_v44 = vpop.f32.mrf.mxu1  ;;  %v9292_v37 = vunpack.c.l.b16 %v3146_v17  ;;  %v4272_v13 = vshll.u32 %v4220_v45, 16  ;;  %v5000_v26 = vrot.slane %v9279_v0, 5  ;;  %v9295_v20 = vunpack.c.l.b16 %v3156_v48  ;;  %v7833_v38 = vld [vmem:[#allocation2 + $0xb4] sm:$0xff] }
 0x24f   : > { %10880 = vst [vmem:[#allocation48_spill] sm:$0xff] %v9289_v44  ;;  %v3160_v42 = vrot.slane %v3158_v43, 4  ;;  %v3163_v31 = vrot.slane %v3161_v36, 5  ;;  %v2320_v14 = vrot.slane %v7940_v10, 5  ;;  %v2837_v51 = vadd.f32 %v9084_v53, %v2547_v27  ;;  %v4886_v27 = vld [vmem:[#allocation2 + $0x78] sm:$0xe] }
 0x250   : > { %v3174_v17 = vor.u32 %v3173_v62, %v9284_v63  ;;  %v4278_v48 = vshll.u32 %v8997_v57, 16  ;;  %v4282_v43 = vshrl.u32 %v8997_v57, 16  ;;  %v4274_v53 = vrot.slane %v4272_v13, 5  ;;  %v2185_v57 = vld [vmem:[#allocation2 + $0x84] sm:$0xe] }
 0x251   : > { %v2139_v40 = vpop.f32.mrf.mxu2  ;;  %v5002_v0 = vrot.slane %v5000_v26, 4  ;;  %v3164_v10 = vor.u32 %v3163_v31, %v3160_v42  ;;  %v10882_v13 = vrot.slane %v9269_v25, 5  ;;  %v7600_v31 = vrot.slane %v4886_v27, 9  ;;  %v4223_v44 = vld [vmem:[#allocation2 + $0x24] sm:$0xf] }
 0x252   : > { %v9272_v32 = vadd.f32 %v2139_v40, %v1511_v15  ;;  %v4269_v40 = vshrl.u32 %v4220_v45, 16  ;;  %v3177_v45 = vshll.u32 %v2901_v61, 16  ;;  %v9310_v61 = vld [vmem:[#allocation2 + $0xa4] sm:$0x1]  ;;  %v9321_v42 = vpop.f32.mrf.mxu0  ;;  %v7323_v25 = vrot.slane %v2185_v57, 9 }
 0x253   : > { %v2469_v15 = vpop.f32.mrf.mxu3  ;;  %10883 = vst [vmem:[#allocation50_spill] sm:$0xff] %v9321_v42  ;;  %v4293_v27 = vshrl.u32 %v4223_v44, 16 }
 0x254   : > { %10878 = vst [vmem:[#allocation46_spill] sm:$0xff] %v9272_v32  ;;  %v2548_v19 = vadd.f32 %v2469_v15, %v2143_v12  ;;  %v2314_v12 = vsel %vm8391_vm13, %v7322_v52, %v2313_v58  ;;  %v4271_v46 = vrot.slane %v4269_v40, 4  ;;  %v5003_v52 = vrot.slane %v4246_v30, 5 }
 0x255   : > { %v2376_v34 = vunpack.c.l.b16 %v2314_v12  ;;  %v4280_v32 = vrot.slane %v4278_v48, 5  ;;  %v4284_v40 = vrot.slane %v4282_v43, 4  ;;  %v5001_v12 = vsel %vm8391_vm13, %v7600_v31, %v5000_v26 }
 0x256   : > { %7444 = vmatmul.msk.bf16.gmra.mxu2 %vm1375_vm7, %v3344_v56  ;;  %v2315_v56 = vrot.slane %v2313_v58, 4  ;;  %v9307_v58 = vld [vmem:[#allocation2 + $0x98] sm:$0x1]  ;;  %v5004_v62 = vsel %vm8391_vm13, %v5002_v0, %v5003_v52  ;;  %v9329_v48 = vpop.f32.mrf.mxu1  ;;  %v2838_v43 = vadd.f32 %v9106_v59, %v2548_v19  ;;  %v4296_v52 = vshll.u32 %v4223_v44, 16 }
 0x257   : > { %v5073_v59 = vunpack.c.l.b16 %v5001_v12 }
 0x258   : > { %7341 = vmatmul.msk.bf16.gmra.mxu3 %vm1375_vm7, %v2397_v2  ;;  %7430 = vmatmul.msk.bf16.gmra.mxu1 %vm1375_vm7, %v7833_v38  ;;  %v3345_v2 = vpack.c.b16 %v9295_v20, %v9292_v37  ;;  %v2317_v30 = vsel %vm8391_vm13, %v2315_v56, %v10882_v13  ;;  %v3175_v38 = vrot.slane %v3174_v17, 4  ;;  %v3179_v37 = vrot.slane %v3177_v45, 5  ;;  %v7943_v13 = vld [vmem:[#allocation2 + $0x20] sm:$0x1] }
 0x259   : > { %v3415_v15 = vpop.f32.mrf.mxu2  ;;  %v4275_v20 = vor.u32 %v4274_v53, %v4271_v46  ;;  %v2377_v56 = vunpack.c.l.b16 %v2317_v30  ;;  %v3165_v17 = vrot.slane %v3164_v10, 4  ;;  %v2321_v45 = vsel %vm8391_vm13, %v7323_v25, %v2320_v14 }
 0x25a   : > { %v9303_v36 = vadd.f32 %v3415_v15, %v2837_v51  ;;  %v2322_v51 = vrot.slane %v2320_v14, 4  ;;  %v7851_v15 = vld [vmem:[#allocation2 + $0xb4] sm:$0xff]  ;;  %v5074_v46 = vunpack.c.l.b16 %v5004_v62  ;;  %v4288_v14 = vshll.u32 %v7943_v13, 16  ;;  %v4226_v62 = vld [vmem:[#allocation2 + $0x30] sm:$0xf] }
 0x25b   : > { %v3170_v53 = vsel %vm8501_vm1, %v3165_v17, %v9284_v63  ;;  %v4276_v57 = vrot.slane %v4275_v20, 4  ;;  %v2398_v19 = vpack.c.b16 %v2377_v56, %v2376_v34  ;;  %v4298_v25 = vrot.slane %v4296_v52, 5  ;;  %v7834_v56 = vld [vmem:[#allocation2 + $0xc0] sm:$0xff] }
 0x25c   : > { %10881 = vst [vmem:[#allocation49_spill] sm:$0xff] %v9303_v36  ;;  %v2472_v36 = vpop.f32.mrf.mxu3  ;;  %v2324_v0 = vsel %vm8391_vm13, %v2322_v51, %v2323_v9  ;;  %v4285_v9 = vor.u32 %v4284_v40, %v4280_v32  ;;  %v9343_v30 = vunpack.c.l.b16 %v3170_v53  ;;  %v4302_v40 = vshll.u32 %v9028_v11, 16 }
 0x25d   : > { %v2549_v28 = vadd.f32 %v2472_v36, %v8974_v24  ;;  %7569 = vmatmul.msk.bf16.gmra.mxu0 %vm1375_vm7, %v7851_v15  ;;  %v3180_v24 = vsel %vm8501_vm1, %v3175_v38, %v3179_v37  ;;  %v2379_v10 = vunpack.c.l.b16 %v2324_v0  ;;  %v2378_v15 = vunpack.c.l.b16 %v2321_v45 }
 0x25e   : > { %v9341_v51 = vunpack.c.l.b16 %v3180_v24  ;;  %v4281_v63 = vsel %vm8501_vm1, %v4276_v57, %v4280_v32  ;;  %v9348_v44 = vpack.c.b16 %v5074_v46, %v5073_v59  ;;  %v4286_v31 = vrot.slane %v4285_v9, 4  ;;  %v4248_v46 = vld [vmem:[#allocation2 + $0x88] sm:$0xf]  ;;  %v4249_v59 = vld [vmem:[#allocation2 + $0x8c] sm:$0x1] }
 0x25f   : > { %v4295_v37 = vrot.slane %v4293_v27, 4  ;;  %v4306_v34 = vshrl.u32 %v9028_v11, 16  ;;  %v9353_v17 = vpack.c.b16 %v2379_v10, %v2378_v15  ;;  %v4317_v0 = vshrl.u32 %v4226_v62, 16 }
 0x260   : > { %10885 = vst [vmem:[#allocation52_spill] sm:$0xff] %v9348_v44  ;;  %v4320_v12 = vshll.u32 %v4226_v62, 16  ;;  %v4326_v24 = vshll.u32 %v9058_v22, 16  ;;  %v4330_v45 = vshrl.u32 %v9058_v22, 16  ;;  %v2839_v11 = vadd.f32 %v9123_v21, %v2549_v28  ;;  %v9368_v22 = vpop.f32.mrf.mxu1  ;;  %v9374_v21 = vld [vmem:[#allocation2 + $0x94] sm:$0xf] }
 0x261   : > { %v3417_v36 = vpop.f32.mrf.mxu2  ;;  %v4354_v53 = vshrl.u32 %v9096_v54, 16  ;;  %v4299_v52 = vor.u32 %v4298_v25, %v4295_v37  ;;  %v9366_v10 = vrot.slane %v4302_v40, 5  ;;  %v4308_v57 = vrot.slane %v4306_v34, 4  ;;  %v4887_v37 = vld [vmem:[#allocation2 + $0x84] sm:$0xe] }
 0x262   : > { %v9339_v26 = vadd.f32 %v3417_v36, %v2838_v43  ;;  %v4290_v43 = vrot.slane %v4288_v14, 5  ;;  %v9360_v36 = vunpack.c.l.b16 %v4281_v63  ;;  %v4322_v28 = vrot.slane %v4320_v12, 5  ;;  %v7944_v12 = vld [vmem:[#allocation2 + $0x2c] sm:$0x1] }
 0x263   : > { %v5007_v13 = vrot.slane %v4248_v46, 5  ;;  %v9376_v14 = vrot.slane %v4326_v24, 5  ;;  %v4332_v62 = vrot.slane %v4330_v45, 4  ;;  %v5010_v34 = vrot.slane %v4249_v59, 5 }
 0x264   : > { %10884 = vst [vmem:[#allocation51_spill] sm:$0xff] %v9339_v26  ;;  %v2474_v38 = vpop.f32.mrf.mxu3  ;;  %v4291_v27 = vsel %vm8501_vm1, %v4286_v31, %v4290_v43  ;;  %v4356_v31 = vrot.slane %v4354_v53, 4  ;;  %v4312_v24 = vshll.u32 %v7944_v12, 16  ;;  %v4300_v46 = vrot.slane %v4299_v52, 4 }
 0x265   : > { %v2550_v20 = vadd.f32 %v2474_v38, %v8990_v55  ;;  %v4229_v55 = vld [vmem:[#allocation2 + $0x3c] sm:$0xf]  ;;  %v5009_v25 = vrot.slane %v5007_v13, 4  ;;  %v7601_v59 = vrot.slane %v4887_v37, 9 }
 0x266   : > { %7445 = vmatmul.msk.bf16.gmra.mxu2 %vm1375_vm7, %v3345_v2  ;;  %v4350_v2 = vshll.u32 %v9096_v54, 16  ;;  %v4319_v54 = vrot.slane %v4317_v0, 4  ;;  %v4341_v63 = vshrl.u32 %v4229_v55, 16  ;;  %v4344_v40 = vshll.u32 %v4229_v55, 16 }
 0x267   : > { %v3195_v0 = vshrl.u32 %v9374_v21, 16  ;;  %v4309_v55 = vor.u32 %v4308_v57, %v9366_v10  ;;  %v2840_v32 = vadd.f32 %v9141_v23, %v2550_v20  ;;  %v5008_v57 = vsel %vm8391_vm13, %v7601_v59, %v5007_v13 }
 0x268   : > { %7342 = vmatmul.msk.bf16.gmra.mxu3 %vm1375_vm7, %v2398_v19  ;;  %7431 = vmatmul.msk.bf16.gmra.mxu1 %vm1375_vm7, %v7834_v56  ;;  %v9378_v38 = vrot.slane %v4350_v2, 5  ;;  %v9380_v19 = vunpack.c.l.b16 %v4291_v27  ;;  %v2902_v56 = vld [vmem:[#allocation2 + $0x90] sm:$0xf]  ;;  %v5011_v2 = vsel %vm8391_vm13, %v5009_v25, %v5010_v34  ;;  %v4323_v53 = vor.u32 %v4322_v28, %v4319_v54  ;;  %v9403_v37 = vpop.f32.mrf.mxu1  ;;  %v9405_v34 = vld [vmem:[#allocation2 + $0x98] sm:$0x1] }
 0x269   : > { %v3420_v9 = vpop.f32.mrf.mxu2  ;;  %v4343_v27 = vrot.slane %v4341_v63, 4  ;;  %v3182_v42 = vshrl.u32 %v2902_v56, 16  ;;  %v4346_v26 = vrot.slane %v4344_v40, 5  ;;  %v3185_v44 = vshll.u32 %v2902_v56, 16 }
 0x26a   : > { %v9370_v15 = vadd.f32 %v3420_v9, %v2839_v11  ;;  %v3191_v11 = vshll.u32 %v9374_v21, 16  ;;  %v4333_v9 = vor.u32 %v4332_v62, %v9376_v14  ;;  %v3197_v52 = vrot.slane %v3195_v0, 4  ;;  %v7945_v62 = vld [vmem:[#allocation2 + $0x38] sm:$0x1] }
 0x26b   : > { %v4310_v54 = vrot.slane %v4309_v55, 4  ;;  %v4314_v28 = vrot.slane %v4312_v24, 5  ;;  %v4336_v63 = vshll.u32 %v7945_v62, 16  ;;  %v4687_v23 = vpack.c.b16 %v9380_v19, %v9360_v36 }
 0x26c   : > { %10886 = vst [vmem:[#allocation53_spill] sm:$0xff] %v9370_v15  ;;  %v2477_v43 = vpop.f32.mrf.mxu3  ;;  %v4357_v15 = vor.u32 %v4356_v31, %v9378_v38  ;;  %v4305_v20 = vsel %vm8501_vm1, %v4300_v46, %v9366_v10  ;;  %v4324_v40 = vrot.slane %v4323_v53, 4  ;;  %v4360_v31 = vshll.u32 %v9100_v49, 16 }
 0x26d   : > { %v2551_v45 = vadd.f32 %v2477_v43, %v9012_v7  ;;  %v9391_v7 = vrot.slane %v3191_v11, 5  ;;  %v4347_v13 = vor.u32 %v4346_v26, %v4343_v27  ;;  %v5075_v43 = vunpack.c.l.b16 %v5008_v57  ;;  %v4232_v26 = vld [vmem:[#allocation2 + $0x48] sm:$0xf]  ;;  %v2905_v27 = vld [vmem:[#allocation2 + $0x9c] sm:$0xf] }
 0x26e   : > { %v5076_v56 = vunpack.c.l.b16 %v5011_v2  ;;  %v3184_v0 = vrot.slane %v3182_v42, 4  ;;  %v3187_v24 = vrot.slane %v3185_v44, 5  ;;  %v4358_v19 = vrot.slane %v4357_v15, 4  ;;  %v9420_v2 = vld [vmem:[#allocation2 + $0xa0] sm:$0xf] }
 0x26f   : > { %v3198_v36 = vor.u32 %v3197_v52, %v9391_v7  ;;  %v10887_v10 = vpack.c.b16 %v9341_v51, %v9343_v30  ;;  %v4315_v49 = vsel %vm8501_vm1, %v4310_v54, %v4314_v28  ;;  %v4338_v46 = vrot.slane %v4336_v63, 5  ;;  %v7946_v15 = vld [vmem:[#allocation2 + $0x94] sm:$0xf] }
 0x270   : > { %v9415_v53 = vpack.c.b16 %v5076_v56, %v5075_v43  ;;  %v3201_v42 = vshll.u32 %v9405_v34, 16  ;;  %v9418_v44 = vunpack.c.l.b16 %v4305_v20  ;;  %v4362_v51 = vrot.slane %v4360_v31, 5 }
 0x271   : > { %v3422_v12 = vpop.f32.mrf.mxu2  ;;  %v2841_v30 = vadd.f32 %v9154_v6, %v2551_v45  ;;  %v3188_v57 = vor.u32 %v3187_v24, %v3184_v0  ;;  %v3199_v54 = vrot.slane %v3198_v36, 4  ;;  %v4365_v62 = vshrl.u32 %v4232_v26, 16 }
 0x272   : > { %v9395_v25 = vadd.f32 %v3422_v12, %v2840_v32  ;;  %v4334_v32 = vrot.slane %v4333_v9, 4  ;;  %v2327_v9 = vrot.slane %v7946_v15, 5  ;;  %v4348_v12 = vrot.slane %v4347_v13, 4  ;;  %v2186_v13 = vld [vmem:[#allocation2 + $0x90] sm:$0xe] }
 0x273   : > { %v4363_v28 = vsel %vm8501_vm1, %v4358_v19, %v4362_v51  ;;  %v3215_v6 = vshll.u32 %v9420_v2, 16  ;;  %v4368_v45 = vshll.u32 %v4232_v26, 16  ;;  %v3203_v20 = vrot.slane %v3201_v42, 5  ;;  %v9462_v15 = vld [vmem:[#allocation2 + $0x94] sm:$0xf] }
 0x274   : > { %v2479_v11 = vpop.f32.mrf.mxu3  ;;  %v4339_v59 = vsel %vm8501_vm1, %v4334_v32, %v4338_v46  ;;  %v3206_v31 = vshrl.u32 %v2905_v27, 16  ;;  %v3209_v32 = vshll.u32 %v2905_v27, 16  ;;  %v2329_v43 = vrot.slane %v2327_v9, 4  ;;  %v9464_v27 = vld [vmem:[#allocation2 + $0xb0] sm:$0x1] }
 0x275   : > { %v2552_v55 = vadd.f32 %v2479_v11, %v9040_v60  ;;  %v4329_v60 = vsel %vm8501_vm1, %v4324_v40, %v9376_v14  ;;  %v3219_v14 = vshrl.u32 %v9420_v2, 16  ;;  %v9437_v40 = vunpack.c.l.b16 %v4315_v49 }
 0x276   : > { %7446 = vmatmul.msk.bf16.gmra.mxu2 %vm1375_vm7, %v10887_v10  ;;  %v9439_v56 = vunpack.c.l.b16 %v4329_v60  ;;  %v9441_v11 = vunpack.c.l.b16 %v4339_v59  ;;  %v3189_v0 = vrot.slane %v3188_v57, 4  ;;  %v3204_v24 = vsel %vm8501_vm1, %v3199_v54, %v3203_v20  ;;  %v9452_v10 = vpop.f32.mrf.mxu1  ;;  %v4888_v20 = vld [vmem:[#allocation2 + $0x90] sm:$0xe]  ;;  %v2908_v59 = vld [vmem:[#allocation2 + $0xa8] sm:$0xf] }
 0x277   : > { %v9448_v36 = vunpack.c.l.b16 %v4363_v28  ;;  %v9450_v19 = vrot.slane %v4365_v62, 4  ;;  %v9455_v46 = vrot.slane %v3215_v6, 5  ;;  %v3221_v26 = vrot.slane %v3219_v14, 4  ;;  %v9476_v62 = vld [vmem:[#allocation2 + $0xa4] sm:$0x1] }
 0x278   : > { %7343 = vmatmul.msk.bf16.gmra.mxu3 %vm1375_vm7, %v9353_v17  ;;  %7576 = vmatmul.msk.bf16.vlgmr.msra.gmra.mxu1 %vm1375_vm7, %v4687_v23  ;;  %v4353_v17 = vsel %vm8501_vm1, %v4348_v12, %v9378_v38  ;;  %v9457_v42 = vrot.slane %v4368_v45, 5  ;;  %v3194_v38 = vsel %vm8501_vm1, %v3189_v0, %v9391_v7  ;;  %v7324_v60 = vrot.slane %v2186_v13, 9 }
 0x279   : > { %v3425_v52 = vpop.f32.mrf.mxu2  ;;  %v3208_v51 = vrot.slane %v3206_v31, 4  ;;  %v3327_v12 = vunpack.c.l.b16 %v3204_v24  ;;  %v4688_v28 = vpack.c.b16 %v9437_v40, %v9418_v44  ;;  %v9480_v14 = vunpack.c.l.b16 %v4353_v17  ;;  %v2187_v44 = vld [vmem:[#allocation2 + $0x9c] sm:$0xe] }
 0x27a   : > { %v9430_v63 = vadd.f32 %v3425_v52, %v2841_v30  ;;  %v3211_v30 = vrot.slane %v3209_v32, 5  ;;  %v10888_v52 = vrot.slane %v9307_v58, 5  ;;  %v2328_v7 = vsel %vm8391_vm13, %v7324_v60, %v2327_v9 }
 0x27b   : > { %v3222_v45 = vor.u32 %v3221_v26, %v9455_v46  ;;  %v5014_v9 = vrot.slane %v9462_v15, 5  ;;  %v3225_v17 = vshll.u32 %v9476_v62, 16  ;;  %v9494_v26 = vld [vmem:[#allocation2 + $0x98] sm:$0x1]  ;;  %v2380_v60 = vunpack.c.l.b16 %v2328_v7 }
 0x27c   : > { %v2482_v23 = vpop.f32.mrf.mxu3  ;;  %v2331_v57 = vsel %vm8391_vm13, %v2329_v43, %v10888_v52  ;;  %v3212_v32 = vor.u32 %v3211_v30, %v3208_v51  ;;  %v7602_v52 = vrot.slane %v4888_v20, 9  ;;  %v5017_v24 = vrot.slane %v9494_v26, 5 }
 0x27d   : > { %v2553_v49 = vadd.f32 %v2482_v23, %v9062_v1  ;;  %v2842_v1 = vadd.f32 %v9167_v35, %v2552_v55  ;;  %v9482_v35 = vpop.f32.mrf.mxu0  ;;  %v3326_v55 = vunpack.c.l.b16 %v3194_v38  ;;  %v2381_v31 = vunpack.c.l.b16 %v2331_v57  ;;  %v7948_v23 = vld [vmem:[#allocation2 + $0xa0] sm:$0xf] }
 0x27e   : > { %10889 = vst [vmem:[#allocation54_spill] sm:$0xff] %v9482_v35  ;;  %v2334_v0 = vrot.slane %v7948_v23, 5  ;;  %v3538_v23 = vld [vmem:[#allocation2 + $0x90] sm:$0xe]  ;;  %v3213_v40 = vrot.slane %v3212_v32, 4  ;;  %v5015_v7 = vsel %vm8391_vm13, %v7602_v52, %v5014_v9  ;;  %v9505_v51 = vpop.f32.mrf.mxu1  ;;  %v3227_v30 = vrot.slane %v3225_v17, 5 }
 0x27f   : > { %v3347_v43 = vpack.c.b16 %v3327_v12, %v3326_v55  ;;  %v3223_v12 = vrot.slane %v3222_v45, 4  ;;  %v5016_v55 = vrot.slane %v5014_v9, 4  ;;  %v2400_v13 = vpack.c.b16 %v2381_v31, %v2380_v60  ;;  %v9515_v32 = vld [vmem:[#allocation2 + $0xac] sm:$0xf]  ;;  %v4889_v60 = vld [vmem:[#allocation2 + $0x9c] sm:$0xe] }
 0x280   : > { %v2843_v20 = vadd.f32 %v9177_v33, %v2553_v49  ;;  %v2336_v45 = vrot.slane %v2334_v0, 4  ;;  %v3218_v31 = vsel %vm8501_vm1, %v3213_v40, %v9455_v46  ;;  %v3230_v17 = vshrl.u32 %v2908_v59, 16  ;;  %v9526_v46 = vld [vmem:[#allocation2 + $0xa0] sm:$0xf] }
 0x281   : > { %v3427_v54 = vpop.f32.mrf.mxu2  ;;  %v5018_v9 = vsel %vm8391_vm13, %v5016_v55, %v5017_v24  ;;  %v3228_v49 = vsel %vm8501_vm1, %v3223_v12, %v3227_v30  ;;  %v5077_v40 = vunpack.c.l.b16 %v5015_v7  ;;  %v3233_v30 = vshll.u32 %v2908_v59, 16  ;;  %v9542_v7 = vld [vmem:[#allocation2 + $0xa4] sm:$0x1] }
 0x282   : > { %v9484_v58 = vadd.f32 %v3427_v54, %v2842_v1  ;;  %v9496_v1 = vld [vmem:[#allocation2 + $0x4c] sm:$0xf]  ;;  %v7325_v54 = vrot.slane %v2187_v44, 9  ;;  %v5078_v52 = vunpack.c.l.b16 %v5018_v9  ;;  %v3239_v12 = vshll.u32 %v9515_v32, 16 }
 0x283   : > { %v5021_v9 = vrot.slane %v9526_v46, 5  ;;  %v3329_v59 = vunpack.c.l.b16 %v3228_v49 }
 0x284   : > { %10890 = vst [vmem:[#allocation55_spill] sm:$0xff] %v9484_v58  ;;  %v2484_v38 = vpop.f32.mrf.mxu3  ;;  %v3235_v58 = vrot.slane %v3233_v30, 5  ;;  %v4890_v30 = vld [vmem:[#allocation2 + $0xa8] sm:$0xe] }
 0x285   : > { %v2554_v57 = vadd.f32 %v2484_v38, %v9079_v16  ;;  %v9510_v16 = vsel %vm8391_vm13, %v7325_v54, %v2334_v0  ;;  %v3670_v38 = vrot.slane %v9374_v21, 5  ;;  %v7852_v0 = vld [vmem:[#allocation2 + $0xc0] sm:$0xff]  ;;  %v3673_v54 = vrot.slane %v9405_v34, 5  ;;  %v9531_v55 = vpop.f32.mrf.mxu0 }
 0x286   : > { %7447 = vmatmul.msk.bf16.gmra.mxu2 %vm1375_vm7, %v3347_v43  ;;  %v7463_v43 = vrot.slane %v3538_v23, 9  ;;  %10891 = vst [vmem:[#allocation56_spill] sm:$0xff] %v9531_v55  ;;  %v3243_v23 = vshrl.u32 %v9515_v32, 16  ;;  %7570 = vmatmul.msk.bf16.gmra.mxu0 %vm1375_vm7, %v7852_v0  ;;  %v5023_v55 = vrot.slane %v5021_v9, 4 }
 0x287   : > { %v3672_v21 = vrot.slane %v3670_v38, 4 }
 0x288   : > { %7344 = vmatmul.msk.bf16.gmra.mxu3 %vm1375_vm7, %v2400_v13  ;;  %7577 = vmatmul.msk.bf16.gmra.mxu1 %vm1375_vm7, %v4688_v28  ;;  %v3671_v24 = vsel %vm8391_vm13, %v7463_v43, %v3670_v38  ;;  %v10892_v28 = vrot.slane %v9310_v61, 5  ;;  %v7603_v61 = vrot.slane %v4889_v60, 9  ;;  %v3232_v43 = vrot.slane %v3230_v17, 4 }
 0x289   : > { %v3430_v44 = vpop.f32.mrf.mxu2  ;;  %v3674_v34 = vsel %vm8391_vm13, %v3672_v21, %v3673_v54  ;;  %v3728_v38 = vunpack.c.l.b16 %v3671_v24  ;;  %v9554_v21 = vrot.slane %v3239_v12, 5  ;;  %v3245_v60 = vrot.slane %v3243_v23, 4  ;;  %v9561_v24 = vpop.f32.mrf.mxu1 }
 0x28a   : > { %v9520_v33 = vadd.f32 %v3430_v44, %v2843_v20  ;;  %v9537_v13 = vsel %vm8391_vm13, %v2336_v45, %v10892_v28  ;;  %v9544_v44 = vpack.c.b16 %v5078_v52, %v5077_v40  ;;  %v3539_v28 = vld [vmem:[#allocation2 + $0x9c] sm:$0xe]  ;;  %v3729_v6 = vunpack.c.l.b16 %v3674_v34 }
 0x28b   : > { %v5022_v0 = vsel %vm8391_vm13, %v7603_v61, %v5021_v9  ;;  %v5024_v40 = vrot.slane %v9542_v7, 5  ;;  %v2844_v52 = vadd.f32 %v9192_v50, %v2554_v57  ;;  %v7464_v49 = vrot.slane %v3539_v28, 9  ;;  %v9565_v61 = vld [vmem:[#allocation2 + $0xac] sm:$0xf] }
 0x28c   : > { %v2487_v20 = vpop.f32.mrf.mxu3  ;;  %v9556_v35 = vpack.c.b16 %v3729_v6, %v3728_v38  ;;  %v3677_v17 = vrot.slane %v9420_v2, 5  ;;  %v3328_v34 = vunpack.c.l.b16 %v3218_v31  ;;  %v5079_v50 = vunpack.c.l.b16 %v5022_v0  ;;  %v2910_v6 = vld [vmem:[#allocation2 + $0xb0] sm:$0x1] }
 0x28d   : > { %v2555_v45 = vadd.f32 %v2487_v20, %v9098_v5  ;;  %v5025_v5 = vsel %vm8391_vm13, %v5023_v55, %v5024_v40  ;;  %v2382_v12 = vunpack.c.l.b16 %v9510_v16  ;;  %v3680_v9 = vrot.slane %v9476_v62, 5  ;;  %v9572_v40 = vld [vmem:[#allocation2 + $0xb0] sm:$0x1] }
 0x28e   : > { %v5080_v57 = vunpack.c.l.b16 %v5025_v5  ;;  %v3678_v23 = vsel %vm8391_vm13, %v7464_v49, %v3677_v17  ;;  %v3679_v55 = vrot.slane %v3677_v17, 4  ;;  %v3348_v2 = vpack.c.b16 %v3329_v59, %v3328_v34 }
 0x28f   : > { %v2383_v38 = vunpack.c.l.b16 %v9537_v13  ;;  %v3236_v28 = vor.u32 %v3235_v58, %v3232_v43  ;;  %v7604_v5 = vrot.slane %v4890_v30, 9  ;;  %v5028_v49 = vrot.slane %v9565_v61, 5  ;;  %v7950_v58 = vld [vmem:[#allocation2 + $0xac] sm:$0xf] }
 0x290   : > { %v9574_v31 = vpack.c.b16 %v5080_v57, %v5079_v50  ;;  %v3681_v16 = vsel %vm8391_vm13, %v3679_v55, %v3680_v9  ;;  %v3249_v13 = vshll.u32 %v2910_v6, 16  ;;  %v2341_v59 = vrot.slane %v7950_v58, 5  ;;  %v3540_v57 = vld [vmem:[#allocation2 + $0xa8] sm:$0xe] }
 0x291   : > { %v3432_v54 = vpop.f32.mrf.mxu2  ;;  %v3730_v43 = vunpack.c.l.b16 %v3678_v23  ;;  %v3731_v17 = vunpack.c.l.b16 %v3681_v16  ;;  %v5029_v34 = vsel %vm8391_vm13, %v7604_v5, %v5028_v49  ;;  %v5031_v50 = vrot.slane %v9572_v40, 5 }
 0x292   : > { %v9563_v20 = vadd.f32 %v3432_v54, %v2844_v52  ;;  %10894 = vst [vmem:[#allocation58_spill] sm:$0xff] %v9574_v31  ;;  %v3246_v52 = vor.u32 %v3245_v60, %v9554_v21  ;;  %v2188_v54 = vld [vmem:[#allocation2 + $0xa8] sm:$0xe]  ;;  %v5030_v60 = vrot.slane %v5028_v49, 4  ;;  %v2845_v30 = vadd.f32 %v9210_v8, %v2555_v45 }
 0x293   : > { %v2401_v55 = vpack.c.b16 %v2383_v38, %v2382_v12  ;;  %v3237_v9 = vrot.slane %v3236_v28, 4  ;;  %v9588_v31 = vpack.c.b16 %v3731_v17, %v3730_v43  ;;  %v3684_v16 = vrot.slane %v9515_v32, 5  ;;  %v9600_v43 = vpop.f32.mrf.mxu1 }
 0x294   : > { %10893 = vst [vmem:[#allocation57_spill] sm:$0xff] %v9563_v20  ;;  %v2489_v0 = vpop.f32.mrf.mxu3  ;;  %v7326_v20 = vrot.slane %v2188_v54, 9  ;;  %v5032_v23 = vsel %vm8391_vm13, %v5030_v60, %v5031_v50  ;;  %v10895_v8 = vpack.c.b16 %v9441_v11, %v9439_v56  ;;  %v5081_v45 = vunpack.c.l.b16 %v5029_v34  ;;  %v2911_v54 = vld [vmem:[#allocation2 + $0xb4] sm:$0xf] }
 0x295   : > { %v2556_v62 = vadd.f32 %v2489_v0, %v9118_v29  ;;  %v3247_v0 = vrot.slane %v3246_v52, 4  ;;  %v5082_v12 = vunpack.c.l.b16 %v5032_v23  ;;  %v7465_v38 = vrot.slane %v3540_v57, 9 }
 0x296   : > { %7448 = vmatmul.msk.bf16.gmra.mxu2 %vm1375_vm7, %v3348_v2  ;;  %v9586_v2 = vld [vmem:[#allocation2 + $0xb8] sm:$0xf]  ;;  %v3251_v28 = vrot.slane %v3249_v13, 5  ;;  %v2343_v52 = vrot.slane %v2341_v59, 4  ;;  %v3686_v49 = vrot.slane %v3684_v16, 4  ;;  %v3687_v58 = vrot.slane %v2910_v6, 5 }
 0x297   : > { %v3263_v32 = vshll.u32 %v9586_v2, 16  ;;  %v3267_v17 = vshrl.u32 %v9586_v2, 16  ;;  %v9604_v60 = vpack.c.b16 %v5082_v12, %v5081_v45  ;;  %v3685_v56 = vsel %vm8391_vm13, %v7465_v38, %v3684_v16  ;;  %v4891_v16 = vld [vmem:[#allocation2 + $0xb4] sm:$0xe] }
 0x298   : > { %7345 = vmatmul.msk.bf16.gmra.mxu3 %vm1375_vm7, %v2401_v55  ;;  %7578 = vmatmul.msk.bf16.gmra.mxu1 %vm1375_vm7, %v10895_v8  ;;  %v3252_v34 = vsel %vm8501_vm1, %v3247_v0, %v3251_v28  ;;  %v10896_v13 = vshll.u32 %v9131_v3, 16  ;;  %v10897_v6 = vshrl.u32 %v9496_v1, 16  ;;  %v2342_v0 = vsel %vm8391_vm13, %v7326_v20, %v2341_v59  ;;  %v9626_v3 = vld [vmem:[#allocation2 + $0xb8] sm:$0xf]  ;;  %v2913_v59 = vld [vmem:[#allocation2 + $0xbc] sm:$0x1] }
 0x299   : > { %v3435_v29 = vpop.f32.mrf.mxu2  ;;  %v3254_v23 = vshrl.u32 %v2911_v54, 16  ;;  %v10898_v1 = vrot.slane %v9464_v27, 5  ;;  %v3257_v45 = vshll.u32 %v2911_v54, 16  ;;  %v3732_v12 = vunpack.c.l.b16 %v3685_v56 }
 0x29a   : > { %v9593_v5 = vadd.f32 %v3435_v29, %v2845_v30  ;;  %v9612_v50 = vrot.slane %v10896_v13, 5  ;;  %v9616_v57 = vrot.slane %v10897_v6, 4  ;;  %v3688_v30 = vsel %vm8391_vm13, %v3686_v49, %v3687_v58 }
 0x29b   : > { %v3242_v29 = vsel %vm8501_vm1, %v3237_v9, %v9554_v21  ;;  %v2345_v8 = vsel %vm8391_vm13, %v2343_v52, %v10898_v1  ;;  %v3733_v38 = vunpack.c.l.b16 %v3688_v30  ;;  %v3331_v49 = vunpack.c.l.b16 %v3252_v34  ;;  %v9635_v9 = vld [vmem:[#allocation2 + $0xbc] sm:$0x1]  ;;  %v3541_v34 = vld [vmem:[#allocation2 + $0xb4] sm:$0xe] }
 0x29c   : > { %v2492_v11 = vpop.f32.mrf.mxu3  ;;  %v9633_v58 = vrot.slane %v3263_v32, 5  ;;  %v3269_v21 = vrot.slane %v3267_v17, 4  ;;  %v7605_v13 = vrot.slane %v4891_v16, 9  ;;  %v5035_v27 = vrot.slane %v9626_v3, 5 }
 0x29d   : > { %v2557_v55 = vadd.f32 %v2492_v11, %v8897_v4  ;;  %v10899_v4 = vld [vmem:[#allocation41_spill] sm:$0xff]  ;;  %v9637_v11 = vpack.c.b16 %v3733_v38, %v3732_v12  ;;  %v3691_v52 = vrot.slane %v9586_v2, 5  ;;  %v3330_v56 = vunpack.c.l.b16 %v3242_v29 }
 0x29e   : > { %v2846_v28 = vadd.f32 %v10899_v4, %v2556_v62  ;;  %v2385_v6 = vunpack.c.l.b16 %v2345_v8  ;;  %v3256_v62 = vrot.slane %v3254_v23, 4  ;;  %v3259_v32 = vrot.slane %v3257_v45, 5  ;;  %v9649_v8 = vpop.f32.mrf.mxu1  ;;  %v10901_v45 = vld [vmem:[#allocation14_spill] sm:$0xff] }
 0x29f   : > { %10900 = vst [vmem:[#allocation41_spill] sm:$0xff] %v9637_v11  ;;  %v5036_v17 = vsel %vm8391_vm13, %v7605_v13, %v5035_v27  ;;  %v5037_v30 = vrot.slane %v5035_v27, 4  ;;  %v5038_v1 = vrot.slane %v9635_v9, 5  ;;  %v3349_v12 = vpack.c.b16 %v3331_v49, %v3330_v56 }
 0x2a0   : > { %v3270_v16 = vor.u32 %v3269_v21, %v9633_v58  ;;  %v3693_v38 = vrot.slane %v3691_v52, 4  ;;  %v3694_v4 = vrot.slane %v2913_v59, 5  ;;  %v2384_v2 = vunpack.c.l.b16 %v2342_v0 }
 0x2a1   : > { %v3437_v20 = vpop.f32.mrf.mxu2  ;;  %v5039_v29 = vsel %vm8391_vm13, %v5037_v30, %v5038_v1  ;;  %v7466_v23 = vrot.slane %v3541_v34, 9  ;;  %v5083_v13 = vunpack.c.l.b16 %v5036_v17  ;;  %v3260_v56 = vor.u32 %v3259_v32, %v3256_v62  ;;  %v7951_v1 = vld [vmem:[#allocation2 + $0xb8] sm:$0xf]  ;;  %v2914_v62 = vld [vmem:[#allocation2 + $0xc0] sm:$0xf] }
 0x2a2   : > { %v9641_v54 = vadd.f32 %v3437_v20, %v2846_v28  ;;  %v3273_v28 = vshll.u32 %v2913_v59, 16  ;;  %v5084_v27 = vunpack.c.l.b16 %v5039_v29  ;;  %v3695_v49 = vsel %vm8391_vm13, %v3693_v38, %v3694_v4 }
 0x2a3   : > { %v2402_v21 = vpack.c.b16 %v2385_v6, %v2384_v2  ;;  %v4381_v0 = vor.u32 %v9616_v57, %v9612_v50  ;;  %v3692_v59 = vsel %vm8391_vm13, %v7466_v23, %v3691_v52  ;;  %v2847_v34 = vadd.f32 %v9255_v18, %v2557_v55  ;;  %v2915_v52 = vld [vmem:[#allocation2 + $0xc4] sm:$0xf] }
 0x2a4   : > { %v2494_v11 = vpop.f32.mrf.mxu3  ;;  %v3271_v30 = vrot.slane %v3270_v16, 4  ;;  %v10903_v6 = vpack.c.b16 %v9448_v36, %v9480_v14  ;;  %v3275_v57 = vrot.slane %v3273_v28, 5  ;;  %v3734_v32 = vunpack.c.l.b16 %v3692_v59 }
 0x2a5   : > { %v2558_v20 = vadd.f32 %v2494_v11, %v10901_v45  ;;  %v2348_v11 = vrot.slane %v7951_v1, 5  ;;  %v9660_v45 = vpack.c.b16 %v5084_v27, %v5083_v13  ;;  %v3735_v18 = vunpack.c.l.b16 %v3695_v49  ;;  %v2189_v13 = vld [vmem:[#allocation2 + $0xb4] sm:$0xe]  ;;  %v7953_v1 = vld [vmem:[#allocation2 + $0x58] sm:$0xf] }
 0x2a6   : > { %7449 = vmatmul.msk.bf16.gmra.mxu2 %vm1375_vm7, %v3349_v12  ;;  %v10904_v55 = vor.u32 %v9457_v42, %v9450_v19  ;;  %v4382_v38 = vrot.slane %v4381_v0, 4  ;;  %v10905_v4 = vshll.u32 %v9135_v47, 16  ;;  %v3261_v29 = vrot.slane %v3260_v56, 4  ;;  %v10907_v42 = vld [vmem:[#allocation15_spill] sm:$0xff] }
 0x2a7   : > { %10902 = vst [vmem:[#allocation14_spill] sm:$0xff] %v9660_v45  ;;  %v3276_v23 = vsel %vm8501_vm1, %v3271_v30, %v3275_v57  ;;  %v2350_v36 = vrot.slane %v2348_v11, 4  ;;  %v9676_v14 = vpack.c.b16 %v3735_v18, %v3734_v32  ;;  %v3278_v27 = vshrl.u32 %v2914_v62, 16  ;;  %v9687_v57 = vpop.f32.mrf.mxu1 }
 0x2a8   : > { %7346 = vmatmul.msk.bf16.gmra.mxu3 %vm1375_vm7, %v2402_v21  ;;  %7579 = vmatmul.msk.bf16.gmra.mxu1 %vm1375_vm7, %v10903_v6  ;;  %v4372_v16 = vrot.slane %v10904_v55, 4  ;;  %v4386_v2 = vrot.slane %v10905_v4, 5  ;;  %v3281_v21 = vshll.u32 %v2914_v62, 16  ;;  %v3287_v49 = vshll.u32 %v2915_v52, 16  ;;  %v10908_v62 = vld [vmem:[#allocation48_spill] sm:$0xff] }
 0x2a9   : > { %v3440_v17 = vpop.f32.mrf.mxu2  ;;  %10906 = vst [vmem:[#allocation59_spill] sm:$0xff] %v9676_v14  ;;  %v3291_v59 = vshrl.u32 %v2915_v52, 16  ;;  %v3266_v56 = vsel %vm8501_vm1, %v3261_v29, %v9633_v58  ;;  %v4402_v6 = vshrl.u32 %v7953_v1, 16  ;;  %v2848_v52 = vadd.f32 %v10908_v62, %v2558_v20 }
 0x2aa   : > { %v9662_v12 = vadd.f32 %v3440_v17, %v2847_v34  ;;  %v7952_v34 = vld [vmem:[#allocation2 + $0xbc] sm:$0x1]  ;;  %v4377_v47 = vsel %vm8501_vm1, %v4372_v16, %v9612_v50  ;;  %v4387_v30 = vsel %vm8501_vm1, %v4382_v38, %v4386_v2  ;;  %v4398_v17 = vshll.u32 %v7953_v1, 16  ;;  %v4235_v50 = vld [vmem:[#allocation2 + $0x54] sm:$0xf] }
 0x2ab   : > { %v2351_v19 = vrot.slane %v7952_v34, 5  ;;  %v3333_v32 = vunpack.c.l.b16 %v3276_v23  ;;  %v7327_v18 = vrot.slane %v2189_v13, 9  ;;  %v3280_v4 = vrot.slane %v3278_v27, 4  ;;  %v2916_v2 = vld [vmem:[#allocation2 + $0xc8] sm:$0x1] }
 0x2ac   : > { %v2497_v28 = vpop.f32.mrf.mxu3  ;;  %v3289_v58 = vrot.slane %v3287_v49, 5  ;;  %v3293_v29 = vrot.slane %v3291_v59, 4  ;;  %v3332_v38 = vunpack.c.l.b16 %v3266_v56  ;;  %v4663_v1 = vunpack.c.l.b16 %v4377_v47  ;;  %v10909_v59 = vld [vmem:[#allocation16_spill] sm:$0xff] }
 0x2ad   : > { %v2559_v0 = vadd.f32 %v2497_v28, %v10907_v42  ;;  %v2352_v55 = vsel %vm8391_vm13, %v2350_v36, %v2351_v19  ;;  %v3283_v28 = vrot.slane %v3281_v21, 5  ;;  %v2349_v42 = vsel %vm8391_vm13, %v7327_v18, %v2348_v11 }
 0x2ae   : > { %v4664_v20 = vunpack.c.l.b16 %v4387_v30  ;;  %v4389_v23 = vshrl.u32 %v4235_v50, 16  ;;  %v3350_v13 = vpack.c.b16 %v3333_v32, %v3332_v38  ;;  %v2387_v62 = vunpack.c.l.b16 %v2352_v55 }
 0x2af   : > { %v4392_v14 = vshll.u32 %v4235_v50, 16  ;;  %v4400_v36 = vrot.slane %v4398_v17, 5  ;;  %v3284_v45 = vor.u32 %v3283_v28, %v3280_v4  ;;  %v3294_v27 = vor.u32 %v3293_v29, %v3289_v58  ;;  %v9699_v4 = vpop.f32.mrf.mxu1 }
 0x2b0   : > { %v3297_v21 = vshll.u32 %v2916_v2, 16  ;;  %v4404_v49 = vrot.slane %v4402_v6, 4  ;;  %v2386_v56 = vunpack.c.l.b16 %v2349_v42  ;;  %v2849_v11 = vadd.f32 %v9329_v48, %v2559_v0  ;;  %v7954_v6 = vld [vmem:[#allocation2 + $0x5c] sm:$0x1] }
 0x2b1   : > { %v3442_v16 = vpop.f32.mrf.mxu2  ;;  %v4391_v30 = vrot.slane %v4389_v23, 4  ;;  %v4394_v18 = vrot.slane %v4392_v14, 5  ;;  %v3285_v55 = vrot.slane %v3284_v45, 4  ;;  %v3295_v50 = vrot.slane %v3294_v27, 4  ;;  %v10910_v42 = vld [vmem:[#allocation17_spill] sm:$0xff] }
 0x2b2   : > { %v9692_v34 = vadd.f32 %v3442_v16, %v2848_v52  ;;  %v4691_v16 = vpack.c.b16 %v4664_v20, %v4663_v1  ;;  %v2403_v47 = vpack.c.b16 %v2387_v62, %v2386_v56  ;;  %v3299_v17 = vrot.slane %v3297_v21, 5 }
 0x2b3   : > { %v4405_v38 = vor.u32 %v4404_v49, %v4400_v36  ;;  %v4408_v29 = vshll.u32 %v7954_v6, 16  ;;  %v3290_v48 = vsel %vm8501_vm1, %v3285_v55, %v3289_v58  ;;  %v4395_v14 = vor.u32 %v4394_v18, %v4391_v30  ;;  %v7955_v49 = vld [vmem:[#allocation2 + $0x64] sm:$0xf] }
 0x2b4   : > { %v2499_v19 = vpop.f32.mrf.mxu3  ;;  %v3300_v45 = vsel %vm8501_vm1, %v3295_v50, %v3299_v17  ;;  %v4426_v58 = vshrl.u32 %v7955_v49, 16  ;;  %v10911_v17 = vld [vmem:[#allocation18_spill] sm:$0xff] }
 0x2b5   : > { %v2560_v52 = vadd.f32 %v2499_v19, %v10909_v59  ;;  %v4406_v0 = vrot.slane %v4405_v38, 4  ;;  %v4410_v20 = vrot.slane %v4408_v29, 5  ;;  %v3335_v62 = vunpack.c.l.b16 %v3300_v45 }
 0x2b6   : > { %7450 = vmatmul.msk.bf16.gmra.mxu2 %vm1375_vm7, %v3350_v13  ;;  %v3334_v13 = vunpack.c.l.b16 %v3290_v48  ;;  %v4396_v27 = vrot.slane %v4395_v14, 4  ;;  %v4422_v59 = vshll.u32 %v7955_v49, 16  ;;  %v4428_v50 = vrot.slane %v4426_v58, 4  ;;  %v7956_v48 = vld [vmem:[#allocation2 + $0x1c] sm:$0xf] }
 0x2b7   : > { %v2850_v23 = vadd.f32 %v9368_v22, %v2560_v52  ;;  %v4411_v21 = vsel %vm8501_vm1, %v4406_v0, %v4410_v20  ;;  %v3600_v45 = vrot.slane %v7956_v48, 5 }
 0x2b8   : > { %7347 = vmatmul.msk.bf16.gmra.mxu3 %vm1375_vm7, %v2403_v47  ;;  %7580 = vmatmul.msk.bf16.gmra.mxu1 %vm1375_vm7, %v4691_v16  ;;  %v4238_v16 = vld [vmem:[#allocation2 + $0x60] sm:$0xf]  ;;  %v9717_v47 = vpop.f32.mrf.mxu1  ;;  %v3351_v30 = vpack.c.b16 %v3335_v62, %v3334_v13  ;;  %v4666_v22 = vunpack.c.l.b16 %v4411_v21  ;;  %v4424_v55 = vrot.slane %v4422_v59, 5  ;;  %v7957_v13 = vld [vmem:[#allocation2 + $0x68] sm:$0x1] }
 0x2b9   : > { %v3445_v32 = vpop.f32.mrf.mxu2  ;;  %v4413_v18 = vshrl.u32 %v4238_v16, 16  ;;  %v4432_v62 = vshll.u32 %v7957_v13, 16  ;;  %v3528_v21 = vld [vmem:[#allocation2 + $0x18] sm:$0xe]  ;;  %v10913_v59 = vld [vmem:[#allocation19_spill] sm:$0xff] }
 0x2ba   : > { %v9701_v28 = vadd.f32 %v3445_v32, %v2849_v11  ;;  %v4401_v11 = vsel %vm8501_vm1, %v4396_v27, %v4400_v36  ;;  %v4416_v32 = vshll.u32 %v4238_v16, 16  ;;  %v7958_v16 = vld [vmem:[#allocation2 + $0x20] sm:$0x1] }
 0x2bb   : > { %v4665_v6 = vunpack.c.l.b16 %v4401_v11  ;;  %v4415_v14 = vrot.slane %v4413_v18, 4  ;;  %v3603_v11 = vrot.slane %v7958_v16, 5 }
 0x2bc   : > { %v2502_v2 = vpop.f32.mrf.mxu3  ;;  %v4418_v0 = vrot.slane %v4416_v32, 5 }
 0x2bd   : > { %v2561_v1 = vadd.f32 %v2502_v2, %v10910_v42  ;;  %v4692_v2 = vpack.c.b16 %v4666_v22, %v4665_v6  ;;  %v4429_v42 = vor.u32 %v4428_v50, %v4424_v55  ;;  %v7959_v6 = vld [vmem:[#allocation2 + $0x70] sm:$0xf] }
 0x2bf   : > { %v2851_v29 = vadd.f32 %v9403_v37, %v2561_v1  ;;  %v4419_v37 = vor.u32 %v4418_v0, %v4415_v14  ;;  %v4430_v1 = vrot.slane %v4429_v42, 4 }
 0x2c0   : > { %v9727_v49 = vpop.f32.mrf.mxu1 }
 0x2c1   : > { %v3447_v19 = vpop.f32.mrf.mxu2  ;;  %v4420_v50 = vrot.slane %v4419_v37, 4  ;;  %v10915_v37 = vld [vmem:[#allocation22_spill] sm:$0xff] }
 0x2c2   : > { %v9713_v56 = vadd.f32 %v3447_v19, %v2850_v23  ;;  %v10912_v23 = vld [vmem:[#allocation20_spill] sm:$0xff]  ;;  %v3602_v19 = vrot.slane %v3600_v45, 4 }
 0x2c4   : > { %v2504_v52 = vpop.f32.mrf.mxu3  ;;  %v3604_v18 = vsel %vm8391_vm13, %v3602_v19, %v3603_v11 }
 0x2c5   : > { %v2562_v38 = vadd.f32 %v2504_v52, %v10911_v17  ;;  %v7453_v52 = vrot.slane %v3528_v21, 9 }
 0x2c6   : > { %7451 = vmatmul.msk.bf16.gmra.mxu2 %vm1375_vm7, %v3351_v30  ;;  %v4434_v30 = vrot.slane %v4432_v62, 5 }
 0x2c7   : > { %v2852_v22 = vadd.f32 %v9452_v10, %v2562_v38  ;;  %v3601_v14 = vsel %vm8391_vm13, %v7453_v52, %v3600_v45  ;;  %v4425_v10 = vsel %vm8501_vm1, %v4420_v50, %v4424_v55  ;;  %v3709_v38 = vunpack.c.l.b16 %v3604_v18 }
 0x2c8   : > { %7472 = vmatmul.msk.bf16.vlgmr.msra.gmra.mxu3 %vm1375_vm7, %v10912_v23  ;;  %7581 = vmatmul.msk.bf16.gmra.mxu1 %vm1375_vm7, %v4692_v2  ;;  %v4435_v17 = vsel %vm8501_vm1, %v4430_v1, %v4434_v30  ;;  %v4450_v2 = vshrl.u32 %v7959_v6, 16  ;;  %v3708_v1 = vunpack.c.l.b16 %v3601_v14  ;;  %v9744_v16 = vpop.f32.mrf.mxu1  ;;  %v7960_v30 = vld [vmem:[#allocation2 + $0x28] sm:$0xf]  ;;  %v3529_v14 = vld [vmem:[#allocation2 + $0x24] sm:$0xe] }
 0x2c9   : > { %v3450_v36 = vpop.f32.mrf.mxu2  ;;  %v4668_v0 = vunpack.c.l.b16 %v4435_v17 }
 0x2ca   : > { %v9722_v20 = vadd.f32 %v3450_v36, %v2851_v29  ;;  %v4446_v29 = vshll.u32 %v7959_v6, 16  ;;  %v4241_v36 = vld [vmem:[#allocation2 + $0x6c] sm:$0xf]  ;;  %v4452_v19 = vrot.slane %v4450_v2, 4  ;;  %v3739_v11 = vpack.c.b16 %v3709_v38, %v3708_v1  ;;  %v7961_v6 = vld [vmem:[#allocation2 + $0x74] sm:$0x1] }
 0x2cb   : > { %v4437_v23 = vshrl.u32 %v4241_v36, 16  ;;  %v4440_v13 = vshll.u32 %v4241_v36, 16 }
 0x2cc   : > { %v2507_v27 = vpop.f32.mrf.mxu3  ;;  %v4448_v62 = vrot.slane %v4446_v29, 5  ;;  %v4456_v29 = vshll.u32 %v7961_v6, 16 }
 0x2cd   : > { %v2563_v58 = vadd.f32 %v2507_v27, %v10913_v59  ;;  %v10914_v27 = vld [vmem:[#allocation21_spill] sm:$0xff]  ;;  %v4667_v59 = vunpack.c.l.b16 %v4425_v10  ;;  %v4439_v18 = vrot.slane %v4437_v23, 4  ;;  %v10916_v10 = vld [vmem:[#allocation23_spill] sm:$0xff] }
 0x2ce   : > { %v4453_v50 = vor.u32 %v4452_v19, %v4448_v62  ;;  %v4458_v23 = vrot.slane %v4456_v29, 5  ;;  %v7454_v19 = vrot.slane %v3529_v14, 9 }
 0x2cf   : > { %v2853_v45 = vadd.f32 %v9505_v51, %v2563_v58  ;;  %v4693_v55 = vpack.c.b16 %v4668_v0, %v4667_v59  ;;  %v7962_v0 = vld [vmem:[#allocation2 + $0x2c] sm:$0x1] }
 0x2d0   : > { %v4454_v58 = vrot.slane %v4453_v50, 4 }
 0x2d1   : > { %v3452_v32 = vpop.f32.mrf.mxu2 }
 0x2d2   : > { %v9735_v48 = vadd.f32 %v3452_v32, %v2852_v22  ;;  %v3607_v22 = vrot.slane %v7960_v30, 5  ;;  %v4442_v32 = vrot.slane %v4440_v13, 5  ;;  %v4459_v59 = vsel %vm8501_vm1, %v4454_v58, %v4458_v23  ;;  %v9757_v30 = vpop.f32.mrf.mxu1 }
 0x2d3   : > { %v4670_v50 = vunpack.c.l.b16 %v4459_v59 }
 0x2d4   : > { %v2509_v42 = vpop.f32.mrf.mxu3  ;;  %v3609_v2 = vrot.slane %v3607_v22, 4  ;;  %v4443_v51 = vor.u32 %v4442_v32, %v4439_v18  ;;  %v4244_v18 = vld [vmem:[#allocation2 + $0x78] sm:$0xf] }
 0x2d5   : > { %v2564_v21 = vadd.f32 %v2509_v42, %v10914_v27  ;;  %v3610_v42 = vrot.slane %v7962_v0, 5  ;;  %v4461_v29 = vshrl.u32 %v4244_v18, 16 }
 0x2d6   : > { %7612 = vmatmul.msk.bf16.vlgmr.msra.gmra.mxu2 %vm1375_vm7, %v10915_v37  ;;  %v4444_v1 = vrot.slane %v4443_v51, 4  ;;  %v10917_v51 = vld [vmem:[#allocation25_spill] sm:$0xff] }
 0x2d7   : > { %v2854_v13 = vadd.f32 %v9561_v24, %v2564_v21  ;;  %v3611_v27 = vsel %vm8391_vm13, %v3609_v2, %v3610_v42  ;;  %v3608_v24 = vsel %vm8391_vm13, %v7454_v19, %v3607_v22  ;;  %v4464_v2 = vshll.u32 %v4244_v18, 16  ;;  %v7964_v19 = vld [vmem:[#allocation2 + $0x34] sm:$0xf] }
 0x2d8   : > { %7473 = vmatmul.msk.bf16.gmra.mxu3 %vm1375_vm7, %v3739_v11  ;;  %7582 = vmatmul.msk.bf16.gmra.mxu1 %vm1375_vm7, %v4693_v55  ;;  %v4449_v21 = vsel %vm8501_vm1, %v4444_v1, %v4448_v62  ;;  %v3711_v32 = vunpack.c.l.b16 %v3611_v27  ;;  %v3710_v0 = vunpack.c.l.b16 %v3608_v24  ;;  %v3614_v62 = vrot.slane %v7964_v19, 5 }
 0x2d9   : > { %v3455_v52 = vpop.f32.mrf.mxu2  ;;  %v4669_v42 = vunpack.c.l.b16 %v4449_v21  ;;  %v4466_v1 = vrot.slane %v4464_v2, 5 }
 0x2da   : > { %v9747_v17 = vadd.f32 %v3455_v52, %v2853_v45  ;;  %v7963_v45 = vld [vmem:[#allocation2 + $0x7c] sm:$0xf]  ;;  %v3740_v22 = vpack.c.b16 %v3711_v32, %v3710_v0  ;;  %v9773_v18 = vpop.f32.mrf.mxu1  ;;  %v3616_v24 = vrot.slane %v3614_v62, 4 }
 0x2db   : > { %v4470_v11 = vshll.u32 %v7963_v45, 16  ;;  %v4474_v55 = vshrl.u32 %v7963_v45, 16 }
 0x2dc   : > { %v2512_v36 = vpop.f32.mrf.mxu3 }
 0x2dd   : > { %v2565_v38 = vadd.f32 %v2512_v36, %v10916_v10  ;;  %v4472_v36 = vrot.slane %v4470_v11, 5  ;;  %v4476_v14 = vrot.slane %v4474_v55, 4  ;;  %v10918_v10 = vld [vmem:[#allocation24_spill] sm:$0xff]  ;;  %v7965_v11 = vld [vmem:[#allocation2 + $0x80] sm:$0x1] }
 0x2de   : > { %v4480_v55 = vshll.u32 %v7965_v11, 16 }
 0x2df   : > { %v2855_v23 = vadd.f32 %v9600_v43, %v2565_v38  ;;  %v4477_v59 = vor.u32 %v4476_v14, %v4472_v36  ;;  %v3530_v38 = vld [vmem:[#allocation2 + $0x30] sm:$0xe] }
 0x2e0   : > { %v4482_v14 = vrot.slane %v4480_v55, 5 }
 0x2e1   : > { %v3457_v37 = vpop.f32.mrf.mxu2  ;;  %v4478_v32 = vrot.slane %v4477_v59, 4 }
 0x2e2   : > { %v9759_v52 = vadd.f32 %v3457_v37, %v2854_v13  ;;  %v4694_v13 = vpack.c.b16 %v4670_v50, %v4669_v42  ;;  %v4463_v37 = vrot.slane %v4461_v29, 4  ;;  %v10919_v50 = vld [vmem:[#allocation27_spill] sm:$0xff]  ;;  %v7966_v29 = vld [vmem:[#allocation2 + $0x38] sm:$0x1] }
 0x2e3   : > { %v3617_v2 = vrot.slane %v7966_v29, 5 }
 0x2e4   : > { %v2514_v6 = vpop.f32.mrf.mxu3  ;;  %v4467_v21 = vor.u32 %v4466_v1, %v4463_v37  ;;  %v4247_v1 = vld [vmem:[#allocation2 + $0x84] sm:$0xf] }
 0x2e5   : > { %v2566_v58 = vadd.f32 %v2514_v6, %v10917_v51  ;;  %v3618_v0 = vsel %vm8391_vm13, %v3616_v24, %v3617_v2  ;;  %v4485_v24 = vshrl.u32 %v4247_v1, 16  ;;  %v10921_v2 = vld [vmem:[#allocation26_spill] sm:$0xff] }
 0x2e6   : > { %7613 = vmatmul.msk.bf16.gmra.mxu2 %vm1375_vm7, %v10918_v10  ;;  %v7455_v10 = vrot.slane %v3530_v38, 9 }
 0x2e7   : > { %v2856_v51 = vadd.f32 %v9649_v8, %v2566_v58  ;;  %v3713_v58 = vunpack.c.l.b16 %v3618_v0  ;;  %v7968_v0 = vld [vmem:[#allocation2 + $0x40] sm:$0xf] }
 0x2e8   : > { %7474 = vmatmul.msk.bf16.gmra.mxu3 %vm1375_vm7, %v3740_v22  ;;  %7583 = vmatmul.msk.bf16.gmra.mxu1 %vm1375_vm7, %v4694_v13  ;;  %v4483_v22 = vsel %vm8501_vm1, %v4478_v32, %v4482_v14  ;;  %v7967_v13 = vld [vmem:[#allocation2 + $0x88] sm:$0xf]  ;;  %v3615_v59 = vsel %vm8391_vm13, %v7455_v10, %v3614_v62  ;;  %v9787_v32 = vpop.f32.mrf.mxu1 }
 0x2e9   : > { %v3460_v27 = vpop.f32.mrf.mxu2  ;;  %v4494_v19 = vshll.u32 %v7967_v13, 16  ;;  %v4672_v11 = vunpack.c.l.b16 %v4483_v22  ;;  %v3712_v14 = vunpack.c.l.b16 %v3615_v59  ;;  %v4487_v22 = vrot.slane %v4485_v24, 4 }
 0x2ea   : > { %v9769_v45 = vadd.f32 %v3460_v27, %v2855_v23  ;;  %v4468_v23 = vrot.slane %v4467_v21, 4  ;;  %v4498_v27 = vshrl.u32 %v7967_v13, 16 }
 0x2eb   : > { %v4496_v38 = vrot.slane %v4494_v19, 5  ;;  %v3741_v10 = vpack.c.b16 %v3713_v58, %v3712_v14  ;;  %v10922_v58 = vld [vmem:[#allocation30_spill] sm:$0xff] }
 0x2ec   : > { %v2517_v43 = vpop.f32.mrf.mxu3  ;;  %v4473_v8 = vsel %vm8501_vm1, %v4468_v23, %v4472_v36  ;;  %v4500_v21 = vrot.slane %v4498_v27, 4 }
 0x2ed   : > { %v2567_v6 = vadd.f32 %v2517_v43, %v10919_v50  ;;  %v4488_v43 = vshll.u32 %v4247_v1, 16  ;;  %v10920_v50 = vld [vmem:[#allocation28_spill] sm:$0xff]  ;;  %v7969_v1 = vld [vmem:[#allocation2 + $0x8c] sm:$0x1] }
 0x2ee   : > { %v4501_v19 = vor.u32 %v4500_v21, %v4496_v38 }
 0x2ef   : > { %v2857_v62 = vadd.f32 %v9687_v57, %v2567_v6  ;;  %v4490_v13 = vrot.slane %v4488_v43, 5 }
 0x2f0   : > { %v4502_v6 = vrot.slane %v4501_v19, 4  ;;  %v9798_v43 = vpop.f32.mrf.mxu1  ;;  %v4250_v19 = vld [vmem:[#allocation2 + $0x90] sm:$0xf] }
 0x2f1   : > { %v3462_v42 = vpop.f32.mrf.mxu2  ;;  %v4491_v57 = vor.u32 %v4490_v13, %v4487_v22  ;;  %v4522_v22 = vshrl.u32 %v9462_v15, 16 }
 0x2f2   : > { %v9781_v37 = vadd.f32 %v3462_v42, %v2856_v51  ;;  %v4671_v51 = vunpack.c.l.b16 %v4473_v8  ;;  %v3621_v42 = vrot.slane %v7968_v0, 5 }
 0x2f4   : > { %v2519_v55 = vpop.f32.mrf.mxu3  ;;  %v4695_v36 = vpack.c.b16 %v4672_v11, %v4671_v51  ;;  %v3623_v59 = vrot.slane %v3621_v42, 4 }
 0x2f5   : > { %v2568_v29 = vadd.f32 %v2519_v55, %v10920_v50  ;;  %v4504_v55 = vshll.u32 %v7969_v1, 16  ;;  %v3531_v50 = vld [vmem:[#allocation2 + $0x3c] sm:$0xe] }
 0x2f6   : > { %7614 = vmatmul.msk.bf16.gmra.mxu2 %vm1375_vm7, %v10921_v2  ;;  %v7970_v2 = vld [vmem:[#allocation2 + $0x44] sm:$0x1]  ;;  %v7456_v51 = vrot.slane %v3531_v50, 9  ;;  %v4512_v50 = vshll.u32 %v4250_v19, 16 }
 0x2f7   : > { %v3624_v14 = vrot.slane %v7970_v2, 5  ;;  %v4506_v24 = vrot.slane %v4504_v55, 5  ;;  %v2858_v21 = vadd.f32 %v9699_v4, %v2568_v29 }
 0x2f8   : > { %7475 = vmatmul.msk.bf16.gmra.mxu3 %vm1375_vm7, %v3741_v10  ;;  %7584 = vmatmul.msk.bf16.gmra.mxu1 %vm1375_vm7, %v4695_v36  ;;  %v4492_v36 = vrot.slane %v4491_v57, 4  ;;  %v3622_v1 = vsel %vm8391_vm13, %v7456_v51, %v3621_v42 }
 0x2f9   : > { %v3465_v23 = vpop.f32.mrf.mxu2  ;;  %v4507_v0 = vsel %vm8501_vm1, %v4502_v6, %v4506_v24  ;;  %v4524_v6 = vrot.slane %v4522_v22, 4  ;;  %v4528_v22 = vshll.u32 %v9494_v26, 16 }
 0x2fa   : > { %v9793_v27 = vadd.f32 %v3465_v23, %v2857_v62  ;;  %v3625_v62 = vsel %vm8391_vm13, %v3623_v59, %v3624_v14  ;;  %v4518_v23 = vshll.u32 %v9462_v15, 16  ;;  %v4497_v4 = vsel %vm8501_vm1, %v4492_v36, %v4496_v38  ;;  %v10925_v14 = vld [vmem:[#allocation29_spill] sm:$0xff] }
 0x2fb   : > { %v3715_v29 = vunpack.c.l.b16 %v3625_v62  ;;  %v4674_v55 = vunpack.c.l.b16 %v4507_v0  ;;  %v3714_v15 = vunpack.c.l.b16 %v3622_v1  ;;  %v4673_v24 = vunpack.c.l.b16 %v4497_v4 }
 0x2fc   : > { %v2522_v8 = vpop.f32.mrf.mxu3  ;;  %v4520_v57 = vrot.slane %v4518_v23, 5  ;;  %v4514_v0 = vrot.slane %v4512_v50, 5 }
 0x2fd   : > { %v2569_v11 = vadd.f32 %v2522_v8, %v10922_v58  ;;  %v4509_v8 = vshrl.u32 %v4250_v19, 16  ;;  %v10924_v58 = vld [vmem:[#allocation31_spill] sm:$0xff]  ;;  %v3742_v42 = vpack.c.b16 %v3715_v29, %v3714_v15  ;;  %v4696_v51 = vpack.c.b16 %v4674_v55, %v4673_v24  ;;  %v9817_v19 = vpop.f32.mrf.mxu1  ;;  %v10926_v55 = vld [vmem:[#allocation33_spill] sm:$0xff] }
 0x2ff   : > { %v4511_v36 = vrot.slane %v4509_v8, 4  ;;  %v7972_v8 = vld [vmem:[#allocation2 + $0x50] sm:$0x1] }
 0x300   : > { %v3631_v50 = vrot.slane %v7972_v8, 5 }
 0x301   : > { %v3467_v10 = vpop.f32.mrf.mxu2  ;;  %v4515_v4 = vor.u32 %v4514_v0, %v4511_v36 }
 0x302   : > { %v9807_v13 = vadd.f32 %v3467_v10, %v2858_v21  ;;  %v2859_v21 = vadd.f32 %v9717_v47, %v2569_v11  ;;  %v7971_v10 = vld [vmem:[#allocation2 + $0x4c] sm:$0xf]  ;;  %v3532_v11 = vld [vmem:[#allocation2 + $0x48] sm:$0xe] }
 0x303   : > { %v3628_v38 = vrot.slane %v7971_v10, 5  ;;  %v4253_v10 = vld [vmem:[#allocation2 + $0x9c] sm:$0xf] }
 0x304   : > { %10923 = vst [vmem:[#allocation15_spill] sm:$0xff] %v9807_v13  ;;  %v2524_v59 = vpop.f32.mrf.mxu3  ;;  %v4525_v13 = vor.u32 %v4524_v6, %v4520_v57  ;;  %v4530_v6 = vrot.slane %v4528_v22, 5 }
 0x305   : > { %v2570_v2 = vadd.f32 %v2524_v59, %v10924_v58  ;;  %v3630_v1 = vrot.slane %v3628_v38, 4 }
 0x306   : > { %7615 = vmatmul.msk.bf16.gmra.mxu2 %vm1375_vm7, %v10925_v14  ;;  %v4526_v29 = vrot.slane %v4525_v13, 4  ;;  %v7457_v14 = vrot.slane %v3532_v11, 9  ;;  %v4546_v13 = vshrl.u32 %v9526_v46, 16 }
 0x307   : > { %v2860_v58 = vadd.f32 %v9727_v49, %v2570_v2  ;;  %v3632_v15 = vsel %vm8391_vm13, %v3630_v1, %v3631_v50  ;;  %v9838_v2 = vpop.f32.mrf.mxu1  ;;  %v4533_v1 = vshrl.u32 %v4253_v10, 16 }
 0x308   : > { %7476 = vmatmul.msk.bf16.gmra.mxu3 %vm1375_vm7, %v3742_v42  ;;  %7585 = vmatmul.msk.bf16.gmra.mxu1 %vm1375_vm7, %v4696_v51  ;;  %v4531_v26 = vsel %vm8501_vm1, %v4526_v29, %v4530_v6  ;;  %v4542_v42 = vshll.u32 %v9526_v46, 16  ;;  %v3717_v36 = vunpack.c.l.b16 %v3632_v15  ;;  %v10927_v29 = vld [vmem:[#allocation34_spill] sm:$0xff] }
 0x309   : > { %v3470_v62 = vpop.f32.mrf.mxu2  ;;  %v4676_v0 = vunpack.c.l.b16 %v4531_v26 }
 0x30a   : > { %v9819_v23 = vadd.f32 %v3470_v62, %v2859_v21  ;;  %v4516_v21 = vrot.slane %v4515_v4, 4  ;;  %v3629_v62 = vsel %vm8391_vm13, %v7457_v14, %v3628_v38  ;;  %v4544_v11 = vrot.slane %v4542_v42, 5  ;;  %v7857_v42 = vld [vmem:[%s10800_s5] sm:$0xff] }
 0x30b   : > { %v4548_v4 = vrot.slane %v4546_v13, 4  ;;  %v3716_v8 = vunpack.c.l.b16 %v3629_v62  ;;  %6106 = vmatpush.bf16.msrb.mxu3 %v7857_v42  ;;  %v3533_v62 = vld [vmem:[#allocation2 + $0x54] sm:$0xe] }
 0x30c   : > { %v2527_v47 = vpop.f32.mrf.mxu3  ;;  %v4521_v49 = vsel %vm8501_vm1, %v4516_v21, %v4520_v57 }
 0x30d   : > { %v2571_v59 = vadd.f32 %v2527_v47, %v10926_v55  ;;  %v4536_v47 = vshll.u32 %v4253_v10, 16  ;;  %v10928_v55 = vld [vmem:[#allocation32_spill] sm:$0xff]  ;;  %v4675_v50 = vunpack.c.l.b16 %v4521_v49  ;;  %v3743_v6 = vpack.c.b16 %v3717_v36, %v3716_v8 }
 0x30e   : > { %v4549_v26 = vor.u32 %v4548_v4, %v4544_v11  ;;  %v7458_v8 = vrot.slane %v3533_v62, 9 }
 0x30f   : > { %v2861_v38 = vadd.f32 %v9744_v16, %v2571_v59  ;;  %v4697_v57 = vpack.c.b16 %v4676_v0, %v4675_v50  ;;  %v4538_v21 = vrot.slane %v4536_v47, 5  ;;  %v4552_v16 = vshll.u32 %v9542_v7, 16  ;;  %v9852_v0 = vpop.f32.mrf.mxu1  ;;  %v7974_v47 = vld [vmem:[#allocation2 + $0x5c] sm:$0x1] }
 0x310   : > { %v4550_v36 = vrot.slane %v4549_v26, 4  ;;  %v3638_v4 = vrot.slane %v7974_v47, 5 }
 0x311   : > { %v3472_v24 = vpop.f32.mrf.mxu2 }
 0x312   : > { %v9832_v51 = vadd.f32 %v3472_v24, %v2860_v58  ;;  %v7973_v58 = vld [vmem:[#allocation2 + $0x58] sm:$0xf]  ;;  %v4535_v24 = vrot.slane %v4533_v1, 4 }
 0x313   : > { %v3635_v14 = vrot.slane %v7973_v58, 5  ;;  %v4570_v58 = vshrl.u32 %v9565_v61, 16 }
 0x314   : > { %v2529_v22 = vpop.f32.mrf.mxu3  ;;  %v4539_v49 = vor.u32 %v4538_v21, %v4535_v24  ;;  %v4256_v24 = vld [vmem:[#allocation2 + $0xa8] sm:$0xf] }
 0x315   : > { %v2572_v46 = vadd.f32 %v2529_v22, %v10927_v29  ;;  %v3637_v59 = vrot.slane %v3635_v14, 4  ;;  %v10929_v22 = vld [vmem:[#allocation36_spill] sm:$0xff]  ;;  %v4554_v29 = vrot.slane %v4552_v16, 5  ;;  %v4572_v62 = vrot.slane %v4570_v58, 4 }
 0x316   : > { %7616 = vmatmul.msk.bf16.gmra.mxu2 %vm1375_vm7, %v10928_v55 }
 0x317   : > { %v2862_v55 = vadd.f32 %v9757_v30, %v2572_v46  ;;  %v3639_v50 = vsel %vm8391_vm13, %v3637_v59, %v3638_v4  ;;  %v7859_v30 = vld [vmem:[%s10802_s7 + $0x8] sm:$0xff]  ;;  %v3636_v46 = vsel %vm8391_vm13, %v7458_v8, %v3635_v14  ;;  %v4557_v59 = vshrl.u32 %v4256_v24, 16  ;;  %v7975_v8 = vld [vmem:[#allocation2 + $0x64] sm:$0xf] }
 0x318   : > { %7477 = vmatmul.msk.bf16.gmra.mxu3 %vm1375_vm7, %v3743_v6  ;;  %7586 = vmatmul.msk.bf16.gmra.mxu1 %vm1375_vm7, %v4697_v57  ;;  %v4555_v6 = vsel %vm8501_vm1, %v4550_v36, %v4554_v29  ;;  %v4566_v57 = vshll.u32 %v9565_v61, 16  ;;  %v3719_v26 = vunpack.c.l.b16 %v3639_v50  ;;  %v3718_v47 = vunpack.c.l.b16 %v3636_v46  ;;  %v9874_v29 = vpop.f32.mrf.mxu1 }
 0x319   : > { %v3475_v15 = vpop.f32.mrf.mxu2  ;;  %v4678_v42 = vunpack.c.l.b16 %v4555_v6  ;;  %6954 = vmatpush.bf16.msrb.mxu0 %v7859_v30  ;;  %v3642_v50 = vrot.slane %v7975_v8, 5  ;;  %v3534_v30 = vld [vmem:[#allocation2 + $0x60] sm:$0xe] }
 0x31a   : > { %v9844_v10 = vadd.f32 %v3475_v15, %v2861_v38  ;;  %v4540_v38 = vrot.slane %v4539_v49, 4  ;;  %v4568_v61 = vrot.slane %v4566_v57, 5  ;;  %v10931_v49 = vld [vmem:[#allocation37_spill] sm:$0xff] }
 0x31b   : > { %v3644_v46 = vrot.slane %v3642_v50, 4 }
 0x31c   : > { %v2532_v13 = vpop.f32.mrf.mxu3  ;;  %v4545_v21 = vsel %vm8501_vm1, %v4540_v38, %v4544_v11  ;;  %v3744_v11 = vpack.c.b16 %v3719_v26, %v3718_v47  ;;  %v4559_v38 = vrot.slane %v4557_v59, 4  ;;  %v4573_v57 = vor.u32 %v4572_v62, %v4568_v61  ;;  %v10934_v26 = vld [vmem:[#allocation39_spill] sm:$0xff]  ;;  %v4259_v47 = vld [vmem:[#allocation2 + $0xb4] sm:$0xf] }
 0x31d   : > { %v2573_v1 = vadd.f32 %v2532_v13, %v10929_v22  ;;  %v4560_v13 = vshll.u32 %v4256_v24, 16  ;;  %v10932_v22 = vld [vmem:[#allocation35_spill] sm:$0xff]  ;;  %v4677_v4 = vunpack.c.l.b16 %v4545_v21  ;;  %v4576_v24 = vshll.u32 %v9572_v40, 16 }
 0x31e   : > { %v7459_v59 = vrot.slane %v3534_v30, 9  ;;  %v4594_v40 = vshrl.u32 %v9626_v3, 16 }
 0x31f   : > { %v2863_v14 = vadd.f32 %v9773_v18, %v2573_v1  ;;  %v4562_v6 = vrot.slane %v4560_v13, 5  ;;  %v4574_v1 = vrot.slane %v4573_v57, 4  ;;  %v4578_v13 = vrot.slane %v4576_v24, 5 }
 0x320   : > { %v9890_v8 = vpop.f32.mrf.mxu1  ;;  %v4584_v24 = vshll.u32 %v4259_v47, 16  ;;  %v4596_v30 = vrot.slane %v4594_v40, 4  ;;  %v4600_v40 = vshll.u32 %v9635_v9, 16 }
 0x321   : > { %v3477_v7 = vpop.f32.mrf.mxu2  ;;  %v4563_v18 = vor.u32 %v4562_v6, %v4559_v38  ;;  %v4581_v6 = vshrl.u32 %v4259_v47, 16 }
 0x322   : > { %v9862_v15 = vadd.f32 %v3477_v7, %v2862_v55  ;;  %v4698_v55 = vpack.c.b16 %v4678_v42, %v4677_v4  ;;  %v4590_v4 = vshll.u32 %v9626_v3, 16 }
 0x324   : > { %10930 = vst [vmem:[#allocation48_spill] sm:$0xff] %v9862_v15  ;;  %v2534_v16 = vpop.f32.mrf.mxu3  ;;  %v4592_v3 = vrot.slane %v4590_v4, 5 }
 0x325   : > { %v2574_v36 = vadd.f32 %v2534_v16, %v10931_v49  ;;  %v7976_v16 = vld [vmem:[#allocation2 + $0x68] sm:$0x1] }
 0x326   : > { %7617 = vmatmul.msk.bf16.gmra.mxu2 %vm1375_vm7, %v10932_v22  ;;  %v3645_v49 = vrot.slane %v7976_v16, 5 }
 0x327   : > { %v2864_v62 = vadd.f32 %v9787_v32, %v2574_v36  ;;  %v3643_v32 = vsel %vm8391_vm13, %v7459_v59, %v3642_v50  ;;  %v4583_v59 = vrot.slane %v4581_v6, 4 }
 0x328   : > { %7478 = vmatmul.msk.bf16.gmra.mxu3 %vm1375_vm7, %v3744_v11  ;;  %7587 = vmatmul.msk.bf16.gmra.mxu1 %vm1375_vm7, %v4698_v55  ;;  %v3646_v22 = vsel %vm8391_vm13, %v3644_v46, %v3645_v49  ;;  %v4564_v11 = vrot.slane %v4563_v18, 4  ;;  %v4579_v55 = vsel %vm8501_vm1, %v4574_v1, %v4578_v13  ;;  %v10936_v18 = vld [vmem:[#allocation42_spill] sm:$0xff]  ;;  %v7977_v13 = vld [vmem:[#allocation2 + $0x70] sm:$0xf] }
 0x329   : > { %v3480_v7 = vpop.f32.mrf.mxu2  ;;  %v3721_v36 = vunpack.c.l.b16 %v3646_v22  ;;  %v4680_v57 = vunpack.c.l.b16 %v4579_v55  ;;  %v3649_v50 = vrot.slane %v7977_v13, 5  ;;  %v4586_v22 = vrot.slane %v4584_v24, 5  ;;  %v3535_v55 = vld [vmem:[#allocation2 + $0x6c] sm:$0xe] }
 0x32a   : > { %v9877_v58 = vadd.f32 %v3480_v7, %v2863_v14  ;;  %v4569_v38 = vsel %vm8501_vm1, %v4564_v11, %v4568_v61  ;;  %v9907_v11 = vpop.f32.mrf.mxu1 }
 0x32b   : > { %v4679_v16 = vunpack.c.l.b16 %v4569_v38 }
 0x32c   : > { %10933 = vst [vmem:[#allocation16_spill] sm:$0xff] %v9877_v58  ;;  %v2537_v21 = vpop.f32.mrf.mxu3 }
 0x32d   : > { %v2575_v42 = vadd.f32 %v2537_v21, %v10934_v26  ;;  %v3720_v21 = vunpack.c.l.b16 %v3643_v32  ;;  %v10937_v26 = vld [vmem:[#allocation38_spill] sm:$0xff]  ;;  %v4699_v61 = vpack.c.b16 %v4680_v57, %v4679_v16  ;;  %v3651_v32 = vrot.slane %v3649_v50, 4  ;;  %v7978_v57 = vld [vmem:[#allocation2 + $0x74] sm:$0x1] }
 0x32e   : > { %v3652_v24 = vrot.slane %v7978_v57, 5  ;;  %v10941_v57 = vld [vmem:[#allocation46_spill] sm:$0xff] }
 0x32f   : > { %v3745_v49 = vpack.c.b16 %v3721_v36, %v3720_v21  ;;  %v4587_v36 = vor.u32 %v4586_v22, %v4583_v59  ;;  %v9910_v21 = vld [vmem:[#allocation2 + $0xc4] sm:$0xf] }
 0x330   : > { %v3653_v9 = vsel %vm8391_vm13, %v3651_v32, %v3652_v24  ;;  %v4618_v22 = vshrl.u32 %v9910_v21, 16 }
 0x331   : > { %v3482_v14 = vpop.f32.mrf.mxu2  ;;  %v4588_v16 = vrot.slane %v4587_v36, 4 }
 0x332   : > { %v9892_v7 = vadd.f32 %v3482_v14, %v2864_v62  ;;  %v2865_v62 = vadd.f32 %v9798_v43, %v2575_v42  ;;  %v4597_v14 = vor.u32 %v4596_v30, %v4592_v3  ;;  %v10939_v43 = vld [vmem:[#allocation45_spill] sm:$0xff]  ;;  %v4602_v30 = vrot.slane %v4600_v40, 5 }
 0x334   : > { %10935 = vst [vmem:[#allocation17_spill] sm:$0xff] %v9892_v7  ;;  %v2539_v46 = vpop.f32.mrf.mxu3  ;;  %v4598_v38 = vrot.slane %v4597_v14, 4 }
 0x335   : > { %v2576_v1 = vadd.f32 %v2539_v46, %v10936_v18  ;;  %v4262_v46 = vld [vmem:[#allocation2 + $0xc0] sm:$0xf]  ;;  %v7460_v18 = vrot.slane %v3535_v55, 9 }
 0x336   : > { %7618 = vmatmul.msk.bf16.gmra.mxu2 %vm1375_vm7, %v10937_v26  ;;  %v4605_v59 = vshrl.u32 %v4262_v46, 16 }
 0x337   : > { %v2866_v26 = vadd.f32 %v9817_v19, %v2576_v1  ;;  %v4593_v19 = vsel %vm8501_vm1, %v4588_v16, %v4592_v3  ;;  %v3723_v1 = vunpack.c.l.b16 %v3653_v9 }
 0x338   : > { %7479 = vmatmul.msk.bf16.gmra.mxu3 %vm1375_vm7, %v3745_v49  ;;  %7588 = vmatmul.msk.bf16.gmra.mxu1 %vm1375_vm7, %v4699_v61  ;;  %v4603_v49 = vsel %vm8501_vm1, %v4598_v38, %v4602_v30  ;;  %v4614_v61 = vshll.u32 %v9910_v21, 16  ;;  %v4607_v32 = vrot.slane %v4605_v59, 4  ;;  %v10942_v30 = vld [vmem:[#allocation43_spill] sm:$0xff] }
 0x339   : > { %v3485_v47 = vpop.f32.mrf.mxu2  ;;  %v4682_v40 = vunpack.c.l.b16 %v4603_v49  ;;  %v7979_v49 = vld [vmem:[#allocation2 + $0x7c] sm:$0xf] }
 0x33a   : > { %v9902_v4 = vadd.f32 %v3485_v47, %v2865_v62  ;;  %v4608_v62 = vshll.u32 %v4262_v46, 16  ;;  %v3650_v47 = vsel %vm8391_vm13, %v7460_v18, %v3649_v50  ;;  %v4616_v38 = vrot.slane %v4614_v61, 5  ;;  %v9930_v50 = vld [vmem:[#allocation2 + $0xc8] sm:$0x1] }
 0x33b   : > { %v3722_v46 = vunpack.c.l.b16 %v3650_v47  ;;  %v4624_v61 = vshll.u32 %v9930_v50, 16 }
 0x33c   : > { %10938 = vst [vmem:[#allocation18_spill] sm:$0xff] %v9902_v4  ;;  %v2542_v6 = vpop.f32.mrf.mxu3  ;;  %v4610_v36 = vrot.slane %v4608_v62, 5 }
 0x33d   : > { %v2577_v42 = vadd.f32 %v2542_v6, %v10939_v43  ;;  %v4620_v6 = vrot.slane %v4618_v22, 4  ;;  %v9925_v43 = vpop.f32.mrf.mxu1  ;;  %v3746_v18 = vpack.c.b16 %v3723_v1, %v3722_v46  ;;  %v7980_v1 = vld [vmem:[#allocation2 + $0x80] sm:$0x1] }
 0x33e   : > { %v4611_v59 = vor.u32 %v4610_v36, %v4607_v32 }
 0x33f   : > { %v2867_v3 = vadd.f32 %v9838_v2, %v2577_v42  ;;  %v4621_v62 = vor.u32 %v4620_v6, %v4616_v38  ;;  %v4626_v2 = vrot.slane %v4624_v61, 5  ;;  %v3536_v42 = vld [vmem:[#allocation2 + $0x78] sm:$0xe] }
 0x340   : > { %v7461_v6 = vrot.slane %v3536_v42, 9 }
 0x341   : > { %v3487_v13 = vpop.f32.mrf.mxu2 }
 0x342   : > { %v9919_v14 = vadd.f32 %v3487_v13, %v2866_v26  ;;  %v4681_v26 = vunpack.c.l.b16 %v4593_v19  ;;  %v3656_v13 = vrot.slane %v7979_v49, 5 }
 0x344   : > { %10940 = vst [vmem:[#allocation20_spill] sm:$0xff] %v9919_v14  ;;  %v2544_v55 = vpop.f32.mrf.mxu3  ;;  %v4700_v9 = vpack.c.b16 %v4682_v40, %v4681_v26  ;;  %v3658_v19 = vrot.slane %v3656_v13, 4  ;;  %v3659_v40 = vrot.slane %v7980_v1, 5 }
 0x345   : > { %v2578_v24 = vadd.f32 %v2544_v55, %v10941_v57  ;;  %v4612_v55 = vrot.slane %v4611_v59, 4  ;;  %v4622_v57 = vrot.slane %v4621_v62, 4 }
 0x346   : > { %7619 = vmatmul.msk.bf16.gmra.mxu2 %vm1375_vm7, %v10942_v30  ;;  %v9938_v30 = vpop.f32.mrf.mxu1  ;;  %v3660_v46 = vsel %vm8391_vm13, %v3658_v19, %v3659_v40 }
 0x347   : > { %v2868_v32 = vadd.f32 %v9852_v0, %v2578_v24  ;;  %v4617_v26 = vsel %vm8501_vm1, %v4612_v55, %v4616_v38  ;;  %v10945_v24 = vld [vmem:[#allocation52_spill] sm:$0xff]  ;;  %v7981_v38 = vld [vmem:[#allocation2 + $0x88] sm:$0xf] }
 0x348   : > { %7480 = vmatmul.msk.bf16.gmra.mxu3 %vm1375_vm7, %v3746_v18  ;;  %7589 = vmatmul.msk.bf16.gmra.mxu1 %vm1375_vm7, %v4700_v9  ;;  %v3657_v9 = vsel %vm8391_vm13, %v7461_v6, %v3656_v13  ;;  %v4683_v49 = vunpack.c.l.b16 %v4617_v26  ;;  %v3663_v55 = vrot.slane %v7981_v38, 5 }
 0x349   : > { %v3490_v16 = vpop.f32.mrf.mxu2  ;;  %v3724_v62 = vunpack.c.l.b16 %v3657_v9 }
 0x34a   : > { %v9934_v22 = vadd.f32 %v3490_v16, %v2867_v3  ;;  %v4627_v3 = vsel %vm8501_vm1, %v4622_v57, %v4626_v2  ;;  %v3725_v16 = vunpack.c.l.b16 %v3660_v46  ;;  %v3665_v57 = vrot.slane %v3663_v55, 4  ;;  %v10946_v2 = vld [vmem:[#allocation49_spill] sm:$0xff] }
 0x34b   : > { %v4684_v59 = vunpack.c.l.b16 %v4627_v3  ;;  %v10947_v46 = vld [vmem:[#allocation53_spill] sm:$0xff] }
 0x34c   : > { %10943 = vst [vmem:[#allocation19_spill] sm:$0xff] %v9934_v22  ;;  %v3817_v47 = vpop.f32.mrf.mxu3  ;;  %v3747_v61 = vpack.c.b16 %v3725_v16, %v3724_v62  ;;  %v10949_v62 = vld [vmem:[#allocation47_spill] sm:$0xff] }
 0x34d   : > { %v4701_v19 = vpack.c.b16 %v4684_v59, %v4683_v49  ;;  %v3897_v40 = vadd.f32 %v3817_v47, %v10946_v2  ;;  %v10948_v49 = vld [vmem:[#allocation40_spill] sm:$0xff]  ;;  %v10950_v2 = vld [vmem:[#allocation51_spill] sm:$0xff] }
 0x34e   : > { %v9953_v1 = vpop.f32.mrf.mxu1 }
 0x34f   : > { %v4188_v59 = vadd.f32 %v10948_v49, %v3897_v40  ;;  %v9973_v49 = vpop.f32.mrf.mxu0 }
 0x351   : > { %v3492_v36 = vpop.f32.mrf.mxu2  ;;  %v4846_v47 = vadd.f32 %v9874_v29, %v4188_v59 }
 0x352   : > { %v9947_v18 = vadd.f32 %v3492_v36, %v2868_v32  ;;  %v3537_v32 = vld [vmem:[#allocation2 + $0x84] sm:$0xe]  ;;  %v7982_v36 = vld [vmem:[#allocation2 + $0x8c] sm:$0x1] }
 0x353   : > { %v3666_v6 = vrot.slane %v7982_v36, 5  ;;  %v7462_v9 = vrot.slane %v3537_v32, 9 }
 0x354   : > { %10944 = vst [vmem:[#allocation21_spill] sm:$0xff] %v9947_v18  ;;  %v3819_v0 = vpop.f32.mrf.mxu3 }
 0x355   : > { %v3667_v16 = vsel %vm8391_vm13, %v3665_v57, %v3666_v6  ;;  %v3898_v32 = vadd.f32 %v3819_v0, %v10950_v2 }
 0x356   : > { %7620 = vmatmul.msk.bf16.gmra.mxu2 %vm1375_vm7, %v10945_v24  ;;  %v3664_v24 = vsel %vm8391_vm13, %v7462_v9, %v3663_v55 }
 0x358   : > { %7481 = vmatmul.msk.bf16.gmra.mxu3 %vm1375_vm7, %v3747_v61  ;;  %7590 = vmatmul.msk.bf16.gmra.mxu1 %vm1375_vm7, %v4701_v19  ;;  %v3727_v19 = vunpack.c.l.b16 %v3667_v16 }
 0x359   : > { %v5168_v42 = vpop.f32.mrf.mxu2 }
 0x35a   : > { %v5248_v36 = vadd.f32 %v5168_v42, %v4846_v47 }
 0x35c   : > { %v3822_v13 = vpop.f32.mrf.mxu3  ;;  %v5280_v16 = vmax.f32 %v5248_v36, 0.0 }
 0x35d   : > { %v3899_v26 = vadd.f32 %v3822_v13, %v10947_v46  ;;  %v3726_v13 = vunpack.c.l.b16 %v3664_v24 }
 0x35f   : > { %v4190_v61 = vadd.f32 %v10949_v62, %v3899_v26  ;;  %v3748_v6 = vpack.c.b16 %v3727_v19, %v3726_v13  ;;  %v10951_v26 = vld [vmem:[#allocation44_spill] sm:$0xff]  ;;  %v9977_v19 = vpop.f32.mrf.mxu1 }
 0x360   : > { %v4189_v9 = vadd.f32 %v10951_v26, %v3898_v32 }
 0x361   : > { %v5170_v3 = vpop.f32.mrf.mxu2  ;;  %v4848_v57 = vadd.f32 %v9907_v11, %v4190_v61 }
 0x362   : > { %v4847_v42 = vadd.f32 %v9890_v8, %v4189_v9 }
 0x364   : > { %v3824_v38 = vpop.f32.mrf.mxu3 }
 0x365   : > { %v3900_v40 = vadd.f32 %v3824_v38, %v9395_v25  ;;  %v5249_v38 = vadd.f32 %v5170_v3, %v4847_v42  ;;  %v4125_v3 = vpop.f32.mrf.mxu0 }
 0x366   : > { %7621 = vmatmul.msk.bf16.gmra.mxu2 %vm1375_vm7, %v9415_v53  ;;  %v10952_v53 = vld [vmem:[#allocation50_spill] sm:$0xff] }
 0x367   : > { %v4191_v59 = vadd.f32 %v10952_v53, %v3900_v40  ;;  %v5281_v26 = vmax.f32 %v5249_v38, 0.0  ;;  %v4783_v38 = vpop.f32.mrf.mxu1 }
 0x368   : > { %7482 = vmatmul.msk.bf16.gmra.mxu3 %vm1375_vm7, %v3748_v6 }
 0x369   : > { %v5173_v46 = vpop.f32.mrf.mxu2  ;;  %v4849_v47 = vadd.f32 %v9925_v43, %v4191_v59 }
 0x36a   : > { %v5250_v55 = vadd.f32 %v5173_v46, %v4848_v57 }
 0x36c   : > { %v5282_v29 = vmax.f32 %v5250_v55, 0.0  ;;  %v3827_v24 = vpop.f32.mrf.mxu3 }
 0x36e   : > { %v5312_v0 = vadd.f32 %v5282_v29, %v5280_v16 }
 0x370   : > { %v5344_v11 = vrot.slane %v5312_v0, 2  ;;  %v5345_v62 = vrot.slane %v5312_v0, 4  ;;  %v5346_v61 = vrot.slane %v5312_v0, 6  ;;  %v7628_v25 = vrot.slane %v5312_v0, 9 }
 0x371   : > { %v5175_v13 = vpop.f32.mrf.mxu2 }
 0x372   : > { %v7629_v2 = vrot.slane %v5344_v11, 9  ;;  %v7630_v32 = vrot.slane %v5345_v62, 9  ;;  %v7631_v36 = vrot.slane %v5346_v61, 9  ;;  %v5632_v57 = vadd.f32 %v7628_v25, %v5312_v0 }
 0x373   : > { %v5251_v6 = vadd.f32 %v5175_v13, %v4849_v47 }
 0x374   : > { %v5633_v40 = vadd.f32 %v7629_v2, %v5344_v11  ;;  %v5634_v46 = vadd.f32 %v7630_v32, %v5345_v62  ;;  %v5635_v55 = vadd.f32 %v7631_v36, %v5346_v61  ;;  %v5696_v8 = vmul.f32 0.25, %v5632_v57  ;;  %v3829_v16 = vpop.f32.mrf.mxu3 }
 0x375   : > { %v5283_v9 = vmax.f32 %v5251_v6, 0.0  ;;  %v3901_v6 = vadd.f32 %v3827_v24, %v9430_v63  ;;  %v9996_v24 = vpop.f32.mrf.mxu1 }
 0x376   : > { %v5697_v29 = vmul.f32 0.25, %v5633_v40  ;;  %v5698_v53 = vmul.f32 0.25, %v5634_v46  ;;  %7622 = vmatmul.msk.bf16.gmra.mxu2 %vm1375_vm7, %v9544_v44  ;;  %v5699_v43 = vmul.f32 0.25, %v5635_v55  ;;  %v5760_v0 = vpack.c.bf16 %v5696_v8, %v5696_v8 }
 0x377   : > { %v9982_v59 = vadd.f32 %v5283_v9, %v5281_v26  ;;  %v10953_v9 = vld [vmem:[#allocation54_spill] sm:$0xff] }
 0x378   : > { %v5761_v42 = vpack.c.bf16 %v5697_v29, %v5697_v29  ;;  %v5762_v18 = vpack.c.bf16 %v5698_v53, %v5698_v53  ;;  %7483 = vmatmul.msk.bf16.gmra.mxu3 %vm1375_vm7, %v9556_v35  ;;  %v5763_v47 = vpack.c.bf16 %v5699_v43, %v5699_v43  ;;  %v5894_v2 = vunpack.c.l.b16 %v5760_v0  ;;  %v9991_v35 = vpop.f32.mrf.mxu0 }
 0x379   : > { %v7632_v11 = vrot.slane %v9982_v59, 9  ;;  %v5178_v62 = vpop.f32.mrf.mxu2  ;;  %v4192_v29 = vadd.f32 %v10953_v9, %v3901_v6 }
 0x37a   : > { %v5895_v61 = vunpack.c.l.b16 %v5761_v42  ;;  %v5896_v25 = vunpack.c.l.b16 %v5762_v18  ;;  %v5897_v40 = vunpack.c.l.b16 %v5763_v47  ;;  %v10955_v47 = vld [vmem:[#allocation55_spill] sm:$0xff] }
 0x37b   : > { %v5636_v13 = vadd.f32 %v7632_v11, %v9982_v59 }
 0x37c   : > { %v5958_v44 = vrot.slane %v5895_v61, 7  ;;  %v3832_v36 = vpop.f32.mrf.mxu3  ;;  %v5961_v57 = vrot.slane %v5896_v25, 6  ;;  %v5964_v43 = vrot.slane %v5897_v40, 5  ;;  %v4850_v61 = vadd.f32 %v9938_v30, %v4192_v29  ;;  %v10954_v25 = vld [vmem:[#allocation58_spill] sm:$0xff]  ;;  %v10957_v40 = vld [vmem:[#allocation56_spill] sm:$0xff] }
 0x37d   : > { %v5700_v32 = vmul.f32 0.25, %v5636_v13  ;;  %v3903_v55 = vadd.f32 %v3832_v36, %v9520_v33  ;;  %v3902_v13 = vadd.f32 %v3829_v16, %v10955_v47  ;;  %v10013_v16 = vpop.f32.mrf.mxu1  ;;  %v5349_v29 = vrot.slane %v9982_v59, 6 }
 0x37e   : > { %v5960_v46 = vsel %vm5959_vm2, %v5958_v44, %v5894_v2  ;;  %v5252_v44 = vadd.f32 %v5178_v62, %v4850_v61  ;;  %v5348_v62 = vrot.slane %v9982_v59, 4 }
 0x37f   : > { %v5764_v18 = vpack.c.bf16 %v5700_v32, %v5700_v32  ;;  %v5963_v8 = vsel %vm5962_vm3, %v5961_v57, %v5960_v46  ;;  %v4194_v63 = vadd.f32 %v9973_v49, %v3903_v55  ;;  %v10956_v32 = vld [vmem:[#allocation57_spill] sm:$0xff]  ;;  %v4193_v46 = vadd.f32 %v10957_v40, %v3902_v13 }
 0x380   : > { %v5966_v0 = vsel %vm5965_vm4, %v5964_v43, %v5963_v8  ;;  %v10010_v6 = vpop.f32.mrf.mxu0  ;;  %v5284_v30 = vmax.f32 %v5252_v44, 0.0 }
 0x381   : > { %v5180_v26 = vpop.f32.mrf.mxu2  ;;  %v5898_v53 = vunpack.c.l.b16 %v5764_v18  ;;  %v4852_v2 = vadd.f32 %v9977_v19, %v4194_v63  ;;  %v5347_v19 = vrot.slane %v9982_v59, 2 }
 0x383   : > { %v5967_v42 = vrot.slane %v5898_v53, 4  ;;  %v4851_v53 = vadd.f32 %v9953_v1, %v4193_v46  ;;  %v7633_v44 = vrot.slane %v5347_v19, 9 }
 0x384   : > { %v3834_v11 = vpop.f32.mrf.mxu3 }
 0x385   : > { %v10000_v33 = vsel %vm5968_vm5, %v5967_v42, %v5966_v0  ;;  %v3904_v49 = vadd.f32 %v3834_v11, %v10956_v32  ;;  %v5253_v0 = vadd.f32 %v5180_v26, %v4851_v53 }
 0x386   : > { %7623 = vmatmul.msk.bf16.gmra.mxu2 %vm1375_vm7, %v10954_v25 }
 0x387   : > { %v4195_v55 = vadd.f32 %v4125_v3, %v3904_v49  ;;  %v7635_v49 = vrot.slane %v5349_v29, 9  ;;  %v5285_v1 = vmax.f32 %v5253_v0, 0.0 }
 0x388   : > { %7484 = vmatmul.msk.bf16.gmra.mxu3 %vm1375_vm7, %v9588_v31  ;;  %v10019_v40 = vpop.f32.mrf.mxu0 }
 0x389   : > { %v5183_v36 = vpop.f32.mrf.mxu2  ;;  %v4853_v11 = vadd.f32 %v4783_v38, %v4195_v55 }
 0x38a   : > { %v5254_v57 = vadd.f32 %v5183_v36, %v4852_v2  ;;  %v7634_v2 = vrot.slane %v5348_v62, 9 }
 0x38c   : > { %v5286_v18 = vmax.f32 %v5254_v57, 0.0  ;;  %v3837_v8 = vpop.f32.mrf.mxu3 }
 0x38d   : > { %v3905_v55 = vadd.f32 %v3837_v8, %v9593_v5 }
 0x38e   : > { %v5314_v9 = vadd.f32 %v5286_v18, %v5284_v30 }
 0x38f   : > { %v4196_v5 = vadd.f32 %v9991_v35, %v3905_v55 }
 0x390   : > { %v5350_v31 = vrot.slane %v5314_v9, 2  ;;  %v5351_v43 = vrot.slane %v5314_v9, 4  ;;  %v5352_v42 = vrot.slane %v5314_v9, 6  ;;  %v7636_v63 = vrot.slane %v5314_v9, 9 }
 0x391   : > { %v5185_v61 = vpop.f32.mrf.mxu2  ;;  %v4854_v55 = vadd.f32 %v9996_v24, %v4196_v5 }
 0x392   : > { %v7637_v3 = vrot.slane %v5350_v31, 9  ;;  %v7638_v25 = vrot.slane %v5351_v43, 9  ;;  %v7639_v47 = vrot.slane %v5352_v42, 9  ;;  %v5640_v13 = vadd.f32 %v7636_v63, %v5314_v9 }
 0x393   : > { %v5255_v32 = vadd.f32 %v5185_v61, %v4853_v11  ;;  %v5637_v9 = vadd.f32 %v7633_v44, %v5347_v19  ;;  %v5638_v11 = vadd.f32 %v7634_v2, %v5348_v62  ;;  %v10024_v61 = vpop.f32.mrf.mxu1 }
 0x394   : > { %v5641_v36 = vadd.f32 %v7637_v3, %v5350_v31  ;;  %v5642_v57 = vadd.f32 %v7638_v25, %v5351_v43  ;;  %v5643_v59 = vadd.f32 %v7639_v47, %v5352_v42  ;;  %v5704_v46 = vmul.f32 0.25, %v5640_v13  ;;  %v3839_v18 = vpop.f32.mrf.mxu3 }
 0x395   : > { %v5287_v30 = vmax.f32 %v5255_v32, 0.0  ;;  %v5639_v31 = vadd.f32 %v7635_v49, %v5349_v29  ;;  %v5701_v2 = vmul.f32 0.25, %v5637_v9 }
 0x396   : > { %v5705_v26 = vmul.f32 0.25, %v5641_v36  ;;  %v5706_v38 = vmul.f32 0.25, %v5642_v57  ;;  %7624 = vmatmul.msk.bf16.gmra.mxu2 %vm1375_vm7, %v9604_v60  ;;  %v5707_v53 = vmul.f32 0.25, %v5643_v59  ;;  %v5768_v0 = vpack.c.bf16 %v5704_v46, %v5704_v46  ;;  %v10958_v60 = vld [vmem:[#allocation41_spill] sm:$0xff] }
 0x397   : > { %v5315_v63 = vadd.f32 %v5287_v30, %v5285_v1  ;;  %v10029_v57 = vmul.f32 0.25, %v5638_v11  ;;  %v3906_v46 = vadd.f32 %v3839_v18, %v9641_v54  ;;  %v4892_v11 = vld [vmem:[#allocation2 + $0xc0] sm:$0xe] }
 0x398   : > { %v5769_v43 = vpack.c.bf16 %v5705_v26, %v5705_v26  ;;  %v5770_v42 = vpack.c.bf16 %v5706_v38, %v5706_v38  ;;  %7485 = vmatmul.msk.bf16.gmra.mxu3 %vm1375_vm7, %v10958_v60  ;;  %v5771_v19 = vpack.c.bf16 %v5707_v53, %v5707_v53  ;;  %v5902_v59 = vunpack.c.l.b16 %v5768_v0 }
 0x399   : > { %v5353_v3 = vrot.slane %v5315_v63, 2  ;;  %v5354_v25 = vrot.slane %v5315_v63, 4  ;;  %v7640_v47 = vrot.slane %v5315_v63, 9  ;;  %v5188_v13 = vpop.f32.mrf.mxu2  ;;  %v5355_v8 = vrot.slane %v5315_v63, 6 }
 0x39a   : > { %v5903_v32 = vunpack.c.l.b16 %v5769_v43  ;;  %v5904_v36 = vunpack.c.l.b16 %v5770_v42  ;;  %v10032_v26 = vmul.f32 0.25, %v5639_v31  ;;  %v10035_v43 = vpop.f32.mrf.mxu0  ;;  %v5905_v53 = vunpack.c.l.b16 %v5771_v19 }
 0x39b   : > { %v7641_v62 = vrot.slane %v5353_v3, 9  ;;  %v7642_v29 = vrot.slane %v5354_v25, 9  ;;  %v5644_v44 = vadd.f32 %v7640_v47, %v5315_v63  ;;  %v7643_v38 = vrot.slane %v5355_v8, 9  ;;  %v10046_v19 = vpop.f32.mrf.mxu1 }
 0x39c   : > { %v5979_v49 = vrot.slane %v5903_v32, 7  ;;  %v3842_v30 = vpop.f32.mrf.mxu3  ;;  %v5981_v35 = vrot.slane %v5904_v36, 6  ;;  %v5765_v47 = vpack.c.bf16 %v5701_v2, %v5701_v2  ;;  %v4197_v18 = vadd.f32 %v10010_v6, %v3906_v46  ;;  %v7853_v6 = vld [vmem:[#allocation2 + $0xcc] sm:$0xff] }
 0x39d   : > { %v5708_v1 = vmul.f32 0.25, %v5644_v44  ;;  %v5645_v9 = vadd.f32 %v7641_v62, %v5353_v3  ;;  %v5646_v42 = vadd.f32 %v7642_v29, %v5354_v25  ;;  %v3907_v32 = vadd.f32 %v3842_v30, %v9662_v12  ;;  %7571 = vmatmul.msk.bf16.gmra.mxu0 %vm1375_vm7, %v7853_v6 }
 0x39e   : > { %v5980_v63 = vsel %vm5959_vm2, %v5979_v49, %v5902_v59  ;;  %v10042_v31 = vadd.f32 %v5188_v13, %v4854_v55  ;;  %v5042_v36 = vrot.slane %v9910_v21, 5  ;;  %v5647_v60 = vadd.f32 %v7643_v38, %v5355_v8  ;;  %v7983_v49 = vld [vmem:[#allocation2 + $0xc4] sm:$0xf] }
 0x39f   : > { %v5772_v0 = vpack.c.bf16 %v5708_v1, %v5708_v1  ;;  %v5982_v5 = vsel %vm5962_vm3, %v5981_v35, %v5980_v63  ;;  %v7606_v25 = vrot.slane %v4892_v11, 9  ;;  %v5983_v62 = vrot.slane %v5905_v53, 5  ;;  %v7858_v59 = vld [vmem:[%s10802_s7] sm:$0xff]  ;;  %v4265_v1 = vld [vmem:[#allocation2 + $0xcc] sm:$0xf] }
 0x3a0   : > { %v10050_v29 = vmul.f32 0.25, %v5645_v9  ;;  %v10052_v44 = vmul.f32 0.25, %v5646_v42  ;;  %v10054_v13 = vunpack.c.l.b16 %v5765_v47  ;;  %v4198_v21 = vadd.f32 %v10019_v40, %v3907_v32  ;;  %v10064_v53 = vld [vmem:[#allocation2 + $0xd0] sm:$0xf]  ;;  %v10959_v9 = vld [vmem:[#allocation14_spill] sm:$0xff]  ;;  %6955 = vmatpush.bf16.msrb.mxu0 %v7858_v59 }
 0x3a1   : > { %v5190_v24 = vpop.f32.mrf.mxu2  ;;  %v5906_v3 = vunpack.c.l.b16 %v5772_v0  ;;  %v3698_v8 = vrot.slane %v7983_v49, 5  ;;  %v5984_v46 = vsel %vm5965_vm4, %v5983_v62, %v5982_v5  ;;  %v5288_v30 = vmax.f32 %v10042_v31, 0.0  ;;  %v10078_v11 = vld [vmem:[#allocation2 + $0xd4] sm:$0x1]  ;;  %v3542_v32 = vld [vmem:[#allocation2 + $0xc0] sm:$0xe] }
 0x3a2   : > { %v4855_v35 = vadd.f32 %v10013_v16, %v4197_v18  ;;  %v5044_v55 = vrot.slane %v5042_v36, 4  ;;  %v10066_v40 = vmul.f32 0.25, %v5647_v60  ;;  %v10075_v42 = vsel %vm8391_vm13, %v7606_v25, %v5042_v36 }
 0x3a3   : > { %v5985_v2 = vrot.slane %v5906_v3, 4  ;;  %v5045_v16 = vrot.slane %v9930_v50, 5  ;;  %v4629_v18 = vshrl.u32 %v4265_v1, 16  ;;  %v4632_v31 = vshll.u32 %v4265_v1, 16  ;;  %v10088_v3 = vpop.f32.mrf.mxu0 }
 0x3a4   : > { %v3844_v38 = vpop.f32.mrf.mxu3  ;;  %v4856_v60 = vadd.f32 %v10024_v61, %v4198_v21  ;;  %v4638_v36 = vshll.u32 %v10064_v53, 16  ;;  %v4642_v50 = vshrl.u32 %v10064_v53, 16  ;;  %v10090_v25 = vadd.f32 %v5190_v24, %v4855_v35 }
 0x3a5   : > { %v10069_v63 = vsel %vm5968_vm5, %v5985_v2, %v5984_v46  ;;  %v3908_v5 = vadd.f32 %v3844_v38, %v9692_v34  ;;  %v4631_v6 = vrot.slane %v4629_v18, 4  ;;  %v4634_v2 = vrot.slane %v4632_v31, 5  ;;  %v10960_v46 = vld [vmem:[#allocation59_spill] sm:$0xff] }
 0x3a6   : > { %7625 = vmatmul.msk.bf16.gmra.mxu2 %vm1375_vm7, %v10959_v9  ;;  %v4648_v49 = vshll.u32 %v10078_v11, 16  ;;  %v5046_v34 = vsel %vm8391_vm13, %v5044_v55, %v5045_v16  ;;  %v7467_v61 = vrot.slane %v3542_v32, 9  ;;  %v4640_v21 = vrot.slane %v4638_v36, 5  ;;  %v7984_v38 = vld [vmem:[#allocation2 + $0xc8] sm:$0x1] }
 0x3a7   : > { %v3700_v1 = vrot.slane %v3698_v8, 4  ;;  %v3701_v9 = vrot.slane %v7984_v38, 5  ;;  %v4635_v0 = vor.u32 %v4634_v2, %v4631_v6  ;;  %v4644_v24 = vrot.slane %v4642_v50, 4 }
 0x3a8   : > { %7486 = vmatmul.msk.bf16.gmra.mxu3 %vm1375_vm7, %v10960_v46  ;;  %v5775_v35 = vpack.c.bf16 %v10066_v40, %v10066_v40  ;;  %v4199_v18 = vadd.f32 %v10035_v43, %v3908_v5  ;;  %v10101_v46 = vpop.f32.mrf.mxu1  ;;  %v5289_v55 = vmax.f32 %v10090_v25, 0.0  ;;  %v4650_v47 = vrot.slane %v4648_v49, 5 }
 0x3a9   : > { %v5193_v62 = vpop.f32.mrf.mxu2  ;;  %v4636_v32 = vrot.slane %v4635_v0, 4  ;;  %v4645_v36 = vor.u32 %v4644_v24, %v4640_v21  ;;  %v5086_v6 = vunpack.c.l.b16 %v5046_v34  ;;  %v3699_v50 = vsel %vm8391_vm13, %v7467_v61, %v3698_v8 }
 0x3aa   : > { %v5258_v59 = vadd.f32 %v5193_v62, %v4856_v60  ;;  %v5085_v60 = vunpack.c.l.b16 %v10075_v42  ;;  %v4893_v62 = vld [vmem:[#allocation2 + $0xcc] sm:$0xe]  ;;  %v5049_v40 = vrot.slane %v10064_v53, 5  ;;  %v3702_v43 = vsel %vm8391_vm13, %v3700_v1, %v3701_v9 }
 0x3ab   : > { %v4641_v42 = vsel %vm8501_vm1, %v4636_v32, %v4640_v21  ;;  %v4646_v5 = vrot.slane %v4645_v36, 4  ;;  %v7607_v2 = vrot.slane %v4893_v62, 9  ;;  %v4857_v49 = vadd.f32 %v10046_v19, %v4199_v18  ;;  %v4140_v21 = vpop.f32.mrf.mxu0 }
 0x3ac   : > { %v5290_v31 = vmax.f32 %v5258_v59, 0.0  ;;  %v3847_v16 = vpop.f32.mrf.mxu3  ;;  %v4685_v61 = vunpack.c.l.b16 %v4641_v42  ;;  %v5052_v53 = vrot.slane %v10078_v11, 5  ;;  %v5103_v62 = vpack.c.b16 %v5086_v6, %v5085_v60 }
 0x3ad   : > { %v4651_v8 = vsel %vm8501_vm1, %v4646_v5, %v4650_v47  ;;  %v3736_v36 = vunpack.c.l.b16 %v3699_v50  ;;  %v3909_v19 = vadd.f32 %v3847_v16, %v9701_v28  ;;  %v3737_v18 = vunpack.c.l.b16 %v3702_v43 }
 0x3ae   : > { %v5316_v38 = vadd.f32 %v5290_v31, %v5288_v30  ;;  %v5051_v31 = vrot.slane %v5049_v40, 4  ;;  %v4686_v12 = vunpack.c.l.b16 %v4651_v8  ;;  %v5050_v41 = vsel %vm8391_vm13, %v7607_v2, %v5049_v40 }
 0x3af   : > { %v10961_v14 = vpack.c.bf16 %v10029_v57, %v10029_v57  ;;  %v10962_v60 = vpack.c.bf16 %v10032_v26, %v10032_v26  ;;  %v5909_v26 = vunpack.c.l.b16 %v5775_v35  ;;  %v4200_v2 = vadd.f32 %v10088_v3, %v3909_v19 }
 0x3b0   : > { %v5356_v25 = vrot.slane %v5316_v38, 2  ;;  %v5357_v59 = vrot.slane %v5316_v38, 4  ;;  %v5358_v0 = vrot.slane %v5316_v38, 6  ;;  %v7644_v30 = vrot.slane %v5316_v38, 9  ;;  %v4798_v16 = vpop.f32.mrf.mxu1 }
 0x3b1   : > { %v5195_v34 = vpop.f32.mrf.mxu2  ;;  %v4702_v22 = vpack.c.b16 %v4686_v12, %v4685_v61  ;;  %v5900_v4 = vunpack.c.l.b16 %v10961_v14  ;;  %v5901_v6 = vunpack.c.l.b16 %v10962_v60  ;;  %v5053_v28 = vsel %vm8391_vm13, %v5051_v31, %v5052_v53 }
 0x3b2   : > { %v7645_v24 = vrot.slane %v5356_v25, 9  ;;  %v7646_v1 = vrot.slane %v5357_v59, 9  ;;  %v7647_v9 = vrot.slane %v5358_v0, 9  ;;  %v5259_v32 = vadd.f32 %v5195_v34, %v4857_v49 }
 0x3b3   : > { %v5648_v47 = vadd.f32 %v7644_v30, %v5316_v38  ;;  %v10963_v38 = vpack.c.bf16 %v10050_v29, %v10050_v29  ;;  %v10964_v12 = vpack.c.bf16 %v10052_v44, %v10052_v44  ;;  %7591 = vmatmul.msk.bf16.gmra.mxu1 %vm1375_vm7, %v4702_v22  ;;  %v5087_v39 = vunpack.c.l.b16 %v5050_v41 }
 0x3b4   : > { %v5649_v54 = vadd.f32 %v7645_v24, %v5356_v25  ;;  %v5650_v42 = vadd.f32 %v7646_v1, %v5357_v59  ;;  %v5291_v5 = vmax.f32 %v5259_v32, 0.0  ;;  %v3849_v11 = vpop.f32.mrf.mxu3  ;;  %v5651_v50 = vadd.f32 %v7647_v9, %v5358_v0  ;;  %v4143_v24 = vpop.f32.mrf.mxu0 }
 0x3b5   : > { %v5907_v40 = vunpack.c.l.b16 %v10963_v38  ;;  %v5908_v57 = vunpack.c.l.b16 %v10964_v12  ;;  %v3753_v25 = vpack.c.b16 %v3737_v18, %v3736_v36  ;;  %v5712_v59 = vmul.f32 0.25, %v5648_v47 }
 0x3b6   : > { %7626 = vmatmul.msk.bf16.gmra.mxu2 %vm1375_vm7, %v5103_v62  ;;  %v5713_v14 = vmul.f32 0.25, %v5649_v54  ;;  %v10133_v43 = vadd.f32 %v5291_v5, %v5289_v55  ;;  %v5714_v0 = vmul.f32 0.25, %v5650_v42  ;;  %v5088_v30 = vunpack.c.l.b16 %v5053_v28 }
 0x3b7   : > { %v5970_v34 = vrot.slane %v10054_v13, 3  ;;  %v5715_v44 = vmul.f32 0.25, %v5651_v50  ;;  %v5973_v54 = vrot.slane %v5900_v4, 2  ;;  %v5976_v55 = vrot.slane %v5901_v6, 1 }
 0x3b8   : > { %v7648_v49 = vrot.slane %v10133_v43, 9  ;;  %7487 = vmatmul.msk.bf16.gmra.mxu3 %vm1375_vm7, %v3753_v25  ;;  %v5777_v8 = vpack.c.bf16 %v5713_v14, %v5713_v14  ;;  %v5987_v35 = vrot.slane %v5907_v40, 3  ;;  %v5989_v3 = vrot.slane %v5908_v57, 2  ;;  %v4801_v42 = vpop.f32.mrf.mxu1  ;;  %v481_v57 = vld [vmem:[%s8276_s17] sm:$0xff]   ;;  %v483_v14 = vld [vmem:[%s8276_s17 + $0x8] sm:$0xff]  }
 0x3b9   : > { %v5198_v29 = vpop.f32.mrf.mxu2  ;;  %v5991_v61 = vrot.slane %v5909_v26, 1  ;;  %v3910_v53 = vadd.f32 %v3849_v11, %v9713_v56  ;;  %v5776_v1 = vpack.c.bf16 %v5712_v59, %v5712_v59  ;;  %v5778_v9 = vpack.c.bf16 %v5714_v0, %v5714_v0  ;;  %v485_v26 = vld [vmem:[%s8276_s17 + $0x10] sm:$0xff]  }
 0x3ba   : > { %v5652_v22 = vadd.f32 %v7648_v49, %v10133_v43  ;;  %v4858_v31 = vadd.f32 %v10101_v46, %v4200_v2  ;;  %v5104_v13 = vpack.c.b16 %v5088_v30, %v5087_v39  ;;  %v5779_v62 = vpack.c.bf16 %v5715_v44, %v5715_v44  ;;  %v487_v39 = vld [vmem:[%s8276_s17 + $0x18] sm:$0xff]  }
 0x3bb   : > { %v5359_v36 = vrot.slane %v10133_v43, 2  ;;  %v5911_v4 = vunpack.c.l.b16 %v5777_v8  ;;  %v5972_v18 = vsel %vm5971_vm6, %v5970_v34, %v10000_v33  ;;  %v4201_v41 = vadd.f32 %v4140_v21, %v3910_v53 }
 0x3bc   : > { %v3852_v32 = vpop.f32.mrf.mxu3  ;;  %v5716_v19 = vmul.f32 0.25, %v5652_v22  ;;  %v5975_v47 = vsel %vm5974_vm8, %v5973_v54, %v5972_v18  ;;  %v5988_v46 = vsel %vm5971_vm6, %v5987_v35, %v10069_v63  ;;  %v5910_v5 = vunpack.c.l.b16 %v5776_v1  ;;  %v4145_v35 = vpop.f32.mrf.mxu0 }
 0x3bd   : > { %v3911_v56 = vadd.f32 %v3852_v32, %v9722_v20  ;;  %v10808_v11 = vrot.slane %v10133_v43, 4  ;;  %v5978_v33 = vsel %vm5977_vm9, %v5976_v55, %v5975_v47  ;;  %v5990_v21 = vsel %vm5974_vm8, %v5989_v3, %v5988_v46 }
 0x3be   : > { %v10153_v6 = vunpack.c.l.b16 %v5778_v9  ;;  %v10155_v20 = vunpack.c.l.b16 %v5779_v62  ;;  %v7649_v50 = vrot.slane %v5359_v36, 9  ;;  %v5992_v28 = vsel %vm5977_vm9, %v5991_v61, %v5990_v21 }
 0x3bf   : > { %v5993_v63 = vrot.slane %v5911_v4, 7  ;;  %v5780_v38 = vpack.c.bf16 %v5716_v19, %v5716_v19  ;;  %v5260_v40 = vadd.f32 %v5198_v29, %v4858_v31  ;;  %v6077_v12 = vpack.c.b16 %v5992_v28, %v5978_v33 }
 0x3c0   : > { %v4202_v2 = vadd.f32 %v4143_v24, %v3911_v56  ;;  %v4859_v25 = vadd.f32 %v4798_v16, %v4201_v41  ;;  %v6128_v59 = vunpack.c.l.bf16 %v481_v57  ;;  %v6129_v0 = vunpack.c.h.bf16 %v481_v57  ;;  %v4803_v56 = vpop.f32.mrf.mxu1 }
 0x3c1   : > { %v5200_v60 = vpop.f32.mrf.mxu2  ;;  %v6130_v30 = vunpack.c.l.bf16 %v485_v26  ;;  %v6144_v34 = vunpack.c.l.bf16 %v483_v14  ;;  %v6145_v44 = vunpack.c.h.bf16 %v483_v14  ;;  %v6146_v54 = vunpack.c.l.bf16 %v487_v39 }
 0x3c2   : > { %v5653_v55 = vadd.f32 %v7649_v50, %v5359_v36  ;;  %v6131_v29 = vunpack.c.h.bf16 %v485_v26  ;;  %v6147_v22 = vunpack.c.h.bf16 %v487_v39  ;;  %v10165_v61 = vunpack.c.l.b16 %v5780_v38 }
 0x3c3   : > { %v10167_v16 = vadd.f32 %v5200_v60, %v4859_v25  ;;  %v10169_v53 = vadd.f32 %v6144_v34, %v6128_v59  ;;  %v10173_v24 = vrot.slane %v10808_v11, 9  ;;  %v4860_v9 = vadd.f32 %v4801_v42, %v4202_v2 }
 0x3c4   : > { %v3854_v49 = vpop.f32.mrf.mxu3  ;;  %v10179_v36 = vadd.f32 %v6146_v54, %v6130_v30  ;;  %v10182_v4 = vsel %vm5959_vm2, %v5993_v63, %v5910_v5  ;;  %v10184_v19 = vmul.f32 0.25, %v5653_v55  ;;  %v10187_v41 = vadd.f32 %v6147_v22, %v6131_v29 }
 0x3c5   : > { %v3912_v8 = vadd.f32 %v3854_v49, %v9735_v48  ;;  %v10175_v48 = vadd.f32 %v6145_v44, %v6129_v0  ;;  %v5293_v46 = vmax.f32 %v10167_v16, 0.0  ;;  %v6192_v42 = vrot.slane %v10169_v53, 2 }
 0x3c6   : > { %7627 = vmatmul.msk.bf16.gmra.mxu2 %vm1375_vm7, %v5104_v13  ;;  %v5292_v13 = vmax.f32 %v5260_v40, 0.0  ;;  %v6193_v60 = vrot.slane %v10169_v53, 4  ;;  %v6194_v5 = vrot.slane %v10169_v53, 6  ;;  %v6198_v38 = vrot.slane %v10179_v36, 2 }
 0x3c7   : > { %v4203_v1 = vadd.f32 %v4145_v35, %v3912_v8  ;;  %v6195_v50 = vrot.slane %v10175_v48, 2  ;;  %v10810_v28 = vrot.slane %v10175_v48, 4  ;;  %v10809_v63 = vrot.slane %v10175_v48, 6 }
 0x3c8   : > { %7696 = vmatmul.msk.bf16.vlgmr.msrb.gmra.mxu3 %vm1375_vm7, %v6077_v12  ;;  %v6199_v40 = vrot.slane %v10179_v36, 4  ;;  %v6200_v14 = vrot.slane %v10179_v36, 6  ;;  %v6201_v26 = vrot.slane %v10187_v41, 2  ;;  %v10812_v2 = vrot.slane %v10187_v41, 4 }
 0x3c9   : > { %v5203_v62 = vpop.f32.mrf.mxu2  ;;  %v4861_v21 = vadd.f32 %v4803_v56, %v4203_v1  ;;  %v10811_v25 = vrot.slane %v10187_v41, 6  ;;  %v7700_v39 = vrot.slane %v10169_v53, 9  ;;  %v7701_v59 = vrot.slane %v6192_v42, 9  ;;  %v4148_v56 = vpop.f32.mrf.mxu0 }
 0x3ca   : > { %v5262_v18 = vadd.f32 %v5203_v62, %v4860_v9  ;;  %v7702_v0 = vrot.slane %v6193_v60, 9  ;;  %v7703_v8 = vrot.slane %v6194_v5, 9  ;;  %v7704_v29 = vrot.slane %v10175_v48, 9 }
 0x3cb   : > { %v7705_v22 = vrot.slane %v6195_v50, 9  ;;  %v7706_v62 = vrot.slane %v10810_v28, 9 }
 0x3cc   : > { %v5294_v33 = vmax.f32 %v5262_v18, 0.0  ;;  %v3857_v57 = vpop.f32.mrf.mxu3  ;;  %v7708_v18 = vrot.slane %v10179_v36, 9 }
 0x3cd   : > { %v3913_v54 = vadd.f32 %v3857_v57, %v9747_v17  ;;  %v7707_v17 = vrot.slane %v10809_v63, 9  ;;  %v7711_v63 = vrot.slane %v6200_v14, 9 }
 0x3ce   : > { %v5318_v12 = vadd.f32 %v5294_v33, %v5292_v13 }
 0x3cf   : > { %v10219_v31 = vadd.f32 %v4148_v56, %v3913_v54  ;;  %v6480_v56 = vadd.f32 %v7700_v39, %v10169_v53  ;;  %v6485_v39 = vadd.f32 %v7705_v22, %v6195_v50  ;;  %v6488_v50 = vadd.f32 %v7708_v18, %v10179_v36 }
 0x3d0   : > { %v5362_v49 = vrot.slane %v5318_v12, 2  ;;  %v5363_v30 = vrot.slane %v5318_v12, 4  ;;  %v5364_v34 = vrot.slane %v5318_v12, 6  ;;  %v7652_v44 = vrot.slane %v5318_v12, 9 }
 0x3d1   : > { %v5205_v55 = vpop.f32.mrf.mxu2  ;;  %v10967_v18 = vrot.slane %v10187_v41, 4  ;;  %v6544_v36 = vmul.f32 0.25, %v6480_v56 }
 0x3d2   : > { %v7653_v35 = vrot.slane %v5362_v49, 9  ;;  %v7654_v16 = vrot.slane %v5363_v30, 9  ;;  %v7655_v1 = vrot.slane %v5364_v34, 9  ;;  %v5656_v9 = vadd.f32 %v7652_v44, %v5318_v12 }
 0x3d3   : > { %v5263_v13 = vadd.f32 %v5205_v55, %v4861_v21  ;;  %v7709_v12 = vrot.slane %v6198_v38, 9  ;;  %v7710_v21 = vrot.slane %v6199_v40, 9  ;;  %v6608_v56 = vpack.c.bf16 %v6544_v36, %v6544_v36 }
 0x3d4   : > { %v5657_v33 = vadd.f32 %v7653_v35, %v5362_v49  ;;  %v5658_v57 = vadd.f32 %v7654_v16, %v5363_v30  ;;  %v5659_v47 = vadd.f32 %v7655_v1, %v5364_v34  ;;  %v5720_v32 = vmul.f32 0.25, %v5656_v9 }
 0x3d5   : > { %v5295_v11 = vmax.f32 %v5263_v13, 0.0  ;;  %v7712_v49 = vrot.slane %v10187_v41, 9  ;;  %v7713_v30 = vrot.slane %v6201_v26, 9  ;;  %v7714_v34 = vrot.slane %v10812_v2, 9 }
 0x3d6   : > { %v5721_v44 = vmul.f32 0.25, %v5657_v33  ;;  %v5722_v55 = vmul.f32 0.25, %v5658_v57  ;;  %v5723_v3 = vmul.f32 0.25, %v5659_v47  ;;  %v5784_v54 = vpack.c.bf16 %v5720_v32, %v5720_v32 }
 0x3d7   : > { %v10227_v28 = vadd.f32 %v5295_v11, %v5293_v46  ;;  %v7715_v1 = vrot.slane %v10811_v25, 9  ;;  %v6481_v33 = vadd.f32 %v7701_v59, %v6192_v42  ;;  %v6482_v32 = vadd.f32 %v7702_v0, %v6193_v60 }
 0x3d8   : > { %v5785_v35 = vpack.c.bf16 %v5721_v44, %v5721_v44  ;;  %v5786_v16 = vpack.c.bf16 %v5722_v55, %v5722_v55  ;;  %v5787_v47 = vpack.c.bf16 %v5723_v3, %v5723_v3  ;;  %v6483_v3 = vadd.f32 %v7703_v8, %v6194_v5  ;;  %v10269_v8 = vpop.f32.mrf.mxu1 }
 0x3d9   : > { %v5365_v9 = vrot.slane %v10227_v28, 2  ;;  %v10813_v11 = vrot.slane %v10227_v28, 4  ;;  %v7656_v46 = vrot.slane %v10227_v28, 9  ;;  %v6484_v55 = vadd.f32 %v7704_v29, %v10175_v48  ;;  %v10293_v29 = vpop.f32.mrf.mxu3 }
 0x3da   : > { %v10239_v13 = vunpack.c.l.b16 %v5785_v35  ;;  %v10246_v57 = vunpack.c.l.b16 %v5786_v16  ;;  %v10251_v25 = vunpack.c.l.b16 %v5784_v54  ;;  %v10965_v42 = vrot.slane %v10175_v48, 4  ;;  %v10291_v35 = vpop.f32.mrf.mxu0 }
 0x3db   : > { %v7657_v44 = vrot.slane %v5365_v9, 9  ;;  %v10258_v2 = vunpack.c.l.b16 %v5787_v47  ;;  %v10262_v60 = vrot.slane %v10813_v11, 9  ;;  %v10265_v53 = vadd.f32 %v7656_v46, %v10227_v28 }
 0x3dc   : > { %v6486_v59 = vadd.f32 %v7706_v62, %v10965_v42  ;;  %v10966_v5 = vrot.slane %v10175_v48, 6  ;;  %v6489_v22 = vadd.f32 %v7709_v12, %v6198_v38  ;;  %v6490_v62 = vadd.f32 %v7710_v21, %v6199_v40  ;;  %v10287_v12 = vpop.f32.mrf.mxu2 }
 0x3dd   : > { %v10278_v16 = vadd.f32 %v7657_v44, %v5365_v9  ;;  %v6491_v48 = vadd.f32 %v7711_v63, %v6200_v14  ;;  %v6493_v47 = vadd.f32 %v7713_v30, %v6201_v26  ;;  %v6494_v46 = vadd.f32 %v7714_v34, %v10967_v18 }
 0x3de   : > { %v6487_v0 = vadd.f32 %v7707_v17, %v10966_v5  ;;  %v6492_v17 = vadd.f32 %v7712_v49, %v10187_v41  ;;  %v6545_v42 = vmul.f32 0.25, %v6481_v33  ;;  %v6546_v38 = vmul.f32 0.25, %v6482_v32 }
 0x3df   : > { %v10968_v40 = vrot.slane %v10187_v41, 6  ;;  %v6547_v9 = vmul.f32 0.25, %v6483_v3  ;;  %v6548_v44 = vmul.f32 0.25, %v6484_v55  ;;  %v6549_v5 = vmul.f32 0.25, %v6485_v39 }
 0x3e0   : > { %v6550_v63 = vmul.f32 0.25, %v6486_v59  ;;  %v6553_v14 = vmul.f32 0.25, %v6489_v22  ;;  %v6554_v49 = vmul.f32 0.25, %v6490_v62  ;;  %v6551_v54 = vmul.f32 0.25, %v6487_v0 }
 0x3e1   : > { %v6495_v21 = vadd.f32 %v7715_v1, %v10968_v40  ;;  %v6552_v11 = vmul.f32 0.25, %v6488_v50  ;;  %v6555_v26 = vmul.f32 0.25, %v6491_v48  ;;  %v6556_v30 = vmul.f32 0.25, %v6492_v17  ;;  %v10295_v17 = vpop.f32.mrf.mxu1 }
 0x3e2   : > { %v6557_v34 = vmul.f32 0.25, %v6493_v47  ;;  %v6558_v33 = vmul.f32 0.25, %v6494_v46  ;;  %v6609_v32 = vpack.c.bf16 %v6545_v42, %v6545_v42  ;;  %v6610_v18 = vpack.c.bf16 %v6546_v38, %v6546_v38 }
 0x3e3   : > { %v6559_v41 = vmul.f32 0.25, %v6495_v21  ;;  %v6611_v1 = vpack.c.bf16 %v6547_v9, %v6547_v9  ;;  %v6612_v3 = vpack.c.bf16 %v6548_v44, %v6548_v44  ;;  %v6613_v55 = vpack.c.bf16 %v6549_v5, %v6549_v5 }
 0x3e4   : > { %v6614_v39 = vpack.c.bf16 %v6550_v63, %v6550_v63  ;;  %v6617_v59 = vpack.c.bf16 %v6553_v14, %v6553_v14  ;;  %v6618_v22 = vpack.c.bf16 %v6554_v49, %v6554_v49  ;;  %v6615_v0 = vpack.c.bf16 %v6551_v54, %v6551_v54  ;;  %v10297_v14 = vpop.f32.mrf.mxu2 }
 0x3e5   : > { %v6616_v50 = vpack.c.bf16 %v6552_v11, %v6552_v11  ;;  %v6619_v62 = vpack.c.bf16 %v6555_v26, %v6555_v26  ;;  %v6620_v48 = vpack.c.bf16 %v6556_v30, %v6556_v30  ;;  %v6621_v47 = vpack.c.bf16 %v6557_v34, %v6557_v34 }
 0x3e6   : > { %v6622_v46 = vpack.c.bf16 %v6558_v33, %v6558_v33  ;;  %v6745_v42 = vunpack.c.l.b16 %v6609_v32  ;;  %v6746_v38 = vunpack.c.l.b16 %v6610_v18  ;;  %v6623_v40 = vpack.c.bf16 %v6559_v41, %v6559_v41 }
 0x3e7   : > { %v6747_v7 = vunpack.c.l.b16 %v6611_v1  ;;  %v6748_v21 = vunpack.c.l.b16 %v6612_v3  ;;  %v6749_v9 = vunpack.c.l.b16 %v6613_v55  ;;  %v6744_v44 = vunpack.c.l.b16 %v6608_v56  ;;  %v4153_v3 = vpop.f32.mrf.mxu0 }
 0x3e8   : > { %v6750_v5 = vunpack.c.l.b16 %v6614_v39  ;;  %v6753_v36 = vunpack.c.l.b16 %v6617_v59  ;;  %v6754_v63 = vunpack.c.l.b16 %v6618_v22  ;;  %v6751_v54 = vunpack.c.l.b16 %v6615_v0  ;;  %v3862_v22 = vpop.f32.mrf.mxu3 }
 0x3e9   : > { %v6752_v11 = vunpack.c.l.b16 %v6616_v50  ;;  %v6755_v49 = vunpack.c.l.b16 %v6619_v62  ;;  %v6756_v26 = vunpack.c.l.b16 %v6620_v48  ;;  %v6757_v30 = vunpack.c.l.b16 %v6621_v47 }
 0x3ea   : > { %v6808_v58 = vrot.slane %v6745_v42, 7  ;;  %v6810_v34 = vrot.slane %v6746_v38, 6  ;;  %v6812_v33 = vrot.slane %v6747_v7, 5  ;;  %v6758_v32 = vunpack.c.l.b16 %v6622_v46 }
 0x3eb   : > { %v6759_v18 = vunpack.c.l.b16 %v6623_v40  ;;  %v6814_v41 = vrot.slane %v6748_v21, 4  ;;  %v6816_v1 = vrot.slane %v6749_v9, 3  ;;  %v6822_v56 = vrot.slane %v6753_v36, 7  ;;  %v4811_v9 = vpop.f32.mrf.mxu1 }
 0x3ec   : > { %v6809_v55 = vsel %vm5959_vm2, %v6808_v58, %v6744_v44  ;;  %v6824_v39 = vrot.slane %v6754_v63, 6  ;;  %v6826_v59 = vrot.slane %v6755_v49, 5  ;;  %v5724_v0 = vmul.f32 0.25, %v10265_v53 }
 0x3ed   : > { %v6811_v50 = vsel %vm5962_vm3, %v6810_v34, %v6809_v55  ;;  %v6818_v62 = vrot.slane %v6750_v5, 2  ;;  %v6828_v48 = vrot.slane %v6756_v26, 4  ;;  %v6820_v7 = vrot.slane %v6751_v54, 1 }
 0x3ee   : > { %v6813_v47 = vsel %vm5965_vm4, %v6812_v33, %v6811_v50  ;;  %v6823_v46 = vsel %vm5959_vm2, %v6822_v56, %v6752_v11  ;;  %v6830_v42 = vrot.slane %v6757_v30, 3  ;;  %v6832_v40 = vrot.slane %v6758_v32, 2  ;;  %v5213_v32 = vpop.f32.mrf.mxu2 }
 0x3ef   : > { %v6815_v38 = vsel %vm5968_vm5, %v6814_v41, %v6813_v47  ;;  %v6825_v58 = vsel %vm5962_vm3, %v6824_v39, %v6823_v46  ;;  %v3915_v21 = vadd.f32 %v3862_v22, %v9769_v45  ;;  %v6834_v5 = vrot.slane %v6759_v18, 1 }
 0x3f0   : > { %v6817_v53 = vsel %vm5971_vm6, %v6816_v1, %v6815_v38  ;;  %v6827_v44 = vsel %vm5965_vm4, %v6826_v59, %v6825_v58  ;;  %v4862_v36 = vadd.f32 %v10269_v8, %v10219_v31  ;;  %v10969_v63 = vrot.slane %v10239_v13, 7 }
 0x3f1   : > { %v6819_v11 = vsel %vm5974_vm8, %v6818_v62, %v6817_v53  ;;  %v6829_v49 = vsel %vm5968_vm5, %v6828_v48, %v6827_v44  ;;  %v4206_v26 = vadd.f32 %v4153_v3, %v3915_v21  ;;  %v5725_v45 = vmul.f32 0.25, %v10278_v16  ;;  %v4155_v62 = vpop.f32.mrf.mxu0 }
 0x3f2   : > { %v6008_v54 = vsel %vm5959_vm2, %v10969_v63, %v10251_v25  ;;  %v6821_v30 = vsel %vm5977_vm9, %v6820_v7, %v6819_v11  ;;  %v6831_v34 = vsel %vm5971_vm6, %v6830_v42, %v6829_v49  ;;  %v5264_v33 = vadd.f32 %v10287_v12, %v4862_v36 }
 0x3f3   : > { %v5788_v31 = vpack.c.bf16 %v5724_v0, %v5724_v0  ;;  %v6833_v8 = vsel %vm5974_vm8, %v6832_v40, %v6831_v34  ;;  %v4864_v13 = vadd.f32 %v4811_v9, %v4206_v26  ;;  %v10970_v25 = vrot.slane %v10133_v43, 6 }
 0x3f4   : > { %v6835_v41 = vsel %vm5977_vm9, %v6834_v5, %v6833_v8  ;;  %v3914_v1 = vadd.f32 %v10293_v29, %v9759_v52  ;;  %v10971_v16 = vrot.slane %v10227_v28, 6  ;;  %v10972_v55 = vrot.slane %v10133_v43, 4 }
 0x3f5   : > { %v7651_v18 = vrot.slane %v10970_v25, 9  ;;  %v6920_v56 = vpack.c.b16 %v6835_v41, %v6821_v30  ;;  %v5266_v39 = vadd.f32 %v5213_v32, %v4864_v13  ;;  %v10973_v59 = vmov %v10970_v25 }
 0x3f6   : > { %v7659_v3 = vrot.slane %v10971_v16, 9  ;;  %v5654_v12 = vadd.f32 %v10173_v24, %v10972_v55  ;;  %v10974_v0 = vrot.slane %v10227_v28, 4  ;;  %v5296_v48 = vmax.f32 %v5264_v33, 0.0  ;;  %v3864_v24 = vpop.f32.mrf.mxu3 }
 0x3f7   : > { %v5655_v22 = vadd.f32 %v7651_v18, %v10973_v59  ;;  %v10975_v52 = vmov %v10971_v16  ;;  %v5781_v7 = vpack.c.bf16 %v10184_v19, %v10184_v19  ;;  %7772 = vmatmul.msk.bf16.vlgmr.msrb.gmra.mxu0 %vm613_vm0, %v6920_v56  ;;  %v5298_v46 = vmax.f32 %v5266_v39, 0.0  ;;  %v4813_v19 = vpop.f32.mrf.mxu1 }
 0x3f8   : > { %v5662_v50 = vadd.f32 %v10262_v60, %v10974_v0  ;;  %v5663_v29 = vadd.f32 %v7659_v3, %v10975_v52  ;;  %v5718_v47 = vmul.f32 0.25, %v5654_v12  ;;  %v5789_v38 = vpack.c.bf16 %v5725_v45, %v5725_v45 }
 0x3f9   : > { %v5719_v42 = vmul.f32 0.25, %v5655_v22  ;;  %v5915_v21 = vunpack.c.l.b16 %v5781_v7  ;;  %v10976_v60 = vrot.slane %v10153_v6, 6  ;;  %v5922_v9 = vunpack.c.l.b16 %v5788_v31  ;;  %v4158_v56 = vpop.f32.mrf.mxu0  ;;  %v489_v7 = vld [vmem:[%s8276_s17 + $0x20] sm:$0xff]  }
 0x3fa   : > { %v5726_v43 = vmul.f32 0.25, %v5662_v50  ;;  %v5727_v58 = vmul.f32 0.25, %v5663_v29  ;;  %v5782_v40 = vpack.c.bf16 %v5718_v47, %v5718_v47  ;;  %v5320_v53 = vadd.f32 %v5298_v46, %v5296_v48  ;;  %v5215_v47 = vpop.f32.mrf.mxu2 }
 0x3fb   : > { %v5996_v28 = vsel %vm5962_vm3, %v10976_v60, %v10182_v4  ;;  %v5783_v44 = vpack.c.bf16 %v5719_v42, %v5719_v42  ;;  %v4205_v36 = vadd.f32 %v10291_v35, %v3914_v1  ;;  %v3916_v63 = vadd.f32 %v3864_v24, %v9781_v37 }
 0x3fc   : > { %v5790_v5 = vpack.c.bf16 %v5726_v43, %v5726_v43  ;;  %v5916_v11 = vunpack.c.l.b16 %v5782_v40  ;;  %v6001_v49 = vrot.slane %v5915_v21, 3  ;;  %v5368_v26 = vrot.slane %v5320_v53, 2  ;;  %v491_v40 = vld [vmem:[%s8276_s17 + $0x28] sm:$0xff]   ;;  %v493_v21 = vld [vmem:[%s8276_s17 + $0x30] sm:$0xff]  }
 0x3fd   : > { %v5369_v45 = vrot.slane %v5320_v53, 4  ;;  %v5370_v30 = vrot.slane %v5320_v53, 6  ;;  %v10977_v34 = vrot.slane %v10155_v20, 5  ;;  %v5791_v33 = vpack.c.bf16 %v5727_v58, %v5727_v58 }
 0x3fe   : > { %v5917_v4 = vunpack.c.l.b16 %v5783_v44  ;;  %v5923_v32 = vunpack.c.l.b16 %v5789_v38  ;;  %v10978_v31 = vrot.slane %v10165_v61, 4  ;;  %v6011_v35 = vrot.slane %v10258_v2, 5  ;;  %v495_v44 = vld [vmem:[%s8276_s17 + $0x38] sm:$0xff]  }
 0x3ff   : > { %v5998_v6 = vsel %vm5965_vm4, %v10977_v34, %v5996_v28  ;;  %v6013_v13 = vrot.slane %v5922_v9, 4  ;;  %v7660_v37 = vrot.slane %v5320_v53, 9  ;;  %v5924_v25 = vunpack.c.l.b16 %v5790_v5  ;;  %v10366_v24 = vpop.f32.mrf.mxu1  ;;  %v3867_v9 = vpop.f32.mrf.mxu3 }
 0x400   : > { %v6000_v8 = vsel %vm5968_vm5, %v10978_v31, %v5998_v6  ;;  %v7661_v18 = vrot.slane %v5368_v26, 9  ;;  %v6003_v1 = vrot.slane %v5916_v11, 2  ;;  %v10979_v20 = vrot.slane %v10246_v57, 6 }
 0x401   : > { %v6002_v41 = vsel %vm5971_vm6, %v6001_v49, %v6000_v8  ;;  %v4863_v3 = vadd.f32 %v10295_v17, %v4205_v36  ;;  %v4207_v55 = vadd.f32 %v4155_v62, %v3916_v63  ;;  %v7662_v12 = vrot.slane %v5369_v45, 9 }
 0x402   : > { %v6010_v16 = vsel %vm5962_vm3, %v10979_v20, %v6008_v54  ;;  %v7663_v61 = vrot.slane %v5370_v30, 9  ;;  %v5925_v39 = vunpack.c.l.b16 %v5791_v33  ;;  %v6004_v2 = vsel %vm5974_vm8, %v6003_v1, %v6002_v41 }
 0x403   : > { %v6005_v59 = vrot.slane %v5917_v4, 1  ;;  %v6015_v22 = vrot.slane %v5923_v32, 3  ;;  %v5265_v0 = vadd.f32 %v10297_v14, %v4863_v3  ;;  %v5664_v50 = vadd.f32 %v7660_v37, %v5320_v53  ;;  %v10380_v32 = vpop.f32.mrf.mxu0 }
 0x404   : > { %v6012_v48 = vsel %vm5965_vm4, %v6011_v35, %v6010_v16  ;;  %v6017_v57 = vrot.slane %v5924_v25, 2  ;;  %v5665_v54 = vadd.f32 %v7661_v18, %v5368_v26  ;;  %v5666_v52 = vadd.f32 %v7662_v12, %v5369_v45 }
 0x405   : > { %v6006_v17 = vsel %vm5977_vm9, %v6005_v59, %v6004_v2  ;;  %v6014_v62 = vsel %vm5968_vm5, %v6013_v13, %v6012_v48  ;;  %v5667_v29 = vadd.f32 %v7663_v61, %v5370_v30  ;;  %v6019_v46 = vrot.slane %v5925_v39, 1 }
 0x406   : > { %v6016_v14 = vsel %vm5971_vm6, %v6015_v22, %v6014_v62  ;;  %v4865_v42 = vadd.f32 %v4813_v19, %v4207_v55  ;;  %v5297_v43 = vmax.f32 %v5265_v0, 0.0  ;;  %v10369_v38 = vmul.f32 0.25, %v5664_v50 }
 0x407   : > { %v6018_v58 = vsel %vm5974_vm8, %v6017_v57, %v6016_v14  ;;  %v5729_v60 = vmul.f32 0.25, %v5665_v54  ;;  %v6132_v5 = vunpack.c.l.bf16 %v489_v7  ;;  %v5730_v36 = vmul.f32 0.25, %v5666_v52  ;;  %v10392_v3 = vpop.f32.mrf.mxu1 }
 0x408   : > { %10980 = vst [vmem:[#allocation22_spill] sm:$0xff] %v10369_v38  ;;  %v6020_v28 = vsel %vm5977_vm9, %v6019_v46, %v6018_v58  ;;  %v5267_v53 = vadd.f32 %v5215_v47, %v4865_v42  ;;  %v10376_v63 = vmul.f32 0.25, %v5667_v29  ;;  %v6133_v49 = vunpack.c.h.bf16 %v489_v7 }
 0x409   : > { %v6078_v11 = vpack.c.b16 %v6020_v28, %v6006_v17  ;;  %v6134_v26 = vunpack.c.l.bf16 %v493_v21  ;;  %v6148_v45 = vunpack.c.l.bf16 %v491_v40  ;;  %v6149_v30 = vunpack.c.h.bf16 %v491_v40  ;;  %v10405_v40 = vpop.f32.mrf.mxu3 }
 0x40a   : > { %v5299_v19 = vmax.f32 %v5267_v53, 0.0  ;;  %v3917_v34 = vadd.f32 %v3867_v9, %v9793_v27  ;;  %v6135_v6 = vunpack.c.h.bf16 %v493_v21  ;;  %v6150_v33 = vunpack.c.l.bf16 %v495_v44  ;;  %v10407_v21 = vpop.f32.mrf.mxu2 }
 0x40b   : > { %7697 = vmatmul.msk.bf16.gmra.mxu3 %vm1375_vm7, %v6078_v11  ;;  %v6151_v4 = vunpack.c.h.bf16 %v495_v44  ;;  %v5793_v31 = vpack.c.bf16 %v5729_v60, %v5729_v60  ;;  %v6164_v35 = vadd.f32 %v6148_v45, %v6132_v5  ;;  %v5794_v13 = vpack.c.bf16 %v5730_v36, %v5730_v36  ;;  %v10409_v60 = vpop.f32.mrf.mxu0 }
 0x40c   : > { %v10382_v8 = vadd.f32 %v5299_v19, %v5297_v43  ;;  %v6165_v37 = vadd.f32 %v6149_v30, %v6133_v49  ;;  %v6166_v41 = vadd.f32 %v6150_v33, %v6134_v26  ;;  %v10389_v1 = vadd.f32 %v4158_v56, %v3917_v34 }
 0x40d   : > { %v6167_v16 = vadd.f32 %v6151_v4, %v6135_v6  ;;  %v10394_v55 = vunpack.c.l.b16 %v5793_v31  ;;  %v6204_v61 = vrot.slane %v6164_v35, 2  ;;  %v6205_v39 = vrot.slane %v6164_v35, 4 }
 0x40e   : > { %v7664_v18 = vrot.slane %v10382_v8, 9  ;;  %v10814_v20 = vrot.slane %v10382_v8, 2  ;;  %v10397_v2 = vunpack.c.l.b16 %v5794_v13  ;;  %v6206_v59 = vrot.slane %v6164_v35, 6 }
 0x40f   : > { %v6207_v22 = vrot.slane %v6165_v37, 2  ;;  %v6208_v0 = vrot.slane %v6165_v37, 4  ;;  %v6209_v56 = vrot.slane %v6165_v37, 6  ;;  %v6210_v48 = vrot.slane %v6166_v41, 2  ;;  %v10413_v31 = vpop.f32.mrf.mxu1 }
 0x410   : > { %v5668_v12 = vadd.f32 %v7664_v18, %v10382_v8  ;;  %10981 = vst [vmem:[#allocation23_spill] sm:$0xff] %v10397_v2  ;;  %v6211_v57 = vrot.slane %v6166_v41, 4  ;;  %v10403_v54 = vrot.slane %v10814_v20, 9  ;;  %v6212_v17 = vrot.slane %v6166_v41, 6 }
 0x411   : > { %v6213_v62 = vrot.slane %v6167_v16, 2  ;;  %v6214_v52 = vrot.slane %v6167_v16, 4  ;;  %v6215_v29 = vrot.slane %v6167_v16, 6  ;;  %v7716_v47 = vrot.slane %v6164_v35, 9 }
 0x412   : > { %v10399_v50 = vmul.f32 0.25, %v5668_v12  ;;  %10983 = vst [vmem:[#allocation24_spill] sm:$0xff] %v10403_v54  ;;  %v7717_v7 = vrot.slane %v6204_v61, 9  ;;  %v7718_v14 = vrot.slane %v6205_v39, 9  ;;  %v7719_v46 = vrot.slane %v6206_v59, 9 }
 0x413   : > { %v7720_v42 = vrot.slane %v6165_v37, 9  ;;  %v7721_v43 = vrot.slane %v6207_v22, 9  ;;  %v7722_v58 = vrot.slane %v6208_v0, 9  ;;  %v7723_v9 = vrot.slane %v6209_v56, 9 }
 0x414   : > { %10982 = vst [vmem:[#allocation25_spill] sm:$0xff] %v10399_v50  ;;  %v7725_v53 = vrot.slane %v6210_v48, 9  ;;  %v7726_v44 = vrot.slane %v6211_v57, 9  ;;  %v7724_v5 = vrot.slane %v6166_v41, 9  ;;  %v7727_v36 = vrot.slane %v6212_v17, 9 }
 0x415   : > { %v7728_v11 = vrot.slane %v6167_v16, 9  ;;  %v7729_v49 = vrot.slane %v6213_v62, 9  ;;  %v7730_v19 = vrot.slane %v6214_v52, 9  ;;  %v7731_v26 = vrot.slane %v6215_v29, 9 }
 0x416   : > { %v6497_v45 = vadd.f32 %v7717_v7, %v6204_v61  ;;  %v6498_v30 = vadd.f32 %v7718_v14, %v6205_v39  ;;  %v6499_v34 = vadd.f32 %v7719_v46, %v6206_v59  ;;  %v6500_v6 = vadd.f32 %v7720_v42, %v6165_v37 }
 0x417   : > { %v6501_v33 = vadd.f32 %v7721_v43, %v6207_v22  ;;  %v6502_v4 = vadd.f32 %v7722_v58, %v6208_v0  ;;  %v6496_v13 = vadd.f32 %v7716_v47, %v6164_v35  ;;  %v6503_v18 = vadd.f32 %v7723_v9, %v6209_v56  ;;  %v10415_v22 = vpop.f32.mrf.mxu3  ;;  %v10417_v0 = vpop.f32.mrf.mxu2 }
 0x418   : > { %v6505_v12 = vadd.f32 %v7725_v53, %v6210_v48  ;;  %v6506_v25 = vadd.f32 %v7726_v44, %v6211_v57  ;;  %v6504_v28 = vadd.f32 %v7724_v5, %v6166_v41  ;;  %v6507_v20 = vadd.f32 %v7727_v36, %v6212_v17 }
 0x419   : > { %v6508_v27 = vadd.f32 %v7728_v11, %v6167_v16  ;;  %v6509_v15 = vadd.f32 %v7729_v49, %v6213_v62  ;;  %v6510_v2 = vadd.f32 %v7730_v19, %v6214_v52  ;;  %v6511_v38 = vadd.f32 %v7731_v26, %v6215_v29  ;;  %v10419_v52 = vpop.f32.mrf.mxu0 }
 0x41a   : > { %v6561_v50 = vmul.f32 0.25, %v6497_v45  ;;  %v6562_v54 = vmul.f32 0.25, %v6498_v30  ;;  %v6563_v61 = vmul.f32 0.25, %v6499_v34  ;;  %v6564_v39 = vmul.f32 0.25, %v6500_v6 }
 0x41b   : > { %v6565_v59 = vmul.f32 0.25, %v6501_v33  ;;  %v6566_v37 = vmul.f32 0.25, %v6502_v4  ;;  %v6560_v35 = vmul.f32 0.25, %v6496_v13  ;;  %v6567_v56 = vmul.f32 0.25, %v6503_v18 }
 0x41c   : > { %v6569_v48 = vmul.f32 0.25, %v6505_v12  ;;  %v6570_v57 = vmul.f32 0.25, %v6506_v25  ;;  %v6568_v41 = vmul.f32 0.25, %v6504_v28  ;;  %v6571_v17 = vmul.f32 0.25, %v6507_v20 }
 0x41d   : > { %v6572_v16 = vmul.f32 0.25, %v6508_v27  ;;  %v6573_v62 = vmul.f32 0.25, %v6509_v15  ;;  %v6574_v29 = vmul.f32 0.25, %v6510_v2  ;;  %v6575_v47 = vmul.f32 0.25, %v6511_v38  ;;  %v10421_v27 = vpop.f32.mrf.mxu1 }
 0x41e   : > { %v6625_v7 = vpack.c.bf16 %v6561_v50, %v6561_v50  ;;  %v6626_v14 = vpack.c.bf16 %v6562_v54, %v6562_v54  ;;  %v6627_v46 = vpack.c.bf16 %v6563_v61, %v6563_v61  ;;  %v6628_v42 = vpack.c.bf16 %v6564_v39, %v6564_v39 }
 0x41f   : > { %v6629_v43 = vpack.c.bf16 %v6565_v59, %v6565_v59  ;;  %v6630_v58 = vpack.c.bf16 %v6566_v37, %v6566_v37  ;;  %v6624_v9 = vpack.c.bf16 %v6560_v35, %v6560_v35  ;;  %v6631_v53 = vpack.c.bf16 %v6567_v56, %v6567_v56  ;;  %v3874_v26 = vpop.f32.mrf.mxu3  ;;  %v5223_v45 = vpop.f32.mrf.mxu2 }
 0x420   : > { %v6633_v44 = vpack.c.bf16 %v6569_v48, %v6569_v48  ;;  %v6634_v5 = vpack.c.bf16 %v6570_v57, %v6570_v57  ;;  %v6632_v36 = vpack.c.bf16 %v6568_v41, %v6568_v41  ;;  %v6635_v25 = vpack.c.bf16 %v6571_v17, %v6571_v17 }
 0x421   : > { %v6636_v28 = vpack.c.bf16 %v6572_v16, %v6572_v16  ;;  %v6637_v20 = vpack.c.bf16 %v6573_v62, %v6573_v62  ;;  %v6638_v15 = vpack.c.bf16 %v6574_v29, %v6574_v29  ;;  %v6639_v11 = vpack.c.bf16 %v6575_v47, %v6575_v47  ;;  %v4168_v41 = vpop.f32.mrf.mxu0 }
 0x422   : > { %v6761_v2 = vunpack.c.l.b16 %v6625_v7  ;;  %v6762_v38 = vunpack.c.l.b16 %v6626_v14  ;;  %v6763_v50 = vunpack.c.l.b16 %v6627_v46  ;;  %v6764_v54 = vunpack.c.l.b16 %v6628_v42 }
 0x423   : > { %v6765_v49 = vunpack.c.l.b16 %v6629_v43  ;;  %v6766_v19 = vunpack.c.l.b16 %v6630_v58  ;;  %v6760_v30 = vunpack.c.l.b16 %v6624_v9  ;;  %v6767_v34 = vunpack.c.l.b16 %v6631_v53  ;;  %v10984_v9 = vld [vmem:[#allocation15_spill] sm:$0xff] }
 0x424   : > { %v6769_v6 = vunpack.c.l.b16 %v6633_v44  ;;  %v6770_v33 = vunpack.c.l.b16 %v6634_v5  ;;  %v6768_v4 = vunpack.c.l.b16 %v6632_v36  ;;  %v6771_v13 = vunpack.c.l.b16 %v6635_v25 }
 0x425   : > { %v6772_v18 = vunpack.c.l.b16 %v6636_v28  ;;  %v6773_v12 = vunpack.c.l.b16 %v6637_v20  ;;  %v6774_v61 = vunpack.c.l.b16 %v6638_v15  ;;  %v6836_v39 = vrot.slane %v6761_v2, 7  ;;  %v4826_v15 = vpop.f32.mrf.mxu1 }
 0x426   : > { %v6838_v59 = vrot.slane %v6762_v38, 6  ;;  %v6840_v37 = vrot.slane %v6763_v50, 5  ;;  %v6775_v35 = vunpack.c.l.b16 %v6639_v11  ;;  %v6842_v56 = vrot.slane %v6764_v54, 4 }
 0x427   : > { %v6844_v48 = vrot.slane %v6765_v49, 3  ;;  %v6846_v57 = vrot.slane %v6766_v19, 2  ;;  %v6837_v17 = vsel %vm5959_vm2, %v6836_v39, %v6760_v30  ;;  %v6850_v16 = vrot.slane %v6769_v6, 7  ;;  %v3877_v28 = vpop.f32.mrf.mxu3  ;;  %v5225_v20 = vpop.f32.mrf.mxu2 }
 0x428   : > { %v6852_v62 = vrot.slane %v6770_v33, 6  ;;  %v6854_v29 = vrot.slane %v6771_v13, 5  ;;  %v6839_v47 = vsel %vm5962_vm3, %v6838_v59, %v6837_v17  ;;  %v6848_v7 = vrot.slane %v6767_v34, 1 }
 0x429   : > { %v6856_v14 = vrot.slane %v6772_v18, 4  ;;  %v6858_v46 = vrot.slane %v6773_v12, 3  ;;  %v6841_v42 = vsel %vm5965_vm4, %v6840_v37, %v6839_v47  ;;  %v6851_v43 = vsel %vm5959_vm2, %v6850_v16, %v6768_v4  ;;  %v10987_v18 = vld [vmem:[#allocation24_spill] sm:$0xff] }
 0x42a   : > { %v6860_v58 = vrot.slane %v6774_v61, 2  ;;  %v3918_v53 = vadd.f32 %v10405_v40, %v10984_v9  ;;  %v6843_v44 = vsel %vm5968_vm5, %v6842_v56, %v6841_v42  ;;  %v6853_v5 = vsel %vm5962_vm3, %v6852_v62, %v6851_v43  ;;  %v10988_v61 = vld [vmem:[#allocation25_spill] sm:$0xff] }
 0x42b   : > { %v6862_v36 = vrot.slane %v6775_v35, 1  ;;  %v3919_v25 = vadd.f32 %v10415_v22, %v9819_v23  ;;  %v6845_v11 = vsel %vm5971_vm6, %v6844_v48, %v6843_v44  ;;  %v6855_v2 = vsel %vm5965_vm4, %v6854_v29, %v6853_v5  ;;  %v10993_v29 = vld [vmem:[#allocation48_spill] sm:$0xff] }
 0x42c   : > { %v4209_v38 = vadd.f32 %v10380_v32, %v3918_v53  ;;  %v3920_v50 = vadd.f32 %v3874_v26, %v9832_v51  ;;  %v6847_v40 = vsel %vm5974_vm8, %v6846_v57, %v6845_v11  ;;  %v6857_v54 = vsel %vm5968_vm5, %v6856_v14, %v6855_v2 }
 0x42d   : > { %v4866_v49 = vadd.f32 %v10366_v24, %v10389_v1  ;;  %v4210_v23 = vadd.f32 %v10409_v60, %v3919_v25  ;;  %v6849_v22 = vsel %vm5977_vm9, %v6848_v7, %v6847_v40  ;;  %v6859_v19 = vsel %vm5971_vm6, %v6858_v46, %v6857_v54  ;;  %v4828_v43 = vpop.f32.mrf.mxu1 }
 0x42e   : > { %v4867_v30 = vadd.f32 %v10392_v3, %v4209_v38  ;;  %v4211_v34 = vadd.f32 %v10419_v52, %v3920_v50  ;;  %v6861_v32 = vsel %vm5974_vm8, %v6860_v58, %v6859_v19  ;;  %v3921_v6 = vadd.f32 %v3877_v28, %v9844_v10 }
 0x42f   : > { %v5268_v51 = vadd.f32 %v10407_v21, %v4866_v49  ;;  %v4868_v26 = vadd.f32 %v10413_v31, %v4210_v23  ;;  %v6863_v24 = vsel %vm5977_vm9, %v6862_v36, %v6861_v32  ;;  %v10985_v33 = vpack.c.bf16 %v10376_v63, %v10376_v63  ;;  %v4170_v21 = vpop.f32.mrf.mxu0  ;;  %v10990_v63 = vld [vmem:[#allocation22_spill] sm:$0xff]  ;;  %v3879_v48 = vpop.f32.mrf.mxu3 }
 0x430   : > { %v5269_v1 = vadd.f32 %v10417_v0, %v4867_v30  ;;  %v4869_v60 = vadd.f32 %v10421_v27, %v4211_v34  ;;  %v6021_v52 = vrot.slane %v10394_v55, 7  ;;  %v6921_v4 = vpack.c.b16 %v6863_v24, %v6849_v22  ;;  %v10992_v55 = vld [vmem:[#allocation23_spill] sm:$0xff]  ;;  %v5228_v57 = vpop.f32.mrf.mxu2 }
 0x431   : > { %v10456_v3 = vunpack.c.l.b16 %v10985_v33  ;;  %v5270_v13 = vadd.f32 %v5223_v45, %v4868_v26  ;;  %v5372_v31 = vrot.slane %v10382_v8, 4  ;;  %v10986_v10 = vrot.slane %v10382_v8, 2  ;;  %v10994_v33 = vld [vmem:[#allocation16_spill] sm:$0xff] }
 0x432   : > { %v10989_v0 = vpack.c.bf16 %v10988_v61, %v10988_v61  ;;  %v5271_v39 = vadd.f32 %v5225_v20, %v4869_v60  ;;  %v10991_v59 = vpack.c.bf16 %v10990_v63, %v10990_v63  ;;  %v6023_v35 = vrot.slane %v10992_v55, 6  ;;  %7773 = vmatmul.msk.bf16.gmra.mxu0 %vm613_vm0, %v6921_v4 }
 0x433   : > { %v5669_v12 = vadd.f32 %v10987_v18, %v10986_v10  ;;  %v5300_v45 = vmax.f32 %v5268_v51, 0.0  ;;  %v5302_v56 = vmax.f32 %v5270_v13, 0.0  ;;  %v5301_v17 = vmax.f32 %v5269_v1, 0.0 }
 0x434   : > { %v10466_v27 = vunpack.c.l.b16 %v10989_v0  ;;  %v5926_v37 = vunpack.c.l.b16 %v10991_v59  ;;  %v4212_v16 = vadd.f32 %v4168_v41, %v3921_v6  ;;  %v5303_v62 = vmax.f32 %v5271_v39, 0.0 }
 0x435   : > { %v3922_v47 = vadd.f32 %v3879_v48, %v10993_v29  ;;  %v6025_v14 = vrot.slane %v10456_v3, 5  ;;  %v5373_v46 = vrot.slane %v10382_v8, 6  ;;  %v5322_v42 = vadd.f32 %v5302_v56, %v5300_v45  ;;  %v4831_v45 = vpop.f32.mrf.mxu1 }
 0x436   : > { %v10475_v7 = vsel %vm5959_vm2, %v6021_v52, %v5926_v37  ;;  %v7666_v58 = vrot.slane %v5372_v31, 9  ;;  %v10481_v9 = vmul.f32 0.25, %v5669_v12  ;;  %v6027_v53 = vrot.slane %v10466_v27, 4 }
 0x437   : > { %v5323_v41 = vadd.f32 %v5303_v62, %v5301_v17  ;;  %v5374_v44 = vrot.slane %v5322_v42, 2  ;;  %v5375_v5 = vrot.slane %v5322_v42, 4  ;;  %v5376_v36 = vrot.slane %v5322_v42, 6  ;;  %v3882_v26 = vpop.f32.mrf.mxu3 }
 0x438   : > { %v7668_v25 = vrot.slane %v5322_v42, 9  ;;  %v4870_v2 = vadd.f32 %v4826_v15, %v4212_v16  ;;  %v4213_v22 = vadd.f32 %v4170_v21, %v3922_v47  ;;  %v5230_v6 = vpop.f32.mrf.mxu2  ;;  %v3923_v52 = vadd.f32 %v3882_v26, %v10994_v33  ;;  %v4173_v15 = vpop.f32.mrf.mxu0 }
 0x439   : > { %v5377_v28 = vrot.slane %v5323_v41, 2  ;;  %v5378_v20 = vrot.slane %v5323_v41, 4  ;;  %v7672_v11 = vrot.slane %v5323_v41, 9  ;;  %v7669_v38 = vrot.slane %v5374_v44, 9 }
 0x43a   : > { %v7670_v50 = vrot.slane %v5375_v5, 9  ;;  %v7671_v40 = vrot.slane %v5376_v36, 9  ;;  %v5672_v54 = vadd.f32 %v7668_v25, %v5322_v42  ;;  %v5272_v19 = vadd.f32 %v5228_v57, %v4870_v2 }
 0x43b   : > { %v7673_v49 = vrot.slane %v5377_v28, 9  ;;  %v5676_v23 = vadd.f32 %v7672_v11, %v5323_v41  ;;  %v5673_v30 = vadd.f32 %v7669_v38, %v5374_v44  ;;  %v5379_v24 = vrot.slane %v5323_v41, 6  ;;  %v10995_v38 = vld [vmem:[#allocation17_spill] sm:$0xff] }
 0x43c   : > { %v5674_v34 = vadd.f32 %v7670_v50, %v5375_v5  ;;  %v5675_v32 = vadd.f32 %v7671_v40, %v5376_v36  ;;  %v5736_v51 = vmul.f32 0.25, %v5672_v54  ;;  %v7674_v18 = vrot.slane %v5378_v20, 9 }
 0x43d   : > { %v5677_v1 = vadd.f32 %v7673_v49, %v5377_v28  ;;  %v5740_v60 = vmul.f32 0.25, %v5676_v23  ;;  %v5737_v4 = vmul.f32 0.25, %v5673_v30  ;;  %v5304_v61 = vmax.f32 %v5272_v19, 0.0  ;;  %v4833_v27 = vpop.f32.mrf.mxu1 }
 0x43e   : > { %v5738_v13 = vmul.f32 0.25, %v5674_v34  ;;  %v5739_v10 = vmul.f32 0.25, %v5675_v32  ;;  %v4214_v21 = vadd.f32 %v4173_v15, %v3923_v52  ;;  %v4871_v0 = vadd.f32 %v4828_v43, %v4213_v22 }
 0x43f   : > { %v5804_v12 = vpack.c.bf16 %v5740_v60, %v5740_v60  ;;  %v5800_v39 = vpack.c.bf16 %v5736_v51, %v5736_v51  ;;  %v5801_v63 = vpack.c.bf16 %v5737_v4, %v5737_v4  ;;  %v5741_v56 = vmul.f32 0.25, %v5677_v1  ;;  %v3884_v28 = vpop.f32.mrf.mxu3 }
 0x440   : > { %v5802_v59 = vpack.c.bf16 %v5738_v13, %v5738_v13  ;;  %v5803_v37 = vpack.c.bf16 %v5739_v10, %v5739_v10  ;;  %v10487_v57 = vadd.f32 %v5230_v6, %v4871_v0  ;;  %v7667_v17 = vrot.slane %v5373_v46, 9  ;;  %v5233_v11 = vpop.f32.mrf.mxu2  ;;  %v4175_v30 = vpop.f32.mrf.mxu0 }
 0x441   : > { %v10485_v48 = vunpack.c.l.b16 %v5804_v12  ;;  %v5935_v16 = vunpack.c.l.b16 %v5801_v63  ;;  %v4872_v29 = vadd.f32 %v4831_v45, %v4214_v21  ;;  %v7675_v47 = vrot.slane %v5379_v24, 9 }
 0x442   : > { %v5936_v62 = vunpack.c.l.b16 %v5802_v59  ;;  %v5937_v42 = vunpack.c.l.b16 %v5803_v37  ;;  %v5670_v41 = vadd.f32 %v7666_v58, %v5372_v31  ;;  %v5671_v43 = vadd.f32 %v7667_v17, %v5373_v46 }
 0x443   : > { %v5678_v44 = vadd.f32 %v7674_v18, %v5378_v20  ;;  %v5934_v5 = vunpack.c.l.b16 %v5800_v39  ;;  %v6035_v36 = vrot.slane %v5935_v16, 7  ;;  %v6041_v25 = vrot.slane %v10485_v48, 4 }
 0x444   : > { %v5679_v2 = vadd.f32 %v7675_v47, %v5379_v24  ;;  %v3924_v50 = vadd.f32 %v3884_v28, %v10995_v38  ;;  %v5274_v40 = vadd.f32 %v5233_v11, %v4872_v29  ;;  %v5734_v54 = vmul.f32 0.25, %v5670_v41 }
 0x445   : > { %v5735_v49 = vmul.f32 0.25, %v5671_v43  ;;  %v6037_v23 = vrot.slane %v5936_v62, 6  ;;  %v5742_v22 = vmul.f32 0.25, %v5678_v44  ;;  %v5797_v8 = vpack.c.bf16 %v10481_v9, %v10481_v9 }
 0x446   : > { %v5743_v19 = vmul.f32 0.25, %v5679_v2  ;;  %v6039_v31 = vrot.slane %v5937_v42, 5  ;;  %v5306_v46 = vmax.f32 %v5274_v40, 0.0  ;;  %v5798_v58 = vpack.c.bf16 %v5734_v54, %v5734_v54 }
 0x447   : > { %v5799_v20 = vpack.c.bf16 %v5735_v49, %v5735_v49  ;;  %v6036_v34 = vsel %vm5959_vm2, %v6035_v36, %v5934_v5  ;;  %v5805_v32 = vpack.c.bf16 %v5741_v56, %v5741_v56  ;;  %v5806_v51 = vpack.c.bf16 %v5742_v22, %v5742_v22  ;;  %v3887_v5 = vpop.f32.mrf.mxu3 }
 0x448   : > { %v5931_v26 = vunpack.c.l.b16 %v5797_v8  ;;  %v4215_v6 = vadd.f32 %v4175_v30, %v3924_v50  ;;  %v5324_v24 = vadd.f32 %v5306_v46, %v5304_v61  ;;  %v5932_v1 = vunpack.c.l.b16 %v5798_v58  ;;  %v4178_v16 = vpop.f32.mrf.mxu0  ;;  %v5235_v36 = vpop.f32.mrf.mxu2  ;;  %v10996_v8 = vld [vmem:[#allocation18_spill] sm:$0xff]  ;;  %v501_v46 = vld [vmem:[%s8276_s17 + $0x50] sm:$0xff]  }
 0x449   : > { %v6024_v60 = vsel %vm5962_vm3, %v6023_v35, %v10475_v7  ;;  %v5807_v33 = vpack.c.bf16 %v5743_v19, %v5743_v19  ;;  %v5933_v9 = vunpack.c.l.b16 %v5799_v20  ;;  %v5939_v52 = vunpack.c.l.b16 %v5805_v32  ;;  %v499_v30 = vld [vmem:[%s8276_s17 + $0x48] sm:$0xff]  }
 0x44a   : > { %v6026_v15 = vsel %vm5965_vm4, %v6025_v14, %v6024_v60  ;;  %v5380_v4 = vrot.slane %v5324_v24, 2  ;;  %v5381_v13 = vrot.slane %v5324_v24, 4  ;;  %v5382_v10 = vrot.slane %v5324_v24, 6 }
 0x44b   : > { %v7676_v18 = vrot.slane %v5324_v24, 9  ;;  %v5940_v12 = vunpack.c.l.b16 %v5806_v51  ;;  %v6028_v61 = vsel %vm5968_vm5, %v6027_v53, %v6026_v15  ;;  %v6029_v21 = vrot.slane %v5931_v26, 3 }
 0x44c   : > { %v6031_v55 = vrot.slane %v5932_v1, 2  ;;  %v7677_v0 = vrot.slane %v5380_v4, 9  ;;  %v7678_v35 = vrot.slane %v5381_v13, 9  ;;  %v7679_v7 = vrot.slane %v5382_v10, 9 }
 0x44d   : > { %v5680_v39 = vadd.f32 %v7676_v18, %v5324_v24  ;;  %v5941_v63 = vunpack.c.l.b16 %v5807_v33  ;;  %v6030_v3 = vsel %vm5971_vm6, %v6029_v21, %v6028_v61  ;;  %v6033_v59 = vrot.slane %v5933_v9, 1 }
 0x44e   : > { %v6038_v14 = vsel %vm5962_vm3, %v6037_v23, %v6036_v34  ;;  %v5681_v37 = vadd.f32 %v7677_v0, %v5380_v4  ;;  %v5682_v45 = vadd.f32 %v7678_v35, %v5381_v13  ;;  %v5683_v56 = vadd.f32 %v7679_v7, %v5382_v10  ;;  %v497_v23 = vld [vmem:[%s8276_s17 + $0x40] sm:$0xff]   ;;  %v503_v34 = vld [vmem:[%s8276_s17 + $0x58] sm:$0xff]  }
 0x44f   : > { %v5744_v17 = vmul.f32 0.25, %v5680_v39  ;;  %v6032_v53 = vsel %vm5974_vm8, %v6031_v55, %v6030_v3  ;;  %v6040_v62 = vsel %vm5965_vm4, %v6039_v31, %v6038_v14  ;;  %v6043_v29 = vrot.slane %v5939_v52, 3 }
 0x450   : > { %v6045_v47 = vrot.slane %v5940_v12, 2  ;;  %v5745_v42 = vmul.f32 0.25, %v5681_v37  ;;  %v5746_v41 = vmul.f32 0.25, %v5682_v45  ;;  %v5747_v43 = vmul.f32 0.25, %v5683_v56  ;;  %v10540_v35 = vpop.f32.mrf.mxu0 }
 0x451   : > { %v5808_v44 = vpack.c.bf16 %v5744_v17, %v5744_v17  ;;  %v5305_v28 = vmax.f32 %v10487_v57, 0.0  ;;  %v6034_v11 = vsel %vm5977_vm9, %v6033_v59, %v6032_v53  ;;  %v6042_v2 = vsel %vm5968_vm5, %v6041_v25, %v6040_v62 }
 0x452   : > { %v4873_v38 = vadd.f32 %v4833_v27, %v4215_v6  ;;  %v5809_v50 = vpack.c.bf16 %v5745_v42, %v5745_v42  ;;  %v5810_v40 = vpack.c.bf16 %v5746_v41, %v5746_v41  ;;  %v5811_v54 = vpack.c.bf16 %v5747_v43, %v5747_v43 }
 0x453   : > { %v6047_v49 = vrot.slane %v5941_v63, 1  ;;  %v5942_v22 = vunpack.c.l.b16 %v5808_v44  ;;  %v6044_v19 = vsel %vm5971_vm6, %v6043_v29, %v6042_v2  ;;  %v3925_v31 = vadd.f32 %v3887_v5, %v10996_v8  ;;  %v10550_v2 = vpop.f32.mrf.mxu1  ;;  %v10554_v8 = vpop.f32.mrf.mxu3 }
 0x454   : > { %v5275_v57 = vadd.f32 %v5235_v36, %v4873_v38  ;;  %v5943_v58 = vunpack.c.l.b16 %v5809_v50  ;;  %v10519_v20 = vunpack.c.l.b16 %v5810_v40  ;;  %v10521_v48 = vunpack.c.l.b16 %v5811_v54 }
 0x455   : > { %v6046_v25 = vsel %vm5974_vm8, %v6045_v47, %v6044_v19  ;;  %v6136_v26 = vunpack.c.l.bf16 %v497_v23  ;;  %v6137_v6 = vunpack.c.h.bf16 %v497_v23  ;;  %v6138_v60 = vunpack.c.l.bf16 %v501_v46 }
 0x456   : > { %v6048_v32 = vsel %vm5977_vm9, %v6047_v49, %v6046_v25  ;;  %v5307_v51 = vmax.f32 %v5275_v57, 0.0  ;;  %v6049_v24 = vrot.slane %v5943_v58, 7  ;;  %v6139_v33 = vunpack.c.h.bf16 %v501_v46 }
 0x457   : > { %v6079_v1 = vpack.c.b16 %v6048_v32, %v6034_v11  ;;  %v6152_v52 = vunpack.c.l.bf16 %v499_v30  ;;  %v6153_v15 = vunpack.c.h.bf16 %v499_v30  ;;  %v6154_v4 = vunpack.c.l.bf16 %v503_v34 }
 0x458   : > { %v10527_v9 = vadd.f32 %v5307_v51, %v5305_v28  ;;  %v10532_v18 = vadd.f32 %v4178_v16, %v3925_v31  ;;  %v6155_v12 = vunpack.c.h.bf16 %v503_v34  ;;  %v10535_v61 = vsel %vm5959_vm2, %v6049_v24, %v5942_v22  ;;  %v10556_v31 = vpop.f32.mrf.mxu2  ;;  %v10558_v30 = vpop.f32.mrf.mxu0 }
 0x459   : > { %7698 = vmatmul.msk.bf16.gmra.mxu3 %vm1375_vm7, %v6079_v1  ;;  %v6168_v7 = vadd.f32 %v6152_v52, %v6136_v26  ;;  %v6169_v39 = vadd.f32 %v6153_v15, %v6137_v6  ;;  %v6170_v63 = vadd.f32 %v6154_v4, %v6138_v60 }
 0x45a   : > { %v5383_v21 = vrot.slane %v10527_v9, 2  ;;  %v10820_v55 = vrot.slane %v10527_v9, 4  ;;  %v7680_v0 = vrot.slane %v10527_v9, 9  ;;  %v6171_v3 = vadd.f32 %v6155_v12, %v6139_v33 }
 0x45b   : > { %v6216_v56 = vrot.slane %v6168_v7, 2  ;;  %v6217_v17 = vrot.slane %v6168_v7, 4  ;;  %v6218_v16 = vrot.slane %v6168_v7, 6  ;;  %v6219_v27 = vrot.slane %v6169_v39, 2 }
 0x45c   : > { %v7681_v14 = vrot.slane %v5383_v21, 9  ;;  %v10545_v37 = vrot.slane %v10820_v55, 9  ;;  %v5684_v45 = vadd.f32 %v7680_v0, %v10527_v9  ;;  %v6220_v29 = vrot.slane %v6169_v39, 4 }
 0x45d   : > { %v6221_v47 = vrot.slane %v6169_v39, 6  ;;  %v6222_v42 = vrot.slane %v6170_v63, 2  ;;  %v6223_v41 = vrot.slane %v6170_v63, 4  ;;  %v6224_v43 = vrot.slane %v6170_v63, 6 }
 0x45e   : > { %v5685_v53 = vadd.f32 %v7681_v14, %v5383_v21  ;;  %v5748_v62 = vmul.f32 0.25, %v5684_v45  ;;  %v6225_v44 = vrot.slane %v6171_v3, 2  ;;  %v6226_v28 = vrot.slane %v6171_v3, 4 }
 0x45f   : > { %v6227_v11 = vrot.slane %v6171_v3, 6  ;;  %v7732_v38 = vrot.slane %v6168_v7, 9  ;;  %v7733_v50 = vrot.slane %v6216_v56, 9  ;;  %v7734_v40 = vrot.slane %v6217_v17, 9 }
 0x460   : > { %v10548_v5 = vmul.f32 0.25, %v5685_v53  ;;  %v5812_v36 = vpack.c.bf16 %v5748_v62, %v5748_v62  ;;  %v7735_v54 = vrot.slane %v6218_v16, 9  ;;  %v7736_v23 = vrot.slane %v6169_v39, 9 }
 0x461   : > { %v7737_v22 = vrot.slane %v6219_v27, 9  ;;  %v7738_v19 = vrot.slane %v6220_v29, 9  ;;  %v7739_v57 = vrot.slane %v6221_v47, 9  ;;  %v7740_v46 = vrot.slane %v6170_v63, 9 }
 0x462   : > { %v10552_v49 = vunpack.c.l.b16 %v5812_v36  ;;  %v7741_v58 = vrot.slane %v6222_v42, 9  ;;  %v7742_v25 = vrot.slane %v6223_v41, 9  ;;  %v7743_v32 = vrot.slane %v6224_v43, 9 }
 0x463   : > { %v7744_v51 = vrot.slane %v6171_v3, 9  ;;  %v7745_v26 = vrot.slane %v6225_v44, 9  ;;  %v7746_v6 = vrot.slane %v6226_v28, 9  ;;  %v7747_v24 = vrot.slane %v6227_v11, 9 }
 0x464   : > { %10997 = vst [vmem:[#allocation27_spill] sm:$0xff] %v10552_v49  ;;  %v6512_v1 = vadd.f32 %v7732_v38, %v6168_v7  ;;  %v6513_v60 = vadd.f32 %v7733_v50, %v6216_v56  ;;  %v6514_v33 = vadd.f32 %v7734_v40, %v6217_v17  ;;  %v6515_v52 = vadd.f32 %v7735_v54, %v6218_v16  ;;  %v10561_v17 = vpop.f32.mrf.mxu3 }
 0x465   : > { %v6516_v15 = vadd.f32 %v7736_v23, %v6169_v39  ;;  %v6517_v4 = vadd.f32 %v7737_v22, %v6219_v27  ;;  %v6518_v12 = vadd.f32 %v7738_v19, %v6220_v29  ;;  %v6519_v21 = vadd.f32 %v7739_v57, %v6221_v47  ;;  %v10563_v39 = vpop.f32.mrf.mxu2  ;;  %v10565_v47 = vpop.f32.mrf.mxu0 }
 0x466   : > { %v6520_v0 = vadd.f32 %v7740_v46, %v6170_v63  ;;  %v6521_v14 = vadd.f32 %v7741_v58, %v6222_v42  ;;  %v6522_v45 = vadd.f32 %v7742_v25, %v6223_v41  ;;  %v6523_v53 = vadd.f32 %v7743_v32, %v6224_v43 }
 0x467   : > { %v6524_v62 = vadd.f32 %v7744_v51, %v6171_v3  ;;  %v6525_v36 = vadd.f32 %v7745_v26, %v6225_v44  ;;  %v6526_v34 = vadd.f32 %v7746_v6, %v6226_v28  ;;  %v6527_v10 = vadd.f32 %v7747_v24, %v6227_v11  ;;  %v10567_v3 = vpop.f32.mrf.mxu1 }
 0x468   : > { %v6576_v13 = vmul.f32 0.25, %v6512_v1  ;;  %v6577_v55 = vmul.f32 0.25, %v6513_v60  ;;  %v6578_v59 = vmul.f32 0.25, %v6514_v33  ;;  %v6579_v49 = vmul.f32 0.25, %v6515_v52 }
 0x469   : > { %v6580_v7 = vmul.f32 0.25, %v6516_v15  ;;  %v6581_v56 = vmul.f32 0.25, %v6517_v4  ;;  %v6582_v16 = vmul.f32 0.25, %v6518_v12  ;;  %v6583_v27 = vmul.f32 0.25, %v6519_v21 }
 0x46a   : > { %v6584_v63 = vmul.f32 0.25, %v6520_v0  ;;  %v6585_v29 = vmul.f32 0.25, %v6521_v14  ;;  %v6586_v42 = vmul.f32 0.25, %v6522_v45  ;;  %v6587_v41 = vmul.f32 0.25, %v6523_v53 }
 0x46b   : > { %v6588_v43 = vmul.f32 0.25, %v6524_v62  ;;  %v6589_v44 = vmul.f32 0.25, %v6525_v36  ;;  %v6590_v28 = vmul.f32 0.25, %v6526_v34  ;;  %v6591_v11 = vmul.f32 0.25, %v6527_v10 }
 0x46c   : > { %v6640_v38 = vpack.c.bf16 %v6576_v13, %v6576_v13  ;;  %v6641_v50 = vpack.c.bf16 %v6577_v55, %v6577_v55  ;;  %v6642_v40 = vpack.c.bf16 %v6578_v59, %v6578_v59  ;;  %v6643_v54 = vpack.c.bf16 %v6579_v49, %v6579_v49  ;;  %v3894_v59 = vpop.f32.mrf.mxu3 }
 0x46d   : > { %v6644_v23 = vpack.c.bf16 %v6580_v7, %v6580_v7  ;;  %v6645_v22 = vpack.c.bf16 %v6581_v56, %v6581_v56  ;;  %v6646_v19 = vpack.c.bf16 %v6582_v16, %v6582_v16  ;;  %v6647_v57 = vpack.c.bf16 %v6583_v27, %v6583_v27  ;;  %v5243_v45 = vpop.f32.mrf.mxu2 }
 0x46e   : > { %v6648_v46 = vpack.c.bf16 %v6584_v63, %v6584_v63  ;;  %v6649_v58 = vpack.c.bf16 %v6585_v29, %v6585_v29  ;;  %v6650_v25 = vpack.c.bf16 %v6586_v42, %v6586_v42  ;;  %v6651_v32 = vpack.c.bf16 %v6587_v41, %v6587_v41 }
 0x46f   : > { %v6652_v51 = vpack.c.bf16 %v6588_v43, %v6588_v43  ;;  %v6653_v26 = vpack.c.bf16 %v6589_v44, %v6589_v44  ;;  %v6654_v6 = vpack.c.bf16 %v6590_v28, %v6590_v28  ;;  %v6655_v24 = vpack.c.bf16 %v6591_v11, %v6591_v11  ;;  %v4841_v14 = vpop.f32.mrf.mxu1 }
 0x470   : > { %v6776_v1 = vunpack.c.l.b16 %v6640_v38  ;;  %v6777_v60 = vunpack.c.l.b16 %v6641_v50  ;;  %v6778_v34 = vunpack.c.l.b16 %v6642_v40  ;;  %v6779_v10 = vunpack.c.l.b16 %v6643_v54 }
 0x471   : > { %v6780_v13 = vunpack.c.l.b16 %v6644_v23  ;;  %v6781_v55 = vunpack.c.l.b16 %v6645_v22  ;;  %v6782_v49 = vunpack.c.l.b16 %v6646_v19  ;;  %v6783_v33 = vunpack.c.l.b16 %v6647_v57 }
 0x472   : > { %v6784_v52 = vunpack.c.l.b16 %v6648_v46  ;;  %v6785_v15 = vunpack.c.l.b16 %v6649_v58  ;;  %v6786_v4 = vunpack.c.l.b16 %v6650_v25  ;;  %v6787_v12 = vunpack.c.l.b16 %v6651_v32  ;;  %v10998_v46 = vld [vmem:[#allocation20_spill] sm:$0xff]  ;;  %v10582_v32 = vld [vmem:[%s10801_s6] ss:$0 sm:$0xff] }
 0x473   : > { %v6788_v21 = vunpack.c.l.b16 %v6652_v51  ;;  %v6789_v0 = vunpack.c.l.b16 %v6653_v26  ;;  %v6790_v53 = vunpack.c.l.b16 %v6654_v6  ;;  %v6791_v62 = vunpack.c.l.b16 %v6655_v24  ;;  %v10999_v24 = vld [vmem:[#allocation19_spill] sm:$0xff] }
 0x474   : > { %v6864_v36 = vrot.slane %v6777_v60, 7  ;;  %v6866_v7 = vrot.slane %v6778_v34, 6  ;;  %v6957_v56 = vpop.f32.mrf.mxu0  ;;  %v6868_v16 = vrot.slane %v6779_v10, 5  ;;  %v6870_v27 = vrot.slane %v6780_v13, 4  ;;  %v6108_v51 = vpop.f32.mrf.mxu3  ;;  %v11000_v60 = vld [vmem:[#allocation21_spill] sm:$0xff] }
 0x475   : > { %v6872_v63 = vrot.slane %v6781_v55, 3  ;;  %v6874_v29 = vrot.slane %v6782_v49, 2  ;;  %v6876_v41 = vrot.slane %v6783_v33, 1  ;;  %v6878_v43 = vrot.slane %v6785_v15, 7 }
 0x476   : > { %v6865_v42 = vsel %vm5959_vm2, %v6864_v36, %v6776_v1  ;;  %v6880_v44 = vrot.slane %v6786_v4, 6  ;;  %v6882_v11 = vrot.slane %v6787_v12, 5  ;;  %v6884_v38 = vrot.slane %v6788_v21, 4  ;;  %v505_v21 = vld [vmem:[%s8276_s17 + $0x60] sm:$0xff]  }
 0x477   : > { %v6867_v28 = vsel %vm5962_vm3, %v6866_v7, %v6865_v42  ;;  %v6886_v50 = vrot.slane %v6789_v0, 3  ;;  %v6879_v54 = vsel %vm5959_vm2, %v6878_v43, %v6784_v52  ;;  %v6888_v23 = vrot.slane %v6790_v53, 2  ;;  %v4843_v12 = vpop.f32.mrf.mxu1  ;;  %v511_v42 = vld [vmem:[%s8276_s17 + $0x78] sm:$0xff]  }
 0x478   : > { %v6869_v40 = vsel %vm5965_vm4, %v6868_v16, %v6867_v28  ;;  %v6890_v22 = vrot.slane %v6791_v62, 1  ;;  %v6881_v57 = vsel %vm5962_vm3, %v6880_v44, %v6879_v54  ;;  %v3926_v58 = vadd.f32 %v10554_v8, %v10998_v46  ;;  %v10592_v8 = vld [vmem:[%s10803_s8] ss:$0 sm:$0xff]  ;;  %v509_v62 = vld [vmem:[%s8276_s17 + $0x70] sm:$0xff]  }
 0x479   : > { %v6871_v19 = vsel %vm5968_vm5, %v6870_v27, %v6869_v40  ;;  %v4874_v25 = vadd.f32 %v10550_v2, %v10532_v18  ;;  %v6883_v6 = vsel %vm5965_vm4, %v6882_v11, %v6881_v57  ;;  %v3927_v1 = vadd.f32 %v10561_v17, %v10999_v24 }
 0x47a   : > { %v6873_v26 = vsel %vm5971_vm6, %v6872_v63, %v6871_v19  ;;  %v3928_v34 = vadd.f32 %v3894_v59, %v11000_v60  ;;  %v6885_v2 = vsel %vm5968_vm5, %v6884_v38, %v6883_v6  ;;  %v4217_v10 = vadd.f32 %v10540_v35, %v3926_v58 }
 0x47b   : > { %v6875_v18 = vsel %vm5974_vm8, %v6874_v29, %v6873_v26  ;;  %v5276_v13 = vadd.f32 %v10556_v31, %v4874_v25  ;;  %v6887_v17 = vsel %vm5971_vm6, %v6886_v50, %v6885_v2  ;;  %v4218_v59 = vadd.f32 %v10558_v30, %v3927_v1  ;;  %v5245_v31 = vpop.f32.mrf.mxu2  ;;  %v507_v29 = vld [vmem:[%s8276_s17 + $0x68] sm:$0xff]   ;;  %s10628_s17 = scalar_lea.vmem [#allocation8], %s7119_s14 }
 0x47c   : > { %v6877_v55 = vsel %vm5977_vm9, %v6876_v41, %v6875_v18  ;;  %v4219_v49 = vadd.f32 %v10565_v47, %v3928_v34  ;;  %v6959_v33 = vpop.f32.mrf.mxu0  ;;  %v6889_v52 = vsel %vm5974_vm8, %v6888_v23, %v6887_v17  ;;  %v4875_v4 = vadd.f32 %v10567_v3, %v4217_v10  ;;  %v6110_v43 = vpop.f32.mrf.mxu3  ;;  %s7023_s24 = sshll.u32 %s10628_s17, 4  ;;  %s7024_s24 = int_to_ptr.vmem [resolvable:$true] %s7023_s24 }
 0x47d   : > { %v5308_v15 = vmax.f32 %v5276_v13, 0.0  ;;  %v6109_v35 = vadd.f32 %v10582_v32, %v6108_v51  ;;  %v6891_v0 = vsel %vm5977_vm9, %v6890_v22, %v6889_v52  ;;  %v4876_v53 = vadd.f32 %v4841_v14, %v4218_v59 }
 0x47e   : > { %v4877_v30 = vadd.f32 %v4843_v12, %v4219_v49  ;;  %v6958_v47 = vadd.f32 %v10592_v8, %v6957_v56  ;;  %v6922_v36 = vpack.c.b16 %v6891_v0, %v6877_v55  ;;  %v5277_v7 = vadd.f32 %v10563_v39, %v4875_v4 }
 0x47f   : > { %v6960_v3 = vadd.f32 %v10592_v8, %v6959_v33  ;;  %v5278_v16 = vadd.f32 %v5243_v45, %v4876_v53  ;;  %v6140_v41 = vunpack.c.l.bf16 %v505_v21  ;;  %v6141_v44 = vunpack.c.h.bf16 %v505_v21 }
 0x480   : > { %v6977_v27 = vadd.f32 %v6958_v47, %v6109_v35  ;;  %v5279_v63 = vadd.f32 %v5245_v31, %v4877_v30  ;;  %7774 = vmatmul.msk.bf16.gmra.mxu0 %vm613_vm0, %v6922_v36  ;;  %v5309_v14 = vmax.f32 %v5277_v7, 0.0  ;;  %v6142_v56 = vunpack.c.l.bf16 %v509_v62 }
 0x481   : > { %v6143_v28 = vunpack.c.h.bf16 %v509_v62  ;;  %v5310_v11 = vmax.f32 %v5278_v16, 0.0  ;;  %v6111_v50 = vadd.f32 %v10582_v32, %v6110_v43  ;;  %v6156_v40 = vunpack.c.l.bf16 %v507_v29 }
 0x482   : > { %v6985_v38 = vmax.f32 %v6977_v27, 0.0  ;;  %v5311_v39 = vmax.f32 %v5279_v63, 0.0  ;;  %v6157_v45 = vunpack.c.h.bf16 %v507_v29  ;;  %v6158_v54 = vunpack.c.l.bf16 %v511_v42 }
 0x483   : > { %v6159_v23 = vunpack.c.h.bf16 %v511_v42  ;;  %v5326_v22 = vadd.f32 %v5310_v11, %v5308_v15  ;;  %v6978_v46 = vadd.f32 %v6960_v3, %v6111_v50  ;;  %v10618_v58 = vadd.f32 %v6156_v40, %v6140_v41 }
 0x484   : > { %v6993_v19 = vpack.c.bf16 %v6985_v38, %v6985_v38  ;;  %v10616_v57 = vadd.f32 %v5311_v39, %v5309_v14  ;;  %v10620_v25 = vadd.f32 %v6157_v45, %v6141_v44  ;;  %v10622_v51 = vadd.f32 %v6158_v54, %v6142_v56 }
 0x485   : > { %v10624_v26 = vadd.f32 %v6159_v23, %v6143_v28  ;;  %v5386_v6 = vrot.slane %v5326_v22, 2  ;;  %v5387_v24 = vrot.slane %v5326_v22, 4  ;;  %v5388_v1 = vrot.slane %v5326_v22, 6 }
 0x486   : > { %v7684_v60 = vrot.slane %v5326_v22, 9  ;;  %7002 = vst.msk [vmem:[%s10628_s17] sm:$0xf] %vm7001_vm10, %v6993_v19  ;;  %v5389_v34 = vrot.slane %v10616_v57, 2  ;;  %v10822_v18 = vrot.slane %v10616_v57, 4  ;;  %v7688_v10 = vrot.slane %v10616_v57, 9 }
 0x487   : > { %v7685_v13 = vrot.slane %v5386_v6, 9  ;;  %v7686_v55 = vrot.slane %v5387_v24, 9  ;;  %v7687_v17 = vrot.slane %v5388_v1, 9  ;;  %v6986_v15 = vmax.f32 %v6978_v46, 0.0 }
 0x488   : > { %v5688_v59 = vadd.f32 %v7684_v60, %v5326_v22  ;;  %v7689_v49 = vrot.slane %v5389_v34, 9  ;;  %v10638_v33 = vrot.slane %v10822_v18, 9  ;;  %v5692_v52 = vadd.f32 %v7688_v10, %v10616_v57 }
 0x489   : > { %v5689_v4 = vadd.f32 %v7685_v13, %v5386_v6  ;;  %v5690_v12 = vadd.f32 %v7686_v55, %v5387_v24  ;;  %v5691_v35 = vadd.f32 %v7687_v17, %v5388_v1  ;;  %v6994_v53 = vpack.c.bf16 %v6986_v15, %v6986_v15 }
 0x48a   : > { %v5752_v31 = vmul.f32 0.25, %v5688_v59  ;;  %v5693_v21 = vadd.f32 %v7689_v49, %v5389_v34  ;;  %v5756_v0 = vmul.f32 0.25, %v5692_v52  ;;  %v6228_v30 = vrot.slane %v10618_v58, 2 }
 0x48b   : > { %v5753_v47 = vmul.f32 0.25, %v5689_v4  ;;  %v5754_v62 = vmul.f32 0.25, %v5690_v12  ;;  %v5755_v36 = vmul.f32 0.25, %v5691_v35  ;;  %7003 = vst.msk [vmem:[%s10628_s17 + $0x4] sm:$0xf] %vm7001_vm10, %v6994_v53  ;;  %v6229_v27 = vrot.slane %v10618_v58, 4 }
 0x48c   : > { %v5816_v7 = vpack.c.bf16 %v5752_v31, %v5752_v31  ;;  %v10642_v3 = vmul.f32 0.25, %v5693_v21  ;;  %v5820_v16 = vpack.c.bf16 %v5756_v0, %v5756_v0  ;;  %v6230_v63 = vrot.slane %v10618_v58, 6 }
 0x48d   : > { %v5817_v29 = vpack.c.bf16 %v5753_v47, %v5753_v47  ;;  %v5818_v42 = vpack.c.bf16 %v5754_v62, %v5754_v62  ;;  %v5819_v41 = vpack.c.bf16 %v5755_v36, %v5755_v36  ;;  %v6231_v44 = vrot.slane %v10620_v25, 2 }
 0x48e   : > { %v5950_v14 = vunpack.c.l.b16 %v5816_v7  ;;  %v10648_v43 = vunpack.c.l.b16 %v5820_v16  ;;  %v6232_v56 = vrot.slane %v10620_v25, 4  ;;  %v6233_v28 = vrot.slane %v10620_v25, 6 }
 0x48f   : > { %v5951_v11 = vunpack.c.l.b16 %v5817_v29  ;;  %v10653_v38 = vunpack.c.l.b16 %v5818_v42  ;;  %v10655_v39 = vunpack.c.l.b16 %v5819_v41  ;;  %v6234_v50 = vrot.slane %v10622_v51, 2 }
 0x490   : > { %v6235_v45 = vrot.slane %v10622_v51, 4  ;;  %v6236_v54 = vrot.slane %v10622_v51, 6  ;;  %v6237_v23 = vrot.slane %v10624_v26, 2  ;;  %v6238_v6 = vrot.slane %v10624_v26, 4 }
 0x491   : > { %v6063_v22 = vrot.slane %v5951_v11, 7  ;;  %v6239_v24 = vrot.slane %v10624_v26, 6  ;;  %v7748_v1 = vrot.slane %v10618_v58, 9  ;;  %v7749_v60 = vrot.slane %v6228_v30, 9 }
 0x492   : > { %v7750_v34 = vrot.slane %v6229_v27, 9  ;;  %v7751_v13 = vrot.slane %v6230_v63, 9  ;;  %v7752_v55 = vrot.slane %v10620_v25, 9  ;;  %v7753_v17 = vrot.slane %v6231_v44, 9 }
 0x493   : > { %v10668_v10 = vsel %vm5959_vm2, %v6063_v22, %v5950_v14  ;;  %v7754_v59 = vrot.slane %v6232_v56, 9  ;;  %v7755_v49 = vrot.slane %v6233_v28, 9  ;;  %v7756_v52 = vrot.slane %v10622_v51, 9 }
 0x494   : > { %v7757_v15 = vrot.slane %v6234_v50, 9  ;;  %v7758_v4 = vrot.slane %v6235_v45, 9  ;;  %v7759_v12 = vrot.slane %v6236_v54, 9  ;;  %v7760_v35 = vrot.slane %v10624_v26, 9 }
 0x495   : > { %v7761_v31 = vrot.slane %v6237_v23, 9  ;;  %v7762_v21 = vrot.slane %v6238_v6, 9  ;;  %v7763_v0 = vrot.slane %v6239_v24, 9  ;;  %v6528_v53 = vadd.f32 %v7748_v1, %v10618_v58 }
 0x496   : > { %v6529_v47 = vadd.f32 %v7749_v60, %v6228_v30  ;;  %v6530_v62 = vadd.f32 %v7750_v34, %v6229_v27  ;;  %v6531_v36 = vadd.f32 %v7751_v13, %v6230_v63  ;;  %v6532_v7 = vadd.f32 %v7752_v55, %v10620_v25 }
 0x497   : > { %v6533_v16 = vadd.f32 %v7753_v17, %v6231_v44  ;;  %v6534_v29 = vadd.f32 %v7754_v59, %v6232_v56  ;;  %v6535_v42 = vadd.f32 %v7755_v49, %v6233_v28  ;;  %v6536_v41 = vadd.f32 %v7756_v52, %v10622_v51 }
 0x498   : > { %v6537_v14 = vadd.f32 %v7757_v15, %v6234_v50  ;;  %v6538_v11 = vadd.f32 %v7758_v4, %v6235_v45  ;;  %v6539_v22 = vadd.f32 %v7759_v12, %v6236_v54  ;;  %v6540_v40 = vadd.f32 %v7760_v35, %v10624_v26 }
 0x499   : > { %v6541_v46 = vadd.f32 %v7761_v31, %v6237_v23  ;;  %v6542_v19 = vadd.f32 %v7762_v21, %v6238_v6  ;;  %v6543_v18 = vadd.f32 %v7763_v0, %v6239_v24  ;;  %v6592_v2 = vmul.f32 0.25, %v6528_v53 }
 0x49a   : > { %v6593_v58 = vmul.f32 0.25, %v6529_v47  ;;  %v6594_v30 = vmul.f32 0.25, %v6530_v62  ;;  %v6595_v27 = vmul.f32 0.25, %v6531_v36  ;;  %v6596_v63 = vmul.f32 0.25, %v6532_v7 }
 0x49b   : > { %v6597_v1 = vmul.f32 0.25, %v6533_v16  ;;  %v6598_v25 = vmul.f32 0.25, %v6534_v29  ;;  %v6599_v44 = vmul.f32 0.25, %v6535_v42  ;;  %v6600_v56 = vmul.f32 0.25, %v6536_v41 }
 0x49c   : > { %v6601_v28 = vmul.f32 0.25, %v6537_v14  ;;  %v6602_v60 = vmul.f32 0.25, %v6538_v11  ;;  %v6603_v51 = vmul.f32 0.25, %v6539_v22  ;;  %v6604_v50 = vmul.f32 0.25, %v6540_v40 }
 0x49d   : > { %v6605_v45 = vmul.f32 0.25, %v6541_v46  ;;  %v6606_v54 = vmul.f32 0.25, %v6542_v19  ;;  %v6607_v34 = vmul.f32 0.25, %v6543_v18  ;;  %v6656_v26 = vpack.c.bf16 %v6592_v2, %v6592_v2 }
 0x49e   : > { %v6657_v23 = vpack.c.bf16 %v6593_v58, %v6593_v58  ;;  %v6658_v6 = vpack.c.bf16 %v6594_v30, %v6594_v30  ;;  %v6659_v24 = vpack.c.bf16 %v6595_v27, %v6595_v27  ;;  %v6660_v13 = vpack.c.bf16 %v6596_v63, %v6596_v63 }
 0x49f   : > { %v6661_v55 = vpack.c.bf16 %v6597_v1, %v6597_v1  ;;  %v6662_v17 = vpack.c.bf16 %v6598_v25, %v6598_v25  ;;  %v6663_v59 = vpack.c.bf16 %v6599_v44, %v6599_v44  ;;  %v6664_v49 = vpack.c.bf16 %v6600_v56, %v6600_v56 }
 0x4a0   : > { %v6665_v52 = vpack.c.bf16 %v6601_v28, %v6601_v28  ;;  %v6666_v15 = vpack.c.bf16 %v6602_v60, %v6602_v60  ;;  %v6667_v4 = vpack.c.bf16 %v6603_v51, %v6603_v51  ;;  %v6668_v12 = vpack.c.bf16 %v6604_v50, %v6604_v50 }
 0x4a1   : > { %v6669_v35 = vpack.c.bf16 %v6605_v45, %v6605_v45  ;;  %v6670_v31 = vpack.c.bf16 %v6606_v54, %v6606_v54  ;;  %v6671_v21 = vpack.c.bf16 %v6607_v34, %v6607_v34  ;;  %v6792_v40 = vunpack.c.l.b16 %v6656_v26 }
 0x4a2   : > { %v6793_v46 = vunpack.c.l.b16 %v6657_v23  ;;  %v6794_v19 = vunpack.c.l.b16 %v6658_v6  ;;  %v6795_v18 = vunpack.c.l.b16 %v6659_v24  ;;  %v6796_v2 = vunpack.c.l.b16 %v6660_v13  ;;  %v6113_v23 = vpop.f32.mrf.mxu3 }
 0x4a3   : > { %v6797_v0 = vunpack.c.l.b16 %v6661_v55  ;;  %v6798_v53 = vunpack.c.l.b16 %v6662_v17  ;;  %v6799_v47 = vunpack.c.l.b16 %v6663_v59  ;;  %v6800_v62 = vunpack.c.l.b16 %v6664_v49 }
 0x4a4   : > { %v6801_v36 = vunpack.c.l.b16 %v6665_v52  ;;  %v6802_v7 = vunpack.c.l.b16 %v6666_v15  ;;  %v6803_v16 = vunpack.c.l.b16 %v6667_v4  ;;  %v6804_v29 = vunpack.c.l.b16 %v6668_v12 }
 0x4a5   : > { %v6805_v42 = vunpack.c.l.b16 %v6669_v35  ;;  %v6806_v41 = vunpack.c.l.b16 %v6670_v31  ;;  %v6807_v14 = vunpack.c.l.b16 %v6671_v21  ;;  %v6892_v11 = vrot.slane %v6793_v46, 7 }
 0x4a6   : > { %v6894_v22 = vrot.slane %v6794_v19, 6  ;;  %v6896_v58 = vrot.slane %v6795_v18, 5  ;;  %v6898_v30 = vrot.slane %v6796_v2, 4  ;;  %v6900_v27 = vrot.slane %v6797_v0, 3 }
 0x4a7   : > { %v6902_v63 = vrot.slane %v6798_v53, 2  ;;  %v6893_v1 = vsel %vm5959_vm2, %v6892_v11, %v6792_v40  ;;  %v6904_v25 = vrot.slane %v6799_v47, 1  ;;  %v6906_v44 = vrot.slane %v6801_v36, 7 }
 0x4a8   : > { %v6908_v56 = vrot.slane %v6802_v7, 6  ;;  %v6895_v28 = vsel %vm5962_vm3, %v6894_v22, %v6893_v1  ;;  %v6910_v60 = vrot.slane %v6803_v16, 5  ;;  %v6912_v51 = vrot.slane %v6804_v29, 4 }
 0x4a9   : > { %v6914_v50 = vrot.slane %v6805_v42, 3  ;;  %v6897_v45 = vsel %vm5965_vm4, %v6896_v58, %v6895_v28  ;;  %v6907_v54 = vsel %vm5959_vm2, %v6906_v44, %v6800_v62  ;;  %v6916_v34 = vrot.slane %v6806_v41, 2 }
 0x4aa   : > { %v6918_v26 = vrot.slane %v6807_v14, 1  ;;  %v6899_v6 = vsel %vm5968_vm5, %v6898_v30, %v6897_v45  ;;  %v6909_v24 = vsel %vm5962_vm3, %v6908_v56, %v6907_v54  ;;  %v11001_v13 = vrot.slane %v10527_v9, 6  ;;  %v11009_v56 = vld [vmem:[#allocation27_spill] sm:$0xff]  ;;  %v6115_v45 = vpop.f32.mrf.mxu3 }
 0x4ab   : > { %v11002_v17 = vrot.slane %v10616_v57, 6  ;;  %v6901_v49 = vsel %vm5971_vm6, %v6900_v27, %v6899_v6  ;;  %v6911_v52 = vsel %vm5965_vm4, %v6910_v60, %v6909_v24  ;;  %v11003_v15 = vrot.slane %v10527_v9, 4 }
 0x4ac   : > { %v7683_v55 = vrot.slane %v11001_v13, 9  ;;  %v11004_v12 = vrot.slane %v10616_v57, 4  ;;  %v6903_v31 = vsel %vm5974_vm8, %v6902_v63, %v6901_v49  ;;  %v6913_v21 = vsel %vm5968_vm5, %v6912_v51, %v6911_v52 }
 0x4ad   : > { %v7691_v59 = vrot.slane %v11002_v17, 9  ;;  %v5686_v4 = vadd.f32 %v10545_v37, %v11003_v15  ;;  %v11005_v40 = vmov %v11001_v13  ;;  %v11006_v19 = vmov %v11002_v17 }
 0x4ae   : > { %v5694_v35 = vadd.f32 %v10638_v33, %v11004_v12  ;;  %v5687_v46 = vadd.f32 %v7683_v55, %v11005_v40  ;;  %v6905_v2 = vsel %vm5977_vm9, %v6904_v25, %v6903_v31  ;;  %v6915_v0 = vsel %vm5971_vm6, %v6914_v50, %v6913_v21 }
 0x4af   : > { %v5695_v18 = vadd.f32 %v7691_v59, %v11006_v19  ;;  %v5750_v53 = vmul.f32 0.25, %v5686_v4  ;;  %v6917_v47 = vsel %vm5974_vm8, %v6916_v34, %v6915_v0  ;;  %v5813_v36 = vpack.c.bf16 %v10548_v5, %v10548_v5  ;;  %v6962_v7 = vpop.f32.mrf.mxu0 }
 0x4b0   : > { %v5758_v37 = vmul.f32 0.25, %v5694_v35  ;;  %v5751_v62 = vmul.f32 0.25, %v5687_v46  ;;  %v6919_v9 = vsel %vm5977_vm9, %v6918_v26, %v6917_v47  ;;  %v5821_v57 = vpack.c.bf16 %v10642_v3, %v10642_v3 }
 0x4b1   : > { %v5759_v33 = vmul.f32 0.25, %v5695_v18  ;;  %v5814_v16 = vpack.c.bf16 %v5750_v53, %v5750_v53  ;;  %v6923_v42 = vpack.c.b16 %v6919_v9, %v6905_v2  ;;  %v5947_v11 = vunpack.c.l.b16 %v5813_v36 }
 0x4b2   : > { %v5822_v29 = vpack.c.bf16 %v5758_v37, %v5758_v37  ;;  %v5815_v41 = vpack.c.bf16 %v5751_v62, %v5751_v62  ;;  %v5955_v58 = vunpack.c.l.b16 %v5821_v57  ;;  %v11007_v27 = vrot.slane %v10519_v20, 6 }
 0x4b3   : > { %v5823_v14 = vpack.c.bf16 %v5759_v33, %v5759_v33  ;;  %v5948_v22 = vunpack.c.l.b16 %v5814_v16  ;;  %7775 = vmatmul.msk.bf16.gmra.mxu0 %vm613_vm0, %v6923_v42  ;;  %v11008_v25 = vrot.slane %v10521_v48, 5  ;;  %v6057_v44 = vrot.slane %v5947_v11, 3 }
 0x4b4   : > { %v5956_v30 = vunpack.c.l.b16 %v5822_v29  ;;  %v6052_v5 = vsel %vm5962_vm3, %v11007_v27, %v10535_v61  ;;  %v5949_v63 = vunpack.c.l.b16 %v5815_v41  ;;  %v11010_v28 = vrot.slane %v11009_v56, 4 }
 0x4b5   : > { %v5957_v1 = vunpack.c.l.b16 %v5823_v14  ;;  %v6054_v3 = vsel %vm5965_vm4, %v11008_v25, %v6052_v5  ;;  %v6059_v51 = vrot.slane %v5948_v22, 2  ;;  %v11011_v50 = vrot.slane %v10653_v38, 6 }
 0x4b6   : > { %v6056_v60 = vsel %vm5968_vm5, %v11010_v28, %v6054_v3  ;;  %v6071_v61 = vrot.slane %v5955_v58, 3  ;;  %v6061_v34 = vrot.slane %v5949_v63, 1  ;;  %v11012_v48 = vrot.slane %v10655_v39, 5 }
 0x4b7   : > { %v6066_v20 = vsel %vm5962_vm3, %v11011_v50, %v10668_v10  ;;  %v6058_v54 = vsel %vm5971_vm6, %v6057_v44, %v6056_v60  ;;  %v6073_v6 = vrot.slane %v5956_v30, 2  ;;  %v11013_v13 = vrot.slane %v10648_v43, 4  ;;  %v6964_v52 = vpop.f32.mrf.mxu0 }
 0x4b8   : > { %v6068_v26 = vsel %vm5965_vm4, %v11012_v48, %v6066_v20  ;;  %v6060_v24 = vsel %vm5974_vm8, %v6059_v51, %v6058_v54  ;;  %v6075_v17 = vrot.slane %v5957_v1, 1  ;;  %v6114_v38 = vadd.f32 %v10582_v32, %v6113_v23 }
 0x4b9   : > { %v6070_v55 = vsel %vm5968_vm5, %v11013_v13, %v6068_v26  ;;  %v6062_v10 = vsel %vm5977_vm9, %v6061_v34, %v6060_v24  ;;  %v6963_v39 = vadd.f32 %v10592_v8, %v6962_v7  ;;  %v6116_v49 = vadd.f32 %v10582_v32, %v6115_v45 }
 0x4ba   : > { %v6072_v59 = vsel %vm5971_vm6, %v6071_v61, %v6070_v55  ;;  %v6965_v43 = vadd.f32 %v10592_v8, %v6964_v52 }
 0x4bb   : > { %v6074_v15 = vsel %vm5974_vm8, %v6073_v6, %v6072_v59  ;;  %v6979_v12 = vadd.f32 %v6963_v39, %v6114_v38 }
 0x4bc   : > { %v6076_v4 = vsel %vm5977_vm9, %v6075_v17, %v6074_v15  ;;  %v6980_v23 = vadd.f32 %v6965_v43, %v6116_v49 }
 0x4bd   : > { %v6080_v35 = vpack.c.b16 %v6076_v4, %v6062_v10  ;;  %v6987_v31 = vmax.f32 %v6979_v12, 0.0 }
 0x4be   : > { %v6988_v21 = vmax.f32 %v6980_v23, 0.0 }
 0x4bf   : > { %7699 = vmatmul.msk.bf16.gmra.mxu3 %vm1375_vm7, %v6080_v35  ;;  %v6995_v40 = vpack.c.bf16 %v6987_v31, %v6987_v31 }
 0x4c0   : > { %v6996_v46 = vpack.c.bf16 %v6988_v21, %v6988_v21 }
 0x4c1   : > { %7004 = vst.msk [vmem:[%s10628_s17 + $0x8] sm:$0xf] %vm7001_vm10, %v6995_v40 }
 0x4c2   : > { %7005 = vst.msk [vmem:[%s10628_s17 + $0xc] sm:$0xf] %vm7001_vm10, %v6996_v46 }
 0x4dc   : > { %v6118_v19 = vpop.f32.mrf.mxu3 }
 0x4dd   : > { %v6119_v18 = vadd.f32 %v10582_v32, %v6118_v19 }
 0x4e4   : > { %v6120_v37 = vpop.f32.mrf.mxu3 }
 0x4e5   : > { %v6121_v33 = vadd.f32 %v10582_v32, %v6120_v37 }
 0x4fd   : > { %v6967_v2 = vpop.f32.mrf.mxu0 }
 0x4fe   : > { %v6968_v0 = vadd.f32 %v10592_v8, %v6967_v2 }
 0x500   : > { %v6981_v53 = vadd.f32 %v6968_v0, %v6119_v18 }
 0x502   : > { %v6989_v47 = vmax.f32 %v6981_v53, 0.0 }
 0x504   : > { %v6997_v62 = vpack.c.bf16 %v6989_v47, %v6989_v47 }
 0x505   : > { %v6969_v36 = vpop.f32.mrf.mxu0 }
 0x506   : > { %7006 = vst.msk [vmem:[%s10628_s17 + $0x10] sm:$0xf] %vm7001_vm10, %v6997_v62  ;;  %v6970_v7 = vadd.f32 %v10592_v8, %v6969_v36 }
 0x508   : > { %v6982_v9 = vadd.f32 %v6970_v7, %v6121_v33 }
 0x50a   : > { %v6990_v16 = vmax.f32 %v6982_v9, 0.0 }
 0x50c   : > { %v6998_v57 = vpack.c.bf16 %v6990_v16, %v6990_v16 }
 0x50e   : > { %7007 = vst.msk [vmem:[%s10628_s17 + $0x14] sm:$0xf] %vm7001_vm10, %v6998_v57 }
 0x530   : > { %v6972_v29 = vpop.f32.mrf.mxu0 }
 0x531   : > { %v6973_v42 = vadd.f32 %v10592_v8, %v6972_v29 }
 0x538   : > { %v6974_v58 = vpop.f32.mrf.mxu0 }
 0x539   : > { %v6975_v5 = vadd.f32 %v10592_v8, %v6974_v58 }
 0x542   : > { %v6123_v41 = vpop.f32.mrf.mxu3 }
 0x543   : > { %v6124_v14 = vadd.f32 %v10582_v32, %v6123_v41 }
 0x545   : > { %v6983_v11 = vadd.f32 %v6973_v42, %v6124_v14 }
 0x547   : > { %v6991_v22 = vmax.f32 %v6983_v11, 0.0 }
 0x549   : > { %v6999_v30 = vpack.c.bf16 %v6991_v22, %v6991_v22 }
 0x54a   : > { %v6125_v27 = vpop.f32.mrf.mxu3 }
 0x54b   : > { %7008 = vst.msk [vmem:[%s10628_s17 + $0x18] sm:$0xf] %vm7001_vm10, %v6999_v30  ;;  %v6126_v63 = vadd.f32 %v10582_v32, %v6125_v27 }
 0x54d   : > { %v6984_v1 = vadd.f32 %v6975_v5, %v6126_v63 }
 0x54f   : > { %v6992_v25 = vmax.f32 %v6984_v1, 0.0 }
 0x551   : > { %v7000_v3 = vpack.c.bf16 %v6992_v25, %v6992_v25 }
 0x553   : > { %7009 = vst.msk [vmem:[%s10628_s17 + $0x1c] sm:$0xf] %vm7001_vm10, %v7000_v3 }
 0x554   : > { %8072 = shalt.err (!%p8069_p10)
}
 0x555   : > { %s8121_s3 = smov 64   ;;  %s8122_s17 = smov 4  }
 0x556   : > { %7869 = dma.vmem_to_hbm [thread:$0]  (%p8242_p3), %s7024_s24, 512, %s7026_s25, %s7011_s13, %s8121_s3, %s8121_s3, %s8122_s17  }
 0x557 PF: > { %s7040_s26 = sand.u32 1, %s8103_s30   ;;  %p11014_p12 = scmp.ge.s32.totalorder %s8115_s12, 2 }
 0x558   : > { %s7041_s28 = scalar_lea.sflag [#allocation5], %s7040_s26 }
 0x559   : > { %p7880_p13 = pnand %p11014_p12, %p8208_p6 }
 0x55b   : > { %p7881_p0 = pneg %p7880_p13 }
 0x55d   : > { %8098 = dma.done.wait (%p7881_p0), %s7041_s28, 512  }
 0x55e   : > { %8100 = vsyncadd (%p7881_p0), %s7041_s28, 4294966784  ;;  %s11015_s11 = sld [smem:[#allocation12_spill]]  ;;  %p23_p5 = scmp.ge.s32.totalorder %s8226_s23, 4  }
 0x55f   : > { %s11016_s20 = sld [smem:[#allocation13_spill]]  ;;  %s11017_s30 = smov %s8107_s10 }
 0x560   : > { %s11020_s12 = smov %s8226_s23 }
 0x561   :  { %25 = sbr.rel (!%p23_p5) target bundleno = 8 (0x8), region = 116 }
 0x564   : > { %s11018_s10 = smov %s11015_s11 }
 0x565   : > { %s11019_s11 = smov %s11016_s20 }
 0x566   :  { %7047 = vsyncpa [#allocation4], 1 }
 0x567   :  { %7049 = vsyncpa [#allocation4 + $0x1], 1 }
 0x568   :  { %7050 = vsyncpa [#allocation7], 1 }
 0x569   :  { %7051 = vsyncpa [#allocation5], 1 }
 0x56a   :  { %7053 = vsyncpa [#allocation5 + $0x1], 1 }

</bundles_post_ra>
